<compile_context>
chip_gen: v7x
topology: tpu7x:2x2x1
jax: 0.10.0
libtpu: 0.0.40
codegen_flags: <defaults>
</compile_context>

<pallas_src>
import functools

import jax
import jax.numpy as jnp
import numpy as np
from jax import lax
from jax.experimental import pallas as pl
from jax.experimental.pallas import tpu as pltpu

RATES = (6, 12, 18)
BRANCH_C = (64, 64, 64, 64, 64)
OUT_C = 256
BN_EPS = 1e-5


# ----------------------------- Pallas kernel --------------------------------
def _aspp_kernel(xp_ref, w_rate_ref, rate_shift_ref, w_pool_ref,
                 w_1x1_ref, b_1x1_ref, w_fin_ref, b_fin_ref, o_ref,
                 *, H, W, C_in, R_max, rates, out_c):
    xp = xp_ref[0]                                        # (Hp, Wp, C_in), zero padded
    # centre slice of the padded block == original (unpadded) image
    x_flat = xp[R_max:R_max + H, R_max:R_max + W, :].reshape(H * W, C_in)

    acc = jnp.zeros((H * W, out_c), jnp.float32)          # lane-dense output accumulator

    # ---- atrous 3x3 branches: im2col slab -> one matmul -> BN(shift)+ReLU ->
    # ---- partial final matmul accumulated into `acc` ----
    for b, r in enumerate(rates):
        taps = []
        for ky in range(3):
            for kx in range(3):
                oy = R_max + (ky - 1) * r
                ox = R_max + (kx - 1) * r
                taps.append(xp[oy:oy + H, ox:ox + W, :].reshape(H * W, C_in))
        slab = jnp.concatenate(taps, axis=-1)             # (H*W, 9*C_in)
        y = jnp.dot(slab, w_rate_ref[b],                  # BN scale pre-folded
                    preferred_element_type=jnp.float32)
        y = jnp.maximum(y + rate_shift_ref[b:b + 1, :], 0.0)
        acc = acc + jnp.dot(y, w_fin_ref[b],
                            preferred_element_type=jnp.float32)

    # ---- global-average-pool branch ----
    # AdaptiveAvgPool2d(1) -> 1x1 conv -> ReLU -> bilinear upsample of a 1x1
    # map (== spatial broadcast); folded into a single (1, out_c) row.
    mean = jnp.sum(x_flat, axis=0, keepdims=True) * (1.0 / float(H * W))
    yp = jnp.maximum(
        jnp.dot(mean, w_pool_ref[...], preferred_element_type=jnp.float32), 0.0)
    pool_row = jnp.dot(yp, w_fin_ref[3], preferred_element_type=jnp.float32)
    acc = acc + pool_row                                  # broadcast-add (1, out_c)

    # ---- plain 1x1 conv branch (+ folded BN + ReLU) ----
    y1 = jnp.dot(x_flat, w_1x1_ref[...], preferred_element_type=jnp.float32)
    y1 = jnp.maximum(y1 + b_1x1_ref[...], 0.0)
    acc = acc + jnp.dot(y1, w_fin_ref[4], preferred_element_type=jnp.float32)

    # ---- final BN (scale pre-folded into w_fin) + ReLU ----
    out = jnp.maximum(acc + b_fin_ref[...], 0.0)
    o_ref[0] = out.reshape(H, W, out_c)


# ------------------------------ wrapper --------------------------------------
def aspp_pallas(x_nchw, kp):
    N, C_in, H, W = x_nchw.shape
    R = max(RATES)
    x = jnp.transpose(x_nchw, (0, 2, 3, 1)).astype(jnp.float32)        # NHWC
    xp = jnp.pad(x, ((0, 0), (R, R), (R, R), (0, 0)))                  # zero pad
    Hp, Wp = H + 2 * R, W + 2 * R

    kernel = functools.partial(
        _aspp_kernel, H=H, W=W, C_in=C_in, R_max=R, rates=RATES, out_c=OUT_C)

    def whole(arr):
        nd = arr.ndim
        # Constant index_map: Pallas fetches these once and never re-DMAs them
        # across the batch grid (only the VMEM double-buffer allocation remains,
        # which is tiny at these weight sizes).
        return pl.BlockSpec(arr.shape, lambda n, _nd=nd: (0,) * _nd)

    out = pl.pallas_call(
        kernel,
        out_shape=jax.ShapeDtypeStruct((N, H, W, OUT_C), jnp.float32),
        grid=(N,),
        in_specs=[
            pl.BlockSpec((1, Hp, Wp, C_in), lambda n: (n, 0, 0, 0)),   # padded x
            whole(kp["w_rate"]),
            whole(kp["rate_shift"]),
            whole(kp["w_pool"]),
            whole(kp["w_1x1"]),
            whole(kp["b_1x1"]),
            whole(kp["w_fin"]),
            whole(kp["b_fin"]),
        ],
        out_specs=pl.BlockSpec((1, H, W, OUT_C), lambda n: (n, 0, 0, 0)),
        compiler_params=pltpu.CompilerParams(
            dimension_semantics=("parallel",),
            vmem_limit_bytes=48 * 1024 * 1024),
    )(xp, kp["w_rate"], kp["rate_shift"], kp["w_pool"], kp["w_1x1"],
      kp["b_1x1"], kp["w_fin"], kp["b_fin"])
    return jnp.transpose(out, (0, 3, 1, 2))                            # back to NCHW


# --------------------- deterministic parameter construction ------------------
def make_raw_params(key, c_in):
    n_rates = len(RATES)
    ks = iter(jax.random.split(key, 32))

    def bn(c):
        return dict(
            gamma=1.0 + 0.1 * jax.random.normal(next(ks), (c,), jnp.float32),
            beta=0.1 * jax.random.normal(next(ks), (c,), jnp.float32),
            mean=0.1 * jax.random.normal(next(ks), (c,), jnp.float32),
            var=jax.random.uniform(next(ks), (c,), jnp.float32, 0.5, 1.5))

    raw = {}
    raw["w3"] = [0.1 * jax.random.normal(next(ks), (BRANCH_C[i], c_in, 3, 3),
                                         jnp.float32) for i in range(n_rates)]
    raw["bn3"] = [bn(BRANCH_C[i]) for i in range(n_rates)]
    raw["w_pool"] = 0.1 * jax.random.normal(next(ks), (BRANCH_C[-1], c_in, 1, 1),
                                            jnp.float32)
    raw["w_1x1"] = 0.1 * jax.random.normal(next(ks), (BRANCH_C[-2], c_in, 1, 1),
                                           jnp.float32)
    raw["bn_1x1"] = bn(BRANCH_C[-2])
    raw["w_fin"] = 0.1 * jax.random.normal(next(ks), (OUT_C, sum(BRANCH_C), 1, 1),
                                           jnp.float32)
    raw["bn_fin"] = bn(OUT_C)
    return raw


def _fold_bn(bn):
    scale = bn["gamma"] / jnp.sqrt(bn["var"] + BN_EPS)
    shift = bn["beta"] - bn["mean"] * scale
    return scale, shift


def make_kernel_params(raw):
    n_rates = len(RATES)
    cb = BRANCH_C[0]
    kp = {}

    # Atrous branches: im2col-stacked weights (9*C_in, Cb) per rate, with the
    # BN scale folded into the weight columns; shift kept as a bias row.
    w_rate, rate_shift = [], []
    for b in range(n_rates):
        scale, shift = _fold_bn(raw["bn3"][b])                      # (Cb,)
        w_im2col = jnp.concatenate(
            [jnp.transpose(raw["w3"][b][:, :, ky, kx])              # (C_in, Cb)
             for ky in range(3) for kx in range(3)], axis=0)        # (9*C_in, Cb)
        w_rate.append(w_im2col * scale[None, :])
        rate_shift.append(shift)
    kp["w_rate"] = jnp.stack(w_rate)                                # (3, 9*C_in, Cb)
    kp["rate_shift"] = jnp.stack(rate_shift)                        # (3, Cb)

    # Pool branch 1x1 conv (no BN).
    kp["w_pool"] = jnp.transpose(raw["w_pool"][:, :, 0, 0])         # (C_in, Cb)

    # Plain 1x1 branch with folded BN.
    s1, b1 = _fold_bn(raw["bn_1x1"])
    kp["w_1x1"] = jnp.transpose(raw["w_1x1"][:, :, 0, 0]) * s1[None, :]
    kp["b_1x1"] = b1[None, :]                                       # (1, Cb)

    # Final 1x1 conv: fold BN scale into columns, split into per-branch slices
    # in concat order [rate0, rate1, rate2, pool, 1x1].
    sf, bf = _fold_bn(raw["bn_fin"])
    wf = jnp.transpose(raw["w_fin"][:, :, 0, 0]) * sf[None, :]      # (sum_c, OUT_C)
    kp["w_fin"] = jnp.stack(
        [wf[i * cb:(i + 1) * cb] for i in range(len(BRANCH_C))])    # (5, Cb, OUT_C)
    kp["b_fin"] = bf[None, :]                                       # (1, OUT_C)
    return kp


# ----------------------------- pure-JAX reference ----------------------------
def aspp_reference(x, raw):
    def conv(inp, w, pad, dil):
        return lax.conv_general_dilated(
            inp, w, (1, 1), [(pad, pad), (pad, pad)], rhs_dilation=(dil, dil),
            dimension_numbers=("NCHW", "OIHW", "NCHW"),
            precision=lax.Precision.HIGHEST)

    def bn_apply(y, bn):
        scale, shift = _fold_bn(bn)
        return y * scale[None, :, None, None] + shift[None, :, None, None]

    outs = []
    for b, r in enumerate(RATES):
        y = conv(x, raw["w3"][b], r, r)
        outs.append(jnp.maximum(bn_apply(y, raw["bn3"][b]), 0.0))

    m = jnp.mean(x, axis=(2, 3), keepdims=True)
    yp = jnp.maximum(conv(m, raw["w_pool"], 0, 1), 0.0)
    outs.append(jnp.broadcast_to(yp, (x.shape[0], yp.shape[1],
                                      x.shape[2], x.shape[3])))

    y1 = conv(x, raw["w_1x1"], 0, 1)
    outs.append(jnp.maximum(bn_apply(y1, raw["bn_1x1"]), 0.0))

    cat = jnp.concatenate(outs, axis=1)
    yf = conv(cat, raw["w_fin"], 0, 1)
    return jnp.maximum(bn_apply(yf, raw["bn_fin"]), 0.0)


# ---------------------------------- main --------------------------------------
if __name__ == "__main__":
    key = jax.random.PRNGKey(0)
    kx, kparams = jax.random.split(key)
    N, C_in, H, W = 2, 4, 16, 16
    x = jax.random.normal(kx, (N, C_in, H, W), jnp.float32)

    raw = make_raw_params(kparams, C_in)
    kp = make_kernel_params(raw)

    out = aspp_pallas(x, kp)
    out = jax.block_until_ready(out)
    assert out.shape == (N, OUT_C, H, W)

    ref = aspp_reference(x, raw)
    np.testing.assert_allclose(np.asarray(out), np.asarray(ref),
                               rtol=2e-3, atol=2e-3)
    print("KERNEL_OK")
</pallas_src>

<mosaic_0001>
module attributes {stable_mosaic.version = 11 : i64} {
  func.func @_aspp_kernel(%arg0: i32, %arg1: memref<1x52x52x4xf32, #tpu.memory_space<vmem>>, %arg2: memref<3x36x64xf32, #tpu.memory_space<vmem>>, %arg3: memref<3x64xf32, #tpu.memory_space<vmem>>, %arg4: memref<4x64xf32, #tpu.memory_space<vmem>>, %arg5: memref<4x64xf32, #tpu.memory_space<vmem>>, %arg6: memref<1x64xf32, #tpu.memory_space<vmem>>, %arg7: memref<5x64x256xf32, #tpu.memory_space<vmem>>, %arg8: memref<1x256xf32, #tpu.memory_space<vmem>>, %arg9: memref<1x16x16x256xf32, #tpu.memory_space<vmem>>) attributes {dimension_semantics = [#tpu.dimension_semantics<parallel>], iteration_bounds = array<i64: 2>, scalar_prefetch = 0 : i64, scratch_operands = 0 : i64, tpu.core_type = #tpu.core_type<tc>, window_params = [{transform_indices = @transform_0, window_bounds = array<i64: 1, 52, 52, 4>}, {pipeline_mode = #tpu.pipeline_mode<synchronous>, transform_indices = @transform_1, window_bounds = array<i64: 3, 36, 64>}, {pipeline_mode = #tpu.pipeline_mode<synchronous>, transform_indices = @transform_2, window_bounds = array<i64: 3, 64>}, {pipeline_mode = #tpu.pipeline_mode<synchronous>, transform_indices = @transform_3, window_bounds = array<i64: 4, 64>}, {pipeline_mode = #tpu.pipeline_mode<synchronous>, transform_indices = @transform_4, window_bounds = array<i64: 4, 64>}, {pipeline_mode = #tpu.pipeline_mode<synchronous>, transform_indices = @transform_5, window_bounds = array<i64: 1, 64>}, {pipeline_mode = #tpu.pipeline_mode<synchronous>, transform_indices = @transform_6, window_bounds = array<i64: 5, 64, 256>}, {pipeline_mode = #tpu.pipeline_mode<synchronous>, transform_indices = @transform_7, window_bounds = array<i64: 1, 256>}, {transform_indices = @transform_8, window_bounds = array<i64: 1, 16, 16, 256>}]} {
    %c0 = arith.constant 0 : index
    %c0_0 = arith.constant 0 : index
    %c0_1 = arith.constant 0 : index
    %c0_2 = arith.constant 0 : index
    %0 = vector.load %arg1[%c0, %c0_0, %c0_1, %c0_2] : memref<1x52x52x4xf32, #tpu.memory_space<vmem>>, vector<1x52x52x4xf32>
    %1 = vector.shape_cast %0 : vector<1x52x52x4xf32> to vector<52x52x4xf32>
    %2 = vector.extract_strided_slice %1 {offsets = [18, 18, 0], sizes = [16, 16, 4], strides = [1, 1, 1]} : vector<52x52x4xf32> to vector<16x16x4xf32>
    %3 = vector.shape_cast %2 : vector<16x16x4xf32> to vector<256x4xf32>
    %cst = arith.constant 0.000000e+00 : f32
    %4 = vector.broadcast %cst : f32 to vector<256x256xf32>
    %5 = vector.extract_strided_slice %1 {offsets = [12, 12, 0], sizes = [16, 16, 4], strides = [1, 1, 1]} : vector<52x52x4xf32> to vector<16x16x4xf32>
    %6 = vector.shape_cast %5 : vector<16x16x4xf32> to vector<256x4xf32>
    %7 = vector.extract_strided_slice %1 {offsets = [12, 18, 0], sizes = [16, 16, 4], strides = [1, 1, 1]} : vector<52x52x4xf32> to vector<16x16x4xf32>
    %8 = vector.shape_cast %7 : vector<16x16x4xf32> to vector<256x4xf32>
    %9 = vector.extract_strided_slice %1 {offsets = [12, 24, 0], sizes = [16, 16, 4], strides = [1, 1, 1]} : vector<52x52x4xf32> to vector<16x16x4xf32>
    %10 = vector.shape_cast %9 : vector<16x16x4xf32> to vector<256x4xf32>
    %11 = vector.extract_strided_slice %1 {offsets = [18, 12, 0], sizes = [16, 16, 4], strides = [1, 1, 1]} : vector<52x52x4xf32> to vector<16x16x4xf32>
    %12 = vector.shape_cast %11 : vector<16x16x4xf32> to vector<256x4xf32>
    %13 = vector.extract_strided_slice %1 {offsets = [18, 18, 0], sizes = [16, 16, 4], strides = [1, 1, 1]} : vector<52x52x4xf32> to vector<16x16x4xf32>
    %14 = vector.shape_cast %13 : vector<16x16x4xf32> to vector<256x4xf32>
    %15 = vector.extract_strided_slice %1 {offsets = [18, 24, 0], sizes = [16, 16, 4], strides = [1, 1, 1]} : vector<52x52x4xf32> to vector<16x16x4xf32>
    %16 = vector.shape_cast %15 : vector<16x16x4xf32> to vector<256x4xf32>
    %17 = vector.extract_strided_slice %1 {offsets = [24, 12, 0], sizes = [16, 16, 4], strides = [1, 1, 1]} : vector<52x52x4xf32> to vector<16x16x4xf32>
    %18 = vector.shape_cast %17 : vector<16x16x4xf32> to vector<256x4xf32>
    %19 = vector.extract_strided_slice %1 {offsets = [24, 18, 0], sizes = [16, 16, 4], strides = [1, 1, 1]} : vector<52x52x4xf32> to vector<16x16x4xf32>
    %20 = vector.shape_cast %19 : vector<16x16x4xf32> to vector<256x4xf32>
    %21 = vector.extract_strided_slice %1 {offsets = [24, 24, 0], sizes = [16, 16, 4], strides = [1, 1, 1]} : vector<52x52x4xf32> to vector<16x16x4xf32>
    %22 = vector.shape_cast %21 : vector<16x16x4xf32> to vector<256x4xf32>
    %23 = tpu.concatenate %6, %8, %10, %12, %14, %16, %18, %20, %22 in 1 : vector<256x4xf32>, vector<256x4xf32>, vector<256x4xf32>, vector<256x4xf32>, vector<256x4xf32>, vector<256x4xf32>, vector<256x4xf32>, vector<256x4xf32>, vector<256x4xf32> -> vector<256x36xf32>
    %c0_3 = arith.constant 0 : index
    %c0_4 = arith.constant 0 : index
    %c0_5 = arith.constant 0 : index
    %24 = vector.load %arg2[%c0_3, %c0_4, %c0_5] : memref<3x36x64xf32, #tpu.memory_space<vmem>>, vector<1x36x64xf32>
    %25 = vector.shape_cast %24 : vector<1x36x64xf32> to vector<36x64xf32>
    %cst_6 = arith.constant dense<0.000000e+00> : vector<256x64xf32>
    %26 = tpu.matmul %23, %25, %cst_6 {dimension_numbers = #tpu.dot_dimension_numbers<[1], [0], [0], [1], [0, 0, 1, 1], [], []>} : vector<256x36xf32>, vector<36x64xf32>, vector<256x64xf32> -> vector<256x64xf32>
    %c0_7 = arith.constant 0 : index
    %c0_8 = arith.constant 0 : index
    %27 = vector.load %arg3[%c0_7, %c0_8] : memref<3x64xf32, #tpu.memory_space<vmem>>, vector<1x64xf32>
    %28 = vector.broadcast %27 : vector<1x64xf32> to vector<256x64xf32>
    %29 = arith.addf %26, %28 : vector<256x64xf32>
    %cst_9 = arith.constant 0.000000e+00 : f32
    %30 = vector.broadcast %cst_9 : f32 to vector<256x64xf32>
    %31 = arith.maximumf %29, %30 : vector<256x64xf32>
    %c0_10 = arith.constant 0 : index
    %c0_11 = arith.constant 0 : index
    %c0_12 = arith.constant 0 : index
    %32 = vector.load %arg7[%c0_10, %c0_11, %c0_12] : memref<5x64x256xf32, #tpu.memory_space<vmem>>, vector<1x64x256xf32>
    %33 = vector.shape_cast %32 : vector<1x64x256xf32> to vector<64x256xf32>
    %cst_13 = arith.constant dense<0.000000e+00> : vector<256x256xf32>
    %34 = tpu.matmul %31, %33, %cst_13 {dimension_numbers = #tpu.dot_dimension_numbers<[1], [0], [0], [1], [0, 0, 1, 1], [], []>} : vector<256x64xf32>, vector<64x256xf32>, vector<256x256xf32> -> vector<256x256xf32>
    %35 = arith.addf %4, %34 : vector<256x256xf32>
    %36 = vector.extract_strided_slice %1 {offsets = [6, 6, 0], sizes = [16, 16, 4], strides = [1, 1, 1]} : vector<52x52x4xf32> to vector<16x16x4xf32>
    %37 = vector.shape_cast %36 : vector<16x16x4xf32> to vector<256x4xf32>
    %38 = vector.extract_strided_slice %1 {offsets = [6, 18, 0], sizes = [16, 16, 4], strides = [1, 1, 1]} : vector<52x52x4xf32> to vector<16x16x4xf32>
    %39 = vector.shape_cast %38 : vector<16x16x4xf32> to vector<256x4xf32>
    %40 = vector.extract_strided_slice %1 {offsets = [6, 30, 0], sizes = [16, 16, 4], strides = [1, 1, 1]} : vector<52x52x4xf32> to vector<16x16x4xf32>
    %41 = vector.shape_cast %40 : vector<16x16x4xf32> to vector<256x4xf32>
    %42 = vector.extract_strided_slice %1 {offsets = [18, 6, 0], sizes = [16, 16, 4], strides = [1, 1, 1]} : vector<52x52x4xf32> to vector<16x16x4xf32>
    %43 = vector.shape_cast %42 : vector<16x16x4xf32> to vector<256x4xf32>
    %44 = vector.extract_strided_slice %1 {offsets = [18, 18, 0], sizes = [16, 16, 4], strides = [1, 1, 1]} : vector<52x52x4xf32> to vector<16x16x4xf32>
    %45 = vector.shape_cast %44 : vector<16x16x4xf32> to vector<256x4xf32>
    %46 = vector.extract_strided_slice %1 {offsets = [18, 30, 0], sizes = [16, 16, 4], strides = [1, 1, 1]} : vector<52x52x4xf32> to vector<16x16x4xf32>
    %47 = vector.shape_cast %46 : vector<16x16x4xf32> to vector<256x4xf32>
    %48 = vector.extract_strided_slice %1 {offsets = [30, 6, 0], sizes = [16, 16, 4], strides = [1, 1, 1]} : vector<52x52x4xf32> to vector<16x16x4xf32>
    %49 = vector.shape_cast %48 : vector<16x16x4xf32> to vector<256x4xf32>
    %50 = vector.extract_strided_slice %1 {offsets = [30, 18, 0], sizes = [16, 16, 4], strides = [1, 1, 1]} : vector<52x52x4xf32> to vector<16x16x4xf32>
    %51 = vector.shape_cast %50 : vector<16x16x4xf32> to vector<256x4xf32>
    %52 = vector.extract_strided_slice %1 {offsets = [30, 30, 0], sizes = [16, 16, 4], strides = [1, 1, 1]} : vector<52x52x4xf32> to vector<16x16x4xf32>
    %53 = vector.shape_cast %52 : vector<16x16x4xf32> to vector<256x4xf32>
    %54 = tpu.concatenate %37, %39, %41, %43, %45, %47, %49, %51, %53 in 1 : vector<256x4xf32>, vector<256x4xf32>, vector<256x4xf32>, vector<256x4xf32>, vector<256x4xf32>, vector<256x4xf32>, vector<256x4xf32>, vector<256x4xf32>, vector<256x4xf32> -> vector<256x36xf32>
    %c1 = arith.constant 1 : index
    %c0_14 = arith.constant 0 : index
    %c0_15 = arith.constant 0 : index
    %55 = vector.load %arg2[%c1, %c0_14, %c0_15] : memref<3x36x64xf32, #tpu.memory_space<vmem>>, vector<1x36x64xf32>
    %56 = vector.shape_cast %55 : vector<1x36x64xf32> to vector<36x64xf32>
    %cst_16 = arith.constant dense<0.000000e+00> : vector<256x64xf32>
    %57 = tpu.matmul %54, %56, %cst_16 {dimension_numbers = #tpu.dot_dimension_numbers<[1], [0], [0], [1], [0, 0, 1, 1], [], []>} : vector<256x36xf32>, vector<36x64xf32>, vector<256x64xf32> -> vector<256x64xf32>
    %c1_17 = arith.constant 1 : index
    %c0_18 = arith.constant 0 : index
    %58 = vector.load %arg3[%c1_17, %c0_18] : memref<3x64xf32, #tpu.memory_space<vmem>>, vector<1x64xf32>
    %59 = vector.broadcast %58 : vector<1x64xf32> to vector<256x64xf32>
    %60 = arith.addf %57, %59 : vector<256x64xf32>
    %cst_19 = arith.constant 0.000000e+00 : f32
    %61 = vector.broadcast %cst_19 : f32 to vector<256x64xf32>
    %62 = arith.maximumf %60, %61 : vector<256x64xf32>
    %c1_20 = arith.constant 1 : index
    %c0_21 = arith.constant 0 : index
    %c0_22 = arith.constant 0 : index
    %63 = vector.load %arg7[%c1_20, %c0_21, %c0_22] : memref<5x64x256xf32, #tpu.memory_space<vmem>>, vector<1x64x256xf32>
    %64 = vector.shape_cast %63 : vector<1x64x256xf32> to vector<64x256xf32>
    %cst_23 = arith.constant dense<0.000000e+00> : vector<256x256xf32>
    %65 = tpu.matmul %62, %64, %cst_23 {dimension_numbers = #tpu.dot_dimension_numbers<[1], [0], [0], [1], [0, 0, 1, 1], [], []>} : vector<256x64xf32>, vector<64x256xf32>, vector<256x256xf32> -> vector<256x256xf32>
    %66 = arith.addf %35, %65 : vector<256x256xf32>
    %67 = vector.extract_strided_slice %1 {offsets = [0, 0, 0], sizes = [16, 16, 4], strides = [1, 1, 1]} : vector<52x52x4xf32> to vector<16x16x4xf32>
    %68 = vector.shape_cast %67 : vector<16x16x4xf32> to vector<256x4xf32>
    %69 = vector.extract_strided_slice %1 {offsets = [0, 18, 0], sizes = [16, 16, 4], strides = [1, 1, 1]} : vector<52x52x4xf32> to vector<16x16x4xf32>
    %70 = vector.shape_cast %69 : vector<16x16x4xf32> to vector<256x4xf32>
    %71 = vector.extract_strided_slice %1 {offsets = [0, 36, 0], sizes = [16, 16, 4], strides = [1, 1, 1]} : vector<52x52x4xf32> to vector<16x16x4xf32>
    %72 = vector.shape_cast %71 : vector<16x16x4xf32> to vector<256x4xf32>
    %73 = vector.extract_strided_slice %1 {offsets = [18, 0, 0], sizes = [16, 16, 4], strides = [1, 1, 1]} : vector<52x52x4xf32> to vector<16x16x4xf32>
    %74 = vector.shape_cast %73 : vector<16x16x4xf32> to vector<256x4xf32>
    %75 = vector.extract_strided_slice %1 {offsets = [18, 18, 0], sizes = [16, 16, 4], strides = [1, 1, 1]} : vector<52x52x4xf32> to vector<16x16x4xf32>
    %76 = vector.shape_cast %75 : vector<16x16x4xf32> to vector<256x4xf32>
    %77 = vector.extract_strided_slice %1 {offsets = [18, 36, 0], sizes = [16, 16, 4], strides = [1, 1, 1]} : vector<52x52x4xf32> to vector<16x16x4xf32>
    %78 = vector.shape_cast %77 : vector<16x16x4xf32> to vector<256x4xf32>
    %79 = vector.extract_strided_slice %1 {offsets = [36, 0, 0], sizes = [16, 16, 4], strides = [1, 1, 1]} : vector<52x52x4xf32> to vector<16x16x4xf32>
    %80 = vector.shape_cast %79 : vector<16x16x4xf32> to vector<256x4xf32>
    %81 = vector.extract_strided_slice %1 {offsets = [36, 18, 0], sizes = [16, 16, 4], strides = [1, 1, 1]} : vector<52x52x4xf32> to vector<16x16x4xf32>
    %82 = vector.shape_cast %81 : vector<16x16x4xf32> to vector<256x4xf32>
    %83 = vector.extract_strided_slice %1 {offsets = [36, 36, 0], sizes = [16, 16, 4], strides = [1, 1, 1]} : vector<52x52x4xf32> to vector<16x16x4xf32>
    %84 = vector.shape_cast %83 : vector<16x16x4xf32> to vector<256x4xf32>
    %85 = tpu.concatenate %68, %70, %72, %74, %76, %78, %80, %82, %84 in 1 : vector<256x4xf32>, vector<256x4xf32>, vector<256x4xf32>, vector<256x4xf32>, vector<256x4xf32>, vector<256x4xf32>, vector<256x4xf32>, vector<256x4xf32>, vector<256x4xf32> -> vector<256x36xf32>
    %c2 = arith.constant 2 : index
    %c0_24 = arith.constant 0 : index
    %c0_25 = arith.constant 0 : index
    %86 = vector.load %arg2[%c2, %c0_24, %c0_25] : memref<3x36x64xf32, #tpu.memory_space<vmem>>, vector<1x36x64xf32>
    %87 = vector.shape_cast %86 : vector<1x36x64xf32> to vector<36x64xf32>
    %cst_26 = arith.constant dense<0.000000e+00> : vector<256x64xf32>
    %88 = tpu.matmul %85, %87, %cst_26 {dimension_numbers = #tpu.dot_dimension_numbers<[1], [0], [0], [1], [0, 0, 1, 1], [], []>} : vector<256x36xf32>, vector<36x64xf32>, vector<256x64xf32> -> vector<256x64xf32>
    %c2_27 = arith.constant 2 : index
    %c0_28 = arith.constant 0 : index
    %89 = vector.load %arg3[%c2_27, %c0_28] : memref<3x64xf32, #tpu.memory_space<vmem>>, vector<1x64xf32>
    %90 = vector.broadcast %89 : vector<1x64xf32> to vector<256x64xf32>
    %91 = arith.addf %88, %90 : vector<256x64xf32>
    %cst_29 = arith.constant 0.000000e+00 : f32
    %92 = vector.broadcast %cst_29 : f32 to vector<256x64xf32>
    %93 = arith.maximumf %91, %92 : vector<256x64xf32>
    %c2_30 = arith.constant 2 : index
    %c0_31 = arith.constant 0 : index
    %c0_32 = arith.constant 0 : index
    %94 = vector.load %arg7[%c2_30, %c0_31, %c0_32] : memref<5x64x256xf32, #tpu.memory_space<vmem>>, vector<1x64x256xf32>
    %95 = vector.shape_cast %94 : vector<1x64x256xf32> to vector<64x256xf32>
    %cst_33 = arith.constant dense<0.000000e+00> : vector<256x256xf32>
    %96 = tpu.matmul %93, %95, %cst_33 {dimension_numbers = #tpu.dot_dimension_numbers<[1], [0], [0], [1], [0, 0, 1, 1], [], []>} : vector<256x64xf32>, vector<64x256xf32>, vector<256x256xf32> -> vector<256x256xf32>
    %97 = arith.addf %66, %96 : vector<256x256xf32>
    %cst_34 = arith.constant dense<0.000000e+00> : vector<4xf32>
    %98 = vector.multi_reduction <add>, %3, %cst_34 [0] : vector<256x4xf32> to vector<4xf32>
    %99 = vector.shape_cast %98 : vector<4xf32> to vector<1x4xf32>
    %cst_35 = arith.constant 3.906250e-03 : f32
    %100 = vector.broadcast %cst_35 : f32 to vector<1x4xf32>
    %101 = arith.mulf %99, %100 : vector<1x4xf32>
    %c0_36 = arith.constant 0 : index
    %c0_37 = arith.constant 0 : index
    %102 = vector.load %arg4[%c0_36, %c0_37] : memref<4x64xf32, #tpu.memory_space<vmem>>, vector<4x64xf32>
    %cst_38 = arith.constant dense<0.000000e+00> : vector<1x64xf32>
    %103 = tpu.matmul %101, %102, %cst_38 {dimension_numbers = #tpu.dot_dimension_numbers<[1], [0], [0], [1], [0, 0, 1, 1], [], []>} : vector<1x4xf32>, vector<4x64xf32>, vector<1x64xf32> -> vector<1x64xf32>
    %cst_39 = arith.constant 0.000000e+00 : f32
    %104 = vector.broadcast %cst_39 : f32 to vector<1x64xf32>
    %105 = arith.maximumf %103, %104 : vector<1x64xf32>
    %c3 = arith.constant 3 : index
    %c0_40 = arith.constant 0 : index
    %c0_41 = arith.constant 0 : index
    %106 = vector.load %arg7[%c3, %c0_40, %c0_41] : memref<5x64x256xf32, #tpu.memory_space<vmem>>, vector<1x64x256xf32>
    %107 = vector.shape_cast %106 : vector<1x64x256xf32> to vector<64x256xf32>
    %cst_42 = arith.constant dense<0.000000e+00> : vector<1x256xf32>
    %108 = tpu.matmul %105, %107, %cst_42 {dimension_numbers = #tpu.dot_dimension_numbers<[1], [0], [0], [1], [0, 0, 1, 1], [], []>} : vector<1x64xf32>, vector<64x256xf32>, vector<1x256xf32> -> vector<1x256xf32>
    %109 = vector.broadcast %108 : vector<1x256xf32> to vector<256x256xf32>
    %110 = arith.addf %97, %109 : vector<256x256xf32>
    %c0_43 = arith.constant 0 : index
    %c0_44 = arith.constant 0 : index
    %111 = vector.load %arg5[%c0_43, %c0_44] : memref<4x64xf32, #tpu.memory_space<vmem>>, vector<4x64xf32>
    %cst_45 = arith.constant dense<0.000000e+00> : vector<256x64xf32>
    %112 = tpu.matmul %3, %111, %cst_45 {dimension_numbers = #tpu.dot_dimension_numbers<[1], [0], [0], [1], [0, 0, 1, 1], [], []>} : vector<256x4xf32>, vector<4x64xf32>, vector<256x64xf32> -> vector<256x64xf32>
    %c0_46 = arith.constant 0 : index
    %c0_47 = arith.constant 0 : index
    %113 = vector.load %arg6[%c0_46, %c0_47] : memref<1x64xf32, #tpu.memory_space<vmem>>, vector<1x64xf32>
    %114 = vector.broadcast %113 : vector<1x64xf32> to vector<256x64xf32>
    %115 = arith.addf %112, %114 : vector<256x64xf32>
    %cst_48 = arith.constant 0.000000e+00 : f32
    %116 = vector.broadcast %cst_48 : f32 to vector<256x64xf32>
    %117 = arith.maximumf %115, %116 : vector<256x64xf32>
    %c4 = arith.constant 4 : index
    %c0_49 = arith.constant 0 : index
    %c0_50 = arith.constant 0 : index
    %118 = vector.load %arg7[%c4, %c0_49, %c0_50] : memref<5x64x256xf32, #tpu.memory_space<vmem>>, vector<1x64x256xf32>
    %119 = vector.shape_cast %118 : vector<1x64x256xf32> to vector<64x256xf32>
    %cst_51 = arith.constant dense<0.000000e+00> : vector<256x256xf32>
    %120 = tpu.matmul %117, %119, %cst_51 {dimension_numbers = #tpu.dot_dimension_numbers<[1], [0], [0], [1], [0, 0, 1, 1], [], []>} : vector<256x64xf32>, vector<64x256xf32>, vector<256x256xf32> -> vector<256x256xf32>
    %121 = arith.addf %110, %120 : vector<256x256xf32>
    %c0_52 = arith.constant 0 : index
    %c0_53 = arith.constant 0 : index
    %122 = vector.load %arg8[%c0_52, %c0_53] : memref<1x256xf32, #tpu.memory_space<vmem>>, vector<1x256xf32>
    %123 = vector.broadcast %122 : vector<1x256xf32> to vector<256x256xf32>
    %124 = arith.addf %121, %123 : vector<256x256xf32>
    %cst_54 = arith.constant 0.000000e+00 : f32
    %125 = vector.broadcast %cst_54 : f32 to vector<256x256xf32>
    %126 = arith.maximumf %124, %125 : vector<256x256xf32>
    %127 = vector.shape_cast %126 : vector<256x256xf32> to vector<16x16x256xf32>
    %c0_55 = arith.constant 0 : index
    %c0_56 = arith.constant 0 : index
    %c0_57 = arith.constant 0 : index
    %c0_58 = arith.constant 0 : index
    %128 = vector.load %arg9[%c0_55, %c0_56, %c0_57, %c0_58] : memref<1x16x16x256xf32, #tpu.memory_space<vmem>>, vector<1x16x16x256xf32>
    %129 = vector.shape_cast %128 : vector<1x16x16x256xf32> to vector<16x16x256xf32>
    %130 = vector.shape_cast %127 : vector<16x16x256xf32> to vector<1x16x16x256xf32>
    tpu.vector_store %arg9[%c0_55, %c0_56, %c0_57, %c0_58], %130 {strides = array<i32>} : memref<1x16x16x256xf32, #tpu.memory_space<vmem>>, vector<1x16x16x256xf32>,
    return
  }
  func.func @transform_0(%arg0: i32) -> (i32, i32, i32, i32) {
    %c0_i32 = arith.constant 0 : i32
    %c0_i32_0 = arith.constant 0 : i32
    %c0_i32_1 = arith.constant 0 : i32
    %c0_i32_2 = arith.constant 0 : i32
    return %arg0, %c0_i32, %c0_i32_0, %c0_i32_1 : i32, i32, i32, i32
  }
  func.func @transform_1(%arg0: i32) -> (i32, i32, i32) {
    %c0_i32 = arith.constant 0 : i32
    %c0_i32_0 = arith.constant 0 : i32
    %c0_i32_1 = arith.constant 0 : i32
    %c0_i32_2 = arith.constant 0 : i32
    return %c0_i32, %c0_i32_0, %c0_i32_1 : i32, i32, i32
  }
  func.func @transform_2(%arg0: i32) -> (i32, i32) {
    %c0_i32 = arith.constant 0 : i32
    %c0_i32_0 = arith.constant 0 : i32
    %c0_i32_1 = arith.constant 0 : i32
    return %c0_i32, %c0_i32_0 : i32, i32
  }
  func.func @transform_3(%arg0: i32) -> (i32, i32) {
    %c0_i32 = arith.constant 0 : i32
    %c0_i32_0 = arith.constant 0 : i32
    %c0_i32_1 = arith.constant 0 : i32
    return %c0_i32, %c0_i32_0 : i32, i32
  }
  func.func @transform_4(%arg0: i32) -> (i32, i32) {
    %c0_i32 = arith.constant 0 : i32
    %c0_i32_0 = arith.constant 0 : i32
    %c0_i32_1 = arith.constant 0 : i32
    return %c0_i32, %c0_i32_0 : i32, i32
  }
  func.func @transform_5(%arg0: i32) -> (i32, i32) {
    %c0_i32 = arith.constant 0 : i32
    %c0_i32_0 = arith.constant 0 : i32
    %c0_i32_1 = arith.constant 0 : i32
    return %c0_i32, %c0_i32_0 : i32, i32
  }
  func.func @transform_6(%arg0: i32) -> (i32, i32, i32) {
    %c0_i32 = arith.constant 0 : i32
    %c0_i32_0 = arith.constant 0 : i32
    %c0_i32_1 = arith.constant 0 : i32
    %c0_i32_2 = arith.constant 0 : i32
    return %c0_i32, %c0_i32_0, %c0_i32_1 : i32, i32, i32
  }
  func.func @transform_7(%arg0: i32) -> (i32, i32) {
    %c0_i32 = arith.constant 0 : i32
    %c0_i32_0 = arith.constant 0 : i32
    %c0_i32_1 = arith.constant 0 : i32
    return %c0_i32, %c0_i32_0 : i32, i32
  }
  func.func @transform_8(%arg0: i32) -> (i32, i32, i32, i32) {
    %c0_i32 = arith.constant 0 : i32
    %c0_i32_0 = arith.constant 0 : i32
    %c0_i32_1 = arith.constant 0 : i32
    %c0_i32_2 = arith.constant 0 : i32
    return %arg0, %c0_i32, %c0_i32_0, %c0_i32_1 : i32, i32, i32, i32
  }
}

</mosaic_0001>

<bundles_post_ra>
// kernel: tpu_custom_call.1
= control target key start
LH: loop header
LB: loop body
LE: loop exit
PB: predicated region body
PF: predicated region fallthrough
CT: control target
= control target key end

     0   :  { %s16032_s0 = inlined_call_operand.vmem [shape: f32[2,52,52,4], index: 0, kind: input, shape index: {}]   ;;  %s16033_s1 = inlined_call_operand.vmem [shape: f32[3,36,64], index: 1, kind: input, shape index: {}]   ;;  %s16034_s2 = inlined_call_operand.vmem [shape: f32[3,64], index: 2, kind: input, shape index: {}]   ;;  %s16035_s3 = inlined_call_operand.vmem [shape: f32[4,64], index: 3, kind: input, shape index: {}]   ;;  %s16036_s4 = inlined_call_operand.vmem [shape: f32[4,64], index: 4, kind: input, shape index: {}]   ;;  %s16037_s5 = inlined_call_operand.vmem [shape: f32[1,64], index: 5, kind: input, shape index: {}]   ;;  %s16038_s6 = inlined_call_operand.vmem [shape: f32[5,64,256], index: 6, kind: input, shape index: {}]   ;;  %s16039_s7 = inlined_call_operand.vmem [shape: f32[1,256], index: 7, kind: input, shape index: {}]   ;;  %s16040_s8 = inlined_call_operand.hbm [shape: f32[2,16,16,256], index: 8, kind: output, shape index: {}]  }
   0x1   :  { %16300 = sst [smem:[#allocation210_spill]] %s16032_s0 }
   0x2   :  { %13 = vsyncpa [#allocation3], 0 }
   0x3   :  { %15 = vsyncpa [#allocation3 + $0x1], 0  ;;  %s9960_s27 = smov 0   ;;  %s9962_s28 = smov 0  }
   0x4   :  { %s9964_s29 = smov 0   ;;  %s9966_s30 = smov 0  }
   0x5 LB: > { %16301 = sst [smem:[#allocation5_spill]] %s9897_s29  ;;  %s9981_s9 = sadd.s32 4294967295, %s9901_s30   ;;  %s9901_s30 = sphi %s9966_s30, %s17062_s30   ;;  %s9897_s29 = sphi %s9964_s29, %s17059_s29   ;;  %s9893_s28 = sphi %s9962_s28, %s17061_s28   ;;  %s9889_s27 = sphi %s9960_s27, %s17060_s27  }
   0x6   : > { %s8431_s10 = sadd.s32 4294967294, %s9901_s30   ;;  %s9985_s11 = sadd.s32 1, %s9901_s30  }
   0x7   : > { %s201_s12 = sadd.s32 1, %s9897_s29  ;;  %s198_s13 = ssub.s32 %s9901_s30, %s9985_s11 }
   0x8   : > { %p211_p0 = scmp.ne.s32.totalorder %s9897_s29, %s9893_s28  ;;  %p199_p1 = scmp.eq.s32.totalorder %s198_s13, 0 }
   0x9   : > { %p212_p2 = scmp.eq.s32.totalorder %s9981_s9, 1  ;;  %p217_p3 = scmp.ne.s32.totalorder %s9893_s28, %s9889_s27 }
   0xa   : > { %p218_p4 = scmp.eq.s32.totalorder %s8431_s10, 1  ;;  %p8434_p7 = scmp.ge.s32.totalorder %s9901_s30, 1 }
   0xb   : > { %s9996_s14 = scalar_select %p199_p1, %s9897_s29, %s201_s12  }
   0xc   : > { %p9998_p5 = por %p212_p2, %p211_p0  ;;  %p10002_p6 = por %p218_p4, %p217_p3 }
   0xd   : > { %16302 = sst [smem:[#allocation6_spill]] %s9996_s14  ;;  %p265_p8 = scmp.lt.s32.totalorder %s9901_s30, 3 }
   0xf   : > { %p266_p9 = pnand %p8434_p7, %p265_p8 }
  0x11   : > { %269 = sbr.rel (%p266_p9) target bundleno = 2213 (0x8a5), region = 52 }
  0x18   : > { %p299_p10 = scmp.lt.s32.totalorder %s9981_s9, 1  ;;  %s16305_s0 = sld [smem:[#allocation210_spill]]  ;;  %vm2565_vm0 = vcmask 1041408   ;;  %vm712_vm1 = vcmask 1045504   ;;  %vm853_vm2 = vcmask 1043456   ;;  %vm1890_vm3 = vcmask 31744  }
  0x19   : > { %s16045_s22 = smov 8   ;;  %s16272_s23 = smov 4   ;;  %vm1923_vm4 = vcmask 64512   ;;  %vm1956_vm5 = vcmask 97280   ;;  %vm1989_vm6 = vcmask 130048   ;;  %vm2022_vm7 = vcmask 162816  }
  0x1a   : > { %s300_s17 = scalar_select %p299_p10, %s9981_s9, 1  ;;  %vm2055_vm8 = vcmask 195584   ;;  %vm2088_vm9 = vcmask 228352   ;;  %vm2121_vm10 = vcmask 261120   ;;  %vm2164_vm11 = vcmask 293888  }
  0x1b   : > { %s16043_s24 = smov 16   ;;  %s16041_s25 = smov 12   ;;  %vm4350_vm12 = vcmask 523264   ;;  %vm9912_vm13 = vmmov 0  }
  0x1c   : > { %s9527_s18 = smul.u32 2912, %s300_s17  ;;  %s16274_s26 = smov 20  }
  0x1d   : > { %s16276_s10 = smov 28   ;;  %s16278_s12 = smov 24  }
  0x1e   : > { %s10013_s21 = scalar_lea.vmem %s16305_s0, %s9527_s18  ;;  %s16047_s13 = smov 32  }
  0x1f   : > { %v349_v0 = vld [vmem:[%s10013_s21 + $0x168] sm:$0xff]  ;;  %v350_v1 = vld [vmem:[%s10013_s21 + $0x170] sm:$0xff]  ;;  %v10018_v2 = vld [vmem:[%s10013_s21 + $0x160] sm:$0xff]  ;;  %s16322_s17 = smov 16   ;;  %s16323_s18 = smov 12  }
  0x20   : > { %v2736_v3 = vrot.slane %v349_v0, 6  ;;  %v2737_v4 = vrot.slane %v350_v1, 6  ;;  %v2690_v5 = vrot.slane %v10018_v2, 2  ;;  %v2691_v6 = vrot.slane %v349_v0, 2  ;;  %v351_v7 = vld [vmem:[%s10013_s21 + $0x178] sm:$0xff]  ;;  %v430_v8 = vld [vmem:[%s10013_s21 + $0x400] sm:$0xff] }
  0x21   : > { %v2739_v9 = vrot.slane %v351_v7, 6  ;;  %v2693_v10 = vrot.slane %v350_v1, 2  ;;  %v431_v11 = vld [vmem:[%s10013_s21 + $0x408] sm:$0xff]  ;;  %v428_v12 = vld [vmem:[%s10013_s21 + $0x3f0] sm:$0xff]  ;;  %v429_v15 = vld [vmem:[%s10013_s21 + $0x3f8] sm:$0xff]  ;;  %v713_v16 = vrot.slane %v430_v8, 2 }
  0x22   : > { %v2738_v13 = vsel %vm2565_vm0, %v2736_v3, %v2737_v4  ;;  %v2692_v14 = vsel %vm712_vm1, %v2690_v5, %v2691_v6  ;;  %v714_v17 = vrot.slane %v431_v11, 2  ;;  %v2626_v20 = vrot.slane %v428_v12, 6  ;;  %v432_v22 = vld [vmem:[%s10013_s21 + $0x410] sm:$0xff]  ;;  %v433_v27 = vld [vmem:[%s10013_s21 + $0x418] sm:$0xff]  ;;  %v514_v33 = vld [vmem:[%s10013_s21 + $0x6a0] sm:$0xff]  ;;  %s16530_s14 = smov 28  }
  0x23   : > { %3194 = vrot.lane.b32.xlu1 %v2738_v13, %s16045_s22  ;;  %3158 = vrot.lane.b32.xlu0 %v2692_v14, %s16272_s23  ;;  %v2740_v18 = vsel %vm2565_vm0, %v2737_v4, %v2739_v9  ;;  %v2694_v19 = vsel %vm712_vm1, %v2691_v6, %v2693_v10  ;;  %v2627_v21 = vrot.slane %v429_v15, 6  ;;  %v716_v25 = vrot.slane %v432_v22, 2  ;;  %v515_v34 = vld [vmem:[%s10013_s21 + $0x6a8] sm:$0xff]  ;;  %v512_v35 = vld [vmem:[%s10013_s21 + $0x690] sm:$0xff]  ;;  %s16541_s0 = smov 4   ;;  %s9913_s19 = smov [#allocation2]  }
  0x24   : > { %v10036_v23 = vsel %vm712_vm1, %v713_v16, %v714_v17  ;;  %v2629_v26 = vrot.slane %v430_v8, 6  ;;  %v2797_v28 = vrot.slane %v432_v22, 6  ;;  %v2799_v29 = vrot.slane %v433_v27, 6  ;;  %v513_v36 = vld [vmem:[%s10013_s21 + $0x698] sm:$0xff]  ;;  %v516_v43 = vld [vmem:[%s10013_s21 + $0x6b0] sm:$0xff]  ;;  %v356_v49 = vld [vmem:[%s10013_s21 + $0x1a0] sm:$0xff] }
  0x25   : > { %16306 = vst [vmem:[#allocation7_spill] sm:$0xff] %v10036_v23  ;;  %v10039_v24 = vsel %vm2565_vm0, %v2626_v20, %v2627_v21  ;;  %v10047_v30 = vsel %vm712_vm1, %v714_v17, %v716_v25  ;;  %v2796_v32 = vrot.slane %v431_v11, 6  ;;  %v773_v38 = vrot.slane %v514_v33, 2  ;;  %v10078_v48 = vld [vmem:[%s10013_s21 + $0x198] sm:$0xff]  ;;  %v357_v56 = vld [vmem:[%s10013_s21 + $0x1a8] sm:$0xff]  ;;  %v358_v62 = vld [vmem:[%s10013_s21 + $0x1b0] sm:$0xff] }
  0x26   : > { %16307 = vst [vmem:[#allocation8_spill] sm:$0xff] %v10039_v24  ;;  %16308 = vst [vmem:[#allocation9_spill] sm:$0xff] %v10047_v30  ;;  %v10050_v31 = vsel %vm2565_vm0, %v2627_v21, %v2629_v26  ;;  %v10061_v37 = vsel %vm2565_vm0, %v2797_v28, %v2799_v29  ;;  %v774_v40 = vrot.slane %v515_v34, 2  ;;  %v2868_v41 = vrot.slane %v512_v35, 6  ;;  %v517_v57 = vld [vmem:[%s10013_s21 + $0x6b8] sm:$0xff]  ;;  %v438_v6 = vld [vmem:[%s10013_s21 + $0x440] sm:$0xff] }
  0x27   : > { %3196 = vrot.lane.b32.xlu1 %v2740_v18, %s16045_s22  ;;  %3160 = vrot.lane.b32.xlu0 %v2694_v19, %s16272_s23  ;;  %16309 = vst [vmem:[#allocation10_spill] sm:$0xff] %v10050_v31  ;;  %v10064_v39 = vsel %vm2565_vm0, %v2796_v32, %v2797_v28  ;;  %v2869_v42 = vrot.slane %v513_v36, 6  ;;  %v776_v46 = vrot.slane %v516_v43, 2  ;;  %v2871_v47 = vrot.slane %v514_v33, 6  ;;  %v437_v5 = vld [vmem:[%s10013_s21 + $0x438] sm:$0xff]  ;;  %v435_v7 = vld [vmem:[%s10013_s21 + $0x428] sm:$0xff] }
  0x28   : > { %v10072_v44 = vsel %vm712_vm1, %v773_v38, %v774_v40  ;;  %v2695_v50 = vrot.slane %v10078_v48, 2  ;;  %v2696_v51 = vrot.slane %v356_v49, 2  ;;  %v2940_v54 = vrot.slane %v515_v34, 6  ;;  %v436_v8 = vld [vmem:[%s10013_s21 + $0x430] sm:$0xff]  ;;  %v439_v15 = vld [vmem:[%s10013_s21 + $0x448] sm:$0xff]  ;;  %v521_v28 = vld [vmem:[%s10013_s21 + $0x6d8] sm:$0xff] }
  0x29   : > { %16310 = vst [vmem:[#allocation11_spill] sm:$0xff] %v10072_v44  ;;  %v10075_v45 = vsel %vm2565_vm0, %v2868_v41, %v2869_v42  ;;  %v10087_v52 = vsel %vm712_vm1, %v774_v40, %v776_v46  ;;  %v10090_v53 = vsel %vm2565_vm0, %v2869_v42, %v2871_v47  ;;  %v2941_v55 = vrot.slane %v516_v43, 6  ;;  %v440_v20 = vld [vmem:[%s10013_s21 + $0x450] sm:$0xff]  ;;  %v522_v29 = vld [vmem:[%s10013_s21 + $0x6e0] sm:$0xff]  ;;  %v519_v32 = vld [vmem:[%s10013_s21 + $0x6c8] sm:$0xff]  ;;  %s9843_s29 = sshll.u32 %s9913_s19, 4  ;;  %s9844_s29 = int_to_ptr.vmem [resolvable:$false] %s9843_s29 }
  0x2a   : > { %16311 = vst [vmem:[#allocation12_spill] sm:$0xff] %v10087_v52  ;;  %v2697_v58 = vsel %vm712_vm1, %v2695_v50, %v2696_v51  ;;  %v2698_v60 = vrot.slane %v357_v56, 2  ;;  %v2943_v61 = vrot.slane %v517_v57, 6  ;;  %v2742_v63 = vrot.slane %v357_v56, 6  ;;  %v520_v33 = vld [vmem:[%s10013_s21 + $0x6d0] sm:$0xff]  ;;  %v523_v42 = vld [vmem:[%s10013_s21 + $0x6e8] sm:$0xff] }
  0x2b   : > { %1410 = vrot.lane.b32.xlu1 %v10036_v23, %s16043_s24  ;;  %3290 = vrot.lane.b32.xlu0 %v10039_v24, %s16041_s25  ;;  %v10100_v59 = vsel %vm2565_vm0, %v2940_v54, %v2941_v55  ;;  %v2744_v3 = vrot.slane %v358_v62, 6  ;;  %v2741_v4 = vrot.slane %v356_v49, 6  ;;  %v718_v9 = vrot.slane %v437_v5, 2  ;;  %v8471_v43 = vld [vmem:[%s16033_s1 + $0x28] sm:$0xff]  ;;  %v8472_v46 = vld [vmem:[%s16033_s1 + $0x30] sm:$0xff]  ;;  %s9845_s20 = scalar_lea.vmem %s9844_s29, 16384 }
  0x2c   : > { %v2699_v0 = vsel %vm712_vm1, %v2696_v51, %v2698_v60  ;;  %v10108_v1 = vsel %vm2565_vm0, %v2941_v55, %v2943_v61  ;;  %v719_v10 = vrot.slane %v438_v6, 2  ;;  %v2631_v13 = vrot.slane %v435_v7, 6  ;;  %v8473_v47 = vld [vmem:[%s16033_s1 + $0x38] sm:$0xff]  ;;  %v8474_v49 = vld [vmem:[%s16033_s1 + $0x40] sm:$0xff]  ;;  %v10177_v56 = vld [vmem:[%s10013_s21 + $0x1d0] sm:$0xff] }
  0x2d   : > { %v2745_v11 = vsel %vm2565_vm0, %v2742_v63, %v2744_v3  ;;  %v2743_v12 = vsel %vm2565_vm0, %v2741_v4, %v2742_v63  ;;  %v2632_v14 = vrot.slane %v436_v8, 6  ;;  %v721_v18 = vrot.slane %v439_v15, 2  ;;  %v363_v57 = vld [vmem:[%s10013_s21 + $0x1d8] sm:$0xff]  ;;  %v8475_v7 = vld [vmem:[%s16033_s1 + $0x48] sm:$0xf]  ;;  %v484_v24 = vld [vmem:[%s10013_s21 + $0x5b0] sm:$0xff] }
  0x2e   : > { %v10123_v16 = vsel %vm712_vm1, %v718_v9, %v719_v10  ;;  %v2634_v19 = vrot.slane %v437_v5, 6  ;;  %v2802_v21 = vrot.slane %v439_v15, 6  ;;  %v2804_v22 = vrot.slane %v440_v20, 6  ;;  %v364_v5 = vld [vmem:[%s10013_s21 + $0x1e0] sm:$0xff]  ;;  %v444_v20 = vld [vmem:[%s10013_s21 + $0x470] sm:$0xff] }
  0x2f   : > { %1412 = vrot.lane.b32.xlu1 %v10047_v30, %s16043_s24  ;;  %3292 = vrot.lane.b32.xlu0 %v10050_v31, %s16041_s25  ;;  %16312 = vst [vmem:[#allocation13_spill] sm:$0xff] %v10123_v16  ;;  %v10126_v17 = vsel %vm2565_vm0, %v2631_v13, %v2632_v14  ;;  %v2801_v25 = vrot.slane %v438_v6, 6  ;;  %v10134_v26 = vsel %vm712_vm1, %v719_v10, %v721_v18  ;;  %v778_v36 = vrot.slane %v521_v28, 2  ;;  %v524_v6 = vld [vmem:[%s10013_s21 + $0x6f0] sm:$0xff] }
  0x30   : > { %16313 = vst [vmem:[#allocation14_spill] sm:$0xff] %v10126_v17  ;;  %16314 = vst [vmem:[#allocation15_spill] sm:$0xff] %v10134_v26  ;;  %v10137_v27 = vsel %vm2565_vm0, %v2632_v14, %v2634_v19  ;;  %v10148_v34 = vsel %vm2565_vm0, %v2802_v21, %v2804_v22  ;;  %v779_v38 = vrot.slane %v522_v29, 2  ;;  %v2873_v40 = vrot.slane %v519_v32, 6  ;;  %v442_v22 = vld [vmem:[%s10013_s21 + $0x460] sm:$0xff] }
  0x31   : > { %16315 = vst [vmem:[#allocation16_spill] sm:$0xff] %v10137_v27  ;;  %v10151_v35 = vsel %vm2565_vm0, %v2801_v25, %v2802_v21  ;;  %v2874_v41 = vrot.slane %v520_v33, 6  ;;  %v781_v50 = vrot.slane %v523_v42, 2  ;;  %v2876_v55 = vrot.slane %v521_v28, 6  ;;  %v445_v21 = vld [vmem:[%s10013_s21 + $0x478] sm:$0xff]  ;;  %v443_v25 = vld [vmem:[%s10013_s21 + $0x468] sm:$0xff] }
  0x32   : > { %v10171_v51 = vsel %vm712_vm1, %v778_v36, %v779_v38  ;;  %v9171_v60 = vpack.c.bf16 %v8474_v49, %v8473_v47  ;;  %v2700_v61 = vrot.slane %v10177_v56, 2  ;;  %v2701_v62 = vrot.slane %v363_v57, 2  ;;  %v447_v47 = vld [vmem:[%s10013_s21 + $0x488] sm:$0xff] }
  0x33   : > { %3388 = vrot.lane.b32.xlu1 %v10061_v37, %s16274_s26  ;;  %3386 = vrot.lane.b32.xlu0 %v10064_v39, %s16274_s26  ;;  %16316 = vst [vmem:[#allocation17_spill] sm:$0xff] %v10171_v51  ;;  %v10174_v54 = vsel %vm2565_vm0, %v2873_v40, %v2874_v41  ;;  %v10186_v63 = vsel %vm712_vm1, %v779_v38, %v781_v50  ;;  %v2945_v3 = vrot.slane %v522_v29, 6  ;;  %v2946_v4 = vrot.slane %v523_v42, 6  ;;  %v446_v40 = vld [vmem:[%s10013_s21 + $0x480] sm:$0xff] }
  0x34   : > { %16317 = vst [vmem:[#allocation18_spill] sm:$0xff] %v10186_v63  ;;  %v2702_v8 = vsel %vm712_vm1, %v2700_v61, %v2701_v62  ;;  %v2703_v10 = vrot.slane %v364_v5, 2  ;;  %v2747_v13 = vrot.slane %v364_v5, 6  ;;  %v2746_v19 = vrot.slane %v363_v57, 6  ;;  %v529_v61 = vld [vmem:[%s10013_s21 + $0x718] sm:$0xff] }
  0x35   : > { %v10202_v9 = vsel %vm2565_vm0, %v2945_v3, %v2946_v4  ;;  %v723_v28 = vrot.slane %v444_v20, 2  ;;  %v724_v29 = vrot.slane %v445_v21, 2  ;;  %v2636_v36 = vrot.slane %v442_v22, 6  ;;  %v527_v3 = vld [vmem:[%s10013_s21 + $0x708] sm:$0xff] }
  0x36   : > { %v2704_v14 = vsel %vm712_vm1, %v2701_v62, %v2703_v10  ;;  %v2748_v33 = vsel %vm2565_vm0, %v2746_v19, %v2747_v13  ;;  %v2637_v38 = vrot.slane %v443_v25, 6  ;;  %v2807_v49 = vrot.slane %v446_v40, 6  ;;  %v526_v62 = vld [vmem:[%s10013_s21 + $0x700] sm:$0xff]  ;;  %v10269_v19 = vld [vmem:[%s10013_s21 + $0x208] sm:$0xff] }
  0x37   : > { %1722 = vrot.lane.b32.xlu1 %v10072_v44, %s16276_s10  ;;  %3482 = vrot.lane.b32.xlu0 %v10075_v45, %s16278_s12  ;;  %v2809_v50 = vrot.slane %v447_v47, 6  ;;  %v2879_v10 = vrot.slane %v527_v3, 6  ;;  %v2705_v22 = vrot.slane %v10269_v19, 2  ;;  %v372_v47 = vld [vmem:[%s10013_s21 + $0x220] sm:$0xff]  ;;  %v452_v3 = vld [vmem:[%s10013_s21 + $0x4b0] sm:$0xff] }
  0x38   : > { %v10230_v42 = vsel %vm2565_vm0, %v2636_v36, %v2637_v38  ;;  %v531_v36 = vld [vmem:[%s10013_s21 + $0x728] sm:$0xff] }
  0x39   : > { %16321 = vst [vmem:[#allocation20_spill] sm:$0xff] %v10230_v42 }
  0x3b   : > { %1724 = vrot.lane.b32.xlu1 %v10087_v52, %s16276_s10  ;;  %3484 = vrot.lane.b32.xlu0 %v10090_v53, %s16278_s12 }
  0x3f   : > { %3162 = vrot.lane.b32.xlu1 %v2697_v58, %s16272_s23  ;;  %3614 = vrot.lane.b32.xlu0 %v10100_v59, %s16047_s13  ;;  %v9167_v58 = vpack.c.bf16 %v8472_v46, %v8471_v43  ;;  %v726_v43 = vrot.slane %v446_v40, 2  ;;  %v2639_v46 = vrot.slane %v444_v20, 6  ;;  %v370_v20 = vld [vmem:[%s10013_s21 + $0x210] sm:$0xff] }
  0x41   : > { %9168 = vmatprep.subr.bf16.mxu1 %v9167_v58  ;;  %v10241_v57 = vsel %vm2565_vm0, %v2637_v38, %v2639_v46  ;;  %v2953_v46 = vrot.slane %v531_v36, 6  ;;  %v454_v36 = vld [vmem:[%s10013_s21 + $0x4c0] sm:$0xff] }
  0x42   : > { %9170 = vmatpush3.bf16.msra.mxu1 %v9167_v58  ;;  %16325 = vst [vmem:[#allocation22_spill] sm:$0xff] %v10241_v57  ;;  %v2806_v58 = vrot.slane %v445_v21, 6 }
  0x43   : > { %3164 = vrot.lane.b32.xlu1 %v2699_v0, %s16272_s23  ;;  %3616 = vrot.lane.b32.xlu0 %v10108_v1, %s16047_s13  ;;  %v10189_v0 = vsel %vm2565_vm0, %v2874_v41, %v2876_v55  ;;  %s16319_s13 = smov 8   ;;  %v10227_v41 = vsel %vm712_vm1, %v723_v28, %v724_v29  ;;  %v10238_v55 = vsel %vm712_vm1, %v724_v29, %v726_v43  ;;  %v2706_v28 = vrot.slane %v370_v20, 2 }
  0x44   : > { %9172 = vmatprep.subr.bf16.mxu1 %v9171_v60  ;;  %16320 = vst [vmem:[#allocation19_spill] sm:$0xff] %v10227_v41  ;;  %16324 = vst [vmem:[#allocation21_spill] sm:$0xff] %v10238_v55  ;;  %v2950_v29 = vrot.slane %v529_v61, 6 }
  0x45   : > { %v2707_v38 = vsel %vm712_vm1, %v2705_v22, %v2706_v28 }
  0x46   : > { %9174 = vmatpush3.bf16.msra.mxu1 %v9171_v60  ;;  %v528_v60 = vld [vmem:[%s10013_s21 + $0x710] sm:$0xff] }
  0x47   : > { %3200 = vrot.lane.b32.xlu1 %v2745_v11, %s16045_s22  ;;  %3198 = vrot.lane.b32.xlu0 %v2743_v12, %s16045_s22  ;;  %v2948_v11 = vrot.slane %v524_v6, 6  ;;  %v365_v12 = vld [vmem:[%s10013_s21 + $0x1e8] sm:$0xff]  ;;  %v783_v5 = vrot.slane %v528_v60, 2  ;;  %v10255_v6 = vsel %vm2565_vm0, %v2806_v58, %v2807_v49  ;;  %s16528_s22 = smov 24  }
  0x48   : > { %8996 = vmatprep.subr.msk.mxu1 %vm853_vm2, %v8475_v7  ;;  %v2749_v18 = vrot.slane %v365_v12, 6  ;;  %16327 = vst [vmem:[#allocation24_spill] sm:$0xff] %v10255_v6 }
  0x49   : > { %v10211_v15 = vsel %vm2565_vm0, %v2946_v4, %v2948_v11  ;;  %v10252_v4 = vsel %vm2565_vm0, %v2807_v49, %v2809_v50  ;;  %v530_v11 = vld [vmem:[%s10013_s21 + $0x720] sm:$0xff] }
  0x4a   : > { %8997 = vmatpush3.msk.msra.mxu1 %vm853_vm2, %v8475_v7  ;;  %v2750_v32 = vsel %vm2565_vm0, %v2747_v13, %v2749_v18  ;;  %16326 = vst [vmem:[#allocation23_spill] sm:$0xff] %v10252_v4  ;;  %v784_v7 = vrot.slane %v529_v61, 2  ;;  %v786_v12 = vrot.slane %v530_v11, 2  ;;  %v2881_v18 = vrot.slane %v528_v60, 6 }
  0x4b   : > { %1414 = vrot.lane.b32.xlu1 %v10123_v16, %s16043_s24  ;;  %3294 = vrot.lane.b32.xlu0 %v10126_v17, %s16041_s25  ;;  %v2754_v60 = vrot.slane %v372_v47, 6  ;;  %v2751_v61 = vrot.slane %v370_v20, 6  ;;  %v453_v20 = vld [vmem:[%s10013_s21 + $0x4b8] sm:$0xff] }
  0x4c   : > { %v10263_v13 = vsel %vm712_vm1, %v783_v5, %v784_v7  ;;  %v10277_v21 = vsel %vm712_vm1, %v784_v7, %v786_v12  ;;  %v10281_v25 = vsel %vm2565_vm0, %v2879_v10, %v2881_v18  ;;  %v449_v5 = vld [vmem:[%s10013_s21 + $0x498] sm:$0xff]  ;;  %v450_v7 = vld [vmem:[%s10013_s21 + $0x4a0] sm:$0xff] }
  0x4d   : > { %16328 = vst [vmem:[#allocation25_spill] sm:$0xff] %v10263_v13  ;;  %16330 = vst [vmem:[#allocation27_spill] sm:$0xff] %v10277_v21  ;;  %v2641_v18 = vrot.slane %v449_v5, 6  ;;  %v2642_v22 = vrot.slane %v450_v7, 6 }
  0x4e   : > { %16331 = vst [vmem:[#allocation28_spill] sm:$0xff] %v10281_v25 }
  0x4f   : > { %1416 = vrot.lane.b32.xlu1 %v10134_v26, %s16043_s24  ;;  %3296 = vrot.lane.b32.xlu0 %v10137_v27, %s16041_s25  ;;  %s16318_s25 = smov 32   ;;  %v346_v27 = vld [vmem:[%s10013_s21 + $0x150] sm:$0xff] }
  0x53   : > { %3392 = vrot.lane.b32.xlu1 %v10148_v34, %s16274_s26  ;;  %3390 = vrot.lane.b32.xlu0 %v10151_v35, %s16274_s26 }
  0x57   : > { %1726 = vrot.lane.b32.xlu1 %v10171_v51, %s16276_s10  ;;  %3486 = vrot.lane.b32.xlu0 %v10174_v54, %s16278_s12 }
  0x5b   : > { %1728 = vrot.lane.b32.xlu1 %v10186_v63, %s16276_s10  ;;  %3488 = vrot.lane.b32.xlu0 %v10189_v0, %s16278_s12 }
  0x5f   : > { %3166 = vrot.lane.b32.xlu1 %v2702_v8, %s16272_s23  ;;  %3618 = vrot.lane.b32.xlu0 %v10202_v9, %s16318_s25  ;;  %v2878_v8 = vrot.slane %v526_v62, 6  ;;  %v451_v62 = vld [vmem:[%s10013_s21 + $0x4a8] sm:$0xff] }
  0x63   : > { %3168 = vrot.lane.b32.xlu1 %v2704_v14, %s16272_s23  ;;  %3620 = vrot.lane.b32.xlu0 %v10211_v15, %s16318_s25  ;;  %v10266_v14 = vsel %vm2565_vm0, %v2878_v8, %v2879_v10  ;;  %v728_v8 = vrot.slane %v451_v62, 2  ;;  %v729_v10 = vrot.slane %v452_v3, 2 }
  0x64   : > { %16329 = vst [vmem:[#allocation26_spill] sm:$0xff] %v10266_v14 }
  0x67   : > { %3204 = vrot.lane.b32.xlu1 %v2750_v32, %s16319_s13  ;;  %3202 = vrot.lane.b32.xlu0 %v2748_v33, %s16319_s13  ;;  %v2951_v32 = vrot.slane %v530_v11, 6  ;;  %v371_v33 = vld [vmem:[%s10013_s21 + $0x218] sm:$0xff] }
  0x68   : > { %v2708_v43 = vrot.slane %v371_v33, 2  ;;  %v2752_v49 = vrot.slane %v371_v33, 6  ;;  %v2644_v33 = vrot.slane %v451_v62, 6  ;;  %v534_v62 = vld [vmem:[%s10013_s21 + $0x740] sm:$0xff] }
  0x69   : > { %v10291_v40 = vsel %vm2565_vm0, %v2950_v29, %v2951_v32  ;;  %v10299_v58 = vsel %vm2565_vm0, %v2951_v32, %v2953_v46  ;;  %v10317_v29 = vsel %vm2565_vm0, %v2641_v18, %v2642_v22  ;;  %v731_v32 = vrot.slane %v453_v20, 2 }
  0x6a   : > { %16332 = vst [vmem:[#allocation29_spill] sm:$0xff] %v10291_v40  ;;  %v2709_v50 = vsel %vm712_vm1, %v2706_v28, %v2708_v43  ;;  %16333 = vst [vmem:[#allocation30_spill] sm:$0xff] %v10299_v58  ;;  %v2755_v11 = vsel %vm2565_vm0, %v2752_v49, %v2754_v60  ;;  %v2753_v12 = vsel %vm2565_vm0, %v2751_v61, %v2752_v49  ;;  %v2814_v43 = vrot.slane %v454_v36, 6  ;;  %v536_v60 = vld [vmem:[%s10013_s21 + $0x750] sm:$0xff]  ;;  %v533_v61 = vld [vmem:[%s10013_s21 + $0x738] sm:$0xff] }
  0x6b   : > { %1418 = vrot.lane.b32.xlu1 %v10227_v41, %s16322_s17  ;;  %3298 = vrot.lane.b32.xlu0 %v10230_v42, %s16323_s18  ;;  %v10314_v28 = vsel %vm712_vm1, %v728_v8, %v729_v10  ;;  %16335 = vst [vmem:[#allocation32_spill] sm:$0xff] %v10317_v29  ;;  %v2811_v46 = vrot.slane %v452_v3, 6  ;;  %v10325_v47 = vsel %vm712_vm1, %v729_v10, %v731_v32  ;;  %v789_v8 = vrot.slane %v536_v60, 2  ;;  %v538_v42 = vld [vmem:[%s10013_s21 + $0x760] sm:$0xff] }
  0x6c   : > { %16334 = vst [vmem:[#allocation31_spill] sm:$0xff] %v10314_v28  ;;  %16336 = vst [vmem:[#allocation33_spill] sm:$0xff] %v10325_v47  ;;  %v10328_v49 = vsel %vm2565_vm0, %v2642_v22, %v2644_v33  ;;  %v2883_v10 = vrot.slane %v533_v61, 6  ;;  %v10356_v33 = vld [vmem:[%s10013_s21 + $0x240] sm:$0xff] }
  0x6d   : > { %16337 = vst [vmem:[#allocation34_spill] sm:$0xff] %v10328_v49  ;;  %v498_v41 = vld [vmem:[%s10013_s21 + $0x620] sm:$0xff] }
  0x6f   : > { %1420 = vrot.lane.b32.xlu1 %v10238_v55, %s16322_s17  ;;  %3300 = vrot.lane.b32.xlu0 %v10241_v57, %s16323_s18  ;;  %v378_v57 = vld [vmem:[%s10013_s21 + $0x250] sm:$0xff]  ;;  %v495_v55 = vld [vmem:[%s10013_s21 + $0x608] sm:$0xff] }
  0x73   : > { %3396 = vrot.lane.b32.xlu1 %v10252_v4, %s16274_s26  ;;  %3394 = vrot.lane.b32.xlu0 %v10255_v6, %s16274_s26  ;;  %v481_v4 = vld [vmem:[%s10013_s21 + $0x598] sm:$0xff]  ;;  %v491_v6 = vld [vmem:[%s10013_s21 + $0x5e8] sm:$0xff] }
  0x77   : > { %1730 = vrot.lane.b32.xlu1 %v10263_v13, %s16276_s10  ;;  %3490 = vrot.lane.b32.xlu0 %v10266_v14, %s16278_s12  ;;  %v477_v14 = vld [vmem:[%s10013_s21 + $0x578] sm:$0xff] }
  0x7b   : > { %1732 = vrot.lane.b32.xlu1 %v10277_v21, %s16276_s10  ;;  %3492 = vrot.lane.b32.xlu0 %v10281_v25, %s16278_s12  ;;  %v463_v25 = vld [vmem:[%s10013_s21 + $0x508] sm:$0xff] }
  0x7f   : > { %3170 = vrot.lane.b32.xlu1 %v2707_v38, %s16272_s23  ;;  %3622 = vrot.lane.b32.xlu0 %v10291_v40, %s16318_s25  ;;  %v2812_v38 = vrot.slane %v453_v20, 6  ;;  %v460_v40 = vld [vmem:[%s10013_s21 + $0x4f0] sm:$0xff] }
  0x81   : > { %v10339_v5 = vsel %vm2565_vm0, %v2812_v38, %v2814_v43  ;;  %v10342_v3 = vsel %vm2565_vm0, %v2811_v46, %v2812_v38  ;;  %v377_v43 = vld [vmem:[%s10013_s21 + $0x248] sm:$0xff] }
  0x82   : > { %16338 = vst [vmem:[#allocation35_spill] sm:$0xff] %v10339_v5  ;;  %16339 = vst [vmem:[#allocation36_spill] sm:$0xff] %v10342_v3  ;;  %v2756_v17 = vrot.slane %v377_v43, 6 }
  0x83   : > { %3172 = vrot.lane.b32.xlu1 %v2709_v50, %s16272_s23  ;;  %3624 = vrot.lane.b32.xlu0 %v10299_v58, %s16318_s25  ;;  %v535_v50 = vld [vmem:[%s10013_s21 + $0x748] sm:$0xff] }
  0x84   : > { %v788_v7 = vrot.slane %v535_v50, 2  ;;  %v2886_v32 = vrot.slane %v535_v50, 6  ;;  %v2710_v50 = vrot.slane %v10356_v33, 2 }
  0x86   : > { %v10350_v22 = vsel %vm712_vm1, %v788_v7, %v789_v8  ;;  %v2955_v7 = vrot.slane %v536_v60, 6 }
  0x87   : > { %3208 = vrot.lane.b32.xlu1 %v2755_v11, %s16319_s13  ;;  %3206 = vrot.lane.b32.xlu0 %v2753_v12, %s16319_s13  ;;  %v2884_v11 = vrot.slane %v534_v62, 6  ;;  %v537_v12 = vld [vmem:[%s10013_s21 + $0x758] sm:$0xff]  ;;  %16340 = vst [vmem:[#allocation37_spill] sm:$0xff] %v10350_v22  ;;  %v2711_v62 = vrot.slane %v377_v43, 2 }
  0x88   : > { %v791_v18 = vrot.slane %v537_v12, 2 }
  0x89   : > { %v10353_v20 = vsel %vm2565_vm0, %v2883_v10, %v2884_v11  ;;  %v10372_v61 = vsel %vm2565_vm0, %v2884_v11, %v2886_v32  ;;  %v2956_v10 = vrot.slane %v537_v12, 6  ;;  %v2713_v11 = vrot.slane %v378_v57, 2 }
  0x8a   : > { %16341 = vst [vmem:[#allocation38_spill] sm:$0xff] %v10353_v20  ;;  %v10368_v46 = vsel %vm712_vm1, %v789_v8, %v791_v18  ;;  %16344 = vst [vmem:[#allocation41_spill] sm:$0xff] %v10372_v61  ;;  %v2712_v8 = vsel %vm712_vm1, %v2710_v50, %v2711_v62  ;;  %v2958_v12 = vrot.slane %v538_v42, 6  ;;  %v2757_v50 = vrot.slane %v378_v57, 6 }
  0x8b   : > { %1422 = vrot.lane.b32.xlu1 %v10314_v28, %s16322_s17  ;;  %3302 = vrot.lane.b32.xlu0 %v10317_v29, %s16323_s18  ;;  %16343 = vst [vmem:[#allocation40_spill] sm:$0xff] %v10368_v46  ;;  %v10388_v60 = vsel %vm2565_vm0, %v2955_v7, %v2956_v10  ;;  %v2714_v7 = vsel %vm712_vm1, %v2711_v62, %v2713_v11 }
  0x8c   : > { %16346 = vst [vmem:[#allocation43_spill] sm:$0xff] %v10388_v60 }
  0x8f   : > { %1424 = vrot.lane.b32.xlu1 %v10325_v47, %s16322_s17  ;;  %3304 = vrot.lane.b32.xlu0 %v10328_v49, %s16323_s18  ;;  %v459_v47 = vld [vmem:[%s10013_s21 + $0x4e8] sm:$0xff] }
  0x90   : > { %v734_v43 = vrot.slane %v459_v47, 2 }
  0x93   : > { %3400 = vrot.lane.b32.xlu1 %v10339_v5, %s16274_s26  ;;  %3398 = vrot.lane.b32.xlu0 %v10342_v3, %s16274_s26  ;;  %v379_v5 = vld [vmem:[%s10013_s21 + $0x258] sm:$0xff]  ;;  %v458_v3 = vld [vmem:[%s10013_s21 + $0x4e0] sm:$0xff] }
  0x94   : > { %v2759_v42 = vrot.slane %v379_v5, 6  ;;  %v733_v5 = vrot.slane %v458_v3, 2 }
  0x95   : > { %v10358_v36 = vpop.permute.xlu1 %3194  ;;  %v10360_v38 = vpop.permute.xlu0 %3158 }
  0x96   : > { %16342 = vst [vmem:[#allocation39_spill] sm:$0xff] %v10360_v38  ;;  %v2760_v62 = vsel %vm2565_vm0, %v2757_v50, %v2759_v42  ;;  %v10420_v42 = vsel %vm712_vm1, %v733_v5, %v734_v43  ;;  %v2900_v5 = vrot.slane %v459_v47, 6  ;;  %v543_v47 = vld [vmem:[%s10013_s21 + $0x788] sm:$0xff] }
  0x97   : > { %1734 = vrot.lane.b32.xlu1 %v10350_v22, %s16276_s10  ;;  %3494 = vrot.lane.b32.xlu0 %v10353_v20, %s16278_s12  ;;  %v347_v22 = vld [vmem:[%s10013_s21 + $0x158] sm:$0xff]  ;;  %v2566_v20 = vrot.slane %v346_v27, 6  ;;  %v456_v27 = vld [vmem:[%s10013_s21 + $0x4d0] sm:$0xff]  ;;  %16350 = vst [vmem:[#allocation47_spill] sm:$0xff] %v10420_v42 }
  0x98   : > { %v2828_v11 = vrot.slane %v456_v27, 6  ;;  %v736_v27 = vrot.slane %v460_v40, 2 }
  0x99   : > { %v10374_v49 = vpop.permute.xlu1 %3196  ;;  %v10376_v29 = vpop.permute.xlu0 %3160 }
  0x9a   : > { %16345 = vst [vmem:[#allocation42_spill] sm:$0xff] %v10376_v29 }
  0x9b   : > { %1736 = vrot.lane.b32.xlu1 %v10368_v46, %s16276_s10  ;;  %3496 = vrot.lane.b32.xlu0 %v10372_v61, %s16278_s12  ;;  %v2567_v46 = vrot.slane %v347_v22, 6  ;;  %v10398_v61 = vsel %vm2565_vm0, %v2956_v10, %v2958_v12  ;;  %v457_v22 = vld [vmem:[%s10013_s21 + $0x4d8] sm:$0xff]  ;;  %v2758_v10 = vsel %vm2565_vm0, %v2756_v17, %v2757_v50 }
  0x9c   : > { %16348 = vst [vmem:[#allocation45_spill] sm:$0xff] %v10398_v61  ;;  %v2829_v12 = vrot.slane %v457_v22, 6  ;;  %v2831_v22 = vrot.slane %v458_v3, 6  ;;  %v2901_v3 = vrot.slane %v460_v40, 6 }
  0x9d   : > { %v10390_v18 = vpop.permute.xlu1 %1410  ;;  %v3291_v32 = vpop.permute.xlu0 %3290  ;;  %v2568_v57 = vsel %vm2565_vm0, %v2566_v20, %v2567_v46 }
  0x9e   : > { %16347 = vst [vmem:[#allocation44_spill] sm:$0xff] %v10390_v18  ;;  %v2830_v50 = vsel %vm2565_vm0, %v2828_v11, %v2829_v12  ;;  %v10439_v11 = vsel %vm712_vm1, %v734_v43, %v736_v27 }
  0x9f   : > { %3174 = vrot.lane.b32.xlu1 %v2712_v8, %s16272_s23  ;;  %3626 = vrot.lane.b32.xlu0 %v10388_v60, %s16318_s25  ;;  %v2569_v8 = vrot.slane %v10018_v2, 6  ;;  %v3710_v2 = vsel %vm1890_vm3, %v2568_v57, %v10360_v38  ;;  %v461_v57 = vld [vmem:[%s10013_s21 + $0x4f8] sm:$0xff]  ;;  %16352 = vst [vmem:[#allocation49_spill] sm:$0xff] %v10439_v11 }
  0xa0   : > { %v3742_v17 = vsel %vm1923_vm4, %v3710_v2, %v10358_v36  ;;  %v2903_v36 = vrot.slane %v461_v57, 6  ;;  %v2832_v2 = vsel %vm2565_vm0, %v2829_v12, %v2831_v22  ;;  %v540_v57 = vld [vmem:[%s10013_s21 + $0x770] sm:$0xff] }
  0xa1   : > { %v10402_v28 = vpop.permute.xlu1 %1412  ;;  %v3293_v58 = vpop.permute.xlu0 %3292  ;;  %v2984_v27 = vrot.slane %v540_v57, 6  ;;  %v384_v57 = vld [vmem:[%s10013_s21 + $0x280] sm:$0xff] }
  0xa2   : > { %16349 = vst [vmem:[#allocation46_spill] sm:$0xff] %v10402_v28 }
  0xa3   : > { %3176 = vrot.lane.b32.xlu1 %v2714_v7, %s16272_s23  ;;  %3628 = vrot.lane.b32.xlu0 %v10398_v61, %s16318_s25  ;;  %v2570_v7 = vsel %vm2565_vm0, %v2567_v46, %v2569_v8  ;;  %v3774_v46 = vsel %vm1956_vm5, %v3742_v17, %v3291_v32 }
  0xa4   : > { %v3711_v38 = vsel %vm1890_vm3, %v2570_v7, %v10376_v29  ;;  %v542_v7 = vld [vmem:[%s10013_s21 + $0x780] sm:$0xff] }
  0xa5   : > { %v3389_v60 = vpop.permute.xlu1 %3388  ;;  %v3387_v20 = vpop.permute.xlu0 %3386  ;;  %v3743_v32 = vsel %vm1923_vm4, %v3711_v38, %v10374_v49  ;;  %v2904_v38 = vsel %vm2565_vm0, %v2901_v3, %v2903_v36  ;;  %v1092_v43 = vrot.slane %v542_v7, 2 }
  0xa6   : > { %v3775_v17 = vsel %vm1956_vm5, %v3743_v32, %v3293_v58  ;;  %v2902_v58 = vsel %vm2565_vm0, %v2900_v5, %v2901_v3  ;;  %v544_v3 = vld [vmem:[%s10013_s21 + $0x790] sm:$0xff] }
  0xa7   : > { %3212 = vrot.lane.b32.xlu1 %v2760_v62, %s16319_s13  ;;  %3210 = vrot.lane.b32.xlu0 %v2758_v10, %s16319_s13  ;;  %v3806_v10 = vsel %vm1989_vm6, %v3774_v46, %v10390_v18  ;;  %v3807_v12 = vsel %vm1989_vm6, %v3775_v17, %v10402_v28  ;;  %v10472_v17 = vld [vmem:[%s10013_s21 + $0x278] sm:$0xff]  ;;  %v502_v28 = vld [vmem:[%s10013_s21 + $0x640] sm:$0xff] }
  0xa8   : > { %v3838_v29 = vsel %vm2022_vm7, %v3806_v10, %v3387_v20  ;;  %v1093_v20 = vrot.slane %v543_v47, 2  ;;  %v1095_v10 = vrot.slane %v544_v3, 2 }
  0xa9   : > { %v10429_v8 = vpop.permute.xlu1 %1722  ;;  %v3483_v62 = vpop.permute.xlu0 %3482 }
  0xaa   : > { %16351 = vst [vmem:[#allocation48_spill] sm:$0xff] %v10429_v8  ;;  %v3870_v49 = vsel %vm2055_vm8, %v3838_v29, %v3483_v62  ;;  %v3839_v29 = vsel %vm2022_vm7, %v3807_v12, %v3389_v60  ;;  %v1094_v60 = vsel %vm712_vm1, %v1092_v43, %v1093_v20  ;;  %v2716_v43 = vrot.slane %v384_v57, 2 }
  0xab   : > { %1426 = vrot.lane.b32.xlu1 %v10420_v42, %s16322_s17  ;;  %3306 = vrot.lane.b32.xlu0 %v2830_v50, %s16323_s18  ;;  %v541_v42 = vld [vmem:[%s10013_s21 + $0x778] sm:$0xff]  ;;  %v3902_v36 = vsel %vm2088_vm9, %v3870_v49, %v10429_v8  ;;  %v1096_v12 = vsel %vm712_vm1, %v1093_v20, %v1095_v10  ;;  %v2761_v8 = vrot.slane %v384_v57, 6 }
  0xac   : > { %v2985_v22 = vrot.slane %v541_v42, 6 }
  0xad   : > { %v10445_v50 = vpop.permute.xlu1 %1724  ;;  %v3485_v40 = vpop.permute.xlu0 %3484 }
  0xae   : > { %16353 = vst [vmem:[#allocation50_spill] sm:$0xff] %v10445_v50  ;;  %v3871_v5 = vsel %vm2055_vm8, %v3839_v29, %v3485_v40  ;;  %v2986_v42 = vsel %vm2565_vm0, %v2984_v27, %v2985_v22  ;;  %v3098_v29 = vrot.slane %v543_v47, 6 }
  0xaf   : > { %1428 = vrot.lane.b32.xlu1 %v10439_v11, %s16322_s17  ;;  %3308 = vrot.lane.b32.xlu0 %v2832_v2, %s16323_s18  ;;  %v2987_v2 = vrot.slane %v542_v7, 6  ;;  %v2715_v7 = vrot.slane %v10472_v17, 2  ;;  %v466_v11 = vld [vmem:[%s10013_s21 + $0x520] sm:$0xff] }
  0xb1   : > { %v10459_v46 = vpop.permute.xlu1 %3162  ;;  %v3615_v62 = vpop.permute.xlu0 %3614  ;;  %v2988_v27 = vsel %vm2565_vm0, %v2985_v22, %v2987_v2  ;;  %v386_v2 = vld [vmem:[%s10013_s21 + $0x290] sm:$0xff] }
  0xb2   : > { %16354 = vst [vmem:[#allocation51_spill] sm:$0xff] %v10459_v46  ;;  %v3934_v32 = vsel %vm2121_vm10, %v3902_v36, %v3615_v62  ;;  %v3099_v62 = vrot.slane %v544_v3, 6 }
  0xb3   : > { %3404 = vrot.lane.b32.xlu1 %v2904_v38, %s16274_s26  ;;  %3402 = vrot.lane.b32.xlu0 %v2902_v58, %s16274_s26  ;;  %v3903_v38 = vsel %vm2088_vm9, %v3871_v5, %v10445_v50  ;;  %v2764_v50 = vrot.slane %v386_v2, 6 }
  0xb4   : > { %8998 = vmatprep.mubr.msk.f32.mxu1 %vm2164_vm11, %v3934_v32  ;;  %v385_v32 = vld [vmem:[%s10013_s21 + $0x288] sm:$0xff]  ;;  %v3100_v20 = vsel %vm2565_vm0, %v3098_v29, %v3099_v62 }
  0xb5   : > { %v10475_v49 = vpop.permute.xlu1 %3164  ;;  %v3617_v40 = vpop.permute.xlu0 %3616  ;;  %v2718_v47 = vrot.slane %v385_v32, 2 }
  0xb6   : > { %16355 = vst [vmem:[#allocation52_spill] sm:$0xff] %v10475_v49  ;;  %v3935_v58 = vsel %vm2121_vm10, %v3903_v38, %v3617_v40  ;;  %v354_v40 = vld [vmem:[%s10013_s21 + $0x190] sm:$0xff]  ;;  %v2717_v38 = vsel %vm712_vm1, %v2715_v7, %v2716_v43 }
  0xb7   : > { %1738 = vrot.lane.b32.xlu1 %v1094_v60, %s16276_s10  ;;  %3498 = vrot.lane.b32.xlu0 %v2986_v42, %s16278_s12  ;;  %v545_v60 = vld [vmem:[%s10013_s21 + $0x798] sm:$0xff]  ;;  %v353_v42 = vld [vmem:[%s10013_s21 + $0x188] sm:$0xff]  ;;  %v2719_v7 = vsel %vm712_vm1, %v2716_v43, %v2718_v47 }
  0xb8   : > { %8999 = vmatmul.mubr.msk.f32.vlgmr.msra.gmra.mrb[0].mxu1 %vm2164_vm11, %v3935_v58  ;;  %v3101_v22 = vrot.slane %v545_v60, 6  ;;  %v2571_v58 = vrot.slane %v353_v42, 6  ;;  %v465_v60 = vld [vmem:[%s10013_s21 + $0x518] sm:$0xff]  ;;  %v464_v42 = vld [vmem:[%s10013_s21 + $0x510] sm:$0xff] }
  0xb9   : > { %v10486_v36 = vpop.permute.xlu1 %3200  ;;  %v3199_v5 = vpop.permute.xlu0 %3198  ;;  %v738_v43 = vrot.slane %v465_v60, 2  ;;  %v2834_v47 = vrot.slane %v464_v42, 6 }
  0xba   : > { %v3102_v29 = vsel %vm2565_vm0, %v3099_v62, %v3101_v22  ;;  %v739_v62 = vrot.slane %v466_v11, 2  ;;  %v467_v22 = vld [vmem:[%s10013_s21 + $0x528] sm:$0xff] }
  0xbb   : > { %1740 = vrot.lane.b32.xlu1 %v1096_v12, %s16276_s10  ;;  %3500 = vrot.lane.b32.xlu0 %v2988_v27, %s16278_s12  ;;  %v2572_v12 = vrot.slane %v354_v40, 6  ;;  %v2762_v27 = vrot.slane %v385_v32, 6  ;;  %v2574_v40 = vrot.slane %v10078_v48, 6 }
  0xbd   : > { %v10496_v3 = vpop.permute.xlu1 %1414  ;;  %v3295_v10 = vpop.permute.xlu0 %3294  ;;  %v2765_v57 = vsel %vm2565_vm0, %v2762_v27, %v2764_v50  ;;  %v2763_v32 = vsel %vm2565_vm0, %v2761_v8, %v2762_v27 }
  0xbe   : > { %16356 = vst [vmem:[#allocation53_spill] sm:$0xff] %v10496_v3 }
  0xbf   : > { %3178 = vrot.lane.b32.xlu1 %v2717_v38, %s16272_s23  ;;  %3630 = vrot.lane.b32.xlu0 %v3100_v20, %s16318_s25  ;;  %v2573_v38 = vsel %vm2565_vm0, %v2571_v58, %v2572_v12  ;;  %v2833_v20 = vrot.slane %v463_v25, 6  ;;  %v741_v58 = vrot.slane %v467_v22, 2  ;;  %v10523_v25 = vsel %vm712_vm1, %v738_v43, %v739_v62 }
  0xc0   : > { %v3712_v48 = vsel %vm1890_vm3, %v2573_v38, %v10459_v46  ;;  %16358 = vst [vmem:[#allocation55_spill] sm:$0xff] %v10523_v25 }
  0xc1   : > { %v10505_v61 = vpop.permute.xlu1 %1416  ;;  %v3297_v21 = vpop.permute.xlu0 %3296  ;;  %v3744_v50 = vsel %vm1923_vm4, %v3712_v48, %v3199_v5  ;;  %v2835_v8 = vsel %vm2565_vm0, %v2833_v20, %v2834_v47  ;;  %v10536_v5 = vsel %vm712_vm1, %v739_v62, %v741_v58  ;;  %v2905_v20 = vrot.slane %v466_v11, 6  ;;  %v548_v48 = vld [vmem:[%s10013_s21 + $0x7b8] sm:$0xff] }
  0xc2   : > { %16357 = vst [vmem:[#allocation54_spill] sm:$0xff] %v10505_v61  ;;  %v3776_v27 = vsel %vm1956_vm5, %v3744_v50, %v3295_v10  ;;  %16360 = vst [vmem:[#allocation57_spill] sm:$0xff] %v10536_v5  ;;  %v2906_v10 = vrot.slane %v467_v22, 6  ;;  %v546_v50 = vld [vmem:[%s10013_s21 + $0x7a8] sm:$0xff]  ;;  %v1097_v11 = vrot.slane %v548_v48, 2 }
  0xc3   : > { %3180 = vrot.lane.b32.xlu1 %v2719_v7, %s16272_s23  ;;  %3632 = vrot.lane.b32.xlu0 %v3102_v29, %s16318_s25  ;;  %v2836_v7 = vrot.slane %v465_v60, 6  ;;  %v2575_v29 = vsel %vm2565_vm0, %v2572_v12, %v2574_v40  ;;  %v3808_v43 = vsel %vm1989_vm6, %v3776_v27, %v10496_v3  ;;  %v488_v3 = vld [vmem:[%s10013_s21 + $0x5d0] sm:$0xff] }
  0xc4   : > { %v3713_v60 = vsel %vm1890_vm3, %v2575_v29, %v10475_v49  ;;  %v549_v29 = vld [vmem:[%s10013_s21 + $0x7c0] sm:$0xff]  ;;  %v2907_v27 = vsel %vm2565_vm0, %v2905_v20, %v2906_v10  ;;  %v2992_v20 = vrot.slane %v548_v48, 6 }
  0xc5   : > { %v3393_v2 = vpop.permute.xlu1 %3392  ;;  %v3391_v13 = vpop.permute.xlu0 %3390  ;;  %v2837_v12 = vsel %vm2565_vm0, %v2834_v47, %v2836_v7  ;;  %v3745_v40 = vsel %vm1923_vm4, %v3713_v60, %v10486_v36  ;;  %v547_v47 = vld [vmem:[%s10013_s21 + $0x7b0] sm:$0xff]  ;;  %v1098_v36 = vrot.slane %v549_v29, 2  ;;  %v2989_v7 = vrot.slane %v546_v50, 6 }
  0xc6   : > { %v3777_v49 = vsel %vm1956_vm5, %v3745_v40, %v3297_v21 }
  0xc7   : > { %3216 = vrot.lane.b32.xlu1 %v2765_v57, %s16319_s13  ;;  %3214 = vrot.lane.b32.xlu0 %v2763_v32, %s16319_s13  ;;  %v468_v57 = vld [vmem:[%s10013_s21 + $0x530] sm:$0xff]  ;;  %v3809_v21 = vsel %vm1989_vm6, %v3777_v49, %v10505_v61  ;;  %v470_v61 = vld [vmem:[%s10013_s21 + $0x540] sm:$0xff] }
  0xc8   : > { %v2908_v32 = vrot.slane %v468_v57, 6  ;;  %v2990_v57 = vrot.slane %v547_v47, 6  ;;  %v391_v47 = vld [vmem:[%s10013_s21 + $0x2b8] sm:$0xff] }
  0xc9   : > { %v10527_v42 = vpop.permute.xlu1 %1726  ;;  %v3487_v38 = vpop.permute.xlu0 %3486 }
  0xca   : > { %16359 = vst [vmem:[#allocation56_spill] sm:$0xff] %v10527_v42 }
  0xcb   : > { %1430 = vrot.lane.b32.xlu1 %v10523_v25, %s16322_s17  ;;  %3310 = vrot.lane.b32.xlu0 %v2835_v8, %s16323_s18  ;;  %v3840_v8 = vsel %vm2022_vm7, %v3808_v43, %v3391_v13  ;;  %v2909_v13 = vsel %vm2565_vm0, %v2906_v10, %v2908_v32  ;;  %v550_v43 = vld [vmem:[%s10013_s21 + $0x7c8] sm:$0xff]  ;;  %v1099_v10 = vsel %vm712_vm1, %v1097_v11, %v1098_v36  ;;  %v973_v11 = vrot.slane %v391_v47, 2 }
  0xcc   : > { %v3872_v22 = vsel %vm2055_vm8, %v3840_v8, %v3487_v38  ;;  %v3841_v38 = vsel %vm2022_vm7, %v3809_v21, %v3393_v2  ;;  %v2991_v2 = vsel %vm2565_vm0, %v2989_v7, %v2990_v57  ;;  %v1100_v32 = vrot.slane %v550_v43, 2  ;;  %v10573_v8 = vld [vmem:[%s10013_s21 + $0x2b0] sm:$0xff] }
  0xcd   : > { %v10548_v62 = vpop.permute.xlu1 %1728  ;;  %v3489_v58 = vpop.permute.xlu0 %3488  ;;  %v972_v48 = vrot.slane %v10573_v8, 2 }
  0xce   : > { %16361 = vst [vmem:[#allocation58_spill] sm:$0xff] %v10548_v62  ;;  %v3873_v50 = vsel %vm2055_vm8, %v3841_v38, %v3489_v58  ;;  %v1101_v7 = vsel %vm712_vm1, %v1098_v36, %v1100_v32  ;;  %v3103_v38 = vrot.slane %v549_v29, 6 }
  0xcf   : > { %1432 = vrot.lane.b32.xlu1 %v10536_v5, %s16322_s17  ;;  %3312 = vrot.lane.b32.xlu0 %v2837_v12, %s16323_s18  ;;  %v3904_v12 = vsel %vm2088_vm9, %v3872_v22, %v10527_v42  ;;  %v3905_v58 = vsel %vm2088_vm9, %v3873_v50, %v10548_v62  ;;  %v2766_v62 = vrot.slane %v391_v47, 6  ;;  %v473_v42 = vld [vmem:[%s10013_s21 + $0x558] sm:$0xff] }
  0xd1   : > { %v10560_v60 = vpop.permute.xlu1 %3166  ;;  %v3619_v40 = vpop.permute.xlu0 %3618 }
  0xd2   : > { %16362 = vst [vmem:[#allocation59_spill] sm:$0xff] %v10560_v60  ;;  %v3936_v49 = vsel %vm2121_vm10, %v3904_v12, %v3619_v40  ;;  %v3104_v12 = vrot.slane %v550_v43, 6 }
  0xd3   : > { %3408 = vrot.lane.b32.xlu1 %v2909_v13, %s16274_s26  ;;  %3406 = vrot.lane.b32.xlu0 %v2907_v27, %s16274_s26  ;;  %v2993_v27 = vsel %vm2565_vm0, %v2990_v57, %v2992_v20  ;;  %v393_v20 = vld [vmem:[%s10013_s21 + $0x2c8] sm:$0xff] }
  0xd4   : > { %9001 = vmatprep.mubr.msk.f32.mxu1 %vm2164_vm11, %v3936_v49  ;;  %v392_v49 = vld [vmem:[%s10013_s21 + $0x2c0] sm:$0xff]  ;;  %v3105_v36 = vsel %vm2565_vm0, %v3103_v38, %v3104_v12  ;;  %v2769_v46 = vrot.slane %v393_v20, 6 }
  0xd5   : > { %v10576_v22 = vpop.permute.xlu1 %3168  ;;  %v3621_v21 = vpop.permute.xlu0 %3620  ;;  %v975_v29 = vrot.slane %v392_v49, 2 }
  0xd6   : > { %16363 = vst [vmem:[#allocation60_spill] sm:$0xff] %v10576_v22  ;;  %v3937_v13 = vsel %vm2121_vm10, %v3905_v58, %v3621_v21  ;;  %v361_v58 = vld [vmem:[%s10013_s21 + $0x1c8] sm:$0xff]  ;;  %v974_v21 = vsel %vm712_vm1, %v972_v48, %v973_v11 }
  0xd7   : > { %1742 = vrot.lane.b32.xlu1 %v1099_v10, %s16276_s10  ;;  %3502 = vrot.lane.b32.xlu0 %v2991_v2, %s16278_s12  ;;  %v551_v10 = vld [vmem:[%s10013_s21 + $0x7d0] sm:$0xff]  ;;  %v360_v2 = vld [vmem:[%s10013_s21 + $0x1c0] sm:$0xff]  ;;  %v976_v48 = vsel %vm712_vm1, %v973_v11, %v975_v29 }
  0xd8   : > { %9002 = vmatmul.mubr.msk.f32.gmra.mrb[2].mxu1 %vm2164_vm11, %v3937_v13  ;;  %v3106_v57 = vrot.slane %v551_v10, 6  ;;  %v2576_v13 = vrot.slane %v360_v2, 6  ;;  %v472_v10 = vld [vmem:[%s10013_s21 + $0x550] sm:$0xff]  ;;  %v471_v2 = vld [vmem:[%s10013_s21 + $0x548] sm:$0xff] }
  0xd9   : > { %v10587_v40 = vpop.permute.xlu1 %3204  ;;  %v3203_v50 = vpop.permute.xlu0 %3202  ;;  %v743_v11 = vrot.slane %v472_v10, 2  ;;  %v2839_v29 = vrot.slane %v471_v2, 6 }
  0xda   : > { %v3107_v38 = vsel %vm2565_vm0, %v3104_v12, %v3106_v57  ;;  %v744_v12 = vrot.slane %v473_v42, 2  ;;  %v474_v57 = vld [vmem:[%s10013_s21 + $0x560] sm:$0xff] }
  0xdb   : > { %1744 = vrot.lane.b32.xlu1 %v1101_v7, %s16276_s10  ;;  %3504 = vrot.lane.b32.xlu0 %v2993_v27, %s16278_s12  ;;  %v2577_v7 = vrot.slane %v361_v58, 6  ;;  %v2767_v27 = vrot.slane %v392_v49, 6  ;;  %v2579_v58 = vrot.slane %v10177_v56, 6 }
  0xdd   : > { %v10597_v43 = vpop.permute.xlu1 %1418  ;;  %v3299_v32 = vpop.permute.xlu0 %3298  ;;  %v2770_v47 = vsel %vm2565_vm0, %v2767_v27, %v2769_v46  ;;  %v2768_v49 = vsel %vm2565_vm0, %v2766_v62, %v2767_v27  ;;  %v2841_v62 = vrot.slane %v472_v10, 6  ;;  %v475_v27 = vld [vmem:[%s10013_s21 + $0x568] sm:$0xff]  ;;  %v2910_v10 = vrot.slane %v473_v42, 6 }
  0xde   : > { %16364 = vst [vmem:[#allocation61_spill] sm:$0xff] %v10597_v43 }
  0xdf   : > { %1122 = vrot.lane.b32.xlu1 %v974_v21, %s16272_s23  ;;  %3634 = vrot.lane.b32.xlu0 %v3105_v36, %s16318_s25  ;;  %v2578_v21 = vsel %vm2565_vm0, %v2576_v13, %v2577_v7  ;;  %v2838_v36 = vrot.slane %v470_v61, 6  ;;  %v2580_v13 = vsel %vm2565_vm0, %v2577_v7, %v2579_v58 }
  0xe0   : > { %v3714_v56 = vsel %vm1890_vm3, %v2578_v21, %v10560_v60  ;;  %v3715_v58 = vsel %vm1890_vm3, %v2580_v13, %v10576_v22 }
  0xe1   : > { %v10606_v5 = vpop.permute.xlu1 %1420  ;;  %v3301_v25 = vpop.permute.xlu0 %3300  ;;  %v3746_v46 = vsel %vm1923_vm4, %v3714_v56, %v3203_v50  ;;  %v2840_v61 = vsel %vm2565_vm0, %v2838_v36, %v2839_v29  ;;  %v2911_v50 = vrot.slane %v474_v57, 6  ;;  %v2842_v36 = vsel %vm2565_vm0, %v2839_v29, %v2841_v62  ;;  %v554_v56 = vld [vmem:[%s10013_s21 + $0x7f0] sm:$0xff] }
  0xe2   : > { %16365 = vst [vmem:[#allocation62_spill] sm:$0xff] %v10606_v5  ;;  %v3778_v2 = vsel %vm1956_vm5, %v3746_v46, %v3299_v32  ;;  %v3747_v32 = vsel %vm1923_vm4, %v3715_v58, %v10587_v40  ;;  %v553_v40 = vld [vmem:[%s10013_s21 + $0x7e8] sm:$0xff]  ;;  %v1102_v29 = vrot.slane %v554_v56, 2 }
  0xe3   : > { %1124 = vrot.lane.b32.xlu1 %v976_v48, %s16272_s23  ;;  %3636 = vrot.lane.b32.xlu0 %v3107_v38, %s16318_s25  ;;  %v746_v48 = vrot.slane %v474_v57, 2  ;;  %v10624_v38 = vsel %vm712_vm1, %v743_v11, %v744_v12  ;;  %v2913_v11 = vrot.slane %v475_v27, 6  ;;  %v3779_v13 = vsel %vm1956_vm5, %v3747_v32, %v3301_v25  ;;  %v552_v27 = vld [vmem:[%s10013_s21 + $0x7e0] sm:$0xff] }
  0xe4   : > { %16366 = vst [vmem:[#allocation63_spill] sm:$0xff] %v10624_v38  ;;  %v2912_v25 = vsel %vm2565_vm0, %v2910_v10, %v2911_v50  ;;  %v2994_v62 = vrot.slane %v552_v27, 6  ;;  %v556_v32 = vld [vmem:[%s10013_s21 + $0x800] sm:$0xff] }
  0xe5   : > { %v3397_v20 = vpop.permute.xlu1 %3396  ;;  %v3395_v31 = vpop.permute.xlu0 %3394 }
  0xe7   : > { %3220 = vrot.lane.b32.xlu1 %v2770_v47, %s16319_s13  ;;  %3218 = vrot.lane.b32.xlu0 %v2768_v49, %s16319_s13  ;;  %v3810_v47 = vsel %vm1989_vm6, %v3778_v2, %v10597_v43  ;;  %v10641_v49 = vsel %vm712_vm1, %v744_v12, %v746_v48  ;;  %v2914_v12 = vsel %vm2565_vm0, %v2911_v50, %v2913_v11  ;;  %v2995_v2 = vrot.slane %v553_v40, 6 }
  0xe8   : > { %16368 = vst [vmem:[#allocation65_spill] sm:$0xff] %v10641_v49  ;;  %v3842_v46 = vsel %vm2022_vm7, %v3810_v47, %v3395_v31  ;;  %v3811_v31 = vsel %vm1989_vm6, %v3779_v13, %v10606_v5  ;;  %v1105_v13 = vrot.slane %v556_v32, 2 }
  0xe9   : > { %v10629_v21 = vpop.permute.xlu1 %1730  ;;  %v3491_v7 = vpop.permute.xlu0 %3490  ;;  %v3843_v47 = vsel %vm2022_vm7, %v3811_v31, %v3397_v20  ;;  %v2996_v27 = vsel %vm2565_vm0, %v2994_v62, %v2995_v2  ;;  %v10678_v31 = vld [vmem:[%s10013_s21 + $0x2e8] sm:$0xff] }
  0xea   : > { %16367 = vst [vmem:[#allocation64_spill] sm:$0xff] %v10629_v21  ;;  %v3874_v58 = vsel %vm2055_vm8, %v3842_v46, %v3491_v7  ;;  %v2997_v46 = vrot.slane %v554_v56, 6  ;;  %v977_v62 = vrot.slane %v10678_v31, 2 }
  0xeb   : > { %1434 = vrot.lane.b32.xlu1 %v10624_v38, %s16322_s17  ;;  %3314 = vrot.lane.b32.xlu0 %v2840_v61, %s16323_s18  ;;  %v555_v61 = vld [vmem:[%s10013_s21 + $0x7f8] sm:$0xff] }
  0xec   : > { %v1103_v48 = vrot.slane %v555_v61, 2 }
  0xed   : > { %v10647_v57 = vpop.permute.xlu1 %1732  ;;  %v3493_v42 = vpop.permute.xlu0 %3492 }
  0xee   : > { %16369 = vst [vmem:[#allocation66_spill] sm:$0xff] %v10647_v57  ;;  %v3875_v50 = vsel %vm2055_vm8, %v3843_v47, %v3493_v42  ;;  %v1104_v20 = vsel %vm712_vm1, %v1102_v29, %v1103_v48  ;;  %v1106_v56 = vsel %vm712_vm1, %v1103_v48, %v1105_v13  ;;  %v2998_v29 = vsel %vm2565_vm0, %v2995_v2, %v2997_v46  ;;  %v367_v48 = vld [vmem:[%s10013_s21 + $0x1f8] sm:$0xff]  ;;  %v368_v13 = vld [vmem:[%s10013_s21 + $0x200] sm:$0xff] }
  0xef   : > { %1436 = vrot.lane.b32.xlu1 %v10641_v49, %s16322_s17  ;;  %3316 = vrot.lane.b32.xlu0 %v2842_v36, %s16323_s18  ;;  %v3906_v36 = vsel %vm2088_vm9, %v3874_v58, %v10629_v21  ;;  %v3907_v42 = vsel %vm2088_vm9, %v3875_v50, %v10647_v57  ;;  %v399_v50 = vld [vmem:[%s10013_s21 + $0x2f8] sm:$0xff]  ;;  %v2581_v22 = vrot.slane %v367_v48, 6  ;;  %v480_v21 = vld [vmem:[%s10013_s21 + $0x590] sm:$0xff] }
  0xf0   : > { %v2772_v60 = vrot.slane %v399_v50, 6  ;;  %v478_v48 = vld [vmem:[%s10013_s21 + $0x580] sm:$0xff] }
  0xf1   : > { %v10662_v7 = vpop.permute.xlu1 %3170  ;;  %v3623_v11 = vpop.permute.xlu0 %3622 }
  0xf2   : > { %16370 = vst [vmem:[#allocation67_spill] sm:$0xff] %v10662_v7  ;;  %v3938_v10 = vsel %vm2121_vm10, %v3906_v36, %v3623_v11  ;;  %v3108_v36 = vrot.slane %v555_v61, 6  ;;  %v3109_v11 = vrot.slane %v556_v32, 6 }
  0xf3   : > { %3412 = vrot.lane.b32.xlu1 %v2914_v12, %s16274_s26  ;;  %3410 = vrot.lane.b32.xlu0 %v2912_v25, %s16274_s26  ;;  %v398_v12 = vld [vmem:[%s10013_s21 + $0x2f0] sm:$0xff] }
  0xf4   : > { %9004 = vmatprep.mubr.msk.f32.mxu1 %vm2164_vm11, %v3938_v10  ;;  %v978_v47 = vrot.slane %v398_v12, 2  ;;  %v3110_v46 = vsel %vm2565_vm0, %v3108_v36, %v3109_v11  ;;  %v2771_v36 = vrot.slane %v398_v12, 6 }
  0xf5   : > { %v10673_v40 = vpop.permute.xlu1 %3172  ;;  %v3625_v58 = vpop.permute.xlu0 %3624 }
  0xf6   : > { %16371 = vst [vmem:[#allocation68_spill] sm:$0xff] %v10673_v40  ;;  %v3939_v25 = vsel %vm2121_vm10, %v3907_v42, %v3625_v58  ;;  %v979_v2 = vsel %vm712_vm1, %v977_v62, %v978_v47 }
  0xf7   : > { %1746 = vrot.lane.b32.xlu1 %v1104_v20, %s16276_s10  ;;  %3506 = vrot.lane.b32.xlu0 %v2996_v27, %s16278_s12  ;;  %v557_v20 = vld [vmem:[%s10013_s21 + $0x808] sm:$0xff]  ;;  %v980_v27 = vrot.slane %v399_v50, 2  ;;  %v2773_v50 = vsel %vm2565_vm0, %v2771_v36, %v2772_v60  ;;  %v482_v36 = vld [vmem:[%s10013_s21 + $0x5a0] sm:$0xff] }
  0xf8   : > { %9005 = vmatmul.mubr.msk.f32.gmra.mrb[4].mxu1 %vm2164_vm11, %v3939_v25  ;;  %v3111_v61 = vrot.slane %v557_v20, 6  ;;  %v400_v25 = vld [vmem:[%s10013_s21 + $0x300] sm:$0xff]  ;;  %v479_v20 = vld [vmem:[%s10013_s21 + $0x588] sm:$0xff] }
  0xf9   : > { %v3209_v10 = vpop.permute.xlu1 %3208  ;;  %v3207_v42 = vpop.permute.xlu0 %3206  ;;  %v2774_v57 = vrot.slane %v400_v25, 6 }
  0xfa   : > { %v3112_v62 = vsel %vm2565_vm0, %v3109_v11, %v3111_v61  ;;  %v749_v11 = vrot.slane %v480_v21, 2 }
  0xfb   : > { %1748 = vrot.lane.b32.xlu1 %v1106_v56, %s16276_s10  ;;  %3508 = vrot.lane.b32.xlu0 %v2998_v29, %s16278_s12  ;;  %v2582_v56 = vrot.slane %v368_v13, 6  ;;  %v981_v29 = vsel %vm712_vm1, %v978_v47, %v980_v27  ;;  %v2584_v13 = vrot.slane %v10269_v19, 6  ;;  %v748_v47 = vrot.slane %v479_v20, 2 }
  0xfc   : > { %v2775_v12 = vsel %vm2565_vm0, %v2772_v60, %v2774_v57  ;;  %v2843_v27 = vrot.slane %v477_v14, 6  ;;  %v751_v60 = vrot.slane %v481_v4, 2 }
  0xfd   : > { %v10696_v58 = vpop.permute.xlu1 %1422  ;;  %v3303_v32 = vpop.permute.xlu0 %3302 }
  0xfe   : > { %16372 = vst [vmem:[#allocation69_spill] sm:$0xff] %v10696_v58 }
  0xff   : > { %1126 = vrot.lane.b32.xlu1 %v979_v2, %s16272_s23  ;;  %3638 = vrot.lane.b32.xlu0 %v3110_v46, %s16318_s25  ;;  %v2583_v2 = vsel %vm2565_vm0, %v2581_v22, %v2582_v56  ;;  %v2844_v46 = vrot.slane %v478_v48, 6  ;;  %v2585_v22 = vsel %vm2565_vm0, %v2582_v56, %v2584_v13 }
 0x100   : > { %v3716_v19 = vsel %vm1890_vm3, %v2583_v2, %v10662_v7  ;;  %v3717_v13 = vsel %vm1890_vm3, %v2585_v22, %v10673_v40 }
 0x101   : > { %v10705_v5 = vpop.permute.xlu1 %1424  ;;  %v3305_v43 = vpop.permute.xlu0 %3304  ;;  %v3748_v57 = vsel %vm1923_vm4, %v3716_v19, %v3207_v42  ;;  %v2845_v14 = vsel %vm2565_vm0, %v2843_v27, %v2844_v46  ;;  %v2916_v42 = vrot.slane %v481_v4, 6  ;;  %v561_v19 = vld [vmem:[%s10013_s21 + $0x828] sm:$0xff] }
 0x102   : > { %16373 = vst [vmem:[#allocation70_spill] sm:$0xff] %v10705_v5  ;;  %v3780_v48 = vsel %vm1956_vm5, %v3748_v57, %v3303_v32 }
 0x103   : > { %1128 = vrot.lane.b32.xlu1 %v981_v29, %s16272_s23  ;;  %3640 = vrot.lane.b32.xlu0 %v3112_v62, %s16318_s25  ;;  %v10722_v29 = vsel %vm712_vm1, %v748_v47, %v749_v11  ;;  %v2846_v62 = vrot.slane %v479_v20, 6  ;;  %v2918_v47 = vrot.slane %v482_v36, 6  ;;  %v2915_v20 = vrot.slane %v480_v21, 6  ;;  %v562_v21 = vld [vmem:[%s10013_s21 + $0x830] sm:$0xff]  ;;  %v559_v36 = vld [vmem:[%s10013_s21 + $0x818] sm:$0xff] }
 0x104   : > { %16374 = vst [vmem:[#allocation71_spill] sm:$0xff] %v10722_v29  ;;  %v3812_v32 = vsel %vm1989_vm6, %v3780_v48, %v10696_v58 }
 0x105   : > { %v3401_v61 = vpop.permute.xlu1 %3400  ;;  %v3399_v25 = vpop.permute.xlu0 %3398  ;;  %v2847_v27 = vsel %vm2565_vm0, %v2844_v46, %v2846_v62  ;;  %v1107_v46 = vrot.slane %v561_v19, 2  ;;  %v2999_v62 = vrot.slane %v559_v36, 6 }
 0x106   : > { %v3844_v57 = vsel %vm2022_vm7, %v3812_v32, %v3399_v25 }
 0x107   : > { %3224 = vrot.lane.b32.xlu1 %v2775_v12, %s16319_s13  ;;  %3222 = vrot.lane.b32.xlu0 %v2773_v50, %s16319_s13  ;;  %v3749_v12 = vsel %vm1923_vm4, %v3717_v13, %v3209_v10  ;;  %v10739_v50 = vsel %vm712_vm1, %v749_v11, %v751_v60  ;;  %v560_v10 = vld [vmem:[%s10013_s21 + $0x820] sm:$0xff]  ;;  %v2919_v11 = vsel %vm2565_vm0, %v2916_v42, %v2918_v47  ;;  %v1108_v60 = vrot.slane %v562_v21, 2 }
 0x108   : > { %16376 = vst [vmem:[#allocation73_spill] sm:$0xff] %v10739_v50  ;;  %v3781_v22 = vsel %vm1956_vm5, %v3749_v12, %v3305_v43  ;;  %v2917_v43 = vsel %vm2565_vm0, %v2915_v20, %v2916_v42  ;;  %v3000_v48 = vrot.slane %v560_v10, 6  ;;  %v563_v12 = vld [vmem:[%s10013_s21 + $0x838] sm:$0xff] }
 0x109   : > { %v10728_v2 = vpop.permute.xlu1 %1734  ;;  %v3495_v56 = vpop.permute.xlu0 %3494  ;;  %v3813_v25 = vsel %vm1989_vm6, %v3781_v22, %v10705_v5  ;;  %v1110_v22 = vrot.slane %v563_v12, 2 }
 0x10a   : > { %16375 = vst [vmem:[#allocation72_spill] sm:$0xff] %v10728_v2  ;;  %v3876_v13 = vsel %vm2055_vm8, %v3844_v57, %v3495_v56  ;;  %v3845_v32 = vsel %vm2022_vm7, %v3813_v25, %v3401_v61  ;;  %v3002_v57 = vrot.slane %v561_v19, 6  ;;  %v1109_v61 = vsel %vm712_vm1, %v1107_v46, %v1108_v60  ;;  %v10776_v25 = vld [vmem:[%s10013_s21 + $0x320] sm:$0xff] }
 0x10b   : > { %1438 = vrot.lane.b32.xlu1 %v10722_v29, %s16322_s17  ;;  %3318 = vrot.lane.b32.xlu0 %v2845_v14, %s16323_s18  ;;  %v3001_v36 = vsel %vm2565_vm0, %v2999_v62, %v3000_v48  ;;  %v1111_v19 = vsel %vm712_vm1, %v1108_v60, %v1110_v22  ;;  %v982_v62 = vrot.slane %v10776_v25, 2  ;;  %v374_v60 = vld [vmem:[%s10013_s21 + $0x230] sm:$0xff]  ;;  %v375_v22 = vld [vmem:[%s10013_s21 + $0x238] sm:$0xff] }
 0x10c   : > { %v3003_v46 = vsel %vm2565_vm0, %v3000_v48, %v3002_v57  ;;  %v2586_v40 = vrot.slane %v374_v60, 6  ;;  %v485_v60 = vld [vmem:[%s10013_s21 + $0x5b8] sm:$0xff] }
 0x10d   : > { %v10745_v14 = vpop.permute.xlu1 %1736  ;;  %v3497_v4 = vpop.permute.xlu0 %3496 }
 0x10e   : > { %16377 = vst [vmem:[#allocation74_spill] sm:$0xff] %v10745_v14  ;;  %v3877_v42 = vsel %vm2055_vm8, %v3845_v32, %v3497_v4 }
 0x10f   : > { %1440 = vrot.lane.b32.xlu1 %v10739_v50, %s16322_s17  ;;  %3320 = vrot.lane.b32.xlu0 %v2847_v27, %s16323_s18  ;;  %v3908_v27 = vsel %vm2088_vm9, %v3876_v13, %v10728_v2  ;;  %v3909_v4 = vsel %vm2088_vm9, %v3877_v42, %v10745_v14  ;;  %v406_v42 = vld [vmem:[%s10013_s21 + $0x330] sm:$0xff]  ;;  %v487_v2 = vld [vmem:[%s10013_s21 + $0x5c8] sm:$0xff] }
 0x110   : > { %v2777_v7 = vrot.slane %v406_v42, 6 }
 0x111   : > { %v10760_v56 = vpop.permute.xlu1 %3174  ;;  %v3627_v47 = vpop.permute.xlu0 %3626 }
 0x112   : > { %16378 = vst [vmem:[#allocation75_spill] sm:$0xff] %v10760_v56  ;;  %v3940_v20 = vsel %vm2121_vm10, %v3908_v27, %v3627_v47  ;;  %v3113_v27 = vrot.slane %v562_v21, 6  ;;  %v3114_v47 = vrot.slane %v563_v12, 6 }
 0x113   : > { %3416 = vrot.lane.b32.xlu1 %v2919_v11, %s16274_s26  ;;  %3414 = vrot.lane.b32.xlu0 %v2917_v43, %s16274_s26  ;;  %v405_v11 = vld [vmem:[%s10013_s21 + $0x328] sm:$0xff] }
 0x114   : > { %9007 = vmatprep.mubr.msk.f32.mxu1 %vm2164_vm11, %v3940_v20  ;;  %v983_v32 = vrot.slane %v405_v11, 2  ;;  %v3115_v57 = vsel %vm2565_vm0, %v3113_v27, %v3114_v47  ;;  %v2776_v27 = vrot.slane %v405_v11, 6 }
 0x115   : > { %v10771_v10 = vpop.permute.xlu1 %3176  ;;  %v3629_v13 = vpop.permute.xlu0 %3628 }
 0x116   : > { %16379 = vst [vmem:[#allocation76_spill] sm:$0xff] %v10771_v10  ;;  %v3941_v43 = vsel %vm2121_vm10, %v3909_v4, %v3629_v13  ;;  %v984_v48 = vsel %vm712_vm1, %v982_v62, %v983_v32 }
 0x117   : > { %1750 = vrot.lane.b32.xlu1 %v1109_v61, %s16276_s10  ;;  %3510 = vrot.lane.b32.xlu0 %v3001_v36, %s16278_s12  ;;  %v564_v61 = vld [vmem:[%s10013_s21 + $0x840] sm:$0xff]  ;;  %v985_v36 = vrot.slane %v406_v42, 2  ;;  %v2778_v42 = vsel %vm2565_vm0, %v2776_v27, %v2777_v7  ;;  %v489_v27 = vld [vmem:[%s10013_s21 + $0x5d8] sm:$0xff] }
 0x118   : > { %9008 = vmatmul.mubr.msk.f32.gmra.mrb[6].mxu1 %vm2164_vm11, %v3941_v43  ;;  %v3116_v21 = vrot.slane %v564_v61, 6  ;;  %v407_v43 = vld [vmem:[%s10013_s21 + $0x338] sm:$0xff]  ;;  %v486_v61 = vld [vmem:[%s10013_s21 + $0x5c0] sm:$0xff] }
 0x119   : > { %v3213_v20 = vpop.permute.xlu1 %3212  ;;  %v3211_v4 = vpop.permute.xlu0 %3210  ;;  %v2779_v14 = vrot.slane %v407_v43, 6 }
 0x11a   : > { %v3117_v62 = vsel %vm2565_vm0, %v3114_v47, %v3116_v21  ;;  %v754_v47 = vrot.slane %v487_v2, 2 }
 0x11b   : > { %1752 = vrot.lane.b32.xlu1 %v1111_v19, %s16276_s10  ;;  %3512 = vrot.lane.b32.xlu0 %v3003_v46, %s16278_s12  ;;  %v2587_v19 = vrot.slane %v375_v22, 6  ;;  %v986_v46 = vsel %vm712_vm1, %v983_v32, %v985_v36  ;;  %v2589_v22 = vrot.slane %v10356_v33, 6  ;;  %v753_v32 = vrot.slane %v486_v61, 2 }
 0x11c   : > { %v2780_v11 = vsel %vm2565_vm0, %v2777_v7, %v2779_v14  ;;  %v2848_v36 = vrot.slane %v484_v24, 6  ;;  %v756_v7 = vrot.slane %v488_v3, 2 }
 0x11d   : > { %v10794_v13 = vpop.permute.xlu1 %1426  ;;  %v3307_v12 = vpop.permute.xlu0 %3306 }
 0x11e   : > { %16380 = vst [vmem:[#allocation77_spill] sm:$0xff] %v10794_v13 }
 0x11f   : > { %1130 = vrot.lane.b32.xlu1 %v984_v48, %s16272_s23  ;;  %3642 = vrot.lane.b32.xlu0 %v3115_v57, %s16318_s25  ;;  %v2588_v48 = vsel %vm2565_vm0, %v2586_v40, %v2587_v19  ;;  %v2849_v57 = vrot.slane %v485_v60, 6  ;;  %v2590_v40 = vsel %vm2565_vm0, %v2587_v19, %v2589_v22 }
 0x120   : > { %v3718_v33 = vsel %vm1890_vm3, %v2588_v48, %v10760_v56  ;;  %v3719_v22 = vsel %vm1890_vm3, %v2590_v40, %v10771_v10 }
 0x121   : > { %v10803_v5 = vpop.permute.xlu1 %1428  ;;  %v3309_v58 = vpop.permute.xlu0 %3308  ;;  %v3750_v14 = vsel %vm1923_vm4, %v3718_v33, %v3211_v4  ;;  %v2850_v24 = vsel %vm2565_vm0, %v2848_v36, %v2849_v57  ;;  %v2921_v4 = vrot.slane %v488_v3, 6  ;;  %v568_v33 = vld [vmem:[%s10013_s21 + $0x860] sm:$0xff] }
 0x122   : > { %16381 = vst [vmem:[#allocation78_spill] sm:$0xff] %v10803_v5  ;;  %v3782_v60 = vsel %vm1956_vm5, %v3750_v14, %v3307_v12 }
 0x123   : > { %1132 = vrot.lane.b32.xlu1 %v986_v46, %s16272_s23  ;;  %3644 = vrot.lane.b32.xlu0 %v3117_v62, %s16318_s25  ;;  %v10820_v46 = vsel %vm712_vm1, %v753_v32, %v754_v47  ;;  %v2851_v62 = vrot.slane %v486_v61, 6  ;;  %v2923_v32 = vrot.slane %v489_v27, 6  ;;  %v2920_v61 = vrot.slane %v487_v2, 6  ;;  %v569_v2 = vld [vmem:[%s10013_s21 + $0x868] sm:$0xff]  ;;  %v566_v27 = vld [vmem:[%s10013_s21 + $0x850] sm:$0xff] }
 0x124   : > { %16382 = vst [vmem:[#allocation79_spill] sm:$0xff] %v10820_v46  ;;  %v3814_v12 = vsel %vm1989_vm6, %v3782_v60, %v10794_v13 }
 0x125   : > { %v3405_v21 = vpop.permute.xlu1 %3404  ;;  %v3403_v43 = vpop.permute.xlu0 %3402  ;;  %v2852_v36 = vsel %vm2565_vm0, %v2849_v57, %v2851_v62  ;;  %v1112_v57 = vrot.slane %v568_v33, 2  ;;  %v3004_v62 = vrot.slane %v566_v27, 6 }
 0x126   : > { %v3846_v14 = vsel %vm2022_vm7, %v3814_v12, %v3403_v43 }
 0x127   : > { %3228 = vrot.lane.b32.xlu1 %v2780_v11, %s16319_s13  ;;  %3226 = vrot.lane.b32.xlu0 %v2778_v42, %s16319_s13  ;;  %v3751_v11 = vsel %vm1923_vm4, %v3719_v22, %v3213_v20  ;;  %v10837_v42 = vsel %vm712_vm1, %v754_v47, %v756_v7  ;;  %v567_v20 = vld [vmem:[%s10013_s21 + $0x858] sm:$0xff]  ;;  %v2924_v47 = vsel %vm2565_vm0, %v2921_v4, %v2923_v32  ;;  %v1113_v7 = vrot.slane %v569_v2, 2 }
 0x128   : > { %16384 = vst [vmem:[#allocation81_spill] sm:$0xff] %v10837_v42  ;;  %v3783_v40 = vsel %vm1956_vm5, %v3751_v11, %v3309_v58  ;;  %v2922_v58 = vsel %vm2565_vm0, %v2920_v61, %v2921_v4  ;;  %v3005_v60 = vrot.slane %v567_v20, 6  ;;  %v570_v11 = vld [vmem:[%s10013_s21 + $0x870] sm:$0xff] }
 0x129   : > { %v10826_v48 = vpop.permute.xlu1 %1738  ;;  %v3499_v19 = vpop.permute.xlu0 %3498  ;;  %v3815_v43 = vsel %vm1989_vm6, %v3783_v40, %v10803_v5  ;;  %v1115_v40 = vrot.slane %v570_v11, 2 }
 0x12a   : > { %16383 = vst [vmem:[#allocation80_spill] sm:$0xff] %v10826_v48  ;;  %v3878_v22 = vsel %vm2055_vm8, %v3846_v14, %v3499_v19  ;;  %v3847_v12 = vsel %vm2022_vm7, %v3815_v43, %v3405_v21  ;;  %v3007_v14 = vrot.slane %v568_v33, 6  ;;  %v1114_v21 = vsel %vm712_vm1, %v1112_v57, %v1113_v7  ;;  %v10874_v43 = vld [vmem:[%s10013_s21 + $0x358] sm:$0xff] }
 0x12b   : > { %1442 = vrot.lane.b32.xlu1 %v10820_v46, %s16322_s17  ;;  %3322 = vrot.lane.b32.xlu0 %v2850_v24, %s16323_s18  ;;  %v3006_v27 = vsel %vm2565_vm0, %v3004_v62, %v3005_v60  ;;  %v1116_v33 = vsel %vm712_vm1, %v1113_v7, %v1115_v40  ;;  %v987_v62 = vrot.slane %v10874_v43, 2  ;;  %v381_v7 = vld [vmem:[%s10013_s21 + $0x268] sm:$0xff]  ;;  %v382_v40 = vld [vmem:[%s10013_s21 + $0x270] sm:$0xff] }
 0x12c   : > { %v3008_v57 = vsel %vm2565_vm0, %v3005_v60, %v3007_v14  ;;  %v2591_v10 = vrot.slane %v381_v7, 6  ;;  %v492_v7 = vld [vmem:[%s10013_s21 + $0x5f0] sm:$0xff] }
 0x12d   : > { %v10843_v24 = vpop.permute.xlu1 %1740  ;;  %v3501_v3 = vpop.permute.xlu0 %3500 }
 0x12e   : > { %16385 = vst [vmem:[#allocation82_spill] sm:$0xff] %v10843_v24  ;;  %v3879_v4 = vsel %vm2055_vm8, %v3847_v12, %v3501_v3 }
 0x12f   : > { %1444 = vrot.lane.b32.xlu1 %v10837_v42, %s16322_s17  ;;  %3324 = vrot.lane.b32.xlu0 %v2852_v36, %s16323_s18  ;;  %v3910_v36 = vsel %vm2088_vm9, %v3878_v22, %v10826_v48  ;;  %v3911_v3 = vsel %vm2088_vm9, %v3879_v4, %v10843_v24  ;;  %v413_v4 = vld [vmem:[%s10013_s21 + $0x368] sm:$0xff]  ;;  %v494_v48 = vld [vmem:[%s10013_s21 + $0x600] sm:$0xff] }
 0x130   : > { %v2782_v56 = vrot.slane %v413_v4, 6 }
 0x131   : > { %v10858_v19 = vpop.permute.xlu1 %3178  ;;  %v3631_v32 = vpop.permute.xlu0 %3630 }
 0x132   : > { %16386 = vst [vmem:[#allocation83_spill] sm:$0xff] %v10858_v19  ;;  %v3942_v61 = vsel %vm2121_vm10, %v3910_v36, %v3631_v32  ;;  %v3118_v36 = vrot.slane %v569_v2, 6  ;;  %v3119_v32 = vrot.slane %v570_v11, 6 }
 0x133   : > { %3420 = vrot.lane.b32.xlu1 %v2924_v47, %s16274_s26  ;;  %3418 = vrot.lane.b32.xlu0 %v2922_v58, %s16274_s26  ;;  %v412_v47 = vld [vmem:[%s10013_s21 + $0x360] sm:$0xff] }
 0x134   : > { %9010 = vmatprep.mubr.msk.f32.mxu1 %vm2164_vm11, %v3942_v61  ;;  %v988_v12 = vrot.slane %v412_v47, 2  ;;  %v3120_v14 = vsel %vm2565_vm0, %v3118_v36, %v3119_v32  ;;  %v2781_v36 = vrot.slane %v412_v47, 6 }
 0x135   : > { %v10869_v20 = vpop.permute.xlu1 %3180  ;;  %v3633_v22 = vpop.permute.xlu0 %3632 }
 0x136   : > { %16387 = vst [vmem:[#allocation84_spill] sm:$0xff] %v10869_v20  ;;  %v3943_v58 = vsel %vm2121_vm10, %v3911_v3, %v3633_v22  ;;  %v989_v60 = vsel %vm712_vm1, %v987_v62, %v988_v12 }
 0x137   : > { %1754 = vrot.lane.b32.xlu1 %v1114_v21, %s16276_s10  ;;  %3514 = vrot.lane.b32.xlu0 %v3006_v27, %s16278_s12  ;;  %v571_v21 = vld [vmem:[%s10013_s21 + $0x878] sm:$0xff]  ;;  %v990_v27 = vrot.slane %v413_v4, 2  ;;  %v2783_v4 = vsel %vm2565_vm0, %v2781_v36, %v2782_v56  ;;  %v496_v36 = vld [vmem:[%s10013_s21 + $0x610] sm:$0xff] }
 0x138   : > { %9011 = vmatmul.mubr.msk.f32.gmra.mrb[8].mxu1 %vm2164_vm11, %v3943_v58  ;;  %v3121_v2 = vrot.slane %v571_v21, 6  ;;  %v414_v58 = vld [vmem:[%s10013_s21 + $0x370] sm:$0xff]  ;;  %v493_v21 = vld [vmem:[%s10013_s21 + $0x5f8] sm:$0xff] }
 0x139   : > { %v3217_v61 = vpop.permute.xlu1 %3216  ;;  %v3215_v3 = vpop.permute.xlu0 %3214  ;;  %v2784_v24 = vrot.slane %v414_v58, 6 }
 0x13a   : > { %v3122_v62 = vsel %vm2565_vm0, %v3119_v32, %v3121_v2  ;;  %v759_v32 = vrot.slane %v494_v48, 2 }
 0x13b   : > { %1756 = vrot.lane.b32.xlu1 %v1116_v33, %s16276_s10  ;;  %3516 = vrot.lane.b32.xlu0 %v3008_v57, %s16278_s12  ;;  %v2592_v33 = vrot.slane %v382_v40, 6  ;;  %v991_v57 = vsel %vm712_vm1, %v988_v12, %v990_v27  ;;  %v2594_v40 = vrot.slane %v10472_v17, 6  ;;  %v758_v12 = vrot.slane %v493_v21, 2 }
 0x13c   : > { %v2785_v47 = vsel %vm2565_vm0, %v2782_v56, %v2784_v24  ;;  %v2853_v27 = vrot.slane %v491_v6, 6  ;;  %v761_v56 = vrot.slane %v495_v55, 2 }
 0x13d   : > { %v10892_v22 = vpop.permute.xlu1 %1430  ;;  %v3311_v11 = vpop.permute.xlu0 %3310 }
 0x13e   : > { %16388 = vst [vmem:[#allocation85_spill] sm:$0xff] %v10892_v22 }
 0x13f   : > { %1134 = vrot.lane.b32.xlu1 %v989_v60, %s16272_s23  ;;  %3646 = vrot.lane.b32.xlu0 %v3120_v14, %s16318_s25  ;;  %v2593_v60 = vsel %vm2565_vm0, %v2591_v10, %v2592_v33  ;;  %v2854_v14 = vrot.slane %v492_v7, 6  ;;  %v2595_v10 = vsel %vm2565_vm0, %v2592_v33, %v2594_v40 }
 0x140   : > { %v3720_v17 = vsel %vm1890_vm3, %v2593_v60, %v10858_v19  ;;  %v3721_v40 = vsel %vm1890_vm3, %v2595_v10, %v10869_v20 }
 0x141   : > { %v10901_v5 = vpop.permute.xlu1 %1432  ;;  %v3313_v13 = vpop.permute.xlu0 %3312  ;;  %v3752_v24 = vsel %vm1923_vm4, %v3720_v17, %v3215_v3  ;;  %v2855_v6 = vsel %vm2565_vm0, %v2853_v27, %v2854_v14  ;;  %v2926_v3 = vrot.slane %v495_v55, 6  ;;  %v575_v17 = vld [vmem:[%s10013_s21 + $0x898] sm:$0xff] }
 0x142   : > { %16389 = vst [vmem:[#allocation86_spill] sm:$0xff] %v10901_v5  ;;  %v3784_v7 = vsel %vm1956_vm5, %v3752_v24, %v3311_v11 }
 0x143   : > { %1136 = vrot.lane.b32.xlu1 %v991_v57, %s16272_s23  ;;  %3648 = vrot.lane.b32.xlu0 %v3122_v62, %s16318_s25  ;;  %v10918_v57 = vsel %vm712_vm1, %v758_v12, %v759_v32  ;;  %v2856_v62 = vrot.slane %v493_v21, 6  ;;  %v2928_v12 = vrot.slane %v496_v36, 6  ;;  %v2925_v21 = vrot.slane %v494_v48, 6  ;;  %v576_v48 = vld [vmem:[%s10013_s21 + $0x8a0] sm:$0xff]  ;;  %v573_v36 = vld [vmem:[%s10013_s21 + $0x888] sm:$0xff] }
 0x144   : > { %16390 = vst [vmem:[#allocation87_spill] sm:$0xff] %v10918_v57  ;;  %v3816_v11 = vsel %vm1989_vm6, %v3784_v7, %v10892_v22 }
 0x145   : > { %v3409_v2 = vpop.permute.xlu1 %3408  ;;  %v3407_v58 = vpop.permute.xlu0 %3406  ;;  %v2857_v27 = vsel %vm2565_vm0, %v2854_v14, %v2856_v62  ;;  %v1117_v14 = vrot.slane %v575_v17, 2  ;;  %v3009_v62 = vrot.slane %v573_v36, 6 }
 0x146   : > { %v3848_v24 = vsel %vm2022_vm7, %v3816_v11, %v3407_v58 }
 0x147   : > { %3232 = vrot.lane.b32.xlu1 %v2785_v47, %s16319_s13  ;;  %3230 = vrot.lane.b32.xlu0 %v2783_v4, %s16319_s13  ;;  %v3753_v47 = vsel %vm1923_vm4, %v3721_v40, %v3217_v61  ;;  %v10935_v4 = vsel %vm712_vm1, %v759_v32, %v761_v56  ;;  %v574_v61 = vld [vmem:[%s10013_s21 + $0x890] sm:$0xff]  ;;  %v2929_v32 = vsel %vm2565_vm0, %v2926_v3, %v2928_v12  ;;  %v1118_v56 = vrot.slane %v576_v48, 2 }
 0x148   : > { %16392 = vst [vmem:[#allocation89_spill] sm:$0xff] %v10935_v4  ;;  %v3785_v10 = vsel %vm1956_vm5, %v3753_v47, %v3313_v13  ;;  %v2927_v13 = vsel %vm2565_vm0, %v2925_v21, %v2926_v3  ;;  %v3010_v7 = vrot.slane %v574_v61, 6  ;;  %v577_v47 = vld [vmem:[%s10013_s21 + $0x8a8] sm:$0xff] }
 0x149   : > { %v10924_v60 = vpop.permute.xlu1 %1742  ;;  %v3503_v33 = vpop.permute.xlu0 %3502  ;;  %v3817_v58 = vsel %vm1989_vm6, %v3785_v10, %v10901_v5  ;;  %v1120_v10 = vrot.slane %v577_v47, 2 }
 0x14a   : > { %16391 = vst [vmem:[#allocation88_spill] sm:$0xff] %v10924_v60  ;;  %v3880_v40 = vsel %vm2055_vm8, %v3848_v24, %v3503_v33  ;;  %v3849_v11 = vsel %vm2022_vm7, %v3817_v58, %v3409_v2  ;;  %v3012_v24 = vrot.slane %v575_v17, 6  ;;  %v1119_v2 = vsel %vm712_vm1, %v1117_v14, %v1118_v56  ;;  %v10972_v58 = vld [vmem:[%s10013_s21 + $0x390] sm:$0xff] }
 0x14b   : > { %1446 = vrot.lane.b32.xlu1 %v10918_v57, %s16322_s17  ;;  %3326 = vrot.lane.b32.xlu0 %v2855_v6, %s16323_s18  ;;  %v3011_v36 = vsel %vm2565_vm0, %v3009_v62, %v3010_v7  ;;  %v1121_v17 = vsel %vm712_vm1, %v1118_v56, %v1120_v10  ;;  %v992_v62 = vrot.slane %v10972_v58, 2  ;;  %v389_v56 = vld [vmem:[%s10013_s21 + $0x2a8] sm:$0xff]  ;;  %v388_v10 = vld [vmem:[%s10013_s21 + $0x2a0] sm:$0xff] }
 0x14c   : > { %v3013_v14 = vsel %vm2565_vm0, %v3010_v7, %v3012_v24  ;;  %v2597_v20 = vrot.slane %v389_v56, 6  ;;  %v499_v56 = vld [vmem:[%s10013_s21 + $0x628] sm:$0xff] }
 0x14d   : > { %v10941_v6 = vpop.permute.xlu1 %1744  ;;  %v3505_v55 = vpop.permute.xlu0 %3504 }
 0x14e   : > { %16393 = vst [vmem:[#allocation90_spill] sm:$0xff] %v10941_v6  ;;  %v3881_v3 = vsel %vm2055_vm8, %v3849_v11, %v3505_v55 }
 0x14f   : > { %1448 = vrot.lane.b32.xlu1 %v10935_v4, %s16322_s17  ;;  %3328 = vrot.lane.b32.xlu0 %v2857_v27, %s16323_s18  ;;  %v3912_v27 = vsel %vm2088_vm9, %v3880_v40, %v10924_v60  ;;  %v3913_v55 = vsel %vm2088_vm9, %v3881_v3, %v10941_v6  ;;  %v420_v3 = vld [vmem:[%s10013_s21 + $0x3a0] sm:$0xff]  ;;  %v501_v60 = vld [vmem:[%s10013_s21 + $0x638] sm:$0xff] }
 0x150   : > { %v2787_v19 = vrot.slane %v420_v3, 6  ;;  %v505_v4 = vld [vmem:[%s10013_s21 + $0x658] sm:$0xff] }
 0x151   : > { %v10956_v33 = vpop.permute.xlu1 %1122  ;;  %v3635_v12 = vpop.permute.xlu0 %3634 }
 0x152   : > { %16394 = vst [vmem:[#allocation91_spill] sm:$0xff] %v10956_v33  ;;  %v3944_v21 = vsel %vm2121_vm10, %v3912_v27, %v3635_v12  ;;  %v3123_v27 = vrot.slane %v576_v48, 6  ;;  %v3124_v12 = vrot.slane %v577_v47, 6 }
 0x153   : > { %3424 = vrot.lane.b32.xlu1 %v2929_v32, %s16274_s26  ;;  %3422 = vrot.lane.b32.xlu0 %v2927_v13, %s16274_s26  ;;  %v419_v32 = vld [vmem:[%s10013_s21 + $0x398] sm:$0xff] }
 0x154   : > { %9013 = vmatprep.mubr.msk.f32.mxu1 %vm2164_vm11, %v3944_v21  ;;  %v993_v11 = vrot.slane %v419_v32, 2  ;;  %v3125_v24 = vsel %vm2565_vm0, %v3123_v27, %v3124_v12  ;;  %v2786_v27 = vrot.slane %v419_v32, 6 }
 0x155   : > { %v10967_v61 = vpop.permute.xlu1 %1124  ;;  %v3637_v40 = vpop.permute.xlu0 %3636 }
 0x156   : > { %16395 = vst [vmem:[#allocation92_spill] sm:$0xff] %v10967_v61  ;;  %v3945_v13 = vsel %vm2121_vm10, %v3913_v55, %v3637_v40  ;;  %v994_v7 = vsel %vm712_vm1, %v992_v62, %v993_v11 }
 0x157   : > { %1758 = vrot.lane.b32.xlu1 %v1119_v2, %s16276_s10  ;;  %3518 = vrot.lane.b32.xlu0 %v3011_v36, %s16278_s12  ;;  %v578_v2 = vld [vmem:[%s10013_s21 + $0x8b0] sm:$0xff]  ;;  %v995_v36 = vrot.slane %v420_v3, 2  ;;  %v2788_v3 = vsel %vm2565_vm0, %v2786_v27, %v2787_v19  ;;  %v503_v27 = vld [vmem:[%s10013_s21 + $0x648] sm:$0xff] }
 0x158   : > { %9014 = vmatmul.mubr.msk.f32.gmra.mrb[10].mxu1 %vm2164_vm11, %v3945_v13  ;;  %v3126_v48 = vrot.slane %v578_v2, 6  ;;  %v421_v13 = vld [vmem:[%s10013_s21 + $0x3a8] sm:$0xff]  ;;  %v500_v2 = vld [vmem:[%s10013_s21 + $0x630] sm:$0xff] }
 0x159   : > { %v3221_v21 = vpop.permute.xlu1 %3220  ;;  %v3219_v55 = vpop.permute.xlu0 %3218  ;;  %v2789_v6 = vrot.slane %v421_v13, 6 }
 0x15a   : > { %v3127_v62 = vsel %vm2565_vm0, %v3124_v12, %v3126_v48  ;;  %v764_v12 = vrot.slane %v501_v60, 2 }
 0x15b   : > { %1760 = vrot.lane.b32.xlu1 %v1121_v17, %s16276_s10  ;;  %3520 = vrot.lane.b32.xlu0 %v3013_v14, %s16278_s12  ;;  %v2596_v17 = vrot.slane %v388_v10, 6  ;;  %v996_v14 = vsel %vm712_vm1, %v993_v11, %v995_v36  ;;  %v2599_v10 = vrot.slane %v10573_v8, 6  ;;  %v763_v11 = vrot.slane %v500_v2, 2 }
 0x15c   : > { %v2790_v32 = vsel %vm2565_vm0, %v2787_v19, %v2789_v6  ;;  %v2858_v36 = vrot.slane %v498_v41, 6  ;;  %v766_v19 = vrot.slane %v502_v28, 2 }
 0x15d   : > { %v10990_v40 = vpop.permute.xlu1 %1434  ;;  %v3315_v47 = vpop.permute.xlu0 %3314  ;;  %v2600_v8 = vsel %vm2565_vm0, %v2597_v20, %v2599_v10 }
 0x15e   : > { %16396 = vst [vmem:[#allocation93_spill] sm:$0xff] %v10990_v40 }
 0x15f   : > { %1138 = vrot.lane.b32.xlu1 %v994_v7, %s16272_s23  ;;  %3650 = vrot.lane.b32.xlu0 %v3125_v24, %s16318_s25  ;;  %v2598_v7 = vsel %vm2565_vm0, %v2596_v17, %v2597_v20  ;;  %v2859_v24 = vrot.slane %v499_v56, 6 }
 0x160   : > { %v3722_v17 = vsel %vm1890_vm3, %v2598_v7, %v10956_v33  ;;  %v3723_v7 = vsel %vm1890_vm3, %v2600_v8, %v10967_v61  ;;  %v509_v61 = vld [vmem:[%s10013_s21 + $0x678] sm:$0xff] }
 0x161   : > { %v10999_v5 = vpop.permute.xlu1 %1436  ;;  %v3317_v22 = vpop.permute.xlu0 %3316  ;;  %v3754_v6 = vsel %vm1923_vm4, %v3722_v17, %v3219_v55  ;;  %v2860_v41 = vsel %vm2565_vm0, %v2858_v36, %v2859_v24  ;;  %v2931_v55 = vrot.slane %v502_v28, 6 }
 0x162   : > { %16397 = vst [vmem:[#allocation94_spill] sm:$0xff] %v10999_v5  ;;  %v3786_v56 = vsel %vm1956_vm5, %v3754_v6, %v3315_v47 }
 0x163   : > { %1140 = vrot.lane.b32.xlu1 %v996_v14, %s16272_s23  ;;  %3652 = vrot.lane.b32.xlu0 %v3127_v62, %s16318_s25  ;;  %v11016_v14 = vsel %vm712_vm1, %v763_v11, %v764_v12  ;;  %v2861_v62 = vrot.slane %v500_v2, 6  ;;  %v2933_v11 = vrot.slane %v503_v27, 6  ;;  %v2930_v2 = vrot.slane %v501_v60, 6  ;;  %v581_v60 = vld [vmem:[%s10013_s21 + $0x8c8] sm:$0xff] }
 0x164   : > { %16398 = vst [vmem:[#allocation95_spill] sm:$0xff] %v11016_v14  ;;  %v3818_v47 = vsel %vm1989_vm6, %v3786_v56, %v10990_v40  ;;  %v583_v56 = vld [vmem:[%s10013_s21 + $0x8d8] sm:$0xff]  ;;  %v508_v40 = vld [vmem:[%s10013_s21 + $0x670] sm:$0xff] }
 0x165   : > { %v3413_v48 = vpop.permute.xlu1 %3412  ;;  %v3411_v13 = vpop.permute.xlu0 %3410  ;;  %v2862_v36 = vsel %vm2565_vm0, %v2859_v24, %v2861_v62 }
 0x166   : > { %v3850_v17 = vsel %vm2022_vm7, %v3818_v47, %v3411_v13  ;;  %v3015_v13 = vrot.slane %v581_v60, 6 }
 0x167   : > { %3236 = vrot.lane.b32.xlu1 %v2790_v32, %s16319_s13  ;;  %3234 = vrot.lane.b32.xlu0 %v2788_v3, %s16319_s13  ;;  %v3755_v32 = vsel %vm1923_vm4, %v3723_v7, %v3221_v21  ;;  %v11033_v3 = vsel %vm712_vm1, %v764_v12, %v766_v19  ;;  %v580_v21 = vld [vmem:[%s10013_s21 + $0x8c0] sm:$0xff]  ;;  %v2934_v12 = vsel %vm2565_vm0, %v2931_v55, %v2933_v11 }
 0x168   : > { %16400 = vst [vmem:[#allocation97_spill] sm:$0xff] %v11033_v3  ;;  %v3787_v8 = vsel %vm1956_vm5, %v3755_v32, %v3317_v22  ;;  %v2932_v22 = vsel %vm2565_vm0, %v2930_v2, %v2931_v55  ;;  %v3014_v62 = vrot.slane %v580_v21, 6  ;;  %v584_v7 = vld [vmem:[%s10013_s21 + $0x8e0] sm:$0xff] }
 0x169   : > { %v11022_v20 = vpop.permute.xlu1 %1746  ;;  %v3507_v10 = vpop.permute.xlu0 %3506  ;;  %v3819_v24 = vsel %vm1989_vm6, %v3787_v8, %v10999_v5  ;;  %v3059_v8 = vrot.slane %v584_v7, 2 }
 0x16a   : > { %16399 = vst [vmem:[#allocation96_spill] sm:$0xff] %v11022_v20  ;;  %v3882_v27 = vsel %vm2055_vm8, %v3850_v17, %v3507_v10  ;;  %v3851_v32 = vsel %vm2022_vm7, %v3819_v24, %v3413_v48  ;;  %v3016_v60 = vsel %vm2565_vm0, %v3014_v62, %v3015_v13 }
 0x16b   : > { %1450 = vrot.lane.b32.xlu1 %v11016_v14, %s16322_s17  ;;  %3330 = vrot.lane.b32.xlu0 %v2860_v41, %s16323_s18  ;;  %v582_v41 = vld [vmem:[%s10013_s21 + $0x8d0] sm:$0xff]  ;;  %v3914_v47 = vsel %vm2088_vm9, %v3882_v27, %v11022_v20 }
 0x16c   : > { %v3017_v19 = vrot.slane %v582_v41, 6  ;;  %v3056_v17 = vrot.slane %v582_v41, 2 }
 0x16d   : > { %v11038_v6 = vpop.permute.xlu1 %1748  ;;  %v3509_v28 = vpop.permute.xlu0 %3508 }
 0x16e   : > { %16401 = vst [vmem:[#allocation98_spill] sm:$0xff] %v11038_v6  ;;  %v3883_v55 = vsel %vm2055_vm8, %v3851_v32, %v3509_v28  ;;  %v3018_v48 = vsel %vm2565_vm0, %v3015_v13, %v3017_v19  ;;  %v3128_v32 = vrot.slane %v583_v56, 6 }
 0x16f   : > { %1452 = vrot.lane.b32.xlu1 %v11033_v3, %s16322_s17  ;;  %3332 = vrot.lane.b32.xlu0 %v2862_v36, %s16323_s18  ;;  %v3057_v36 = vrot.slane %v583_v56, 2  ;;  %v3915_v28 = vsel %vm2088_vm9, %v3883_v55, %v11038_v6 }
 0x171   : > { %v11054_v10 = vpop.permute.xlu1 %1126  ;;  %v3639_v11 = vpop.permute.xlu0 %3638  ;;  %v3060_v41 = vsel %vm712_vm1, %v3057_v36, %v3059_v8  ;;  %v3058_v13 = vsel %vm712_vm1, %v3056_v17, %v3057_v36  ;;  %v396_v8 = vld [vmem:[%s10013_s21 + $0x2e0] sm:$0xff] }
 0x172   : > { %16402 = vst [vmem:[#allocation99_spill] sm:$0xff] %v11054_v10  ;;  %v3946_v2 = vsel %vm2121_vm10, %v3914_v47, %v3639_v11  ;;  %v3129_v47 = vrot.slane %v584_v7, 6  ;;  %v426_v11 = vld [vmem:[%s10013_s21 + $0x3d8] sm:$0xff]  ;;  %v2602_v6 = vrot.slane %v396_v8, 6  ;;  %v506_v8 = vld [vmem:[%s10013_s21 + $0x660] sm:$0xff] }
 0x173   : > { %3428 = vrot.lane.b32.xlu1 %v2934_v12, %s16274_s26  ;;  %3426 = vrot.lane.b32.xlu0 %v2932_v22, %s16274_s26  ;;  %v11070_v12 = vld [vmem:[%s10013_s21 + $0x3c8] sm:$0xff]  ;;  %v425_v22 = vld [vmem:[%s10013_s21 + $0x3d0] sm:$0xff]  ;;  %v2792_v20 = vrot.slane %v426_v11, 6 }
 0x174   : > { %9016 = vmatprep.mubr.msk.f32.mxu1 %vm2164_vm11, %v3946_v2  ;;  %v997_v19 = vrot.slane %v11070_v12, 2  ;;  %v998_v62 = vrot.slane %v425_v22, 2  ;;  %v3130_v17 = vsel %vm2565_vm0, %v3128_v32, %v3129_v47  ;;  %v2791_v32 = vrot.slane %v425_v22, 6 }
 0x175   : > { %v11065_v21 = vpop.permute.xlu1 %1128  ;;  %v3641_v27 = vpop.permute.xlu0 %3640 }
 0x176   : > { %16403 = vst [vmem:[#allocation100_spill] sm:$0xff] %v11065_v21  ;;  %v3947_v24 = vsel %vm2121_vm10, %v3915_v28, %v3641_v27  ;;  %v395_v28 = vld [vmem:[%s10013_s21 + $0x2d8] sm:$0xff]  ;;  %v999_v36 = vsel %vm712_vm1, %v997_v19, %v998_v62 }
 0x177   : > { %3524 = vrot.lane.b32.xlu1 %v3018_v48, %s16278_s12  ;;  %3522 = vrot.lane.b32.xlu0 %v3016_v60, %s16278_s12  ;;  %v585_v48 = vld [vmem:[%s10013_s21 + $0x8e8] sm:$0xff]  ;;  %v1000_v60 = vrot.slane %v426_v11, 2  ;;  %v2793_v11 = vsel %vm2565_vm0, %v2791_v32, %v2792_v20 }
 0x178   : > { %9017 = vmatmul.mubr.msk.f32.gmra.mrb[12].mxu1 %vm2164_vm11, %v3947_v24  ;;  %v3131_v56 = vrot.slane %v585_v48, 6  ;;  %v427_v24 = vld [vmem:[%s10013_s21 + $0x3e0] sm:$0xff]  ;;  %v507_v48 = vld [vmem:[%s10013_s21 + $0x668] sm:$0xff] }
 0x179   : > { %v3225_v55 = vpop.permute.xlu1 %3224  ;;  %v3223_v2 = vpop.permute.xlu0 %3222  ;;  %v2794_v5 = vrot.slane %v427_v24, 6 }
 0x17a   : > { %v3132_v19 = vsel %vm2565_vm0, %v3129_v47, %v3131_v56  ;;  %v769_v47 = vrot.slane %v508_v40, 2 }
 0x17b   : > { %3580 = vrot.lane.b32.xlu1 %v3060_v41, %s16276_s10  ;;  %3578 = vrot.lane.b32.xlu0 %v3058_v13, %s16276_s10  ;;  %v2601_v41 = vrot.slane %v395_v28, 6  ;;  %v1001_v13 = vsel %vm712_vm1, %v998_v62, %v1000_v60  ;;  %v2604_v28 = vrot.slane %v10678_v31, 6  ;;  %v768_v62 = vrot.slane %v507_v48, 2 }
 0x17c   : > { %v2795_v22 = vsel %vm2565_vm0, %v2792_v20, %v2794_v5  ;;  %v2863_v60 = vrot.slane %v505_v4, 6  ;;  %v771_v20 = vrot.slane %v509_v61, 2 }
 0x17d   : > { %v11088_v27 = vpop.permute.xlu1 %1438  ;;  %v3319_v7 = vpop.permute.xlu0 %3318  ;;  %v2605_v18 = vsel %vm2565_vm0, %v2602_v6, %v2604_v28 }
 0x17e   : > { %16404 = vst [vmem:[#allocation101_spill] sm:$0xff] %v11088_v27 }
 0x17f   : > { %1142 = vrot.lane.b32.xlu1 %v999_v36, %s16272_s23  ;;  %3654 = vrot.lane.b32.xlu0 %v3130_v17, %s16318_s25  ;;  %v2603_v36 = vsel %vm2565_vm0, %v2601_v41, %v2602_v6  ;;  %v2864_v17 = vrot.slane %v506_v8, 6  ;;  %v11114_v41 = vsel %vm712_vm1, %v768_v62, %v769_v47  ;;  %v3725_v8 = vsel %vm1890_vm3, %v2605_v18, %v11065_v21 }
 0x180   : > { %v3724_v31 = vsel %vm1890_vm3, %v2603_v36, %v11054_v10  ;;  %16406 = vst [vmem:[#allocation103_spill] sm:$0xff] %v11114_v41  ;;  %v11134_v18 = vsel %vm712_vm1, %v769_v47, %v771_v20 }
 0x181   : > { %v11097_v3 = vpop.permute.xlu1 %1440  ;;  %v3321_v14 = vpop.permute.xlu0 %3320  ;;  %v3756_v5 = vsel %vm1923_vm4, %v3724_v31, %v3223_v2  ;;  %v2865_v4 = vsel %vm2565_vm0, %v2863_v60, %v2864_v17  ;;  %v2935_v2 = vrot.slane %v508_v40, 6  ;;  %16410 = vst [vmem:[#allocation107_spill] sm:$0xff] %v11134_v18 }
 0x182   : > { %16405 = vst [vmem:[#allocation102_spill] sm:$0xff] %v11097_v3 }
 0x183   : > { %1144 = vrot.lane.b32.xlu1 %v1001_v13, %s16272_s23  ;;  %3656 = vrot.lane.b32.xlu0 %v3132_v19, %s16318_s25  ;;  %v2866_v13 = vrot.slane %v507_v48, 6  ;;  %v3788_v19 = vsel %vm1956_vm5, %v3756_v5, %v3319_v7  ;;  %v2936_v48 = vrot.slane %v509_v61, 6  ;;  %v3757_v7 = vsel %vm1923_vm4, %v3725_v8, %v3225_v55  ;;  %v587_v61 = vld [vmem:[%s10013_s21 + $0x8f8] sm:$0xff]  ;;  %v588_v5 = vld [vmem:[%s10013_s21 + $0x900] sm:$0xff] }
 0x184   : > { %v3820_v36 = vsel %vm1989_vm6, %v3788_v19, %v11088_v27  ;;  %v510_v55 = vld [vmem:[%s10013_s21 + $0x680] sm:$0xff] }
 0x185   : > { %v3417_v56 = vpop.permute.xlu1 %3416  ;;  %v3415_v24 = vpop.permute.xlu0 %3414  ;;  %v2937_v47 = vsel %vm2565_vm0, %v2935_v2, %v2936_v48  ;;  %v2938_v20 = vrot.slane %v510_v55, 6  ;;  %v592_v27 = vld [vmem:[%s10013_s21 + $0x920] sm:$0xff] }
 0x186   : > { %v3852_v60 = vsel %vm2022_vm7, %v3820_v36, %v3415_v24  ;;  %v3020_v24 = vrot.slane %v588_v5, 6  ;;  %v11159_v36 = vld [vmem:[%s10013_s21 + $0x2b8] sm:$0xff] }
 0x187   : > { %3240 = vrot.lane.b32.xlu1 %v2795_v22, %s16319_s13  ;;  %3238 = vrot.lane.b32.xlu0 %v2793_v11, %s16319_s13  ;;  %v2867_v22 = vsel %vm2565_vm0, %v2864_v17, %v2866_v13  ;;  %v3789_v11 = vsel %vm1956_vm5, %v3757_v7, %v3321_v14  ;;  %v3019_v17 = vrot.slane %v587_v61, 6  ;;  %v9580_v61 = vld [vmem:[%s10013_s21 + $0x400] sm:$0xff] }
 0x188   : > { %v3821_v14 = vsel %vm1989_vm6, %v3789_v11, %v11097_v3  ;;  %v9579_v11 = vld [vmem:[%s10013_s21 + $0x3f8] sm:$0xff] }
 0x189   : > { %v11119_v32 = vpop.permute.xlu1 %1750  ;;  %v3511_v6 = vpop.permute.xlu0 %3510  ;;  %v3853_v13 = vsel %vm2022_vm7, %v3821_v14, %v3417_v56  ;;  %v3021_v56 = vsel %vm2565_vm0, %v3019_v17, %v3020_v24  ;;  %v589_v14 = vld [vmem:[%s10013_s21 + $0x908] sm:$0xff] }
 0x18a   : > { %16407 = vst [vmem:[#allocation104_spill] sm:$0xff] %v11119_v32 }
 0x18b   : > { %v11123_v28 = vpop.f32.mrb[0].mxu1  ;;  %1454 = vrot.lane.b32.xlu1 %v11114_v41, %s16322_s17  ;;  %3334 = vrot.lane.b32.xlu0 %v2865_v4, %s16323_s18  ;;  %v3884_v4 = vsel %vm2055_vm8, %v3852_v60, %v3511_v6  ;;  %v884_v60 = vrot.slane %v9579_v11, 4  ;;  %v9581_v11 = vld [vmem:[%s10013_s21 + $0x2c0] sm:$0xff] }
 0x18c   : > { %16408 = vst [vmem:[#allocation105_spill] sm:$0xff] %v11123_v28  ;;  %v11131_v62 = vpop.f32.mrb[1].mxu1  ;;  %v3916_v6 = vsel %vm2088_vm9, %v3884_v4, %v11119_v32 }
 0x18d   : > { %16409 = vst [vmem:[#allocation106_spill] sm:$0xff] %v11131_v62  ;;  %v11139_v31 = vpop.permute.xlu1 %1752  ;;  %v3513_v40 = vpop.permute.xlu0 %3512 }
 0x18e   : > { %16411 = vst [vmem:[#allocation108_spill] sm:$0xff] %v11139_v31  ;;  %v3885_v7 = vsel %vm2055_vm8, %v3853_v13, %v3513_v40  ;;  %v885_v40 = vrot.slane %v9580_v61, 4 }
 0x18f   : > { %1456 = vrot.lane.b32.xlu1 %v11134_v18, %s16322_s17  ;;  %3336 = vrot.lane.b32.xlu0 %v2867_v22, %s16323_s18  ;;  %v2939_v22 = vsel %vm2565_vm0, %v2936_v48, %v2938_v20  ;;  %v3917_v55 = vsel %vm2088_vm9, %v3885_v7, %v11139_v31  ;;  %v3061_v20 = vrot.slane %v589_v14, 2 }
 0x190   : > { %v11180_v48 = vsel %vm853_vm2, %v884_v60, %v885_v40 }
 0x191   : > { %v11152_v19 = vpop.permute.xlu1 %1130  ;;  %v3643_v8 = vpop.permute.xlu0 %3642  ;;  %16414 = vst [vmem:[#allocation111_spill] sm:$0xff] %v11180_v48 }
 0x192   : > { %16412 = vst [vmem:[#allocation109_spill] sm:$0xff] %v11152_v19  ;;  %v3948_v2 = vsel %vm2121_vm10, %v3916_v6, %v3643_v8  ;;  %v3022_v6 = vrot.slane %v589_v14, 6 }
 0x193   : > { %1218 = vrot.lane.b32.xlu1 %v11159_v36, %s16319_s13  ;;  %3430 = vrot.lane.b32.xlu0 %v2937_v47, %s16274_s26  ;;  %v590_v47 = vld [vmem:[%s10013_s21 + $0x910] sm:$0xff] }
 0x194   : > { %9019 = vmatprep.mubr.msk.f32.mxu1 %vm2164_vm11, %v3948_v2  ;;  %v3062_v13 = vrot.slane %v590_v47, 2  ;;  %v591_v2 = vld [vmem:[%s10013_s21 + $0x918] sm:$0xff] }
 0x195   : > { %v11169_v5 = vpop.permute.xlu1 %1132  ;;  %v3645_v4 = vpop.permute.xlu0 %3644  ;;  %v3064_v60 = vrot.slane %v591_v2, 2 }
 0x196   : > { %16413 = vst [vmem:[#allocation110_spill] sm:$0xff] %v11169_v5  ;;  %v3949_v17 = vsel %vm2121_vm10, %v3917_v55, %v3645_v4  ;;  %v3063_v61 = vsel %vm712_vm1, %v3061_v20, %v3062_v13  ;;  %v3023_v55 = vsel %vm2565_vm0, %v3020_v24, %v3022_v6  ;;  %v9582_v4 = vld [vmem:[%s10013_s21 + $0x408] sm:$0xff]  ;;  %v3133_v20 = vrot.slane %v590_v47, 6 }
 0x197   : > { %3526 = vrot.lane.b32.xlu1 %v3021_v56, %s16278_s12  ;;  %3432 = vrot.lane.b32.xlu0 %v2939_v22, %s16274_s26  ;;  %v403_v56 = vld [vmem:[%s10013_s21 + $0x318] sm:$0xff]  ;;  %v402_v22 = vld [vmem:[%s10013_s21 + $0x310] sm:$0xff]  ;;  %v3134_v24 = vrot.slane %v591_v2, 6 }
 0x198   : > { %9020 = vmatmul.mubr.msk.f32.gmra.mrb[14].mxu1 %vm2164_vm11, %v3949_v17  ;;  %v887_v17 = vrot.slane %v9582_v4, 4  ;;  %v2607_v32 = vrot.slane %v403_v56, 6  ;;  %v2606_v28 = vrot.slane %v402_v22, 6  ;;  %v2609_v56 = vrot.slane %v10776_v25, 6 }
 0x199   : > { %v3229_v8 = vpop.permute.xlu1 %3228  ;;  %v3227_v7 = vpop.permute.xlu0 %3226 }
 0x19a   : > { %v11198_v62 = vsel %vm853_vm2, %v885_v40, %v887_v17  ;;  %v2608_v22 = vsel %vm2565_vm0, %v2606_v28, %v2607_v32  ;;  %v2610_v2 = vsel %vm2565_vm0, %v2607_v32, %v2609_v56 }
 0x19b   : > { %1314 = vrot.lane.b32.xlu1 %v11180_v48, %s16323_s18  ;;  %1220 = vrot.lane.b32.xlu0 %v9581_v11, %s16319_s13  ;;  %v3065_v11 = vsel %vm712_vm1, %v3062_v13, %v3064_v60  ;;  %16416 = vst [vmem:[#allocation113_spill] sm:$0xff] %v11198_v62  ;;  %v3135_v13 = vsel %vm2565_vm0, %v3133_v20, %v3134_v24  ;;  %v598_v48 = vld [vmem:[%s10013_s21 + $0x950] sm:$0xff] }
 0x19c   : > { %v3726_v47 = vsel %vm1890_vm3, %v2608_v22, %v11152_v19  ;;  %v9584_v22 = vld [vmem:[%s10013_s21 + $0x550] sm:$0xff] }
 0x19d   : > { %v11192_v14 = vpop.permute.xlu1 %1442  ;;  %v3323_v31 = vpop.permute.xlu0 %3322  ;;  %v3758_v25 = vsel %vm1923_vm4, %v3726_v47, %v3227_v7 }
 0x19e   : > { %16415 = vst [vmem:[#allocation112_spill] sm:$0xff] %v11192_v14 }
 0x19f   : > { %3582 = vrot.lane.b32.xlu1 %v3063_v61, %s16276_s10  ;;  %3528 = vrot.lane.b32.xlu0 %v3023_v55, %s16278_s12  ;;  %v3136_v61 = vrot.slane %v592_v27, 6  ;;  %v3790_v27 = vsel %vm1956_vm5, %v3758_v25, %v3323_v31  ;;  %v9583_v31 = vld [vmem:[%s10013_s21 + $0x548] sm:$0xff] }
 0x1a0   : > { %v3822_v7 = vsel %vm1989_vm6, %v3790_v27, %v11192_v14  ;;  %v914_v56 = vrot.slane %v9583_v31, 4  ;;  %v11260_v31 = vld [vmem:[%s10013_s21 + $0x410] sm:$0xff] }
 0x1a1   : > { %v11200_v6 = vpop.permute.xlu1 %1444  ;;  %v3325_v3 = vpop.permute.xlu0 %3324  ;;  %v3137_v28 = vsel %vm2565_vm0, %v3134_v24, %v3136_v61 }
 0x1a2   : > { %16417 = vst [vmem:[#allocation114_spill] sm:$0xff] %v11200_v6 }
 0x1a3   : > { %3584 = vrot.lane.b32.xlu1 %v3065_v11, %s16276_s10  ;;  %1316 = vrot.lane.b32.xlu0 %v11198_v62, %s16323_s18  ;;  %v3727_v11 = vsel %vm1890_vm3, %v2610_v2, %v11169_v5 }
 0x1a4   : > { %v3759_v32 = vsel %vm1923_vm4, %v3727_v11, %v3229_v8  ;;  %v11239_v8 = vld [vmem:[%s10013_s21 + $0x2f0] sm:$0xff] }
 0x1a5   : > { %v3421_v40 = vpop.permute.xlu1 %3420  ;;  %v3419_v55 = vpop.permute.xlu0 %3418  ;;  %v3791_v61 = vsel %vm1956_vm5, %v3759_v32, %v3325_v3 }
 0x1a6   : > { %v3854_v47 = vsel %vm2022_vm7, %v3822_v7, %v3419_v55  ;;  %v3823_v3 = vsel %vm1989_vm6, %v3791_v61, %v11200_v6 }
 0x1a7   : > { %1146 = vrot.lane.b32.xlu1 %v10036_v23, %s16272_s23  ;;  %3658 = vrot.lane.b32.xlu0 %v3135_v13, %s16318_s25  ;;  %v915_v13 = vrot.slane %v9584_v22, 4  ;;  %v9588_v22 = vld [vmem:[%s10013_s21 + $0x430] sm:$0xff] }
 0x1a8   : > { %v889_v61 = vrot.slane %v9588_v22, 4  ;;  %v2156_v23 = vld [vmem:[%s16033_s1 + $0x10] sm:$0xff] }
 0x1a9   : > { %v11218_v60 = vpop.permute.xlu1 %1754  ;;  %v3515_v17 = vpop.permute.xlu0 %3514  ;;  %v11248_v55 = vsel %vm853_vm2, %v914_v56, %v915_v13 }
 0x1aa   : > { %16418 = vst [vmem:[#allocation115_spill] sm:$0xff] %v11218_v60  ;;  %16422 = vst [vmem:[#allocation119_spill] sm:$0xff] %v11248_v55 }
 0x1ab   : > { %v11222_v20 = vpop.f32.mrb[2].mxu1  ;;  %3660 = vrot.lane.b32.xlu1 %v3137_v28, %s16318_s25  ;;  %1506 = vrot.lane.b32.xlu0 %v9582_v4, %s16274_s26  ;;  %v3886_v4 = vsel %vm2055_vm8, %v3854_v47, %v3515_v17  ;;  %v3855_v28 = vsel %vm2022_vm7, %v3823_v3, %v3421_v40  ;;  %v9587_v40 = vld [vmem:[%s10013_s21 + $0x558] sm:$0xff] }
 0x1ac   : > { %16419 = vst [vmem:[#allocation116_spill] sm:$0xff] %v11222_v20  ;;  %v11229_v24 = vpop.f32.mrb[3].mxu1  ;;  %v3918_v17 = vsel %vm2088_vm9, %v3886_v4, %v11218_v60  ;;  %v917_v56 = vrot.slane %v9587_v40, 4  ;;  %v9589_v47 = vld [vmem:[%s10013_s21 + $0x438] sm:$0xff] }
 0x1ad   : > { %16420 = vst [vmem:[#allocation117_spill] sm:$0xff] %v11229_v24  ;;  %v11235_v2 = vpop.permute.xlu1 %1756  ;;  %v3517_v25 = vpop.permute.xlu0 %3516  ;;  %v890_v4 = vrot.slane %v9589_v47, 4  ;;  %v597_v24 = vld [vmem:[%s10013_s21 + $0x948] sm:$0xff] }
 0x1ae   : > { %16421 = vst [vmem:[#allocation118_spill] sm:$0xff] %v11235_v2  ;;  %v3887_v32 = vsel %vm2055_vm8, %v3855_v28, %v3517_v25 }
 0x1af   : > { %1222 = vrot.lane.b32.xlu1 %v11239_v8, %s16319_s13  ;;  %1148 = vrot.lane.b32.xlu0 %v10047_v30, %s16272_s23  ;;  %v3919_v3 = vsel %vm2088_vm9, %v3887_v32, %v11235_v2  ;;  %v11282_v22 = vsel %vm853_vm2, %v889_v61, %v890_v4 }
 0x1b0   : > { %16426 = vst [vmem:[#allocation123_spill] sm:$0xff] %v11282_v22 }
 0x1b1   : > { %v11251_v27 = vpop.permute.xlu1 %1134  ;;  %v3647_v11 = vpop.permute.xlu0 %3646 }
 0x1b2   : > { %16423 = vst [vmem:[#allocation120_spill] sm:$0xff] %v11251_v27  ;;  %v3950_v7 = vsel %vm2121_vm10, %v3918_v17, %v3647_v11  ;;  %v9590_v11 = vld [vmem:[%s10013_s21 + $0x2f8] sm:$0xff] }
 0x1b3   : > { %1602 = vrot.lane.b32.xlu1 %v11248_v55, %s16278_s12  ;;  %1508 = vrot.lane.b32.xlu0 %v11260_v31, %s16274_s26 }
 0x1b4   : > { %9022 = vmatprep.mubr.msk.f32.mxu1 %vm2164_vm11, %v3950_v7  ;;  %v11279_v7 = vsel %vm853_vm2, %v915_v13, %v917_v56  ;;  %v2155_v13 = vld [vmem:[%s16033_s1 + $0x8] sm:$0xff]  ;;  %v9591_v56 = vld [vmem:[%s10013_s21 + $0x440] sm:$0xff] }
 0x1b5   : > { %v11268_v25 = vpop.permute.xlu1 %1136  ;;  %v3649_v28 = vpop.permute.xlu0 %3648  ;;  %16425 = vst [vmem:[#allocation122_spill] sm:$0xff] %v11279_v7 }
 0x1b6   : > { %16424 = vst [vmem:[#allocation121_spill] sm:$0xff] %v11268_v25  ;;  %v3951_v17 = vsel %vm2121_vm10, %v3919_v3, %v3649_v28  ;;  %v892_v3 = vrot.slane %v9591_v56, 4  ;;  %v410_v28 = vld [vmem:[%s10013_s21 + $0x350] sm:$0xff] }
 0x1b7   : > { %1224 = vrot.lane.b32.xlu1 %v9590_v11, %s16319_s13  ;;  %3242 = vrot.lane.b32.xlu0 %v10064_v39, %s16319_s13  ;;  %v2154_v39 = vld [vmem:[%s16033_s1] sm:$0xff] }
 0x1b8   : > { %9023 = vmatmul.mubr.msk.f32.gmra.mrb[16].mxu1 %vm2164_vm11, %v3951_v17  ;;  %v9159_v61 = vpack.c.bf16 %v2155_v13, %v2154_v39  ;;  %v409_v17 = vld [vmem:[%s10013_s21 + $0x348] sm:$0xff]  ;;  %v2157_v39 = vld [vmem:[%s16033_s1 + $0x18] sm:$0xff]  ;;  %v2612_v13 = vrot.slane %v410_v28, 6  ;;  %v11310_v60 = vsel %vm853_vm2, %v890_v4, %v892_v3  ;;  %v2158_v28 = vld [vmem:[%s16033_s1 + $0x20] sm:$0xf] }
 0x1b9   : > { %v3233_v32 = vpop.permute.xlu1 %3232  ;;  %v3231_v47 = vpop.permute.xlu0 %3230  ;;  %v2611_v2 = vrot.slane %v409_v17, 6  ;;  %16428 = vst [vmem:[#allocation125_spill] sm:$0xff] %v11310_v60  ;;  %v9163_v6 = vpack.c.bf16 %v2157_v39, %v2156_v23  ;;  %v2614_v17 = vrot.slane %v10874_v43, 6 }
 0x1ba   : > { %9160 = vmatprep.subr.bf16.mxu0 %v9159_v61 }
 0x1bb   : > { %1604 = vrot.lane.b32.xlu1 %v11279_v7, %s16278_s12  ;;  %1318 = vrot.lane.b32.xlu0 %v11282_v22, %s16323_s18  ;;  %v2613_v4 = vsel %vm2565_vm0, %v2611_v2, %v2612_v13 }
 0x1bc   : > { %9162 = vmatpush3.bf16.msra.mxu0 %v9159_v61  ;;  %v3728_v61 = vsel %vm1890_vm3, %v2613_v4, %v11251_v27 }
 0x1bd   : > { %v11297_v11 = vpop.permute.xlu1 %1446  ;;  %v3327_v30 = vpop.permute.xlu0 %3326  ;;  %9164 = vmatprep.subr.bf16.mxu0 %v9163_v6  ;;  %v3760_v43 = vsel %vm1923_vm4, %v3728_v61, %v3231_v47 }
 0x1be   : > { %16427 = vst [vmem:[#allocation124_spill] sm:$0xff] %v11297_v11 }
 0x1bf   : > { %3244 = vrot.lane.b32.xlu1 %v10061_v37, %s16319_s13  ;;  %1698 = vrot.lane.b32.xlu0 %v10624_v38, %s16276_s10 }
 0x1c0   : > { %9166 = vmatpush3.bf16.msra.mxu0 %v9163_v6  ;;  %v3792_v6 = vsel %vm1956_vm5, %v3760_v43, %v3327_v30 }
 0x1c1   : > { %v11312_v20 = vpop.permute.xlu1 %1448  ;;  %v3329_v37 = vpop.permute.xlu0 %3328  ;;  %8938 = vmatprep.subr.msk.mxu0 %vm853_vm2, %v2158_v28  ;;  %v3824_v47 = vsel %vm1989_vm6, %v3792_v6, %v11297_v11  ;;  %v9600_v11 = vld [vmem:[%s10013_s21 + $0x330] sm:$0xff] }
 0x1c2   : > { %16429 = vst [vmem:[#allocation126_spill] sm:$0xff] %v11312_v20 }
 0x1c3   : > { %1320 = vrot.lane.b32.xlu1 %v11310_v60, %s16323_s18  ;;  %3338 = vrot.lane.b32.xlu0 %v10075_v45, %s16323_s18  ;;  %v2615_v45 = vsel %vm2565_vm0, %v2612_v13, %v2614_v17 }
 0x1c4   : > { %8939 = vmatpush3.msk.msra.mxu0 %vm853_vm2, %v2158_v28  ;;  %v3729_v4 = vsel %vm1890_vm3, %v2615_v45, %v11268_v25 }
 0x1c5   : > { %v3425_v23 = vpop.permute.xlu1 %3424  ;;  %v3423_v3 = vpop.permute.xlu0 %3422  ;;  %v3761_v13 = vsel %vm1923_vm4, %v3729_v4, %v3233_v32 }
 0x1c6   : > { %v3793_v30 = vsel %vm1956_vm5, %v3761_v13, %v3329_v37  ;;  %v3856_v17 = vsel %vm2022_vm7, %v3824_v47, %v3423_v3  ;;  %v9594_v13 = vld [vmem:[%s10013_s21 + $0x588] sm:$0xff] }
 0x1c7   : > { %1700 = vrot.lane.b32.xlu1 %v10641_v49, %s16276_s10  ;;  %1458 = vrot.lane.b32.xlu0 %v10072_v44, %s16322_s17  ;;  %v920_v47 = vrot.slane %v9594_v13, 4 }
 0x1c9   : > { %v11334_v2 = vpop.permute.xlu1 %1758  ;;  %v3519_v39 = vpop.permute.xlu0 %3518 }
 0x1ca   : > { %16430 = vst [vmem:[#allocation127_spill] sm:$0xff] %v11334_v2 }
 0x1cb   : > { %v11338_v14 = vpop.f32.mrb[4].mxu1  ;;  %3340 = vrot.lane.b32.xlu1 %v10090_v53, %s16323_s18  ;;  %1794 = vrot.lane.b32.xlu0 %v9587_v40, %s16318_s25  ;;  %v3888_v53 = vsel %vm2055_vm8, %v3856_v17, %v3519_v39  ;;  %v3825_v40 = vsel %vm1989_vm6, %v3793_v30, %v11312_v20  ;;  %v11368_v39 = vld [vmem:[%s10013_s21 + $0x560] sm:$0xff] }
 0x1cc   : > { %16431 = vst [vmem:[#allocation128_spill] sm:$0xff] %v11338_v14  ;;  %v11346_v28 = vpop.f32.mrb[5].mxu1  ;;  %v3857_v32 = vsel %vm2022_vm7, %v3825_v40, %v3425_v23  ;;  %v3920_v3 = vsel %vm2088_vm9, %v3888_v53, %v11334_v2  ;;  %v9593_v23 = vld [vmem:[%s10013_s21 + $0x580] sm:$0xff]  ;;  %v594_v53 = vld [vmem:[%s10013_s21 + $0x930] sm:$0xff] }
 0x1cd   : > { %16432 = vst [vmem:[#allocation129_spill] sm:$0xff] %v11346_v28  ;;  %v11350_v61 = vpop.permute.xlu1 %1760  ;;  %v3521_v45 = vpop.permute.xlu0 %3520  ;;  %v919_v4 = vrot.slane %v9593_v23, 4  ;;  %v416_v20 = vld [vmem:[%s10013_s21 + $0x380] sm:$0xff] }
 0x1ce   : > { %16433 = vst [vmem:[#allocation130_spill] sm:$0xff] %v11350_v61  ;;  %v3889_v6 = vsel %vm2055_vm8, %v3857_v32, %v3521_v45  ;;  %v11383_v32 = vld [vmem:[%s10013_s21 + $0x448] sm:$0xff]  ;;  %v2616_v60 = vrot.slane %v416_v20, 6 }
 0x1cf   : > { %1510 = vrot.lane.b32.xlu1 %v9591_v56, %s16274_s26  ;;  %1460 = vrot.lane.b32.xlu0 %v10087_v52, %s16322_s17  ;;  %v3921_v17 = vsel %vm2088_vm9, %v3889_v6, %v11350_v61  ;;  %v3024_v6 = vrot.slane %v594_v53, 6  ;;  %v596_v61 = vld [vmem:[%s10013_s21 + $0x940] sm:$0xff] }
 0x1d0   : > { %v3027_v14 = vrot.slane %v596_v61, 6 }
 0x1d1   : > { %v11359_v37 = vpop.permute.xlu1 %1138  ;;  %v3651_v43 = vpop.permute.xlu0 %3650 }
 0x1d2   : > { %v3952_v56 = vsel %vm2121_vm10, %v3920_v3, %v3651_v43  ;;  %v11388_v3 = vld [vmem:[%s10013_s21 + $0x328] sm:$0xff]  ;;  %v11394_v43 = vsel %vm853_vm2, %v919_v4, %v920_v47 }
 0x1d3   : > { %3434 = vrot.lane.b32.xlu1 %v10100_v59, %s16274_s26  ;;  %1796 = vrot.lane.b32.xlu0 %v11368_v39, %s16318_s25  ;;  %v595_v59 = vld [vmem:[%s10013_s21 + $0x938] sm:$0xff]  ;;  %16435 = vst [vmem:[#allocation132_spill] sm:$0xff] %v11394_v43 }
 0x1d4   : > { %9025 = vmatprep.mubr.msk.f32.mxu1 %vm2164_vm11, %v3952_v56  ;;  %v3025_v56 = vrot.slane %v595_v59, 6  ;;  %v9599_v59 = vld [vmem:[%s10013_s21 + $0x470] sm:$0xff] }
 0x1d5   : > { %v11375_v30 = vpop.permute.xlu1 %1140  ;;  %v3653_v45 = vpop.permute.xlu0 %3652  ;;  %v895_v52 = vrot.slane %v9599_v59, 4 }
 0x1d6   : > { %16434 = vst [vmem:[#allocation131_spill] sm:$0xff] %v11375_v30  ;;  %v3953_v40 = vsel %vm2121_vm10, %v3921_v17, %v3653_v45  ;;  %v3026_v17 = vsel %vm2565_vm0, %v3024_v6, %v3025_v56  ;;  %v11402_v45 = vld [vmem:[%s10013_s21 + $0x590] sm:$0xff] }
 0x1d7   : > { %1512 = vrot.lane.b32.xlu1 %v11383_v32, %s16274_s26  ;;  %1226 = vrot.lane.b32.xlu0 %v11388_v3, %s16319_s13  ;;  %v922_v4 = vrot.slane %v11402_v45, 4 }
 0x1d8   : > { %9026 = vmatmul.mubr.msk.f32.gmra.mrb[18].mxu1 %vm2164_vm11, %v3953_v40  ;;  %v9598_v40 = vld [vmem:[%s10013_s21 + $0x468] sm:$0xff] }
 0x1d9   : > { %v3237_v23 = vpop.permute.xlu1 %3236  ;;  %v3235_v13 = vpop.permute.xlu0 %3234  ;;  %v894_v53 = vrot.slane %v9598_v40, 4  ;;  %v11416_v6 = vsel %vm853_vm2, %v920_v47, %v922_v4  ;;  %v11430_v47 = vld [vmem:[%s10013_s21 + $0x478] sm:$0xff]  ;;  %v3066_v4 = vrot.slane %v596_v61, 2 }
 0x1da   : > { %16437 = vst [vmem:[#allocation134_spill] sm:$0xff] %v11416_v6 }
 0x1db   : > { %3436 = vrot.lane.b32.xlu1 %v10108_v1, %s16274_s26  ;;  %1606 = vrot.lane.b32.xlu0 %v11394_v43, %s16278_s12  ;;  %v417_v1 = vld [vmem:[%s10013_s21 + $0x388] sm:$0xff]  ;;  %v11419_v40 = vsel %vm853_vm2, %v894_v53, %v895_v52  ;;  %v3067_v53 = vrot.slane %v597_v24, 2 }
 0x1dc   : > { %16438 = vst [vmem:[#allocation135_spill] sm:$0xff] %v11419_v40  ;;  %v2617_v22 = vrot.slane %v417_v1, 6  ;;  %v2619_v1 = vrot.slane %v10972_v58, 6 }
 0x1dd   : > { %v11407_v44 = vpop.permute.xlu1 %1450  ;;  %v3331_v2 = vpop.permute.xlu0 %3330 }
 0x1de   : > { %16436 = vst [vmem:[#allocation133_spill] sm:$0xff] %v11407_v44  ;;  %v2618_v20 = vsel %vm2565_vm0, %v2616_v60, %v2617_v22  ;;  %v2620_v60 = vsel %vm2565_vm0, %v2617_v22, %v2619_v1 }
 0x1df   : > { %1228 = vrot.lane.b32.xlu1 %v9600_v11, %s16319_s13  ;;  %3530 = vrot.lane.b32.xlu0 %v3026_v17, %s16278_s12  ;;  %v3028_v11 = vsel %vm2565_vm0, %v3025_v56, %v3027_v14  ;;  %v897_v17 = vrot.slane %v11430_v47, 4  ;;  %v3068_v56 = vsel %vm712_vm1, %v3066_v4, %v3067_v53  ;;  %v3730_v61 = vsel %vm1890_vm3, %v2618_v20, %v11359_v37 }
 0x1e0   : > { %v3762_v58 = vsel %vm1923_vm4, %v3730_v61, %v3235_v13  ;;  %v3139_v4 = vrot.slane %v598_v48, 6  ;;  %v3069_v20 = vrot.slane %v598_v48, 2  ;;  %v3731_v22 = vsel %vm1890_vm3, %v2620_v60, %v11375_v30 }
 0x1e1   : > { %v11421_v59 = vpop.permute.xlu1 %1452  ;;  %v3333_v28 = vpop.permute.xlu0 %3332  ;;  %v11439_v14 = vsel %vm853_vm2, %v895_v52, %v897_v17  ;;  %v3138_v17 = vrot.slane %v597_v24, 6 }
 0x1e2   : > { %16439 = vst [vmem:[#allocation136_spill] sm:$0xff] %v11421_v59  ;;  %16440 = vst [vmem:[#allocation137_spill] sm:$0xff] %v11439_v14  ;;  %v3070_v60 = vsel %vm712_vm1, %v3067_v53, %v3069_v20 }
 0x1e3   : > { %1608 = vrot.lane.b32.xlu1 %v11416_v6, %s16278_s12  ;;  %1322 = vrot.lane.b32.xlu0 %v11419_v40, %s16323_s18  ;;  %v3140_v24 = vsel %vm2565_vm0, %v3138_v17, %v3139_v4 }
 0x1e5   : > { %v3429_v49 = vpop.permute.xlu1 %3428  ;;  %v3427_v38 = vpop.permute.xlu0 %3426 }
 0x1e7   : > { %3532 = vrot.lane.b32.xlu1 %v3028_v11, %s16278_s12  ;;  %1702 = vrot.lane.b32.xlu0 %v10722_v29, %s16276_s10  ;;  %v3794_v11 = vsel %vm1956_vm5, %v3762_v58, %v3331_v2  ;;  %v3763_v2 = vsel %vm1923_vm4, %v3731_v22, %v3237_v23  ;;  %v599_v22 = vld [vmem:[%s10013_s21 + $0x958] sm:$0xff] }
 0x1e8   : > { %v3826_v61 = vsel %vm1989_vm6, %v3794_v11, %v11407_v44  ;;  %v3141_v53 = vrot.slane %v599_v22, 6 }
 0x1e9   : > { %v3525_v40 = vpop.permute.xlu1 %3524  ;;  %v3523_v62 = vpop.permute.xlu0 %3522  ;;  %v3858_v58 = vsel %vm2022_vm7, %v3826_v61, %v3427_v38 }
 0x1ea   : > { %v3890_v48 = vsel %vm2055_vm8, %v3858_v58, %v3523_v62 }
 0x1eb   : > { %v11448_v25 = vpop.f32.mrb[6].mxu1  ;;  %1324 = vrot.lane.b32.xlu1 %v11439_v14, %s16323_s18  ;;  %3586 = vrot.lane.b32.xlu0 %v3068_v56, %s16276_s10  ;;  %v3795_v56 = vsel %vm1956_vm5, %v3763_v2, %v3333_v28 }
 0x1ec   : > { %16441 = vst [vmem:[#allocation138_spill] sm:$0xff] %v11448_v25  ;;  %v11453_v52 = vpop.f32.mrb[7].mxu1  ;;  %v3827_v38 = vsel %vm1989_vm6, %v3795_v56, %v11421_v59  ;;  %v9610_v59 = vld [vmem:[%s10013_s21 + $0x368] sm:$0xff] }
 0x1ed   : > { %16442 = vst [vmem:[#allocation139_spill] sm:$0xff] %v11453_v52  ;;  %v11457_v1 = vpop.permute.xlu1 %3580  ;;  %v11459_v13 = vpop.permute.xlu0 %3578  ;;  %v3859_v61 = vsel %vm2022_vm7, %v3827_v38, %v3429_v49 }
 0x1ee   : > { %16443 = vst [vmem:[#allocation140_spill] sm:$0xff] %v11457_v1  ;;  %16444 = vst [vmem:[#allocation141_spill] sm:$0xff] %v11459_v13  ;;  %v3922_v23 = vsel %vm2088_vm9, %v3890_v48, %v11459_v13  ;;  %v3891_v62 = vsel %vm2055_vm8, %v3859_v61, %v3525_v40  ;;  %v3142_v40 = vsel %vm2565_vm0, %v3139_v4, %v3141_v53 }
 0x1ef   : > { %1798 = vrot.lane.b32.xlu1 %v11402_v45, %s16318_s25  ;;  %1704 = vrot.lane.b32.xlu0 %v10739_v50, %s16276_s10  ;;  %v3923_v17 = vsel %vm2088_vm9, %v3891_v62, %v11457_v1 }
 0x1f1   : > { %v11475_v11 = vpop.permute.xlu1 %1142  ;;  %v3655_v28 = vpop.permute.xlu0 %3654 }
 0x1f2   : > { %16445 = vst [vmem:[#allocation142_spill] sm:$0xff] %v11475_v11  ;;  %v3954_v2 = vsel %vm2121_vm10, %v3922_v23, %v3655_v28  ;;  %v9604_v28 = vld [vmem:[%s10013_s21 + $0x5c0] sm:$0xff] }
 0x1f3   : > { %3662 = vrot.lane.b32.xlu1 %v3140_v24, %s16318_s25  ;;  %3588 = vrot.lane.b32.xlu0 %v3070_v60, %s16276_s10  ;;  %v11501_v24 = vld [vmem:[%s10013_s21 + $0x598] sm:$0xff]  ;;  %v925_v22 = vrot.slane %v9604_v28, 4  ;;  %v9609_v28 = vld [vmem:[%s10013_s21 + $0x4a8] sm:$0xff] }
 0x1f4   : > { %9028 = vmatprep.mubr.msk.f32.mxu1 %vm2164_vm11, %v3954_v2  ;;  %v9603_v60 = vld [vmem:[%s10013_s21 + $0x5b8] sm:$0xff]  ;;  %v11510_v2 = vld [vmem:[%s10013_s21 + $0x360] sm:$0xff]  ;;  %v900_v1 = vrot.slane %v9609_v28, 4 }
 0x1f5   : > { %v11488_v20 = vpop.permute.xlu1 %1144  ;;  %v3657_v56 = vpop.permute.xlu0 %3656  ;;  %v924_v23 = vrot.slane %v9603_v60, 4 }
 0x1f6   : > { %16446 = vst [vmem:[#allocation143_spill] sm:$0xff] %v11488_v20  ;;  %v3955_v49 = vsel %vm2121_vm10, %v3923_v17, %v3657_v56  ;;  %v11524_v17 = vld [vmem:[%s10013_s21 + $0x480] sm:$0xff]  ;;  %v9607_v56 = vld [vmem:[%s10013_s21 + $0x5c8] sm:$0xff] }
 0x1f7   : > { %1514 = vrot.lane.b32.xlu1 %v11430_v47, %s16274_s26  ;;  %1150 = vrot.lane.b32.xlu0 %v10123_v16, %s16272_s23  ;;  %v11517_v61 = vsel %vm853_vm2, %v924_v23, %v925_v22  ;;  %v423_v16 = vld [vmem:[%s10013_s21 + $0x3c0] sm:$0xff] }
 0x1f8   : > { %9029 = vmatmul.mubr.msk.f32.gmra.mrb[20].mxu1 %vm2164_vm11, %v3955_v49  ;;  %16448 = vst [vmem:[#allocation145_spill] sm:$0xff] %v11517_v61  ;;  %v927_v49 = vrot.slane %v9607_v56, 4  ;;  %v2622_v14 = vrot.slane %v423_v16, 6  ;;  %v2624_v16 = vrot.slane %v11070_v12, 6 }
 0x1f9   : > { %v11497_v58 = vpop.permute.xlu1 %3240  ;;  %v3239_v48 = vpop.permute.xlu0 %3238 }
 0x1fa   : > { %v11540_v44 = vsel %vm853_vm2, %v925_v22, %v927_v49  ;;  %v2625_v30 = vsel %vm2565_vm0, %v2622_v14, %v2624_v16 }
 0x1fb   : > { %3664 = vrot.lane.b32.xlu1 %v3142_v40, %s16318_s25  ;;  %1800 = vrot.lane.b32.xlu0 %v11501_v24, %s16318_s25  ;;  %v9608_v40 = vld [vmem:[%s10013_s21 + $0x4a0] sm:$0xff]  ;;  %16450 = vst [vmem:[#allocation147_spill] sm:$0xff] %v11540_v44 }
 0x1fc   : > { %v899_v60 = vrot.slane %v9608_v40, 4 }
 0x1fd   : > { %v11507_v38 = vpop.permute.xlu1 %1454  ;;  %v3335_v4 = vpop.permute.xlu0 %3334 }
 0x1fe   : > { %16447 = vst [vmem:[#allocation144_spill] sm:$0xff] %v11507_v38  ;;  %v11543_v25 = vsel %vm853_vm2, %v899_v60, %v900_v1 }
 0x1ff   : > { %1230 = vrot.lane.b32.xlu1 %v11510_v2, %s16319_s13  ;;  %1152 = vrot.lane.b32.xlu0 %v10134_v26, %s16272_s23  ;;  %v422_v26 = vld [vmem:[%s10013_s21 + $0x3b8] sm:$0xff]  ;;  %16451 = vst [vmem:[#allocation148_spill] sm:$0xff] %v11543_v25 }
 0x200   : > { %v2621_v52 = vrot.slane %v422_v26, 6 }
 0x201   : > { %v11519_v62 = vpop.permute.xlu1 %1456  ;;  %v3337_v53 = vpop.permute.xlu0 %3336 }
 0x202   : > { %16449 = vst [vmem:[#allocation146_spill] sm:$0xff] %v11519_v62  ;;  %v2623_v29 = vsel %vm2565_vm0, %v2621_v52, %v2622_v14 }
 0x203   : > { %1610 = vrot.lane.b32.xlu1 %v11517_v61, %s16278_s12  ;;  %1516 = vrot.lane.b32.xlu0 %v11524_v17, %s16274_s26 }
 0x205   : > { %v11531_v23 = vpop.permute.xlu1 %1218  ;;  %v3431_v13 = vpop.permute.xlu0 %3430 }
 0x207   : > { %1232 = vrot.lane.b32.xlu1 %v9610_v59, %s16319_s13  ;;  %3246 = vrot.lane.b32.xlu0 %v10151_v35, %s16319_s13  ;;  %v9611_v35 = vld [vmem:[%s10013_s21 + $0x4b0] sm:$0xff] }
 0x208   : > { %v902_v22 = vrot.slane %v9611_v35, 4 }
 0x209   : > { %v3527_v40 = vpop.permute.xlu1 %3526  ;;  %v3433_v28 = vpop.permute.xlu0 %3432 }
 0x20a   : > { %v11565_v26 = vsel %vm853_vm2, %v900_v1, %v902_v22 }
 0x20b   : > { %v11545_v50 = vpop.f32.mrb[8].mxu1  ;;  %1612 = vrot.lane.b32.xlu1 %v11540_v44, %s16278_s12  ;;  %1326 = vrot.lane.b32.xlu0 %v11543_v25, %s16323_s18  ;;  %16454 = vst [vmem:[#allocation151_spill] sm:$0xff] %v11565_v26 }
 0x20c   : > { %16452 = vst [vmem:[#allocation149_spill] sm:$0xff] %v11545_v50  ;;  %v11551_v59 = vpop.f32.mrb[9].mxu1  ;;  %v3732_v50 = vsel %vm1890_vm3, %v2623_v29, %v11475_v11  ;;  %v604_v11 = vld [vmem:[%s10013_s21 + $0x980] sm:$0xff] }
 0x20d   : > { %16453 = vst [vmem:[#allocation150_spill] sm:$0xff] %v11551_v59  ;;  %v11554_v49 = vpop.permute.xlu1 %1314  ;;  %v11556_v60 = vpop.permute.xlu0 %1220  ;;  %v3764_v52 = vsel %vm1923_vm4, %v3732_v50, %v3239_v48 }
 0x20e   : > { %v3796_v12 = vsel %vm1956_vm5, %v3764_v52, %v3335_v4 }
 0x20f   : > { %3248 = vrot.lane.b32.xlu1 %v10148_v34, %s16319_s13  ;;  %1706 = vrot.lane.b32.xlu0 %v10820_v46, %s16276_s10  ;;  %v3733_v34 = vsel %vm1890_vm3, %v2625_v30, %v11488_v20  ;;  %v3828_v50 = vsel %vm1989_vm6, %v3796_v12, %v11507_v38  ;;  %v9620_v38 = vld [vmem:[%s10013_s21 + $0x2a8] sm:$0xff] }
 0x210   : > { %v3765_v14 = vsel %vm1923_vm4, %v3733_v34, %v11497_v58  ;;  %v3860_v4 = vsel %vm2022_vm7, %v3828_v50, %v3431_v13  ;;  %v9614_v50 = vld [vmem:[%s10013_s21 + $0x5f8] sm:$0xff] }
 0x211   : > { %v11569_v59 = vpop.permute.xlu1 %3582  ;;  %v3529_v25 = vpop.permute.xlu0 %3528  ;;  %v3797_v48 = vsel %vm1956_vm5, %v3765_v14, %v3337_v53 }
 0x212   : > { %16455 = vst [vmem:[#allocation152_spill] sm:$0xff] %v11569_v59  ;;  %v3829_v16 = vsel %vm1989_vm6, %v3797_v48, %v11519_v62  ;;  %v930_v48 = vrot.slane %v9614_v50, 4  ;;  %v11663_v50 = vld [vmem:[%s10013_s21 + $0x600] sm:$0xff]  ;;  %v603_v62 = vld [vmem:[%s10013_s21 + $0x978] sm:$0xff] }
 0x213   : > { %1328 = vrot.lane.b32.xlu1 %v11565_v26, %s16323_s18  ;;  %3342 = vrot.lane.b32.xlu0 %v10174_v54, %s16323_s18  ;;  %v3892_v54 = vsel %vm2055_vm8, %v3860_v4, %v3527_v40  ;;  %v3861_v13 = vsel %vm2022_vm7, %v3829_v16, %v3433_v28  ;;  %v11637_v16 = vld [vmem:[%s10013_s21 + $0x4b8] sm:$0xff]  ;;  %16462 = vst [vmem:[#allocation159_spill] sm:$0xff] %v11663_v50 }
 0x214   : > { %v3924_v30 = vsel %vm2088_vm9, %v3892_v54, %v11569_v59  ;;  %v3893_v40 = vsel %vm2055_vm8, %v3861_v13, %v3529_v25  ;;  %16458 = vst [vmem:[#allocation155_spill] sm:$0xff] %v11637_v16 }
 0x215   : > { %v11580_v1 = vpop.permute.xlu1 %3584  ;;  %v11582_v29 = vpop.permute.xlu0 %1316 }
 0x216   : > { %16456 = vst [vmem:[#allocation153_spill] sm:$0xff] %v11580_v1  ;;  %v3925_v52 = vsel %vm2088_vm9, %v3893_v40, %v11580_v1 }
 0x217   : > { %1708 = vrot.lane.b32.xlu1 %v10837_v42, %s16276_s10  ;;  %1462 = vrot.lane.b32.xlu0 %v10171_v51, %s16322_s17  ;;  %v9619_v51 = vld [vmem:[%s10013_s21 + $0x4e0] sm:$0xff]  ;;  %v3032_v42 = vrot.slane %v603_v62, 6 }
 0x218   : > { %v905_v1 = vrot.slane %v9619_v51, 4 }
 0x219   : > { %v11597_v22 = vpop.permute.xlu1 %1146  ;;  %v3659_v58 = vpop.permute.xlu0 %3658 }
 0x21a   : > { %16457 = vst [vmem:[#allocation154_spill] sm:$0xff] %v11597_v22  ;;  %v3956_v53 = vsel %vm2121_vm10, %v3924_v30, %v3659_v58  ;;  %v601_v30 = vld [vmem:[%s10013_s21 + $0x968] sm:$0xff]  ;;  %v602_v58 = vld [vmem:[%s10013_s21 + $0x970] sm:$0xff] }
 0x21b   : > { %3344 = vrot.lane.b32.xlu1 %v10189_v0, %s16323_s18  ;;  %1802 = vrot.lane.b32.xlu0 %v9607_v56, %s16318_s25  ;;  %v11624_v56 = vld [vmem:[%s10013_s21 + $0x5d0] sm:$0xff]  ;;  %v3029_v13 = vrot.slane %v601_v30, 6  ;;  %v3030_v40 = vrot.slane %v602_v58, 6  ;;  %v932_v30 = vrot.slane %v11663_v50, 4  ;;  %v9618_v58 = vld [vmem:[%s10013_s21 + $0x4d8] sm:$0xff] }
 0x21c   : > { %9031 = vmatprep.mubr.msk.f32.mxu1 %vm2164_vm11, %v3956_v53 }
 0x21d   : > { %v3661_v12 = vpop.permute.xlu1 %3660  ;;  %v11610_v34 = vpop.permute.xlu0 %1506 }
 0x21e   : > { %v3957_v28 = vsel %vm2121_vm10, %v3925_v52, %v3661_v12 }
 0x21f   : > { %1518 = vrot.lane.b32.xlu1 %v9611_v35, %s16274_s26  ;;  %1464 = vrot.lane.b32.xlu0 %v10186_v63, %s16322_s17  ;;  %v9613_v35 = vld [vmem:[%s10013_s21 + $0x5f0] sm:$0xff]  ;;  %v904_v63 = vrot.slane %v9618_v58, 4  ;;  %v11679_v58 = vsel %vm853_vm2, %v930_v48, %v932_v30  ;;  %v3072_v30 = vrot.slane %v604_v11, 2 }
 0x220   : > { %9032 = vmatmul.mubr.msk.f32.gmra.mrb[22].mxu1 %vm2164_vm11, %v3957_v28  ;;  %v929_v14 = vrot.slane %v9613_v35, 4  ;;  %16463 = vst [vmem:[#allocation160_spill] sm:$0xff] %v11679_v58 }
 0x221   : > { %v11617_v0 = vpop.permute.xlu1 %1222  ;;  %v11619_v25 = vpop.permute.xlu0 %1148  ;;  %v11682_v51 = vsel %vm853_vm2, %v904_v63, %v905_v1 }
 0x222   : > { %v11647_v53 = vsel %vm853_vm2, %v929_v14, %v930_v48  ;;  %v3031_v14 = vsel %vm2565_vm0, %v3029_v13, %v3030_v40  ;;  %v9622_v13 = vld [vmem:[%s10013_s21 + $0x3a0] sm:$0xff]  ;;  %16464 = vst [vmem:[#allocation161_spill] sm:$0xff] %v11682_v51  ;;  %v11694_v48 = vld [vmem:[%s10013_s21 + $0x4e8] sm:$0xff] }
 0x223   : > { %3438 = vrot.lane.b32.xlu1 %v10202_v9, %s16274_s26  ;;  %1804 = vrot.lane.b32.xlu0 %v11624_v56, %s16318_s25  ;;  %v11642_v9 = vld [vmem:[%s10013_s21 + $0x398] sm:$0xff]  ;;  %16459 = vst [vmem:[#allocation156_spill] sm:$0xff] %v11647_v53  ;;  %16465 = vst [vmem:[#allocation162_spill] sm:$0xff] %v11694_v48  ;;  %v907_v63 = vrot.slane %v11694_v48, 4 }
 0x225   : > { %v11630_v4 = vpop.permute.xlu1 %1602  ;;  %v11632_v54 = vpop.permute.xlu0 %1508 }
 0x227   : > { %1520 = vrot.lane.b32.xlu1 %v11637_v16, %s16274_s26  ;;  %1234 = vrot.lane.b32.xlu0 %v11642_v9, %s16319_s13 }
 0x229   : > { %v11649_v52 = vpop.permute.xlu1 %1224  ;;  %v11651_v12 = vpop.permute.xlu0 %3242 }
 0x22b   : > { %v11653_v28 = vpop.f32.mrb[10].mxu1  ;;  %3440 = vrot.lane.b32.xlu1 %v10211_v15, %s16274_s26  ;;  %1614 = vrot.lane.b32.xlu0 %v11647_v53, %s16278_s12  ;;  %v605_v53 = vld [vmem:[%s10013_s21 + $0x988] sm:$0xff] }
 0x22c   : > { %16460 = vst [vmem:[#allocation157_spill] sm:$0xff] %v11653_v28  ;;  %v11659_v35 = vpop.f32.mrb[11].mxu1  ;;  %v854_v28 = vrot.slane %v9620_v38, 4 }
 0x22d   : > { %16461 = vst [vmem:[#allocation158_spill] sm:$0xff] %v11659_v35  ;;  %v11668_v59 = vpop.permute.xlu1 %1604  ;;  %v11670_v15 = vpop.permute.xlu0 %1318  ;;  %v9621_v35 = vld [vmem:[%s10013_s21 + $0x2b0] sm:$0xff] }
 0x22e   : > { %v855_v26 = vrot.slane %v9621_v35, 4  ;;  %v3033_v35 = vsel %vm2565_vm0, %v3030_v40, %v3032_v42 }
 0x22f   : > { %1236 = vrot.lane.b32.xlu1 %v9622_v13, %s16319_s13  ;;  %3534 = vrot.lane.b32.xlu0 %v3031_v14, %s16278_s12  ;;  %v3071_v14 = vrot.slane %v603_v62, 2  ;;  %v11712_v62 = vsel %vm853_vm2, %v905_v1, %v907_v63  ;;  %v3074_v63 = vrot.slane %v605_v53, 2 }
 0x230   : > { %v856_v38 = vsel %vm853_vm2, %v854_v28, %v855_v26  ;;  %16466 = vst [vmem:[#allocation163_spill] sm:$0xff] %v11712_v62 }
 0x231   : > { %v11684_v46 = vpop.permute.xlu1 %3244  ;;  %v1699_v20 = vpop.permute.xlu0 %1698  ;;  %v1891_v13 = vsel %vm1890_vm3, %v856_v38, %v10956_v33  ;;  %v3073_v40 = vsel %vm712_vm1, %v3071_v14, %v3072_v30  ;;  %v16469_v14 = vld [vmem:[#allocation92_spill] sm:$0xff] }
 0x233   : > { %1616 = vrot.lane.b32.xlu1 %v11679_v58, %s16278_s12  ;;  %1330 = vrot.lane.b32.xlu0 %v11682_v51, %s16323_s18  ;;  %v1924_v58 = vsel %vm1923_vm4, %v1891_v13, %v11531_v23  ;;  %v857_v51 = vrot.slane %v11159_v36, 4  ;;  %v16468_v36 = vld [vmem:[#allocation44_spill] sm:$0xff] }
 0x234   : > { %v1957_v42 = vsel %vm1956_vm5, %v1924_v58, %v11554_v49  ;;  %v3143_v58 = vrot.slane %v604_v11, 6  ;;  %v16470_v11 = vld [vmem:[#allocation89_spill] sm:$0xff] }
 0x235   : > { %v11699_v16 = vpop.permute.xlu1 %1320  ;;  %v11701_v28 = vpop.permute.xlu0 %3338  ;;  %v858_v23 = vsel %vm853_vm2, %v855_v26, %v857_v51  ;;  %v1990_v13 = vsel %vm1989_vm6, %v1957_v42, %v16468_v36 }
 0x236   : > { %v2023_v49 = vsel %vm2022_vm7, %v1990_v13, %v11610_v34  ;;  %v1892_v26 = vsel %vm1890_vm3, %v858_v23, %v16469_v14 }
 0x237   : > { %3536 = vrot.lane.b32.xlu1 %v3033_v35, %s16278_s12  ;;  %1710 = vrot.lane.b32.xlu0 %v10918_v57, %s16276_s10  ;;  %v2056_v1 = vsel %vm2055_vm8, %v2023_v49, %v11630_v4  ;;  %v3144_v35 = vrot.slane %v605_v53, 6  ;;  %v1925_v13 = vsel %vm1923_vm4, %v1892_v26, %v11556_v60  ;;  %v3075_v53 = vsel %vm712_vm1, %v3072_v30, %v3074_v63  ;;  %v606_v49 = vld [vmem:[%s10013_s21 + $0x990] sm:$0xff] }
 0x238   : > { %v2089_v51 = vsel %vm2088_vm9, %v2056_v1, %v1699_v20  ;;  %v1958_v4 = vsel %vm1956_vm5, %v1925_v13, %v11582_v29  ;;  %v16472_v1 = vld [vmem:[#allocation46_spill] sm:$0xff]  ;;  %v3146_v30 = vrot.slane %v606_v49, 6  ;;  %v9625_v49 = vld [vmem:[%s10013_s21 + $0x628] sm:$0xff] }
 0x239   : > { %v1701_v38 = vpop.permute.xlu1 %1700  ;;  %v11715_v33 = vpop.permute.xlu0 %1458  ;;  %v3145_v20 = vsel %vm2565_vm0, %v3143_v58, %v3144_v35  ;;  %v1991_v29 = vsel %vm1989_vm6, %v1958_v4, %v16472_v1  ;;  %v9629_v1 = vld [vmem:[%s10013_s21 + $0x2e8] sm:$0xff] }
 0x23a   : > { %16467 = vst [vmem:[#allocation164_spill] sm:$0xff] %v11715_v33  ;;  %v2024_v26 = vsel %vm2022_vm7, %v1991_v29, %v11632_v54  ;;  %v16473_v54 = vld [vmem:[#allocation19_spill] sm:$0xff]  ;;  %v1008_v29 = vrot.slane %v9625_v49, 4  ;;  %v860_v36 = vrot.slane %v9629_v1, 4 }
 0x23b   : > { %1332 = vrot.lane.b32.xlu1 %v11712_v62, %s16323_s18  ;;  %3590 = vrot.lane.b32.xlu0 %v3073_v40, %s16276_s10  ;;  %v2057_v58 = vsel %vm2055_vm8, %v2024_v26, %v11668_v59  ;;  %v3147_v59 = vsel %vm2565_vm0, %v3144_v35, %v3146_v30  ;;  %v9626_v35 = vld [vmem:[%s10013_s21 + $0x630] sm:$0xff]  ;;  %v9633_v62 = vld [vmem:[%s10013_s21 + $0x518] sm:$0xff] }
 0x23c   : > { %v2090_v63 = vsel %vm2088_vm9, %v2057_v58, %v1701_v38  ;;  %v1009_v26 = vrot.slane %v9626_v35, 4  ;;  %v9628_v35 = vld [vmem:[%s10013_s21 + $0x2e0] sm:$0xff] }
 0x23d   : > { %v11731_v42 = vpop.permute.xlu1 %3340  ;;  %v1795_v34 = vpop.permute.xlu0 %1794  ;;  %v859_v14 = vrot.slane %v9628_v35, 4 }
 0x23e   : > { %v2122_v40 = vsel %vm2121_vm10, %v2089_v51, %v1795_v34 }
 0x23f   : > { %1806 = vrot.lane.b32.xlu1 %v11663_v50, %s16318_s25  ;;  %1712 = vrot.lane.b32.xlu0 %v16470_v11, %s16276_s10  ;;  %v910_v11 = vrot.slane %v9633_v62, 4  ;;  %v861_v57 = vsel %vm853_vm2, %v859_v14, %v860_v36 }
 0x240   : > { %8940 = vmatprep.mubr.msk.f32.mxu0 %vm2164_vm11, %v2122_v40  ;;  %v1893_v62 = vsel %vm1890_vm3, %v861_v57, %v11054_v10 }
 0x241   : > { %v11745_v23 = vpop.permute.xlu1 %1510  ;;  %v11747_v60 = vpop.permute.xlu0 %1460  ;;  %v1926_v14 = vsel %vm1923_vm4, %v1893_v62, %v11617_v0  ;;  %v16485_v0 = vld [vmem:[#allocation53_spill] sm:$0xff] }
 0x242   : > { %16471 = vst [vmem:[#allocation165_spill] sm:$0xff] %v11747_v60 }
 0x243   : > { %3666 = vrot.lane.b32.xlu1 %v3145_v20, %s16318_s25  ;;  %3592 = vrot.lane.b32.xlu0 %v3075_v53, %s16276_s10  ;;  %v11776_v20 = vld [vmem:[%s10013_s21 + $0x608] sm:$0xff] }
 0x244   : > { %16475 = vst [vmem:[#allocation167_spill] sm:$0xff] %v11776_v20 }
 0x245   : > { %v11759_v51 = vpop.permute.xlu1 %3434  ;;  %v1797_v34 = vpop.permute.xlu0 %1796 }
 0x246   : > { %v2123_v13 = vsel %vm2121_vm10, %v2090_v63, %v1797_v34  ;;  %v11787_v63 = vld [vmem:[%s10013_s21 + $0x3d0] sm:$0xff] }
 0x247   : > { %1522 = vrot.lane.b32.xlu1 %v11694_v48, %s16274_s26  ;;  %1154 = vrot.lane.b32.xlu0 %v16473_v54, %s16272_s23  ;;  %16477 = vst [vmem:[#allocation169_spill] sm:$0xff] %v11787_v63  ;;  %v16478_v34 = vld [vmem:[#allocation21_spill] sm:$0xff] }
 0x248   : > { %8941 = vmatmul.mubr.msk.f32.vlgmr.msra.gmra.mrb[0].mxu0 %vm2164_vm11, %v2123_v13  ;;  %v11794_v13 = vsel %vm853_vm2, %v1008_v29, %v1009_v26  ;;  %v11803_v54 = vld [vmem:[%s10013_s21 + $0x4f0] sm:$0xff] }
 0x249   : > { %v11768_v40 = vpop.permute.xlu1 %1512  ;;  %v11770_v38 = vpop.permute.xlu0 %1226  ;;  %16479 = vst [vmem:[#allocation170_spill] sm:$0xff] %v11794_v13  ;;  %16480 = vst [vmem:[#allocation171_spill] sm:$0xff] %v11803_v54 }
 0x24b   : > { %v11772_v4 = vpop.f32.mrb[12].mxu1  ;;  %3668 = vrot.lane.b32.xlu1 %v3147_v59, %s16318_s25  ;;  %1808 = vrot.lane.b32.xlu0 %v11776_v20, %s16318_s25 }
 0x24c   : > { %16474 = vst [vmem:[#allocation166_spill] sm:$0xff] %v11772_v4  ;;  %v11780_v53 = vpop.f32.mrb[13].mxu1  ;;  %v9632_v4 = vld [vmem:[%s10013_s21 + $0x510] sm:$0xff] }
 0x24d   : > { %16476 = vst [vmem:[#allocation168_spill] sm:$0xff] %v11780_v53  ;;  %v11784_v58 = vpop.permute.xlu1 %3436  ;;  %v1607_v30 = vpop.permute.xlu0 %1606  ;;  %v909_v53 = vrot.slane %v9632_v4, 4 }
 0x24f   : > { %1238 = vrot.lane.b32.xlu1 %v11787_v63, %s16319_s13  ;;  %1156 = vrot.lane.b32.xlu0 %v16478_v34, %s16272_s23  ;;  %v11808_v34 = vld [vmem:[%s10013_s21 + $0x638] sm:$0xff]  ;;  %v11826_v4 = vsel %vm853_vm2, %v909_v53, %v910_v11 }
 0x250   : > { %v1011_v29 = vrot.slane %v11808_v34, 4  ;;  %16483 = vst [vmem:[#allocation172_spill] sm:$0xff] %v11826_v4 }
 0x251   : > { %v11796_v59 = vpop.permute.xlu1 %1228  ;;  %v3531_v49 = vpop.permute.xlu0 %3530 }
 0x252   : > { %v11823_v20 = vsel %vm853_vm2, %v1009_v26, %v1011_v29  ;;  %v862_v29 = vrot.slane %v11239_v8, 4 }
 0x253   : > { %1618 = vrot.lane.b32.xlu1 %v11794_v13, %s16278_s12  ;;  %1524 = vrot.lane.b32.xlu0 %v11803_v54, %s16274_s26  ;;  %v9634_v13 = vld [vmem:[%s10013_s21 + $0x3d8] sm:$0xff]  ;;  %v16481_v54 = vld [vmem:[#allocation24_spill] sm:$0xff] }
 0x254   : > { %16482 = vst [vmem:[#allocation24_spill] sm:$0xff] %v11823_v20 }
 0x255   : > { %v11813_v35 = vpop.permute.xlu1 %1608  ;;  %v11815_v1 = vpop.permute.xlu0 %1322 }
 0x257   : > { %1240 = vrot.lane.b32.xlu1 %v9634_v13, %s16319_s13  ;;  %3250 = vrot.lane.b32.xlu0 %v16481_v54, %s16319_s13  ;;  %v1959_v13 = vsel %vm1956_vm5, %v1926_v14, %v11670_v15  ;;  %v11839_v54 = vld [vmem:[%s10013_s21 + $0x520] sm:$0xff]  ;;  %v16486_v15 = vld [vmem:[#allocation8_spill] sm:$0xff] }
 0x258   : > { %v912_v53 = vrot.slane %v11839_v54, 4  ;;  %v1992_v62 = vsel %vm1989_vm6, %v1959_v13, %v16485_v0  ;;  %v3734_v14 = vsel %vm1890_vm3, %v16486_v15, %v11597_v22 }
 0x259   : > { %v3533_v63 = vpop.permute.xlu1 %3532  ;;  %v1703_v48 = vpop.permute.xlu0 %1702  ;;  %v2025_v10 = vsel %vm2022_vm7, %v1992_v62, %v11745_v23  ;;  %v3766_v50 = vsel %vm1923_vm4, %v3734_v14, %v11651_v12  ;;  %v16490_v12 = vld [vmem:[#allocation26_spill] sm:$0xff] }
 0x25a   : > { %v2058_v8 = vsel %vm2055_vm8, %v2025_v10, %v1607_v30  ;;  %v11862_v13 = vsel %vm853_vm2, %v910_v11, %v912_v53  ;;  %v3798_v15 = vsel %vm1956_vm5, %v3766_v50, %v11701_v28  ;;  %v16492_v30 = vld [vmem:[#allocation10_spill] sm:$0xff]  ;;  %v16493_v53 = vld [vmem:[#allocation97_spill] sm:$0xff] }
 0x25b   : > { %1620 = vrot.lane.b32.xlu1 %v11823_v20, %s16278_s12  ;;  %1334 = vrot.lane.b32.xlu0 %v11826_v4, %s16323_s18  ;;  %v16487_v4 = vld [vmem:[#allocation23_spill] sm:$0xff]  ;;  %16489 = vst [vmem:[#allocation8_spill] sm:$0xff] %v11862_v13  ;;  %v2091_v0 = vsel %vm2088_vm9, %v2058_v8, %v1703_v48 }
 0x25c   : > { %v16488_v20 = vld [vmem:[#allocation95_spill] sm:$0xff] }
 0x25d   : > { %v11842_v26 = vpop.permute.xlu1 %1324  ;;  %v11844_v57 = vpop.permute.xlu0 %3586 }
 0x25e   : > { %16484 = vst [vmem:[#allocation173_spill] sm:$0xff] %v11844_v57 }
 0x25f   : > { %3252 = vrot.lane.b32.xlu1 %v16487_v4, %s16319_s13  ;;  %1714 = vrot.lane.b32.xlu0 %v16488_v20, %s16276_s10  ;;  %v863_v4 = vsel %vm853_vm2, %v860_v36, %v862_v29  ;;  %v3830_v20 = vsel %vm1989_vm6, %v3798_v15, %v11715_v33  ;;  %v16494_v29 = vld [vmem:[#allocation25_spill] sm:$0xff]  ;;  %v16495_v15 = vld [vmem:[#allocation54_spill] sm:$0xff] }
 0x260   : > { %v3862_v10 = vsel %vm2022_vm7, %v3830_v20, %v11759_v51  ;;  %v1894_v48 = vsel %vm1890_vm3, %v863_v4, %v11065_v21 }
 0x261   : > { %v1799_v23 = vpop.permute.xlu1 %1798  ;;  %v1705_v62 = vpop.permute.xlu0 %1704  ;;  %v3894_v50 = vsel %vm2055_vm8, %v3862_v10, %v3531_v49  ;;  %v1927_v51 = vsel %vm1923_vm4, %v1894_v48, %v11649_v52  ;;  %v3735_v49 = vsel %vm1890_vm3, %v16492_v30, %v11619_v25  ;;  %v16500_v30 = vld [vmem:[#allocation29_spill] sm:$0xff] }
 0x262   : > { %v2124_v22 = vsel %vm2121_vm10, %v2091_v0, %v1799_v23  ;;  %v3926_v28 = vsel %vm2088_vm9, %v3894_v50, %v11844_v57  ;;  %v3767_v0 = vsel %vm1923_vm4, %v3735_v49, %v11684_v46  ;;  %v11943_v49 = vld [vmem:[%s10013_s21 + $0x640] sm:$0xff]  ;;  %v611_v57 = vld [vmem:[%s10013_s21 + $0x9b8] sm:$0xff] }
 0x263   : > { %1336 = vrot.lane.b32.xlu1 %v11862_v13, %s16323_s18  ;;  %3346 = vrot.lane.b32.xlu0 %v16490_v12, %s16323_s18  ;;  %v3799_v52 = vsel %vm1956_vm5, %v3767_v0, %v11731_v42  ;;  %v16497_v42 = vld [vmem:[#allocation28_spill] sm:$0xff] }
 0x264   : > { %8943 = vmatprep.mubr.msk.f32.mxu0 %vm2164_vm11, %v2124_v22  ;;  %v1960_v22 = vsel %vm1956_vm5, %v1927_v51, %v11699_v16  ;;  %v3831_v23 = vsel %vm1989_vm6, %v3799_v52, %v11747_v60  ;;  %v9638_v52 = vld [vmem:[%s10013_s21 + $0x668] sm:$0xff]  ;;  %v867_v60 = vrot.slane %v11388_v3, 4 }
 0x265   : > { %v3663_v36 = vpop.permute.xlu1 %3662  ;;  %v11883_v11 = vpop.permute.xlu0 %3588  ;;  %v1993_v16 = vsel %vm1989_vm6, %v1960_v22, %v16495_v15  ;;  %v3863_v46 = vsel %vm2022_vm7, %v3831_v23, %v11784_v58  ;;  %v9637_v22 = vld [vmem:[%s10013_s21 + $0x660] sm:$0xff] }
 0x266   : > { %16491 = vst [vmem:[#allocation23_spill] sm:$0xff] %v11883_v11  ;;  %v3958_v20 = vsel %vm2121_vm10, %v3926_v28, %v3663_v36  ;;  %v2026_v4 = vsel %vm2022_vm7, %v1993_v16, %v11768_v40  ;;  %v3895_v50 = vsel %vm2055_vm8, %v3863_v46, %v3533_v63  ;;  %v16499_v63 = vld [vmem:[#allocation27_spill] sm:$0xff]  ;;  %v1013_v0 = vrot.slane %v9637_v22, 4  ;;  %v11973_v22 = vld [vmem:[%s10013_s21 + $0x670] sm:$0xff] }
 0x267   : > { %1716 = vrot.lane.b32.xlu1 %v16493_v53, %s16276_s10  ;;  %1466 = vrot.lane.b32.xlu0 %v16494_v29, %s16322_s17  ;;  %v2059_v12 = vsel %vm2055_vm8, %v2026_v4, %v11813_v35  ;;  %v3927_v58 = vsel %vm2088_vm9, %v3895_v50, %v11883_v11  ;;  %v1014_v16 = vrot.slane %v9638_v52, 4  ;;  %v608_v46 = vld [vmem:[%s10013_s21 + $0x9a0] sm:$0xff]  ;;  %v9640_v50 = vld [vmem:[%s10013_s21 + $0x408] sm:$0xff] }
 0x268   : > { %9034 = vmatprep.mubr.msk.f32.mxu1 %vm2164_vm11, %v3958_v20  ;;  %v2092_v40 = vsel %vm2088_vm9, %v2059_v12, %v1705_v62  ;;  %v11954_v12 = vld [vmem:[%s10013_s21 + $0x528] sm:$0xff]  ;;  %v9643_v29 = vld [vmem:[%s10013_s21 + $0x320] sm:$0xff] }
 0x269   : > { %v11902_v14 = vpop.permute.xlu1 %1514  ;;  %v11904_v8 = vpop.permute.xlu0 %1150  ;;  %v865_v21 = vrot.slane %v9643_v29, 4 }
 0x26b   : > { %v11914_v10 = vpop.f32.mrb[14].mxu1  ;;  %3348 = vrot.lane.b32.xlu1 %v16497_v42, %s16323_s18  ;;  %1810 = vrot.lane.b32.xlu0 %v11808_v34, %s16318_s25  ;;  %v609_v42 = vld [vmem:[%s10013_s21 + $0x9a8] sm:$0xff] }
 0x26c   : > { %16496 = vst [vmem:[#allocation26_spill] sm:$0xff] %v11914_v10  ;;  %v11923_v48 = vpop.f32.mrb[15].mxu1  ;;  %v16550_v10 = vld [vmem:[#allocation85_spill] sm:$0xff] }
 0x26d   : > { %16498 = vst [vmem:[#allocation10_spill] sm:$0xff] %v11923_v48  ;;  %v3665_v28 = vpop.permute.xlu1 %3664  ;;  %v1801_v36 = vpop.permute.xlu0 %1800 }
 0x26e   : > { %v3959_v51 = vsel %vm2121_vm10, %v3927_v58, %v3665_v28  ;;  %v2125_v20 = vsel %vm2121_vm10, %v2092_v40, %v1801_v36  ;;  %v11961_v40 = vsel %vm853_vm2, %v1013_v0, %v1014_v16  ;;  %v3034_v58 = vrot.slane %v608_v46, 6 }
 0x26f   : > { %1526 = vrot.lane.b32.xlu1 %v11839_v54, %s16274_s26  ;;  %1468 = vrot.lane.b32.xlu0 %v16499_v63, %s16322_s17  ;;  %v3035_v28 = vrot.slane %v609_v42, 6  ;;  %v1016_v0 = vrot.slane %v11973_v22, 4  ;;  %v610_v42 = vld [vmem:[%s10013_s21 + $0x9b0] sm:$0xff] }
 0x270   : > { %8944 = vmatmul.mubr.msk.f32.gmra.mrb[2].mxu0 %vm2164_vm11, %v2125_v20  ;;  %9035 = vmatmul.mubr.msk.f32.gmra.mrb[24].mxu1 %vm2164_vm11, %v3959_v51  ;;  %v16501_v20 = vld [vmem:[#allocation30_spill] sm:$0xff]  ;;  %v3076_v29 = vrot.slane %v610_v42, 2 }
 0x271   : > { %v11936_v35 = vpop.permute.xlu1 %1230  ;;  %v11938_v62 = vpop.permute.xlu0 %1152 }
 0x273   : > { %3442 = vrot.lane.b32.xlu1 %v16500_v30, %s16274_s26  ;;  %1812 = vrot.lane.b32.xlu0 %v11943_v49, %s16318_s25  ;;  %v3036_v30 = vsel %vm2565_vm0, %v3034_v58, %v3035_v28  ;;  %v11987_v58 = vsel %vm853_vm2, %v1014_v16, %v1016_v0 }
 0x275   : > { %v1611_v23 = vpop.permute.xlu1 %1610  ;;  %v11949_v4 = vpop.permute.xlu0 %1516 }
 0x277   : > { %1528 = vrot.lane.b32.xlu1 %v11954_v12, %s16274_s26  ;;  %1242 = vrot.lane.b32.xlu0 %v9640_v50, %s16319_s13  ;;  %v9642_v50 = vld [vmem:[%s10013_s21 + $0x318] sm:$0xff] }
 0x278   : > { %v864_v63 = vrot.slane %v9642_v50, 4 }
 0x279   : > { %v11963_v36 = vpop.permute.xlu1 %1232  ;;  %v11965_v51 = vpop.permute.xlu0 %3246 }
 0x27a   : > { %v866_v15 = vsel %vm853_vm2, %v864_v63, %v865_v21 }
 0x27b   : > { %3444 = vrot.lane.b32.xlu1 %v16501_v20, %s16274_s26  ;;  %1622 = vrot.lane.b32.xlu0 %v11961_v40, %s16278_s12  ;;  %v3037_v20 = vrot.slane %v610_v42, 6  ;;  %v1895_v16 = vsel %vm1890_vm3, %v866_v15, %v11152_v19  ;;  %v868_v19 = vsel %vm853_vm2, %v865_v21, %v867_v60 }
 0x27c   : > { %v1928_v63 = vsel %vm1923_vm4, %v1895_v16, %v11770_v38  ;;  %v3148_v16 = vrot.slane %v611_v57, 6 }
 0x27d   : > { %v11976_v52 = vpop.permute.xlu1 %1612  ;;  %v11978_v46 = vpop.permute.xlu0 %1326  ;;  %v1961_v33 = vsel %vm1956_vm5, %v1928_v63, %v11815_v1 }
 0x27f   : > { %1244 = vrot.lane.b32.xlu1 %v11260_v31, %s16319_s13  ;;  %3538 = vrot.lane.b32.xlu0 %v3036_v30, %s16278_s12  ;;  %v3038_v31 = vsel %vm2565_vm0, %v3035_v28, %v3037_v20  ;;  %v3077_v30 = vrot.slane %v611_v57, 2  ;;  %v612_v20 = vld [vmem:[%s10013_s21 + $0x9c0] sm:$0xff] }
 0x280   : > { %v3149_v63 = vrot.slane %v612_v20, 6  ;;  %v3079_v21 = vrot.slane %v612_v20, 2  ;;  %v613_v20 = vld [vmem:[%s10013_s21 + $0x9c8] sm:$0xff] }
 0x281   : > { %v11989_v53 = vpop.permute.xlu1 %3248  ;;  %v1707_v11 = vpop.permute.xlu0 %1706  ;;  %v3078_v28 = vsel %vm712_vm1, %v3076_v29, %v3077_v30 }
 0x282   : > { %v3080_v57 = vsel %vm712_vm1, %v3077_v30, %v3079_v21  ;;  %v3151_v30 = vrot.slane %v613_v20, 6  ;;  %v9647_v20 = vld [vmem:[%s10013_s21 + $0x6a0] sm:$0xff] }
 0x283   : > { %1624 = vrot.lane.b32.xlu1 %v11987_v58, %s16278_s12  ;;  %1338 = vrot.lane.b32.xlu0 %v11248_v55, %s16323_s18  ;;  %v16503_v55 = vld [vmem:[#allocation61_spill] sm:$0xff] }
 0x284   : > { %v1994_v38 = vsel %vm1989_vm6, %v1961_v33, %v16503_v55  ;;  %v1896_v33 = vsel %vm1890_vm3, %v868_v19, %v11169_v5  ;;  %v3150_v19 = vsel %vm2565_vm0, %v3148_v16, %v3149_v63  ;;  %v9650_v5 = vld [vmem:[%s10013_s21 + $0x358] sm:$0xff] }
 0x285   : > { %v12000_v0 = vpop.permute.xlu1 %1328  ;;  %v12002_v50 = vpop.permute.xlu0 %3342  ;;  %v2027_v3 = vsel %vm2022_vm7, %v1994_v38, %v11902_v14 }
 0x287   : > { %3540 = vrot.lane.b32.xlu1 %v3038_v31, %s16278_s12  ;;  %1718 = vrot.lane.b32.xlu0 %v11114_v41, %s16276_s10  ;;  %v2060_v31 = vsel %vm2055_vm8, %v2027_v3, %v1611_v23  ;;  %v1929_v41 = vsel %vm1923_vm4, %v1896_v33, %v11796_v59  ;;  %v16507_v3 = vld [vmem:[#allocation62_spill] sm:$0xff] }
 0x288   : > { %v2093_v60 = vsel %vm2088_vm9, %v2060_v31, %v1707_v11  ;;  %v1962_v23 = vsel %vm1956_vm5, %v1929_v41, %v11842_v26 }
 0x289   : > { %v1709_v15 = vpop.permute.xlu1 %1708  ;;  %v12013_v42 = vpop.permute.xlu0 %1462  ;;  %v1995_v41 = vsel %vm1989_vm6, %v1962_v23, %v16507_v3  ;;  %v12078_v23 = vld [vmem:[%s10013_s21 + $0x678] sm:$0xff] }
 0x28a   : > { %16502 = vst [vmem:[#allocation28_spill] sm:$0xff] %v12013_v42  ;;  %v2028_v26 = vsel %vm2022_vm7, %v1995_v41, %v11949_v4  ;;  %v16508_v4 = vld [vmem:[#allocation31_spill] sm:$0xff]  ;;  %v1019_v41 = vrot.slane %v9647_v20, 4  ;;  %v12102_v20 = vld [vmem:[%s10013_s21 + $0x6a8] sm:$0xff] }
 0x28b   : > { %v12021_v1 = vpop.f32.mrb[16].mxu1  ;;  %1340 = vrot.lane.b32.xlu1 %v11279_v7, %s16323_s18  ;;  %3594 = vrot.lane.b32.xlu0 %v3078_v28, %s16276_s10  ;;  %v2061_v31 = vsel %vm2055_vm8, %v2028_v26, %v11976_v52  ;;  %v3152_v52 = vsel %vm2565_vm0, %v3149_v63, %v3151_v30  ;;  %v16509_v30 = vld [vmem:[#allocation33_spill] sm:$0xff] }
 0x28c   : > { %16504 = vst [vmem:[#allocation29_spill] sm:$0xff] %v12021_v1  ;;  %v12027_v29 = vpop.f32.mrb[17].mxu1  ;;  %v2094_v16 = vsel %vm2088_vm9, %v2061_v31, %v1709_v15  ;;  %v9648_v31 = vld [vmem:[%s10013_s21 + $0x440] sm:$0xff]  ;;  %v16546_v1 = vld [vmem:[#allocation162_spill] sm:$0xff] }
 0x28d   : > { %16505 = vst [vmem:[#allocation30_spill] sm:$0xff] %v12027_v29  ;;  %v12032_v14 = vpop.permute.xlu1 %3344  ;;  %v1803_v38 = vpop.permute.xlu0 %1802 }
 0x28e   : > { %v2126_v28 = vsel %vm2121_vm10, %v2093_v60, %v1803_v38  ;;  %v12064_v38 = vld [vmem:[%s10013_s21 + $0x558] sm:$0xff] }
 0x28f   : > { %1814 = vrot.lane.b32.xlu1 %v11973_v22, %s16318_s25  ;;  %1720 = vrot.lane.b32.xlu0 %v11134_v18, %s16276_s10  ;;  %v870_v18 = vrot.slane %v9650_v5, 4  ;;  %v16510_v5 = vld [vmem:[#allocation36_spill] sm:$0xff] }
 0x290   : > { %8946 = vmatprep.mubr.msk.f32.mxu0 %vm2164_vm11, %v2126_v28 }
 0x291   : > { %v12046_v11 = vpop.permute.xlu1 %1518  ;;  %v12048_v59 = vpop.permute.xlu0 %1464 }
 0x292   : > { %16506 = vst [vmem:[#allocation174_spill] sm:$0xff] %v12048_v59 }
 0x293   : > { %3670 = vrot.lane.b32.xlu1 %v3150_v19, %s16318_s25  ;;  %3596 = vrot.lane.b32.xlu0 %v3080_v57, %s16276_s10  ;;  %v9646_v19 = vld [vmem:[%s10013_s21 + $0x698] sm:$0xff] }
 0x294   : > { %v1018_v57 = vrot.slane %v9646_v19, 4 }
 0x295   : > { %v12060_v21 = vpop.permute.xlu1 %3438  ;;  %v1805_v33 = vpop.permute.xlu0 %1804 }
 0x296   : > { %v2127_v60 = vsel %vm2121_vm10, %v2094_v16, %v1805_v33  ;;  %v12091_v16 = vsel %vm853_vm2, %v1018_v57, %v1019_v41 }
 0x297   : > { %1530 = vrot.lane.b32.xlu1 %v12064_v38, %s16274_s26  ;;  %1158 = vrot.lane.b32.xlu0 %v16508_v4, %s16272_s23 }
 0x298   : > { %8947 = vmatmul.mubr.msk.f32.gmra.mrb[4].mxu0 %vm2164_vm11, %v2127_v60 }
 0x299   : > { %v12072_v15 = vpop.permute.xlu1 %1520  ;;  %v12074_v28 = vpop.permute.xlu0 %1234 }
 0x29b   : > { %3672 = vrot.lane.b32.xlu1 %v3152_v52, %s16318_s25  ;;  %1816 = vrot.lane.b32.xlu0 %v12078_v23, %s16318_s25  ;;  %v9649_v52 = vld [vmem:[%s10013_s21 + $0x350] sm:$0xff] }
 0x29c   : > { %v869_v19 = vrot.slane %v9649_v52, 4 }
 0x29d   : > { %v12084_v26 = vpop.permute.xlu1 %3440  ;;  %v1615_v63 = vpop.permute.xlu0 %1614 }
 0x29e   : > { %v871_v55 = vsel %vm853_vm2, %v869_v19, %v870_v18 }
 0x29f   : > { %1246 = vrot.lane.b32.xlu1 %v9648_v31, %s16319_s13  ;;  %1160 = vrot.lane.b32.xlu0 %v16509_v30, %s16272_s23  ;;  %v1021_v31 = vrot.slane %v12102_v20, 4  ;;  %s16534_s23 = smov 20  }
 0x2a1   : > { %v12093_v33 = vpop.permute.xlu1 %1236  ;;  %v3535_v60 = vpop.permute.xlu0 %3534  ;;  %v12113_v52 = vsel %vm853_vm2, %v1019_v41, %v1021_v31  ;;  %v872_v31 = vrot.slane %v11510_v2, 4 }
 0x2a3   : > { %1626 = vrot.lane.b32.xlu1 %v12091_v16, %s16278_s12  ;;  %1532 = vrot.lane.b32.xlu0 %v11368_v39, %s16274_s26  ;;  %v1897_v39 = vsel %vm1890_vm3, %v871_v55, %v11251_v27  ;;  %v16516_v27 = vld [vmem:[#allocation38_spill] sm:$0xff] }
 0x2a4   : > { %v1930_v7 = vsel %vm1923_vm4, %v1897_v39, %v11936_v35  ;;  %v16514_v35 = vld [vmem:[#allocation69_spill] sm:$0xff] }
 0x2a5   : > { %v1617_v3 = vpop.permute.xlu1 %1616  ;;  %v12105_v57 = vpop.permute.xlu0 %1330  ;;  %v1963_v19 = vsel %vm1956_vm5, %v1930_v7, %v11978_v46  ;;  %v16515_v7 = vld [vmem:[#allocation14_spill] sm:$0xff] }
 0x2a6   : > { %v3736_v46 = vsel %vm1890_vm3, %v16515_v7, %v11904_v8 }
 0x2a7   : > { %1248 = vrot.lane.b32.xlu1 %v11383_v32, %s16319_s13  ;;  %3254 = vrot.lane.b32.xlu0 %v16510_v5, %s16319_s13  ;;  %v1996_v5 = vsel %vm1989_vm6, %v1963_v19, %v16514_v35 }
 0x2a8   : > { %v2029_v39 = vsel %vm2022_vm7, %v1996_v5, %v12046_v11  ;;  %v873_v11 = vsel %vm853_vm2, %v870_v18, %v872_v31 }
 0x2a9   : > { %v3537_v30 = vpop.permute.xlu1 %3536  ;;  %v1711_v4 = vpop.permute.xlu0 %1710  ;;  %v2062_v2 = vsel %vm2055_vm8, %v2029_v39, %v1615_v63 }
 0x2aa   : > { %v2095_v35 = vsel %vm2088_vm9, %v2062_v2, %v1711_v4  ;;  %v16522_v2 = vld [vmem:[#allocation41_spill] sm:$0xff] }
 0x2ab   : > { %v12121_v13 = vpop.f32.mrb[18].mxu1  ;;  %1628 = vrot.lane.b32.xlu1 %v12113_v52, %s16278_s12  ;;  %1342 = vrot.lane.b32.xlu0 %v11394_v43, %s16323_s18  ;;  %v16517_v43 = vld [vmem:[#allocation35_spill] sm:$0xff] }
 0x2ac   : > { %16511 = vst [vmem:[#allocation36_spill] sm:$0xff] %v12121_v13  ;;  %v12127_v32 = vpop.f32.mrb[19].mxu1  ;;  %v3768_v13 = vsel %vm1923_vm4, %v3736_v46, %v11965_v51  ;;  %v16518_v51 = vld [vmem:[#allocation37_spill] sm:$0xff]  ;;  %v16521_v46 = vld [vmem:[#allocation16_spill] sm:$0xff] }
 0x2ad   : > { %16512 = vst [vmem:[#allocation175_spill] sm:$0xff] %v12127_v32  ;;  %v12129_v41 = vpop.permute.xlu1 %1332  ;;  %v12131_v55 = vpop.permute.xlu0 %3590  ;;  %v3800_v19 = vsel %vm1956_vm5, %v3768_v13, %v12002_v50  ;;  %v16519_v50 = vld [vmem:[#allocation121_spill] sm:$0xff] }
 0x2ae   : > { %16513 = vst [vmem:[#allocation176_spill] sm:$0xff] %v12131_v55  ;;  %v1898_v18 = vsel %vm1890_vm3, %v873_v11, %v16519_v50 }
 0x2af   : > { %3350 = vrot.lane.b32.xlu1 %v16516_v27, %s16323_s18  ;;  %3256 = vrot.lane.b32.xlu0 %v16517_v43, %s16319_s13  ;;  %v3832_v27 = vsel %vm1989_vm6, %v3800_v19, %v12013_v42 }
 0x2b0   : > { %v3864_v43 = vsel %vm2022_vm7, %v3832_v27, %v12060_v21  ;;  %v1931_v21 = vsel %vm1923_vm4, %v1898_v18, %v11963_v36  ;;  %v16523_v27 = vld [vmem:[#allocation70_spill] sm:$0xff] }
 0x2b1   : > { %v1807_v7 = vpop.permute.xlu1 %1806  ;;  %v1713_v32 = vpop.permute.xlu0 %1712  ;;  %v3896_v13 = vsel %vm2055_vm8, %v3864_v43, %v3535_v60  ;;  %v3737_v60 = vsel %vm1890_vm3, %v16521_v46, %v11938_v62  ;;  %v1964_v39 = vsel %vm1956_vm5, %v1931_v21, %v12000_v0  ;;  %v12212_v46 = vld [vmem:[%s10013_s21 + $0x6b0] sm:$0xff] }
 0x2b2   : > { %v2128_v5 = vsel %vm2121_vm10, %v2095_v35, %v1807_v7  ;;  %v3928_v4 = vsel %vm2088_vm9, %v3896_v13, %v12131_v55  ;;  %v3769_v19 = vsel %vm1923_vm4, %v3737_v60, %v11989_v53  ;;  %v1997_v0 = vsel %vm1989_vm6, %v1964_v39, %v16523_v27  ;;  %v619_v55 = vld [vmem:[%s10013_s21 + $0x9f8] sm:$0xff]  ;;  %v8519_v27 = vld [vmem:[%s16038_s6 + $0xc8] sm:$0xff] }
 0x2b3   : > { %1470 = vrot.lane.b32.xlu1 %v16518_v51, %s16322_s17  ;;  %1344 = vrot.lane.b32.xlu0 %v11416_v6, %s16323_s18  ;;  %v3801_v36 = vsel %vm1956_vm5, %v3769_v19, %v12032_v14  ;;  %v2030_v43 = vsel %vm2022_vm7, %v1997_v0, %v12072_v15  ;;  %v16524_v14 = vld [vmem:[#allocation40_spill] sm:$0xff]  ;;  %v615_v19 = vld [vmem:[%s10013_s21 + $0x9d8] sm:$0xff] }
 0x2b4   : > { %8949 = vmatprep.mubr.msk.f32.mxu0 %vm2164_vm11, %v2128_v5  ;;  %v3833_v5 = vsel %vm1989_vm6, %v3801_v36, %v12048_v59  ;;  %v2063_v13 = vsel %vm2055_vm8, %v2030_v43, %v1617_v3  ;;  %v9653_v3 = vld [vmem:[%s10013_s21 + $0x6d0] sm:$0xff]  ;;  %v616_v36 = vld [vmem:[%s10013_s21 + $0x9e0] sm:$0xff]  ;;  %v8521_v59 = vld [vmem:[%s16038_s6 + $0xd8] sm:$0xff] }
 0x2b5   : > { %v3667_v63 = vpop.permute.xlu1 %3666  ;;  %v12167_v31 = vpop.permute.xlu0 %3592  ;;  %v3865_v53 = vsel %vm2022_vm7, %v3833_v5, %v12084_v26  ;;  %v3039_v5 = vrot.slane %v615_v19, 6  ;;  %v3040_v43 = vrot.slane %v616_v36, 6  ;;  %v16545_v6 = vld [vmem:[#allocation142_spill] sm:$0xff] }
 0x2b6   : > { %16520 = vst [vmem:[#allocation14_spill] sm:$0xff] %v12167_v31  ;;  %v3960_v35 = vsel %vm2121_vm10, %v3928_v4, %v3667_v63  ;;  %v3897_v18 = vsel %vm2055_vm8, %v3865_v53, %v3537_v30  ;;  %v2096_v4 = vsel %vm2088_vm9, %v2063_v13, %v1713_v32  ;;  %v1023_v30 = vrot.slane %v9653_v3, 4  ;;  %v9654_v32 = vld [vmem:[%s10013_s21 + $0x6d8] sm:$0xff] }
 0x2b7   : > { %3352 = vrot.lane.b32.xlu1 %v16522_v2, %s16323_s18  ;;  %1818 = vrot.lane.b32.xlu0 %v12102_v20, %s16318_s25  ;;  %v3929_v15 = vsel %vm2088_vm9, %v3897_v18, %v12167_v31  ;;  %v1024_v60 = vrot.slane %v9654_v32, 4  ;;  %v16526_v18 = vld [vmem:[#allocation45_spill] sm:$0xff] }
 0x2b8   : > { %9037 = vmatprep.mubr.msk.f32.mxu1 %vm2164_vm11, %v3960_v35  ;;  %v16525_v35 = vld [vmem:[#allocation43_spill] sm:$0xff]  ;;  %v8512_v32 = vld [vmem:[%s16038_s6 + $0x90] sm:$0xff] }
 0x2b9   : > { %v12186_v7 = vpop.permute.xlu1 %1522  ;;  %v12188_v11 = vpop.permute.xlu0 %1154  ;;  %v12231_v0 = vsel %vm853_vm2, %v1023_v30, %v1024_v60  ;;  %v8510_v30 = vld [vmem:[%s16038_s6 + $0x80] sm:$0xff] }
 0x2ba   : > { %v9177_v36 = vpack.c.bf16 %v8512_v32, %v8510_v30  ;;  %v9657_v30 = vld [vmem:[%s10013_s21 + $0x390] sm:$0xff] }
 0x2bb   : > { %1534 = vrot.lane.b32.xlu1 %v11402_v45, %s16274_s26  ;;  %1472 = vrot.lane.b32.xlu0 %v16524_v14, %s16322_s17  ;;  %v875_v32 = vrot.slane %v9657_v30, 4 }
 0x2bd   : > { %v3669_v63 = vpop.permute.xlu1 %3668  ;;  %v1809_v26 = vpop.permute.xlu0 %1808 }
 0x2be   : > { %v3961_v21 = vsel %vm2121_vm10, %v3929_v15, %v3669_v63  ;;  %v2129_v45 = vsel %vm2121_vm10, %v2096_v4, %v1809_v26  ;;  %v12243_v4 = vld [vmem:[%s10013_s21 + $0x6e0] sm:$0xff]  ;;  %v617_v15 = vld [vmem:[%s10013_s21 + $0x9e8] sm:$0xff] }
 0x2bf   : > { %3446 = vrot.lane.b32.xlu1 %v16525_v35, %s16274_s26  ;;  %1820 = vrot.lane.b32.xlu0 %v12212_v46, %s16318_s25  ;;  %v8513_v35 = vld [vmem:[%s16038_s6 + $0x98] sm:$0xff]  ;;  %v3042_v50 = vrot.slane %v617_v15, 6 }
 0x2c0   : > { %8950 = vmatmul.mubr.msk.f32.gmra.mrb[6].mxu0 %vm2164_vm11, %v2129_v45  ;;  %9038 = vmatmul.mubr.msk.f32.gmra.mrb[26].mxu1 %vm2164_vm11, %v3961_v21  ;;  %v12252_v21 = vld [vmem:[%s10013_s21 + $0x9f0] sm:$0xff]  ;;  %v8511_v45 = vld [vmem:[%s16038_s6 + $0x88] sm:$0xff] }
 0x2c1   : > { %v12220_v39 = vpop.permute.xlu1 %1238  ;;  %v12222_v2 = vpop.permute.xlu0 %1156  ;;  %v9175_v3 = vpack.c.bf16 %v8513_v35, %v8511_v45  ;;  %v3081_v45 = vrot.slane %v617_v15, 2  ;;  %v3082_v35 = vrot.slane %v12252_v21, 2  ;;  %v3043_v30 = vsel %vm2565_vm0, %v3040_v43, %v3042_v50  ;;  %v8518_v50 = vld [vmem:[%s16038_s6 + $0xc0] sm:$0xff] }
 0x2c3   : > { %1536 = vrot.lane.b32.xlu1 %v11501_v24, %s16274_s26  ;;  %1250 = vrot.lane.b32.xlu0 %v11430_v47, %s16319_s13  ;;  %v3041_v24 = vsel %vm2565_vm0, %v3039_v5, %v3040_v43  ;;  %v1026_v47 = vrot.slane %v12243_v4, 4  ;;  %v8520_v43 = vld [vmem:[%s16038_s6 + $0xd0] sm:$0xff] }
 0x2c4   : > { %9176 = vmatprep.subr.bf16.mxu1 %v9175_v3  ;;  %v8514_v3 = vld [vmem:[%s16038_s6 + $0xa0] sm:$0xff] }
 0x2c5   : > { %v12233_v53 = vpop.permute.xlu1 %1618  ;;  %v12235_v13 = vpop.permute.xlu0 %1524  ;;  %9178 = vmatpush1.bf16.msra.mxu1 %v9177_v36  ;;  %v8516_v36 = vld [vmem:[%s16038_s6 + $0xb0] sm:$0xff] }
 0x2c6   : > { %v9181_v31 = vpack.c.bf16 %v8516_v36, %v8514_v3  ;;  %v9183_v36 = vpack.c.bf16 %v8521_v59, %v8519_v27 }
 0x2c7   : > { %3448 = vrot.lane.b32.xlu1 %v16526_v18, %s16274_s26  ;;  %1630 = vrot.lane.b32.xlu0 %v12231_v0, %s16278_s12  ;;  %v12274_v18 = vsel %vm853_vm2, %v1024_v60, %v1026_v47  ;;  %v9656_v60 = vld [vmem:[%s10013_s21 + $0x388] sm:$0xff] }
 0x2c8   : > { %v874_v47 = vrot.slane %v9656_v60, 4  ;;  %v3083_v60 = vsel %vm712_vm1, %v3081_v45, %v3082_v35  ;;  %v3153_v45 = vrot.slane %v12252_v21, 6  ;;  %v8525_v21 = vld [vmem:[%s16038_s6 + $0xf8] sm:$0xff] }
 0x2c9   : > { %v12247_v63 = vpop.permute.xlu1 %1240  ;;  %v12249_v26 = vpop.permute.xlu0 %3250 }
 0x2ca   : > { %v876_v3 = vsel %vm853_vm2, %v874_v47, %v875_v32 }
 0x2cb   : > { %v12266_v19 = vpop.f32.mrb[20].mxu1  ;;  %1252 = vrot.lane.b32.xlu1 %v11524_v17, %s16319_s13  ;;  %3542 = vrot.lane.b32.xlu0 %v3041_v24, %s16528_s22  ;;  %v8515_v17 = vld [vmem:[%s16038_s6 + $0xa8] sm:$0xff]  ;;  %v8517_v24 = vld [vmem:[%s16038_s6 + $0xb8] sm:$0xff]  ;;  %v1899_v59 = vsel %vm1890_vm3, %v876_v3, %v11359_v37 }
 0x2cc   : > { %16527 = vst [vmem:[#allocation38_spill] sm:$0xff] %v12266_v19  ;;  %v12271_v5 = vpop.f32.mrb[21].mxu1  ;;  %v9179_v15 = vpack.c.bf16 %v8517_v24, %v8515_v17  ;;  %v8522_v3 = vld [vmem:[%s16038_s6 + $0xe0] sm:$0xff] }
 0x2cd   : > { %16529 = vst [vmem:[#allocation35_spill] sm:$0xff] %v12271_v5  ;;  %v12277_v14 = vpop.permute.xlu1 %1620  ;;  %v12279_v51 = vpop.permute.xlu0 %1334 }
 0x2ce   : > { %9180 = vmatprep.subr.bf16.mxu1 %v9179_v15  ;;  %v3154_v15 = vrot.slane %v619_v55, 6 }
 0x2cf   : > { %1632 = vrot.lane.b32.xlu1 %v12274_v18, %s16528_s22  ;;  %1346 = vrot.lane.b32.xlu0 %v11517_v61, %s16323_s18  ;;  %v3084_v61 = vrot.slane %v619_v55, 2  ;;  %v877_v55 = vrot.slane %v11642_v9, 4 }
 0x2d0   : > { %9182 = vmatpush1.bf16.msra.mxu1 %v9181_v31  ;;  %v9185_v31 = vpack.c.bf16 %v8520_v43, %v8518_v50 }
 0x2d1   : > { %v12301_v17 = vpop.permute.xlu1 %3252  ;;  %v1715_v24 = vpop.permute.xlu0 %1714  ;;  %9184 = vmatprep.subr.bf16.mxu1 %v9183_v36  ;;  %v8524_v36 = vld [vmem:[%s16038_s6 + $0xf0] sm:$0xff]  ;;  %v3085_v43 = vsel %vm712_vm1, %v3082_v35, %v3084_v61 }
 0x2d2   : > { %v9189_v9 = vpack.c.bf16 %v8524_v36, %v8522_v3 }
 0x2d3   : > { %3598 = vrot.lane.b32.xlu1 %v3083_v60, %s16530_s14  ;;  %3544 = vrot.lane.b32.xlu0 %v3043_v30, %s16528_s22  ;;  %v8523_v60 = vld [vmem:[%s16038_s6 + $0xe8] sm:$0xff]  ;;  %v1932_v30 = vsel %vm1923_vm4, %v1899_v59, %v12074_v28  ;;  %v3155_v28 = vsel %vm2565_vm0, %v3153_v45, %v3154_v15  ;;  %v16533_v45 = vld [vmem:[#allocation131_spill] sm:$0xff] }
 0x2d4   : > { %9186 = vmatpush1.bf16.msra.mxu1 %v9185_v31  ;;  %v9187_v37 = vpack.c.bf16 %v8525_v21, %v8523_v60  ;;  %v1965_v50 = vsel %vm1956_vm5, %v1932_v30, %v12105_v57  ;;  %v620_v60 = vld [vmem:[%s10013_s21 + $0xa00] sm:$0xff]  ;;  %v878_v57 = vsel %vm853_vm2, %v875_v32, %v877_v55  ;;  %v16532_v21 = vld [vmem:[#allocation77_spill] sm:$0xff] }
 0x2d5   : > { %v12322_v27 = vpop.permute.xlu1 %1336  ;;  %v12324_v47 = vpop.permute.xlu0 %3346  ;;  %v1998_v30 = vsel %vm1989_vm6, %v1965_v50, %v16532_v21  ;;  %v3156_v35 = vrot.slane %v620_v60, 6  ;;  %v1900_v32 = vsel %vm1890_vm3, %v878_v57, %v16533_v45  ;;  %v9661_v60 = vld [vmem:[%s10013_s21 + $0x710] sm:$0xff] }
 0x2d6   : > { %9188 = vmatprep.subr.bf16.mxu1 %v9187_v37  ;;  %v2031_v3 = vsel %vm2022_vm7, %v1998_v30, %v12186_v7  ;;  %v1933_v7 = vsel %vm1923_vm4, %v1900_v32, %v12093_v33  ;;  %v1029_v57 = vrot.slane %v9661_v60, 4  ;;  %v9662_v32 = vld [vmem:[%s10013_s21 + $0x4b0] sm:$0xff] }
 0x2d7   : > { %1822 = vrot.lane.b32.xlu1 %v12243_v4, %s16318_s25  ;;  %1348 = vrot.lane.b32.xlu0 %v11540_v44, %s16323_s18  ;;  %v2064_v61 = vsel %vm2055_vm8, %v2031_v3, %v12233_v53  ;;  %v12372_v53 = vld [vmem:[%s10013_s21 + $0x6e8] sm:$0xff]  ;;  %v3157_v33 = vsel %vm2565_vm0, %v3154_v15, %v3156_v35  ;;  %v16536_v3 = vld [vmem:[#allocation78_spill] sm:$0xff] }
 0x2d8   : > { %9190 = vmatpush1.bf16.msra.mxu1 %v9189_v9  ;;  %v2097_v55 = vsel %vm2088_vm9, %v2064_v61, %v1715_v24  ;;  %v1966_v9 = vsel %vm1956_vm5, %v1933_v7, %v12129_v41  ;;  %v9660_v24 = vld [vmem:[%s10013_s21 + $0x708] sm:$0xff] }
 0x2d9   : > { %v1717_v31 = vpop.permute.xlu1 %1716  ;;  %v12349_v59 = vpop.permute.xlu0 %1466  ;;  %v1999_v61 = vsel %vm1989_vm6, %v1966_v9, %v16536_v3  ;;  %v9668_v44 = vld [vmem:[%s10013_s21 + $0x748] sm:$0xff] }
 0x2da   : > { %16531 = vst [vmem:[#allocation16_spill] sm:$0xff] %v12349_v59  ;;  %v2032_v45 = vsel %vm2022_vm7, %v1999_v61, %v12235_v13  ;;  %v16539_v61 = vld [vmem:[#allocation160_spill] sm:$0xff]  ;;  %v1034_v42 = vrot.slane %v9668_v44, 4 }
 0x2db   : > { %3674 = vrot.lane.b32.xlu1 %v3155_v28, %s16318_s25  ;;  %3600 = vrot.lane.b32.xlu0 %v3085_v43, %s16530_s14  ;;  %v12377_v28 = vld [vmem:[%s10013_s21 + $0x5c8] sm:$0xff]  ;;  %v1028_v43 = vrot.slane %v9660_v24, 4  ;;  %v2065_v15 = vsel %vm2055_vm8, %v2032_v45, %v12277_v14  ;;  %v12409_v14 = vld [vmem:[%s10013_s21 + $0x718] sm:$0xff]  ;;  %v16538_v24 = vld [vmem:[#allocation155_spill] sm:$0xff] }
 0x2dc   : > { %v1031_v13 = vrot.slane %v12409_v14, 4 }
 0x2dd   : > { %v12364_v37 = vpop.permute.xlu1 %3348  ;;  %v1811_v36 = vpop.permute.xlu0 %1810  ;;  %v12397_v35 = vsel %vm853_vm2, %v1028_v43, %v1029_v57 }
 0x2de   : > { %v2130_v50 = vsel %vm2121_vm10, %v2097_v55, %v1811_v36  ;;  %v2098_v55 = vsel %vm2088_vm9, %v2065_v15, %v1717_v31  ;;  %v12421_v43 = vsel %vm853_vm2, %v1029_v57, %v1031_v13  ;;  %v9664_v15 = vld [vmem:[%s10013_s21 + $0x3c0] sm:$0xff] }
 0x2df   : > { %1824 = vrot.lane.b32.xlu1 %v12372_v53, %s16318_s25  ;;  %1538 = vrot.lane.b32.xlu0 %v12377_v28, %s16534_s23  ;;  %v16542_v13 = vld [vmem:[#allocation47_spill] sm:$0xff] }
 0x2e0   : > { %8952 = vmatprep.mubr.msk.f32.mxu0 %vm2164_vm11, %v2130_v50 }
 0x2e1   : > { %v1527_v30 = vpop.permute.xlu1 %1526  ;;  %v12385_v41 = vpop.permute.xlu0 %1468 }
 0x2e2   : > { %16535 = vst [vmem:[#allocation41_spill] sm:$0xff] %v12385_v41 }
 0x2e3   : > { %1254 = vrot.lane.b32.xlu1 %v9662_v32, %s16319_s13  ;;  %3676 = vrot.lane.b32.xlu0 %v3157_v33, %s16318_s25  ;;  %v16537_v33 = vld [vmem:[#allocation156_spill] sm:$0xff] }
 0x2e5   : > { %v12400_v36 = vpop.permute.xlu1 %3442  ;;  %v1813_v7 = vpop.permute.xlu0 %1812 }
 0x2e6   : > { %v2131_v50 = vsel %vm2121_vm10, %v2098_v55, %v1813_v7  ;;  %v879_v55 = vrot.slane %v9664_v15, 4  ;;  %v9665_v7 = vld [vmem:[%s10013_s21 + $0x3c8] sm:$0xff]  ;;  %v16544_v15 = vld [vmem:[#allocation159_spill] sm:$0xff] }
 0x2e7   : > { %1634 = vrot.lane.b32.xlu1 %v12397_v35, %s16528_s22  ;;  %1540 = vrot.lane.b32.xlu0 %v11624_v56, %s16534_s23  ;;  %v880_v57 = vrot.slane %v9665_v7, 4  ;;  %v9667_v7 = vld [vmem:[%s10013_s21 + $0x740] sm:$0xff] }
 0x2e8   : > { %8953 = vmatmul.mubr.msk.f32.gmra.mrb[8].mxu0 %vm2164_vm11, %v2131_v50 }
 0x2e9   : > { %v12412_v31 = vpop.permute.xlu1 %1528  ;;  %v12414_v9 = vpop.permute.xlu0 %1242 }
 0x2eb   : > { %1350 = vrot.lane.b32.xlu1 %v16537_v33, %s16323_s18  ;;  %1256 = vrot.lane.b32.xlu0 %v16538_v24, %s16319_s13  ;;  %v12447_v33 = vld [vmem:[%s10013_s21 + $0x720] sm:$0xff] }
 0x2ed   : > { %v12423_v56 = vpop.permute.xlu1 %3444  ;;  %v1623_v60 = vpop.permute.xlu0 %1622 }
 0x2ef   : > { %1352 = vrot.lane.b32.xlu1 %v16539_v61, %s16323_s18  ;;  %1636 = vrot.lane.b32.xlu0 %v12421_v43, %s16528_s22  ;;  %v881_v61 = vsel %vm853_vm2, %v879_v55, %v880_v57 }
 0x2f1   : > { %v12429_v45 = vpop.permute.xlu1 %1244  ;;  %v3539_v32 = vpop.permute.xlu0 %3538 }
 0x2f3   : > { %v12433_v50 = vpop.f32.mrb[22].mxu1  ;;  %1162 = vrot.lane.b32.xlu1 %v16542_v13, %s16541_s0  ;;  %1826 = vrot.lane.b32.xlu0 %v12409_v14, %s16318_s25  ;;  %v1033_v13 = vrot.slane %v9667_v7, 4 }
 0x2f4   : > { %16540 = vst [vmem:[#allocation43_spill] sm:$0xff] %v12433_v50  ;;  %v12439_v24 = vpop.f32.mrb[23].mxu1  ;;  %v1901_v50 = vsel %vm1890_vm3, %v881_v61, %v16545_v6  ;;  %v16549_v61 = vld [vmem:[#allocation169_spill] sm:$0xff] }
 0x2f5   : > { %16543 = vst [vmem:[#allocation45_spill] sm:$0xff] %v12439_v24  ;;  %v12441_v3 = vpop.permute.xlu1 %1624  ;;  %v12443_v21 = vpop.permute.xlu0 %1338  ;;  %v1934_v55 = vsel %vm1923_vm4, %v1901_v50, %v12220_v39  ;;  %v12466_v44 = vsel %vm853_vm2, %v1033_v13, %v1034_v42  ;;  %v882_v29 = vrot.slane %v16549_v61, 4  ;;  %v16552_v13 = vld [vmem:[#allocation167_spill] sm:$0xff] }
 0x2f6   : > { %v1967_v5 = vsel %vm1956_vm5, %v1934_v55, %v12279_v51  ;;  %v16551_v51 = vld [vmem:[#allocation20_spill] sm:$0xff] }
 0x2f7   : > { %1828 = vrot.lane.b32.xlu1 %v12447_v33, %s16318_s25  ;;  %1542 = vrot.lane.b32.xlu0 %v16544_v15, %s16534_s23  ;;  %v16547_v15 = vld [vmem:[#allocation49_spill] sm:$0xff]  ;;  %v2000_v39 = vsel %vm1989_vm6, %v1967_v5, %v16550_v10  ;;  %v3738_v50 = vsel %vm1890_vm3, %v16551_v51, %v12188_v11  ;;  %v883_v48 = vsel %vm853_vm2, %v880_v57, %v882_v29 }
 0x2f8   : > { %v3770_v55 = vsel %vm1923_vm4, %v3738_v50, %v12249_v26  ;;  %v16553_v50 = vld [vmem:[#allocation170_spill] sm:$0xff] }
 0x2f9   : > { %v3541_v24 = vpop.permute.xlu1 %3540  ;;  %v1719_v19 = vpop.permute.xlu0 %1718  ;;  %v3802_v51 = vsel %vm1956_vm5, %v3770_v55, %v12324_v47  ;;  %v16555_v47 = vld [vmem:[#allocation143_spill] sm:$0xff] }
 0x2fa   : > { %v1902_v57 = vsel %vm1890_vm3, %v883_v48, %v16555_v47  ;;  %v16558_v48 = vld [vmem:[#allocation24_spill] sm:$0xff] }
 0x2fb   : > { %1258 = vrot.lane.b32.xlu1 %v16546_v1, %s16319_s13  ;;  %1164 = vrot.lane.b32.xlu0 %v16547_v15, %s16541_s0  ;;  %v2033_v1 = vsel %vm2022_vm7, %v2000_v39, %v1527_v30  ;;  %v12487_v15 = vld [vmem:[%s10013_s21 + $0x750] sm:$0xff] }
 0x2fc   : > { %v2066_v61 = vsel %vm2055_vm8, %v2033_v1, %v1623_v60  ;;  %v1036_v5 = vrot.slane %v12487_v15, 4  ;;  %v16554_v1 = vld [vmem:[#allocation171_spill] sm:$0xff] }
 0x2fd   : > { %v12468_v7 = vpop.permute.xlu1 %1340  ;;  %v12470_v6 = vpop.permute.xlu0 %3594  ;;  %v2099_v30 = vsel %vm2088_vm9, %v2066_v61, %v1719_v19 }
 0x2fe   : > { %16548 = vst [vmem:[#allocation131_spill] sm:$0xff] %v12470_v6  ;;  %v12506_v29 = vsel %vm853_vm2, %v1034_v42, %v1036_v5 }
 0x2ff   : > { %1638 = vrot.lane.b32.xlu1 %v12466_v44, %s16528_s22  ;;  %1544 = vrot.lane.b32.xlu0 %v16552_v13, %s16534_s23  ;;  %v3834_v13 = vsel %vm1989_vm6, %v3802_v51, %v12349_v59  ;;  %v1935_v51 = vsel %vm1923_vm4, %v1902_v57, %v12247_v63 }
 0x300   : > { %v3866_v60 = vsel %vm2022_vm7, %v3834_v13, %v12400_v36  ;;  %v1968_v5 = vsel %vm1956_vm5, %v1935_v51, %v12322_v27  ;;  %v16559_v27 = vld [vmem:[#allocation86_spill] sm:$0xff] }
 0x301   : > { %v1815_v39 = vpop.permute.xlu1 %1814  ;;  %v1721_v10 = vpop.permute.xlu0 %1720  ;;  %v3898_v19 = vsel %vm2055_vm8, %v3866_v60, %v3539_v32  ;;  %v16557_v32 = vld [vmem:[#allocation22_spill] sm:$0xff]  ;;  %v2001_v60 = vsel %vm1989_vm6, %v1968_v5, %v16559_v27  ;;  %v373_v27 = vld [vmem:[%s10013_s21 + $0x228] sm:$0xf] }
 0x302   : > { %v2132_v26 = vsel %vm2121_vm10, %v2099_v30, %v1815_v39  ;;  %v3930_v55 = vsel %vm2088_vm9, %v3898_v19, %v12470_v6  ;;  %v3739_v42 = vsel %vm1890_vm3, %v16557_v32, %v12222_v2 }
 0x303   : > { %1354 = vrot.lane.b32.xlu1 %v16553_v50, %s16323_s18  ;;  %1260 = vrot.lane.b32.xlu0 %v16554_v1, %s16319_s13  ;;  %v3771_v63 = vsel %vm1923_vm4, %v3739_v42, %v12301_v17  ;;  %v2034_v1 = vsel %vm2022_vm7, %v2001_v60, %v12412_v31  ;;  %v9672_v31 = vld [vmem:[%s10013_s21 + $0x778] sm:$0xff]  ;;  %v16560_v60 = vld [vmem:[#allocation55_spill] sm:$0xff] }
 0x304   : > { %8955 = vmatprep.mubr.msk.f32.mxu0 %vm2164_vm11, %v2132_v26  ;;  %v3803_v39 = vsel %vm1956_vm5, %v3771_v63, %v12364_v37  ;;  %v9670_v37 = vld [vmem:[%s10013_s21 + $0x780] sm:$0xff]  ;;  %v2067_v47 = vsel %vm2055_vm8, %v2034_v1, %v12441_v3  ;;  %v1056_v51 = vrot.slane %v9672_v31, 4  ;;  %v12561_v3 = vld [vmem:[%s10013_s21 + $0x758] sm:$0xff] }
 0x305   : > { %v3671_v36 = vpop.permute.xlu1 %3670  ;;  %v12512_v61 = vpop.permute.xlu0 %3596  ;;  %v3835_v50 = vsel %vm1989_vm6, %v3803_v39, %v12385_v41  ;;  %v1057_v19 = vrot.slane %v9670_v37, 4  ;;  %v16561_v37 = vld [vmem:[#allocation57_spill] sm:$0xff]  ;;  %v16563_v31 = vld [vmem:[#allocation111_spill] sm:$0xff] }
 0x306   : > { %16556 = vst [vmem:[#allocation155_spill] sm:$0xff] %v12512_v61  ;;  %v3962_v30 = vsel %vm2121_vm10, %v3930_v55, %v3671_v36  ;;  %v3867_v17 = vsel %vm2022_vm7, %v3835_v50, %v12423_v56  ;;  %v9671_v55 = vld [vmem:[%s10013_s21 + $0x788] sm:$0xff]  ;;  %v2100_v56 = vsel %vm2088_vm9, %v2067_v47, %v1721_v10 }
 0x307   : > { %1356 = vrot.lane.b32.xlu1 %v16558_v48, %s16323_s18  ;;  %1640 = vrot.lane.b32.xlu0 %v12506_v29, %s16528_s22  ;;  %v3899_v57 = vsel %vm2055_vm8, %v3867_v17, %v3541_v24  ;;  %v1059_v36 = vrot.slane %v9671_v55, 4  ;;  %v1058_v24 = vsel %vm853_vm2, %v1056_v51, %v1057_v19 }
 0x308   : > { %9040 = vmatprep.mubr.msk.f32.mxu1 %vm2164_vm11, %v3962_v30 }
 0x309   : > { %v12531_v13 = vpop.permute.xlu1 %1530  ;;  %v12533_v26 = vpop.permute.xlu0 %1158  ;;  %v1060_v10 = vsel %vm853_vm2, %v1057_v19, %v1059_v36  ;;  %v9674_v19 = vld [vmem:[%s10013_s21 + $0x790] sm:$0xff] }
 0x30b   : > { %1546 = vrot.lane.b32.xlu1 %v11808_v34, %s16534_s23  ;;  %1830 = vrot.lane.b32.xlu0 %v12487_v15, %s16318_s25  ;;  %v3931_v34 = vsel %vm2088_vm9, %v3899_v57, %v12512_v61 }
 0x30d   : > { %v3673_v30 = vpop.permute.xlu1 %3672  ;;  %v1817_v32 = vpop.permute.xlu0 %1816 }
 0x30e   : > { %v3963_v42 = vsel %vm2121_vm10, %v3931_v34, %v3673_v30  ;;  %v2133_v5 = vsel %vm2121_vm10, %v2100_v56, %v1817_v32 }
 0x30f   : > { %1548 = vrot.lane.b32.xlu1 %v11943_v49, %s16534_s23  ;;  %1832 = vrot.lane.b32.xlu0 %v12561_v3, %s16318_s25 }
 0x310   : > { %8956 = vmatmul.mubr.msk.f32.gmra.mrb[10].mxu0 %vm2164_vm11, %v2133_v5  ;;  %9041 = vmatmul.mubr.msk.f32.gmra.mrb[28].mxu1 %vm2164_vm11, %v3963_v42 }
 0x311   : > { %v12569_v48 = vpop.permute.xlu1 %1246  ;;  %v12571_v63 = vpop.permute.xlu0 %1160 }
 0x313   : > { %1644 = vrot.lane.b32.xlu1 %v1060_v10, %s16528_s22  ;;  %1642 = vrot.lane.b32.xlu0 %v1058_v24, %s16528_s22  ;;  %v9676_v10 = vld [vmem:[%s10013_s21 + $0x7c0] sm:$0xff]  ;;  %v9677_v24 = vld [vmem:[%s10013_s21 + $0x7b0] sm:$0xff] }
 0x315   : > { %v1627_v49 = vpop.permute.xlu1 %1626  ;;  %v1533_v39 = vpop.permute.xlu0 %1532 }
 0x317   : > { %1166 = vrot.lane.b32.xlu1 %v16560_v60, %s16541_s0  ;;  %1834 = vrot.lane.b32.xlu0 %v9671_v55, %s16318_s25  ;;  %v16562_v55 = vld [vmem:[#allocation154_spill] sm:$0xff] }
 0x318   : > { %v1903_v51 = vsel %vm1890_vm3, %v16563_v31, %v16562_v55 }
 0x319   : > { %v12578_v50 = vpop.permute.xlu1 %1248  ;;  %v12580_v1 = vpop.permute.xlu0 %3254  ;;  %v1936_v56 = vsel %vm1923_vm4, %v1903_v51, %v12414_v9  ;;  %v1064_v9 = vrot.slane %v9676_v10, 4 }
 0x31a   : > { %v1969_v34 = vsel %vm1956_vm5, %v1936_v56, %v12443_v21 }
 0x31b   : > { %v12582_v17 = vpop.f32.mrb[0].mxu0  ;;  %1168 = vrot.lane.b32.xlu1 %v16561_v37, %s16541_s0  ;;  %1836 = vrot.lane.b32.xlu0 %v9674_v19, %s16318_s25  ;;  %v1061_v19 = vrot.slane %v9677_v24, 4 }
 0x31c   : > { %v12588_v47 = vpop.f32.mrb[1].mxu0 }
 0x31d   : > { %v1629_v57 = vpop.permute.xlu1 %1628  ;;  %v12590_v36 = vpop.permute.xlu0 %1342 }
 0x31f   : > { %1264 = vrot.lane.b32.xlu1 %v11954_v12, %s16319_s13  ;;  %1262 = vrot.lane.b32.xlu0 %v11839_v54, %s16319_s13  ;;  %v16564_v12 = vld [vmem:[#allocation93_spill] sm:$0xff]  ;;  %v9675_v54 = vld [vmem:[%s10013_s21 + $0x7b8] sm:$0xff] }
 0x320   : > { %v2002_v42 = vsel %vm1989_vm6, %v1969_v34, %v16564_v12  ;;  %v1062_v5 = vrot.slane %v9675_v54, 4  ;;  %v16567_v54 = vld [vmem:[#allocation48_spill] sm:$0xff] }
 0x321   : > { %v12603_v30 = vpop.permute.xlu1 %3350  ;;  %v12605_v32 = vpop.permute.xlu0 %3256  ;;  %v2035_v21 = vsel %vm2022_vm7, %v2002_v42, %v12531_v13 }
 0x322   : > { %v1065_v13 = vsel %vm853_vm2, %v1062_v5, %v1064_v9  ;;  %v1063_v34 = vsel %vm853_vm2, %v1061_v19, %v1062_v5 }
 0x323   : > { %1360 = vrot.lane.b32.xlu1 %v11987_v58, %s16323_s18  ;;  %1358 = vrot.lane.b32.xlu0 %v11961_v40, %s16323_s18  ;;  %v2068_v58 = vsel %vm2055_vm8, %v2035_v21, %v1627_v49  ;;  %v16566_v40 = vld [vmem:[#allocation113_spill] sm:$0xff]  ;;  %v16570_v21 = vld [vmem:[#allocation63_spill] sm:$0xff] }
 0x324   : > { %v1904_v51 = vsel %vm1890_vm3, %v16566_v40, %v11619_v25  ;;  %v2101_v25 = vsel %vm2088_vm9, %v2068_v58, %v16567_v54  ;;  %v16571_v40 = vld [vmem:[#allocation50_spill] sm:$0xff] }
 0x325   : > { %v12618_v55 = vpop.permute.xlu1 %1470  ;;  %v12620_v31 = vpop.permute.xlu0 %1344  ;;  %v1937_v56 = vsel %vm1923_vm4, %v1904_v51, %v12429_v45 }
 0x326   : > { %16565 = vst [vmem:[#allocation159_spill] sm:$0xff] %v12618_v55  ;;  %v1970_v49 = vsel %vm1956_vm5, %v1937_v56, %v12468_v7 }
 0x327   : > { %1552 = vrot.lane.b32.xlu1 %v12078_v23, %s16534_s23  ;;  %1550 = vrot.lane.b32.xlu0 %v11973_v22, %s16534_s23  ;;  %v16568_v22 = vld [vmem:[#allocation94_spill] sm:$0xff] }
 0x328   : > { %v2003_v45 = vsel %vm1989_vm6, %v1970_v49, %v16568_v22  ;;  %v9679_v49 = vld [vmem:[%s10013_s21 + $0x560] sm:$0xff] }
 0x329   : > { %v12636_v42 = vpop.permute.xlu1 %3352  ;;  %v1819_v24 = vpop.permute.xlu0 %1818  ;;  %v2036_v7 = vsel %vm2022_vm7, %v2003_v45, %v1533_v39  ;;  %v16572_v39 = vld [vmem:[#allocation65_spill] sm:$0xff]  ;;  %v9681_v45 = vld [vmem:[%s10013_s21 + $0x7f8] sm:$0xff] }
 0x32a   : > { %v2134_v23 = vsel %vm2121_vm10, %v2101_v25, %v1819_v24  ;;  %v2069_v19 = vsel %vm2055_vm8, %v2036_v7, %v1629_v57  ;;  %v9680_v24 = vld [vmem:[%s10013_s21 + $0x7f0] sm:$0xff]  ;;  %v1069_v7 = vrot.slane %v9681_v45, 4 }
 0x32b   : > { %1648 = vrot.lane.b32.xlu1 %v1065_v13, %s16528_s22  ;;  %1646 = vrot.lane.b32.xlu0 %v1063_v34, %s16528_s22  ;;  %v2102_v51 = vsel %vm2088_vm9, %v2069_v19, %v16571_v40  ;;  %v9678_v34 = vld [vmem:[%s10013_s21 + $0x7c8] sm:$0xff] }
 0x32c   : > { %8958 = vmatprep.mubr.msk.f32.mxu0 %vm2164_vm11, %v2134_v23  ;;  %v1067_v23 = vrot.slane %v9680_v24, 4  ;;  %v12676_v19 = vld [vmem:[%s10013_s21 + $0x7e8] sm:$0xff] }
 0x32d   : > { %v1535_v5 = vpop.permute.xlu1 %1534  ;;  %v12647_v9 = vpop.permute.xlu0 %1472  ;;  %v1066_v40 = vrot.slane %v12676_v19, 4 }
 0x32e   : > { %16569 = vst [vmem:[#allocation142_spill] sm:$0xff] %v12647_v9 }
 0x32f   : > { %1170 = vrot.lane.b32.xlu1 %v16570_v21, %s16541_s0  ;;  %1838 = vrot.lane.b32.xlu0 %v9676_v10, %s16318_s25  ;;  %v16578_v21 = vld [vmem:[#allocation71_spill] sm:$0xff] }
 0x331   : > { %v3447_v58 = vpop.permute.xlu1 %3446  ;;  %v1821_v56 = vpop.permute.xlu0 %1820 }
 0x332   : > { %v2135_v13 = vsel %vm2121_vm10, %v2102_v51, %v1821_v56  ;;  %v16573_v56 = vld [vmem:[#allocation123_spill] sm:$0xff] }
 0x333   : > { %1172 = vrot.lane.b32.xlu1 %v16572_v39, %s16541_s0  ;;  %1840 = vrot.lane.b32.xlu0 %v9678_v34, %s16318_s25  ;;  %v1068_v34 = vsel %vm853_vm2, %v1066_v40, %v1067_v23 }
 0x334   : > { %8959 = vmatmul.mubr.msk.f32.gmra.mrb[12].mxu0 %vm2164_vm11, %v2135_v13  ;;  %v1905_v13 = vsel %vm1890_vm3, %v16573_v56, %v11904_v8 }
 0x335   : > { %v1537_v57 = vpop.permute.xlu1 %1536  ;;  %v12661_v10 = vpop.permute.xlu0 %1250 }
 0x337   : > { %1268 = vrot.lane.b32.xlu1 %v9679_v49, %s16319_s13  ;;  %1266 = vrot.lane.b32.xlu0 %v12064_v38, %s16319_s13 }
 0x339   : > { %v12667_v54 = vpop.permute.xlu1 %3448  ;;  %v1631_v25 = vpop.permute.xlu0 %1630 }
 0x33b   : > { %1364 = vrot.lane.b32.xlu1 %v12113_v52, %s16323_s18  ;;  %1362 = vrot.lane.b32.xlu0 %v12091_v16, %s16323_s18  ;;  %v1938_v16 = vsel %vm1923_vm4, %v1905_v13, %v12569_v48  ;;  %v1070_v52 = vsel %vm853_vm2, %v1067_v23, %v1069_v7 }
 0x33c   : > { %v1971_v49 = vsel %vm1956_vm5, %v1938_v16, %v12590_v36  ;;  %v16576_v16 = vld [vmem:[#allocation125_spill] sm:$0xff] }
 0x33d   : > { %v12679_v51 = vpop.permute.xlu1 %1252  ;;  %v3543_v38 = vpop.permute.xlu0 %3542 }
 0x33f   : > { %1556 = vrot.lane.b32.xlu1 %v12212_v46, %s16534_s23  ;;  %1554 = vrot.lane.b32.xlu0 %v12102_v20, %s16534_s23  ;;  %v16574_v20 = vld [vmem:[#allocation101_spill] sm:$0xff] }
 0x340   : > { %v2004_v46 = vsel %vm1989_vm6, %v1971_v49, %v16574_v20 }
 0x341   : > { %v1633_v24 = vpop.permute.xlu1 %1632  ;;  %v12694_v39 = vpop.permute.xlu0 %1346  ;;  %v2037_v36 = vsel %vm2022_vm7, %v2004_v46, %v1535_v5 }
 0x342   : > { %v2070_v13 = vsel %vm2055_vm8, %v2037_v36, %v1631_v25 }
 0x343   : > { %v12696_v8 = vpop.f32.mrb[2].mxu0  ;;  %v12698_v56 = vpop.f32.mrb[24].mxu1  ;;  %1652 = vrot.lane.b32.xlu1 %v1070_v52, %s16528_s22  ;;  %1650 = vrot.lane.b32.xlu0 %v1068_v34, %s16528_s22  ;;  %v1906_v52 = vsel %vm1890_vm3, %v16576_v16, %v11938_v62  ;;  %v16577_v34 = vld [vmem:[#allocation32_spill] sm:$0xff] }
 0x344   : > { %v12704_v48 = vpop.f32.mrb[3].mxu0  ;;  %v12706_v23 = vpop.f32.mrb[25].mxu1  ;;  %v3740_v49 = vsel %vm1890_vm3, %v16577_v34, %v12533_v26  ;;  %v1939_v5 = vsel %vm1923_vm4, %v1906_v52, %v12578_v50  ;;  %v16579_v16 = vld [vmem:[#allocation56_spill] sm:$0xff]  ;;  %v16580_v52 = vld [vmem:[#allocation73_spill] sm:$0xff] }
 0x345   : > { %v12709_v7 = vpop.permute.xlu1 %3598  ;;  %v3545_v40 = vpop.permute.xlu0 %3544  ;;  %v3772_v25 = vsel %vm1923_vm4, %v3740_v49, %v12580_v1  ;;  %v1972_v62 = vsel %vm1956_vm5, %v1939_v5, %v12620_v31  ;;  %v2103_v34 = vsel %vm2088_vm9, %v2070_v13, %v16579_v16  ;;  %v16581_v31 = vld [vmem:[#allocation102_spill] sm:$0xff] }
 0x346   : > { %16575 = vst [vmem:[#allocation162_spill] sm:$0xff] %v12709_v7  ;;  %v3804_v46 = vsel %vm1956_vm5, %v3772_v25, %v12603_v30  ;;  %v12740_v30 = vld [vmem:[%s10013_s21 + $0x800] sm:$0xff]  ;;  %v2005_v13 = vsel %vm1989_vm6, %v1972_v62, %v16581_v31 }
 0x347   : > { %1174 = vrot.lane.b32.xlu1 %v16578_v21, %s16541_s0  ;;  %1842 = vrot.lane.b32.xlu0 %v9681_v45, %s16318_s25  ;;  %v3836_v45 = vsel %vm1989_vm6, %v3804_v46, %v12618_v55  ;;  %v2038_v5 = vsel %vm2022_vm7, %v2005_v13, %v1537_v57  ;;  %v9769_v31 = vld [vmem:[%s10013_s21 + $0x220] sm:$0xff] }
 0x348   : > { %v3868_v1 = vsel %vm2022_vm7, %v3836_v45, %v3447_v58  ;;  %v9684_v45 = vld [vmem:[%s10013_s21 + $0x598] sm:$0xff]  ;;  %v5173_v20 = vrot.slane %v9769_v31, 4 }
 0x349   : > { %v1823_v36 = vpop.permute.xlu1 %1822  ;;  %v12731_v37 = vpop.permute.xlu0 %1348  ;;  %v3900_v49 = vsel %vm2055_vm8, %v3868_v1, %v3543_v38  ;;  %v9685_v38 = vld [vmem:[%s10013_s21 + $0x590] sm:$0xff]  ;;  %v16584_v1 = vld [vmem:[#allocation58_spill] sm:$0xff] }
 0x34a   : > { %v2136_v50 = vsel %vm2121_vm10, %v2103_v34, %v1823_v36  ;;  %v3932_v58 = vsel %vm2088_vm9, %v3900_v49, %v12709_v7  ;;  %v2071_v36 = vsel %vm2055_vm8, %v2038_v5, %v1633_v24  ;;  %v16583_v34 = vld [vmem:[#allocation34_spill] sm:$0xff]  ;;  %v16629_v7 = vld [vmem:[#allocation175_spill] sm:$0xff] }
 0x34b   : > { %1176 = vrot.lane.b32.xlu1 %v16580_v52, %s16541_s0  ;;  %1844 = vrot.lane.b32.xlu0 %v12740_v30, %s16318_s25  ;;  %v3741_v62 = vsel %vm1890_vm3, %v16583_v34, %v12571_v63  ;;  %v2104_v13 = vsel %vm2088_vm9, %v2071_v36, %v16584_v1  ;;  %v9686_v36 = vld [vmem:[%s10013_s21 + $0x828] sm:$0xff]  ;;  %v9687_v34 = vld [vmem:[%s10013_s21 + $0x830] sm:$0xff] }
 0x34c   : > { %8961 = vmatprep.mubr.msk.f32.mxu0 %vm2164_vm11, %v2136_v50  ;;  %v3773_v57 = vsel %vm1923_vm4, %v3741_v62, %v12605_v32  ;;  %v12775_v32 = vld [vmem:[%s16034_s2 + $0x1] ss:$0 sm:$0xff]  ;;  %v1074_v62 = vrot.slane %v9687_v34, 4 }
 0x34d   : > { %v3675_v25 = vpop.permute.xlu1 %3674  ;;  %v12751_v46 = vpop.permute.xlu0 %3600  ;;  %v3805_v24 = vsel %vm1956_vm5, %v3773_v57, %v12636_v42 }
 0x34e   : > { %16582 = vst [vmem:[#allocation169_spill] sm:$0xff] %v12751_v46  ;;  %v3964_v16 = vsel %vm2121_vm10, %v3932_v58, %v3675_v25  ;;  %v3837_v5 = vsel %vm1989_vm6, %v3805_v24, %v12647_v9  ;;  %v16585_v24 = vld [vmem:[#allocation106_spill] sm:$0xff] }
 0x34f   : > { %1272 = vrot.lane.b32.xlu1 %v9684_v45, %s16319_s13  ;;  %1270 = vrot.lane.b32.xlu0 %v9685_v38, %s16319_s13  ;;  %v3869_v25 = vsel %vm2022_vm7, %v3837_v5, %v12667_v54  ;;  %v12788_v45 = vld [vmem:[%s10013_s21 + $0x820] sm:$0xff] }
 0x350   : > { %9043 = vmatprep.mubr.msk.f32.mxu1 %vm2164_vm11, %v3964_v16  ;;  %v3901_v42 = vsel %vm2055_vm8, %v3869_v25, %v3545_v40  ;;  %v1072_v16 = vrot.slane %v9686_v36, 4  ;;  %v1071_v38 = vrot.slane %v12788_v45, 4  ;;  %v16586_v25 = vld [vmem:[#allocation105_spill] sm:$0xff] }
 0x351   : > { %v1825_v50 = vpop.permute.xlu1 %1824  ;;  %v1539_v49 = vpop.permute.xlu0 %1538  ;;  %v3933_v54 = vsel %vm2088_vm9, %v3901_v42, %v12751_v46  ;;  %v4148_v42 = vadd.f32 %v16586_v25, %v12775_v32  ;;  %v16611_v46 = vld [vmem:[#allocation158_spill] sm:$0xff] }
 0x352   : > { %v2137_v58 = vsel %vm2121_vm10, %v2104_v13, %v1825_v50  ;;  %v1075_v50 = vsel %vm853_vm2, %v1072_v16, %v1074_v62  ;;  %v1073_v1 = vsel %vm853_vm2, %v1071_v38, %v1072_v16 }
 0x353   : > { %1368 = vrot.lane.b32.xlu1 %v12274_v18, %s16323_s18  ;;  %1366 = vrot.lane.b32.xlu0 %v12231_v0, %s16323_s18  ;;  %v4143_v0 = vadd.f32 %v12775_v32, %v16585_v24 }
 0x354   : > { %8962 = vmatmul.mubr.msk.f32.gmra.mrb[14].mxu0 %vm2164_vm11, %v2137_v58  ;;  %v16290_v58 = vmov 0.0  }
 0x355   : > { %v12793_v57 = vpop.permute.xlu1 %1254  ;;  %v3677_v18 = vpop.permute.xlu0 %3676  ;;  %v4301_v36 = vmax.f32 %v4143_v0, 0.0  ;;  %v16589_v0 = vld [vmem:[#allocation137_spill] sm:$0xff] }
 0x356   : > { %v3965_v40 = vsel %vm2121_vm10, %v3933_v54, %v3677_v18  ;;  %v4302_v18 = vmax.f32 %v4148_v42, 0.0 }
 0x357   : > { %1560 = vrot.lane.b32.xlu1 %v12372_v53, %s16534_s23  ;;  %1558 = vrot.lane.b32.xlu0 %v12243_v4, %s16534_s23  ;;  %v16587_v53 = vld [vmem:[#allocation135_spill] sm:$0xff] }
 0x358   : > { %9044 = vmatmul.mubr.msk.f32.gmra.mrb[30].mxu1 %vm2164_vm11, %v3965_v40  ;;  %v1907_v4 = vsel %vm1890_vm3, %v16587_v53, %v12188_v11  ;;  %v16588_v11 = vld [vmem:[#allocation117_spill] sm:$0xff]  ;;  %v16590_v40 = vld [vmem:[#allocation79_spill] sm:$0xff] }
 0x359   : > { %v1635_v13 = vpop.permute.xlu1 %1634  ;;  %v1541_v5 = vpop.permute.xlu0 %1540  ;;  %4511 = vmatprep.mubr.f32.mxu1 %v16290_v58  ;;  %v1940_v16 = vsel %vm1923_vm4, %v1907_v4, %v12661_v10  ;;  %v4153_v24 = vadd.f32 %v12775_v32, %v16588_v11  ;;  %v1908_v10 = vsel %vm1890_vm3, %v16589_v0, %v12222_v2 }
 0x35a   : > { %v1973_v62 = vsel %vm1956_vm5, %v1940_v16, %v12694_v39  ;;  %v1941_v39 = vsel %vm1923_vm4, %v1908_v10, %v12679_v51  ;;  %v16593_v16 = vld [vmem:[#allocation81_spill] sm:$0xff] }
 0x35b   : > { %1656 = vrot.lane.b32.xlu1 %v1075_v50, %s16528_s22  ;;  %1654 = vrot.lane.b32.xlu0 %v1073_v1, %s16528_s22  ;;  %v16591_v50 = vld [vmem:[#allocation112_spill] sm:$0xff]  ;;  %v1974_v25 = vsel %vm1956_vm5, %v1941_v39, %v12731_v37  ;;  %v4303_v4 = vmax.f32 %v4153_v24, 0.0  ;;  %v16594_v37 = vld [vmem:[#allocation114_spill] sm:$0xff]  ;;  %v16596_v39 = vld [vmem:[#allocation129_spill] sm:$0xff] }
 0x35c   : > { %8526 = vmatmul.mubr.msk.f32.vlgmr.msra.gmra.mrb[32].mxu1 %vm4350_vm12, %v4301_v36  ;;  %v2006_v1 = vsel %vm1989_vm6, %v1973_v62, %v16591_v50  ;;  %v12848_v62 = vld [vmem:[%s10013_s21 + $0x838] sm:$0xff]  ;;  %v16595_v24 = vld [vmem:[#allocation64_spill] sm:$0xff]  ;;  %v9767_v50 = vld [vmem:[%s10013_s21 + $0x970] sm:$0xff] }
 0x35d   : > { %v12818_v38 = vpop.permute.xlu1 %1350  ;;  %v12820_v54 = vpop.permute.xlu0 %1256  ;;  %4517 = vmatprep.mubr.f32.mxu1 %v16290_v58  ;;  %v2039_v42 = vsel %vm2022_vm7, %v2006_v1, %v1539_v49  ;;  %v2007_v49 = vsel %vm1989_vm6, %v1974_v25, %v16594_v37  ;;  %v4163_v1 = vadd.f32 %v12775_v32, %v16596_v39  ;;  %v9692_v39 = vld [vmem:[%s10013_s21 + $0x868] sm:$0xff]  ;;  %v607_v37 = vld [vmem:[%s10013_s21 + $0x998] sm:$0xf] }
 0x35e   : > { %v2072_v51 = vsel %vm2055_vm8, %v2039_v42, %v1635_v13  ;;  %v5411_v12 = vrot.slane %v607_v37, 4 }
 0x35f   : > { %1178 = vrot.lane.b32.xlu1 %v16590_v40, %s16541_s0  ;;  %1846 = vrot.lane.b32.xlu0 %v9687_v34, %s16318_s25  ;;  %v16592_v34 = vld [vmem:[#allocation116_spill] sm:$0xff]  ;;  %v2105_v13 = vsel %vm2088_vm9, %v2072_v51, %v16595_v24  ;;  %v16610_v40 = vmov 0.0  }
 0x360   : > { %8527 = vmatmul.mubr.msk.f32.gmra.mrb[34].mxu1 %vm4350_vm12, %v4302_v18  ;;  %v4158_v53 = vadd.f32 %v16592_v34, %v12775_v32  ;;  %v2040_v18 = vsel %vm2022_vm7, %v2007_v49, %v1541_v5  ;;  %v9690_v34 = vld [vmem:[%s10013_s21 + $0x5d0] sm:$0xff]  ;;  %v16598_v51 = vld [vmem:[#allocation128_spill] sm:$0xff] }
 0x361   : > { %v12839_v36 = vpop.permute.xlu1 %1352  ;;  %v1637_v2 = vpop.permute.xlu0 %1636  ;;  %4523 = vmatprep.mubr.f32.mxu1 %v16290_v58  ;;  %v4168_v49 = vadd.f32 %v16598_v51, %v12775_v32 }
 0x362   : > { %v4304_v10 = vmax.f32 %v4158_v53, 0.0  ;;  %v2073_v42 = vsel %vm2055_vm8, %v2040_v18, %v1637_v2  ;;  %v16597_v53 = vld [vmem:[#allocation66_spill] sm:$0xff]  ;;  %v4305_v18 = vmax.f32 %v4163_v1, 0.0  ;;  %v1079_v1 = vrot.slane %v9692_v39, 4 }
 0x363   : > { %1180 = vrot.lane.b32.xlu1 %v16593_v16, %s16541_s0  ;;  %1848 = vrot.lane.b32.xlu0 %v12848_v62, %s16318_s25  ;;  %v16601_v16 = vld [vmem:[#allocation148_spill] sm:$0xff] }
 0x364   : > { %8528 = vmatmul.mubr.msk.f32.gmra.mrb[36].mxu1 %vm4350_vm12, %v4303_v4  ;;  %v2106_v4 = vsel %vm2088_vm9, %v2073_v42, %v16597_v53  ;;  %v12890_v42 = vld [vmem:[%s10013_s21 + $0x858] sm:$0xff] }
 0x365   : > { %v12856_v11 = vpop.permute.xlu1 %1162  ;;  %v1827_v0 = vpop.permute.xlu0 %1826  ;;  %4529 = vmatprep.mubr.f32.mxu1 %v16290_v58 }
 0x366   : > { %v2138_v25 = vsel %vm2121_vm10, %v2105_v13, %v1827_v0  ;;  %v9691_v0 = vld [vmem:[%s10013_s21 + $0x860] sm:$0xff] }
 0x367   : > { %1276 = vrot.lane.b32.xlu1 %v9690_v34, %s16319_s13  ;;  %1274 = vrot.lane.b32.xlu0 %v12377_v28, %s16319_s13 }
 0x368   : > { %8964 = vmatprep.mubr.msk.f32.mxu0 %vm2164_vm11, %v2138_v25  ;;  %8529 = vmatmul.mubr.msk.f32.gmra.mrb[38].mxu1 %vm4350_vm12, %v4304_v10  ;;  %v1077_v10 = vrot.slane %v9691_v0, 4  ;;  %v1076_v25 = vrot.slane %v12890_v42, 4 }
 0x369   : > { %v1829_v5 = vpop.permute.xlu1 %1828  ;;  %v1543_v2 = vpop.permute.xlu0 %1542  ;;  %4535 = vmatprep.mubr.f32.mxu1 %v16290_v58 }
 0x36a   : > { %v2139_v28 = vsel %vm2121_vm10, %v2106_v4, %v1829_v5  ;;  %v16599_v5 = vld [vmem:[#allocation139_spill] sm:$0xff]  ;;  %v1080_v4 = vsel %vm853_vm2, %v1077_v10, %v1079_v1  ;;  %v1078_v51 = vsel %vm853_vm2, %v1076_v25, %v1077_v10 }
 0x36b   : > { %v12877_v24 = vpop.f32.mrb[4].mxu0  ;;  %1372 = vrot.lane.b32.xlu1 %v12421_v43, %s16323_s18  ;;  %1370 = vrot.lane.b32.xlu0 %v12397_v35, %s16323_s18  ;;  %v4306_v35 = vmax.f32 %v4168_v49, 0.0  ;;  %v4173_v53 = vadd.f32 %v12775_v32, %v16599_v5  ;;  %v16600_v49 = vld [vmem:[#allocation138_spill] sm:$0xff] }
 0x36c   : > { %v12883_v13 = vpop.f32.mrb[5].mxu0  ;;  %8965 = vmatmul.mubr.msk.f32.gmra.mrb[16].mxu0 %vm2164_vm11, %v2139_v28  ;;  %8530 = vmatmul.mubr.msk.f32.gmra.mrb[40].mxu1 %vm4350_vm12, %v4305_v18  ;;  %v4178_v0 = vadd.f32 %v16600_v49, %v12775_v32 }
 0x36d   : > { %v12893_v34 = vpop.permute.xlu1 %1258  ;;  %v12895_v43 = vpop.permute.xlu0 %1164  ;;  %4541 = vmatprep.mubr.f32.mxu1 %v16290_v58  ;;  %v4307_v5 = vmax.f32 %v4173_v53, 0.0  ;;  %v2522_v53 = vld [vmem:[%s16038_s6 + $0x8] sm:$0xff] }
 0x36f   : > { %1564 = vrot.lane.b32.xlu1 %v12447_v33, %s16534_s23  ;;  %1562 = vrot.lane.b32.xlu0 %v12409_v14, %s16534_s23  ;;  %v1909_v33 = vsel %vm1890_vm3, %v16601_v16, %v12533_v26  ;;  %v16602_v26 = vld [vmem:[#allocation150_spill] sm:$0xff] }
 0x370   : > { %8531 = vmatmul.mubr.msk.f32.gmra.mrb[42].mxu1 %vm4350_vm12, %v4306_v35  ;;  %v1942_v14 = vsel %vm1923_vm4, %v1909_v33, %v12793_v57  ;;  %v4308_v35 = vmax.f32 %v4178_v0, 0.0  ;;  %v4183_v16 = vadd.f32 %v12775_v32, %v16602_v26  ;;  %v2524_v57 = vld [vmem:[%s16038_s6 + $0x18] sm:$0xff]  ;;  %v2521_v0 = vld [vmem:[%s16038_s6] sm:$0xff] }
 0x371   : > { %v1639_v18 = vpop.permute.xlu1 %1638  ;;  %v1545_v28 = vpop.permute.xlu0 %1544  ;;  %4547 = vmatprep.mubr.f32.mxu1 %v16290_v58  ;;  %v1975_v10 = vsel %vm1956_vm5, %v1942_v14, %v12818_v38  ;;  %v16603_v38 = vld [vmem:[#allocation151_spill] sm:$0xff]  ;;  %v9191_v49 = vpack.c.bf16 %v2524_v57, %v2522_v53  ;;  %v16605_v14 = vld [vmem:[#allocation124_spill] sm:$0xff] }
 0x373   : > { %1660 = vrot.lane.b32.xlu1 %v1080_v4, %s16528_s22  ;;  %1658 = vrot.lane.b32.xlu0 %v1078_v51, %s16528_s22  ;;  %v1910_v4 = vsel %vm1890_vm3, %v16603_v38, %v12571_v63  ;;  %v16604_v51 = vld [vmem:[#allocation87_spill] sm:$0xff]  ;;  %v2008_v63 = vsel %vm1989_vm6, %v1975_v10, %v16605_v14 }
 0x374   : > { %8532 = vmatmul.mubr.msk.f32.gmra.mrb[44].mxu1 %vm4350_vm12, %v4307_v5  ;;  %v2523_v5 = vld [vmem:[%s16038_s6 + $0x10] sm:$0xff]  ;;  %v1943_v33 = vsel %vm1923_vm4, %v1910_v4, %v12820_v54  ;;  %v2041_v53 = vsel %vm2022_vm7, %v2008_v63, %v1543_v2  ;;  %9192 = vmatprep.subr.bf16.mxu0 %v9191_v49 }
 0x375   : > { %v12920_v1 = vpop.permute.xlu1 %1354  ;;  %v12922_v25 = vpop.permute.xlu0 %1260  ;;  %4553 = vmatprep.mubr.f32.mxu1 %v16290_v58  ;;  %v9193_v26 = vpack.c.bf16 %v2523_v5, %v2521_v0  ;;  %v16606_v54 = vld [vmem:[#allocation149_spill] sm:$0xff]  ;;  %v2074_v10 = vsel %vm2055_vm8, %v2041_v53, %v1639_v18  ;;  %9263 = vmatprep.subr.bf16.mxu1 %v9191_v49  ;;  %v2525_v18 = vld [vmem:[%s16038_s6 + $0x20] sm:$0xff]  ;;  %v16608_v5 = vld [vmem:[#allocation126_spill] sm:$0xff] }
 0x376   : > { %v4188_v4 = vadd.f32 %v16606_v54, %v12775_v32  ;;  %v16607_v2 = vld [vmem:[#allocation89_spill] sm:$0xff]  ;;  %v16609_v54 = vld [vmem:[#allocation72_spill] sm:$0xff] }
 0x377   : > { %1182 = vrot.lane.b32.xlu1 %v16604_v51, %s16541_s0  ;;  %1850 = vrot.lane.b32.xlu0 %v9692_v39, %s16318_s25  ;;  %v1976_v39 = vsel %vm1956_vm5, %v1943_v33, %v12839_v36  ;;  %v4309_v51 = vmax.f32 %v4183_v16, 0.0  ;;  %v2528_v36 = vld [vmem:[%s16038_s6 + $0x38] sm:$0xff]  ;;  %v12968_v0 = vld [vmem:[%s10013_s21 + $0x870] sm:$0xff] }
 0x378   : > { %8533 = vmatmul.mubr.msk.f32.gmra.mrb[46].mxu1 %vm4350_vm12, %v4308_v35  ;;  %9194 = vmatpush1.bf16.msra.mxu0 %v9193_v26  ;;  %v2526_v35 = vld [vmem:[%s16038_s6 + $0x28] sm:$0xff]  ;;  %v2527_v16 = vld [vmem:[%s16038_s6 + $0x30] sm:$0xff]  ;;  %v2009_v33 = vsel %vm1989_vm6, %v1976_v39, %v16608_v5  ;;  %v4310_v21 = vmax.f32 %v4188_v4, 0.0  ;;  %v4193_v39 = vadd.f32 %v12775_v32, %v16611_v46  ;;  %v9696_v46 = vld [vmem:[%s10013_s21 + $0x600] sm:$0xff] }
 0x379   : > { %v12953_v57 = vpop.permute.xlu1 %1356  ;;  %v1641_v38 = vpop.permute.xlu0 %1640  ;;  %4559 = vmatprep.mubr.f32.mxu1 %v16290_v58  ;;  %v9195_v49 = vpack.c.bf16 %v2528_v36, %v2526_v35  ;;  %v2042_v63 = vsel %vm2022_vm7, %v2009_v33, %v1545_v28  ;;  %v2107_v58 = vsel %vm2088_vm9, %v2074_v10, %v16609_v54  ;;  %v9197_v52 = vpack.c.bf16 %v2527_v16, %v2525_v18  ;;  %v2530_v28 = vld [vmem:[%s16038_s6 + $0x48] sm:$0xff]  ;;  %v2532_v10 = vld [vmem:[%s16038_s6 + $0x58] sm:$0xff] }
 0x37a   : > { %9267 = vmatpush1.bf16.msra.mxu1 %v9193_v26  ;;  %v16612_v26 = vld [vmem:[#allocation161_spill] sm:$0xff]  ;;  %v9695_v36 = vld [vmem:[%s10013_s21 + $0x608] sm:$0xff]  ;;  %v16613_v33 = vld [vmem:[#allocation74_spill] sm:$0xff] }
 0x37b   : > { %1184 = vrot.lane.b32.xlu1 %v16607_v2, %s16541_s0  ;;  %1852 = vrot.lane.b32.xlu0 %v12968_v0, %s16318_s25  ;;  %v1911_v4 = vsel %vm1890_vm3, %v16612_v26, %v12856_v11 }
 0x37c   : > { %8534 = vmatmul.mubr.msk.f32.gmra.mrb[48].mxu1 %vm4350_vm12, %v4309_v51  ;;  %v2075_v51 = vsel %vm2055_vm8, %v2042_v63, %v1641_v38  ;;  %9196 = vmatprep.subr.bf16.mxu0 %v9195_v49  ;;  %v2529_v38 = vld [vmem:[%s16038_s6 + $0x40] sm:$0xff]  ;;  %v1944_v18 = vsel %vm1923_vm4, %v1911_v4, %v12893_v34 }
 0x37d   : > { %v1547_v53 = vpop.permute.xlu1 %1546  ;;  %v1831_v2 = vpop.permute.xlu0 %1830  ;;  %4565 = vmatprep.mubr.f32.mxu1 %v16610_v40  ;;  %9264 = vmatprep.subr.bf16.mxu1 %v9195_v49  ;;  %v1977_v11 = vsel %vm1956_vm5, %v1944_v18, %v12920_v1  ;;  %v2108_v49 = vsel %vm2088_vm9, %v2075_v51, %v16613_v33  ;;  %v2536_v1 = vld [vmem:[%s16038_s6 + $0x78] sm:$0xff]  ;;  %v16615_v51 = vld [vmem:[#allocation163_spill] sm:$0xff]  ;;  %v13048_v18 = vld [vmem:[%s10013_s21 + $0x890] sm:$0xff] }
 0x37e   : > { %v2140_v35 = vsel %vm2121_vm10, %v2107_v58, %v1831_v2  ;;  %v9199_v58 = vpack.c.bf16 %v2532_v10, %v2530_v28  ;;  %v2531_v2 = vld [vmem:[%s16038_s6 + $0x50] sm:$0xff]  ;;  %9198 = vmatpush1.bf16.msra.mxu0 %v9197_v52  ;;  %v4311_v10 = vmax.f32 %v4193_v39, 0.0  ;;  %9268 = vmatpush1.bf16.msra.mxu1 %v9197_v52  ;;  %v1912_v26 = vsel %vm1890_vm3, %v16615_v51, %v12895_v43  ;;  %v9697_v39 = vld [vmem:[%s10013_s21 + $0x898] sm:$0xff] }
 0x37f   : > { %1280 = vrot.lane.b32.xlu1 %v9695_v36, %s16319_s13  ;;  %1278 = vrot.lane.b32.xlu0 %v9696_v46, %s16319_s13  ;;  %v9201_v54 = vpack.c.bf16 %v2531_v2, %v2529_v38  ;;  %v16614_v28 = vld [vmem:[#allocation157_spill] sm:$0xff]  ;;  %v1082_v4 = vrot.slane %v9697_v39, 4  ;;  %v2533_v46 = vld [vmem:[%s16038_s6 + $0x60] sm:$0xff]  ;;  %v1945_v43 = vsel %vm1923_vm4, %v1912_v26, %v12922_v25  ;;  %v1081_v33 = vrot.slane %v13048_v18, 4  ;;  %v307_v26 = vld [vmem:[%s10013_s21 + $0x18] sm:$0xff] }
 0x380   : > { %8967 = vmatprep.mubr.msk.f32.mxu0 %vm2164_vm11, %v2140_v35  ;;  %8535 = vmatmul.mubr.msk.f32.gmra.mrb[50].mxu1 %vm4350_vm12, %v4310_v21  ;;  %v4198_v34 = vadd.f32 %v16614_v28, %v12775_v32  ;;  %v2534_v21 = vld [vmem:[%s16038_s6 + $0x68] sm:$0xff]  ;;  %v2535_v52 = vld [vmem:[%s16038_s6 + $0x70] sm:$0xff]  ;;  %v308_v39 = vld [vmem:[%s10013_s21 + $0x20] sm:$0xff] }
 0x381   : > { %v1549_v16 = vpop.permute.xlu1 %1548  ;;  %v1833_v63 = vpop.permute.xlu0 %1832  ;;  %4571 = vmatprep.mubr.f32.mxu1 %v16610_v40  ;;  %9200 = vmatprep.subr.bf16.mxu0 %v9199_v58  ;;  %v9203_v36 = vpack.c.bf16 %v2536_v1, %v2534_v21  ;;  %v16616_v38 = vld [vmem:[#allocation133_spill] sm:$0xff]  ;;  %v1083_v51 = vsel %vm853_vm2, %v1081_v33, %v1082_v4  ;;  %v5076_v33 = vrot.slane %v307_v26, 2 }
 0x382   : > { %v2141_v35 = vsel %vm2121_vm10, %v2108_v49, %v1833_v63  ;;  %v1978_v49 = vsel %vm1956_vm5, %v1945_v43, %v12953_v57  ;;  %9202 = vmatpush1.bf16.msra.mxu0 %v9201_v54  ;;  %9265 = vmatprep.subr.bf16.mxu1 %v9199_v58  ;;  %v16618_v57 = vld [vmem:[#allocation136_spill] sm:$0xff] }
 0x383   : > { %1376 = vrot.lane.b32.xlu1 %v12506_v29, %s16323_s18  ;;  %1374 = vrot.lane.b32.xlu0 %v12466_v44, %s16323_s18  ;;  %v2010_v29 = vsel %vm1989_vm6, %v1977_v11, %v16616_v38  ;;  %v9698_v44 = vld [vmem:[%s10013_s21 + $0x8a0] sm:$0xff]  ;;  %v9205_v11 = vpack.c.bf16 %v2535_v52, %v2533_v46  ;;  %v16619_v52 = vld [vmem:[#allocation80_spill] sm:$0xff] }
 0x384   : > { %8968 = vmatmul.mubr.msk.f32.gmra.mrb[18].mxu0 %vm2164_vm11, %v2141_v35  ;;  %8536 = vmatmul.mubr.msk.f32.gmra.mrb[52].mxu1 %vm4350_vm12, %v4311_v10  ;;  %v1084_v2 = vrot.slane %v9698_v44, 4  ;;  %v2043_v63 = vsel %vm2022_vm7, %v2010_v29, %v1547_v53  ;;  %v4312_v10 = vmax.f32 %v4198_v34, 0.0  ;;  %v16617_v35 = vld [vmem:[#allocation168_spill] sm:$0xff]  ;;  %v2011_v53 = vsel %vm1989_vm6, %v1978_v49, %v16618_v57  ;;  %v16620_v29 = vld [vmem:[#allocation166_spill] sm:$0xff] }
 0x385   : > { %v1645_v28 = vpop.permute.xlu1 %1644  ;;  %v1643_v25 = vpop.permute.xlu0 %1642  ;;  %4577 = vmatprep.mubr.f32.mxu1 %v16610_v40  ;;  %v4203_v21 = vadd.f32 %v12775_v32, %v16617_v35  ;;  %9204 = vmatprep.subr.bf16.mxu0 %v9203_v36  ;;  %v2044_v46 = vsel %vm2022_vm7, %v2011_v53, %v1549_v16  ;;  %v4208_v49 = vadd.f32 %v16620_v29, %v12775_v32  ;;  %v16621_v35 = vld [vmem:[#allocation82_spill] sm:$0xff]  ;;  %v16627_v57 = vld [vmem:[#allocation8_spill] sm:$0xff] }
 0x386   : > { %v2076_v1 = vsel %vm2055_vm8, %v2043_v63, %v1643_v25  ;;  %v1085_v34 = vsel %vm853_vm2, %v1082_v4, %v1084_v2  ;;  %9206 = vmatpush1.bf16.msra.mxu0 %v9205_v11  ;;  %v2077_v4 = vsel %vm2055_vm8, %v2044_v46, %v1645_v28  ;;  %9269 = vmatpush1.bf16.msra.mxu1 %v9201_v54  ;;  %v5078_v63 = vrot.slane %v308_v39, 2  ;;  %v309_v54 = vld [vmem:[%s10013_s21 + $0x28] sm:$0xff] }
 0x387   : > { %1568 = vrot.lane.b32.xlu1 %v12561_v3, %s16534_s23  ;;  %1566 = vrot.lane.b32.xlu0 %v12487_v15, %s16534_s23  ;;  %v2109_v3 = vsel %vm2088_vm9, %v2076_v1, %v16619_v52  ;;  %v306_v15 = vld [vmem:[%s10013_s21 + $0x10] sm:$0xff]  ;;  %v4313_v2 = vmax.f32 %v4203_v21, 0.0  ;;  %v2110_v21 = vsel %vm2088_vm9, %v2077_v4, %v16621_v35  ;;  %v4314_v53 = vmax.f32 %v4208_v49, 0.0  ;;  %v13093_v46 = vld [vmem:[%s10013_s21 + $0x8a8] sm:$0xff]  ;;  %v16623_v49 = vld [vmem:[#allocation26_spill] sm:$0xff] }
 0x388   : > { %8537 = vmatmul.mubr.msk.f32.gmra.mrb[54].mxu1 %vm4350_vm12, %v4312_v10  ;;  %v5075_v25 = vrot.slane %v306_v15, 2  ;;  %v310_v1 = vld [vmem:[%s10013_s21 + $0x30] sm:$0xf]  ;;  %9266 = vmatprep.subr.bf16.mxu1 %v9203_v36  ;;  %v5079_v52 = vsel %vm712_vm1, %v5076_v33, %v5078_v63  ;;  %v5127_v15 = vrot.slane %v308_v39, 4  ;;  %v313_v35 = vld [vmem:[%s10013_s21 + $0x48] sm:$0xff] }
 0x389   : > { %v13070_v58 = vpop.permute.xlu1 %1166  ;;  %v1835_v43 = vpop.permute.xlu0 %1834  ;;  %4583 = vmatprep.mubr.f32.mxu1 %v16610_v40 }
 0x38a   : > { %v2142_v16 = vsel %vm2121_vm10, %v2109_v3, %v1835_v43  ;;  %9270 = vmatpush1.bf16.msra.mxu1 %v9205_v11  ;;  %v5077_v36 = vsel %vm712_vm1, %v5075_v25, %v5076_v33  ;;  %v5128_v3 = vrot.slane %v309_v54, 4  ;;  %v5130_v43 = vrot.slane %v310_v1, 4 }
 0x38b   : > { %1664 = vrot.lane.b32.xlu1 %v1085_v34, %s16528_s22  ;;  %1662 = vrot.lane.b32.xlu0 %v1083_v51, %s16528_s22  ;;  %v16622_v34 = vld [vmem:[#allocation10_spill] sm:$0xff] }
 0x38c   : > { %8970 = vmatprep.mubr.msk.f32.mxu0 %vm2164_vm11, %v2142_v16  ;;  %8538 = vmatmul.mubr.msk.f32.gmra.mrb[56].mxu1 %vm4350_vm12, %v4313_v2  ;;  %v4213_v51 = vadd.f32 %v12775_v32, %v16622_v34  ;;  %v5131_v63 = vsel %vm853_vm2, %v5128_v3, %v5130_v43  ;;  %v5129_v25 = vsel %vm853_vm2, %v5127_v15, %v5128_v3  ;;  %v13130_v3 = vld [vmem:[%s10013_s21 + $0x418] sm:$0xff]  ;;  %v5080_v15 = vrot.slane %v313_v35, 2 }
 0x38d   : > { %v1169_v10 = vpop.permute.xlu1 %1168  ;;  %v1837_v28 = vpop.permute.xlu0 %1836  ;;  %4589 = vmatprep.mubr.f32.mxu1 %v16610_v40  ;;  %v5224_v43 = vrot.slane %v13130_v3, 4 }
 0x38e   : > { %v2143_v26 = vsel %vm2121_vm10, %v2110_v21, %v1837_v28  ;;  %v4315_v2 = vmax.f32 %v4213_v51, 0.0  ;;  %v314_v21 = vld [vmem:[%s10013_s21 + $0x50] sm:$0xff]  ;;  %v1914_v35 = vsel %vm1890_vm3, %v16627_v57, %v1169_v10 }
 0x38f   : > { %1856 = vrot.lane.b32.xlu1 %v13093_v46, %s16318_s25  ;;  %1854 = vrot.lane.b32.xlu0 %v9698_v44, %s16318_s25  ;;  %v4218_v44 = vadd.f32 %v16623_v49, %v12775_v32  ;;  %v9701_v51 = vld [vmem:[%s10013_s21 + $0x410] sm:$0xff]  ;;  %v5081_v49 = vrot.slane %v314_v21, 2  ;;  %v9703_v21 = vld [vmem:[%s10013_s21 + $0x3f8] sm:$0xff] }
 0x390   : > { %8971 = vmatmul.mubr.msk.f32.gmra.mrb[20].mxu0 %vm2164_vm11, %v2143_v26  ;;  %8539 = vmatmul.mubr.msk.f32.gmra.mrb[58].mxu1 %vm4350_vm12, %v4314_v53  ;;  %v16624_v53 = vld [vmem:[#allocation30_spill] sm:$0xff]  ;;  %v5223_v26 = vrot.slane %v9701_v51, 4  ;;  %v16626_v51 = vld [vmem:[#allocation29_spill] sm:$0xff] }
 0x391   : > { %v1265_v11 = vpop.permute.xlu1 %1264  ;;  %v1263_v29 = vpop.permute.xlu0 %1262  ;;  %4595 = vmatprep.mubr.f32.mxu1 %v16610_v40  ;;  %v4316_v1 = vmax.f32 %v4218_v44, 0.0  ;;  %v4223_v34 = vadd.f32 %v12775_v32, %v16624_v53 }
 0x393   : > { %v13105_v4 = vpop.f32.mrb[6].mxu0  ;;  %v13107_v16 = vpop.f32.mrb[26].mxu1  ;;  %5455 = vrot.lane.b32.xlu1 %v5079_v52, %s16541_s0  ;;  %5453 = vrot.lane.b32.xlu0 %v5077_v36, %s16541_s0  ;;  %v16625_v52 = vld [vmem:[#allocation172_spill] sm:$0xff]  ;;  %v4317_v3 = vmax.f32 %v4223_v34, 0.0 }
 0x394   : > { %v13111_v33 = vpop.f32.mrb[7].mxu0  ;;  %v13113_v39 = vpop.f32.mrb[27].mxu1  ;;  %8540 = vmatmul.mubr.msk.f32.gmra.mrb[60].mxu1 %vm4350_vm12, %v4315_v2  ;;  %v1913_v36 = vsel %vm1890_vm3, %v16625_v52, %v13070_v58  ;;  %v4228_v52 = vadd.f32 %v16626_v51, %v12775_v32 }
 0x395   : > { %v1361_v28 = vpop.permute.xlu1 %1360  ;;  %v1359_v54 = vpop.permute.xlu0 %1358  ;;  %4601 = vmatprep.mubr.f32.mxu1 %v16610_v40  ;;  %v1946_v44 = vsel %vm1923_vm4, %v1913_v36, %v1263_v29  ;;  %v9704_v29 = vld [vmem:[%s10013_s21 + $0x3f0] sm:$0xff]  ;;  %v1947_v36 = vsel %vm1923_vm4, %v1914_v35, %v1265_v11  ;;  %v4233_v11 = vadd.f32 %v12775_v32, %v16629_v7  ;;  %v434_v35 = vld [vmem:[%s10013_s21 + $0x420] sm:$0xf] }
 0x396   : > { %v1979_v2 = vsel %vm1956_vm5, %v1946_v44, %v1359_v54  ;;  %v5225_v54 = vsel %vm853_vm2, %v5223_v26, %v5224_v43  ;;  %v16628_v44 = vld [vmem:[#allocation144_spill] sm:$0xff]  ;;  %v1980_v10 = vsel %vm1956_vm5, %v1947_v36, %v1361_v28  ;;  %v16630_v28 = vld [vmem:[#allocation146_spill] sm:$0xff]  ;;  %v5226_v36 = vrot.slane %v434_v35, 4 }
 0x397   : > { %5491 = vrot.lane.b32.xlu1 %v5131_v63, %s16319_s13  ;;  %5489 = vrot.lane.b32.xlu0 %v5129_v25, %s16319_s13  ;;  %v315_v63 = vld [vmem:[%s10013_s21 + $0x58] sm:$0xff]  ;;  %v13139_v25 = vld [vmem:[%s10013_s21 + $0x60] sm:$0xff]  ;;  %v2012_v51 = vsel %vm1989_vm6, %v1979_v2, %v16628_v44 }
 0x398   : > { %8541 = vmatmul.mubr.msk.f32.gmra.mrb[62].mxu1 %vm4350_vm12, %v4316_v1  ;;  %v5082_v1 = vsel %vm712_vm1, %v5080_v15, %v5081_v49  ;;  %v5132_v34 = vrot.slane %v315_v63, 4  ;;  %v5133_v57 = vrot.slane %v13139_v25, 4  ;;  %v5083_v26 = vrot.slane %v315_v63, 2  ;;  %v359_v44 = vld [vmem:[%s10013_s21 + $0x1b8] sm:$0xf] }
 0x399   : > { %v1553_v53 = vpop.permute.xlu1 %1552  ;;  %v1551_v58 = vpop.permute.xlu0 %1550  ;;  %4607 = vmatprep.mubr.f32.mxu1 %v16610_v40  ;;  %v4318_v15 = vmax.f32 %v4228_v52, 0.0 }
 0x39a   : > { %v5134_v25 = vsel %vm853_vm2, %v5132_v34, %v5133_v57 }
 0x39b   : > { %5587 = vrot.lane.b32.xlu1 %v9703_v21, %s16323_s18  ;;  %5585 = vrot.lane.b32.xlu0 %v9704_v29, %s16323_s18  ;;  %v2045_v21 = vsel %vm2022_vm7, %v2012_v51, %v1551_v58  ;;  %v2013_v58 = vsel %vm1989_vm6, %v1980_v10, %v16630_v28  ;;  %v4319_v10 = vmax.f32 %v4233_v11, 0.0 }
 0x39c   : > { %8542 = vmatmul.mubr.msk.f32.gmra.mrb[64].mxu1 %vm4350_vm12, %v4317_v3  ;;  %v2046_v63 = vsel %vm2022_vm7, %v2013_v58, %v1553_v53  ;;  %v16631_v3 = vld [vmem:[#allocation88_spill] sm:$0xff]  ;;  %v16634_v58 = vld [vmem:[#allocation35_spill] sm:$0xff] }
 0x39d   : > { %v1649_v29 = vpop.permute.xlu1 %1648  ;;  %v1647_v38 = vpop.permute.xlu0 %1646  ;;  %4613 = vmatprep.mubr.f32.mxu1 %v16610_v40  ;;  %v317_v53 = vld [vmem:[%s10013_s21 + $0x68] sm:$0xf] }
 0x39e   : > { %v2078_v2 = vsel %vm2055_vm8, %v2045_v21, %v1647_v38  ;;  %v2079_v21 = vsel %vm2055_vm8, %v2046_v63, %v1649_v29  ;;  %v5227_v29 = vsel %vm853_vm2, %v5224_v43, %v5226_v36  ;;  %v5135_v11 = vrot.slane %v317_v53, 4  ;;  %v13199_v36 = vld [vmem:[%s10013_s21 + $0x88] sm:$0xff] }
 0x39f   : > { %5681 = vrot.lane.b32.xlu1 %v5225_v54, %s16534_s23  ;;  %5457 = vrot.lane.b32.xlu0 %v5082_v1, %s16541_s0  ;;  %v2111_v7 = vsel %vm2088_vm9, %v2078_v2, %v16631_v3  ;;  %v5084_v54 = vsel %vm712_vm1, %v5081_v49, %v5083_v26  ;;  %v16632_v1 = vld [vmem:[#allocation36_spill] sm:$0xff]  ;;  %v16633_v26 = vld [vmem:[#allocation90_spill] sm:$0xff]  ;;  %v9705_v3 = vld [vmem:[%s10013_s21 + $0x7e0] sm:$0xff]  ;;  %v5086_v53 = vrot.slane %v13199_v36, 2 }
 0x3a0   : > { %8543 = vmatmul.mubr.msk.f32.gmra.mrb[66].mxu1 %vm4350_vm12, %v4318_v15  ;;  %v4238_v51 = vadd.f32 %v16632_v1, %v12775_v32  ;;  %v2112_v15 = vsel %vm2088_vm9, %v2079_v21, %v16633_v26  ;;  %v16635_v1 = vld [vmem:[#allocation38_spill] sm:$0xff]  ;;  %v9706_v21 = vld [vmem:[%s10013_s21 + $0x428] sm:$0xff] }
 0x3a1   : > { %v1171_v52 = vpop.permute.xlu1 %1170  ;;  %v1839_v38 = vpop.permute.xlu0 %1838  ;;  %4619 = vmatprep.mubr.f32.mxu1 %v16610_v40 }
 0x3a2   : > { %v2144_v34 = vsel %vm2121_vm10, %v2111_v7, %v1839_v38  ;;  %v4320_v35 = vmax.f32 %v4238_v51, 0.0  ;;  %v5136_v38 = vsel %vm853_vm2, %v5133_v57, %v5135_v11  ;;  %v4248_v51 = vadd.f32 %v16635_v1, %v12775_v32  ;;  %v558_v57 = vld [vmem:[%s10013_s21 + $0x810] sm:$0xf] }
 0x3a3   : > { %8973 = vmatprep.mubr.msk.f32.mxu0 %vm2164_vm11, %v2144_v34  ;;  %5493 = vrot.lane.b32.xlu1 %v5134_v25, %s16319_s13  ;;  %v4243_v25 = vadd.f32 %v12775_v32, %v16634_v58  ;;  %v16636_v58 = vld [vmem:[#allocation45_spill] sm:$0xff] }
 0x3a4   : > { %8544 = vmatmul.mubr.msk.f32.gmra.mrb[68].mxu1 %vm4350_vm12, %v4319_v10  ;;  %5459 = vrot.lane.b32.xlu0 %v5084_v54, %s16541_s0  ;;  %v320_v54 = vld [vmem:[%s10013_s21 + $0x80] sm:$0xff] }
 0x3a5   : > { %v1173_v49 = vpop.permute.xlu1 %1172  ;;  %v1841_v2 = vpop.permute.xlu0 %1840  ;;  %4625 = vmatprep.mubr.f32.mxu1 %v16610_v40  ;;  %v4321_v10 = vmax.f32 %v4243_v25, 0.0  ;;  %v5085_v34 = vrot.slane %v320_v54, 2  ;;  %v4253_v25 = vadd.f32 %v12775_v32, %v16636_v58  ;;  %v5376_v54 = vrot.slane %v558_v57, 4  ;;  %v9710_v57 = vld [vmem:[%s10013_s21 + $0x450] sm:$0xff] }
 0x3a6   : > { %v2145_v63 = vsel %vm2121_vm10, %v2112_v15, %v1841_v2  ;;  %v5373_v2 = vrot.slane %v12740_v30, 4  ;;  %v5229_v58 = vrot.slane %v9710_v57, 4 }
 0x3a7   : > { %8974 = vmatmul.mubr.msk.f32.gmra.mrb[22].mxu0 %vm2164_vm11, %v2145_v63  ;;  %5789 = vrot.lane.b32.xlu1 %v9705_v3, %s16528_s22  ;;  %v16637_v63 = vld [vmem:[#allocation119_spill] sm:$0xff]  ;;  %v5087_v30 = vsel %vm712_vm1, %v5085_v34, %v5086_v53  ;;  %v16639_v34 = vld [vmem:[#allocation122_spill] sm:$0xff] }
 0x3a8   : > { %8545 = vmatmul.mubr.msk.f32.gmra.mrb[70].mxu1 %vm4350_vm12, %v4320_v35  ;;  %5683 = vrot.lane.b32.xlu0 %v5227_v29, %s16534_s23  ;;  %v9707_v29 = vld [vmem:[%s10013_s21 + $0x808] sm:$0xff]  ;;  %v4322_v35 = vmax.f32 %v4248_v51, 0.0  ;;  %v1915_v3 = vsel %vm1890_vm3, %v16637_v63, %v1171_v52  ;;  %v13230_v63 = vld [vmem:[%s10013_s21 + $0x98] sm:$0xff] }
 0x3a9   : > { %v1269_v7 = vpop.permute.xlu1 %1268  ;;  %v1267_v43 = vpop.permute.xlu0 %1266  ;;  %4631 = vmatprep.mubr.f32.mxu1 %v16610_v40  ;;  %v5374_v11 = vrot.slane %v9707_v29, 4 }
 0x3aa   : > { %v1948_v36 = vsel %vm1923_vm4, %v1915_v3, %v1267_v43  ;;  %v322_v43 = vld [vmem:[%s10013_s21 + $0x90] sm:$0xff]  ;;  %v4323_v3 = vmax.f32 %v4253_v25, 0.0  ;;  %v5138_v25 = vrot.slane %v13230_v63, 4 }
 0x3ab   : > { %5589 = vrot.lane.b32.xlu1 %v9706_v21, %s16323_s18  ;;  %v5375_v52 = vsel %vm853_vm2, %v5373_v2, %v5374_v11  ;;  %v9709_v21 = vld [vmem:[%s10013_s21 + $0x448] sm:$0xff]  ;;  %v5137_v57 = vrot.slane %v322_v43, 4  ;;  %v16641_v63 = vld [vmem:[#allocation165_spill] sm:$0xff] }
 0x3ac   : > { %8546 = vmatmul.mubr.msk.f32.gmra.mrb[72].mxu1 %vm4350_vm12, %v4321_v10  ;;  %5495 = vrot.lane.b32.xlu0 %v5136_v38, %s16319_s13  ;;  %v9708_v38 = vld [vmem:[%s10013_s21 + $0x430] sm:$0xff]  ;;  %v5228_v29 = vrot.slane %v9709_v21, 4 }
 0x3ad   : > { %v1365_v26 = vpop.permute.xlu1 %1364  ;;  %v1363_v15 = vpop.permute.xlu0 %1362  ;;  %4637 = vmatprep.mubr.f32.mxu1 %v16610_v40 }
 0x3ae   : > { %v1981_v1 = vsel %vm1956_vm5, %v1948_v36, %v1363_v15  ;;  %v1916_v15 = vsel %vm1890_vm3, %v16639_v34, %v1173_v49  ;;  %v16640_v36 = vld [vmem:[#allocation164_spill] sm:$0xff] }
 0x3af   : > { %5591 = vrot.lane.b32.xlu1 %v9708_v38, %s16323_s18  ;;  %v5377_v38 = vsel %vm853_vm2, %v5374_v11, %v5376_v54  ;;  %v1949_v2 = vsel %vm1923_vm4, %v1916_v15, %v1269_v7  ;;  %v2014_v21 = vsel %vm1989_vm6, %v1981_v1, %v16640_v36  ;;  %v5230_v7 = vsel %vm853_vm2, %v5228_v29, %v5229_v58 }
 0x3b0   : > { %8547 = vmatmul.mubr.msk.f32.gmra.mrb[74].mxu1 %vm4350_vm12, %v4322_v35  ;;  %5791 = vrot.lane.b32.xlu0 %v12676_v19, %s16528_s22  ;;  %v16638_v35 = vld [vmem:[#allocation43_spill] sm:$0xff]  ;;  %v5088_v11 = vrot.slane %v322_v43, 2  ;;  %v4263_v1 = vadd.f32 %v12775_v32, %v12706_v23 }
 0x3b1   : > { %v1557_v51 = vpop.permute.xlu1 %1556  ;;  %v1555_v10 = vpop.permute.xlu0 %1554  ;;  %4643 = vmatprep.mubr.f32.mxu1 %v16610_v40  ;;  %v4258_v19 = vadd.f32 %v16638_v35, %v12775_v32  ;;  %v1982_v35 = vsel %vm1956_vm5, %v1949_v2, %v1365_v26 }
 0x3b2   : > { %v2047_v49 = vsel %vm2022_vm7, %v2014_v21, %v1555_v10  ;;  %v2015_v26 = vsel %vm1989_vm6, %v1982_v35, %v16641_v63  ;;  %v5139_v10 = vsel %vm853_vm2, %v5137_v57, %v5138_v25  ;;  %v4268_v21 = vadd.f32 %v12698_v56, %v12775_v32 }
 0x3b3   : > { %5461 = vrot.lane.b32.xlu1 %v5087_v30, %s16541_s0  ;;  %v4324_v54 = vmax.f32 %v4258_v19, 0.0  ;;  %v2048_v29 = vsel %vm2022_vm7, %v2015_v26, %v1557_v51  ;;  %v16642_v19 = vld [vmem:[#allocation96_spill] sm:$0xff]  ;;  %v4325_v35 = vmax.f32 %v4263_v1, 0.0 }
 0x3b4   : > { %8548 = vmatmul.mubr.msk.f32.gmra.mrb[76].mxu1 %vm4350_vm12, %v4323_v3  ;;  %5921 = vrot.lane.b32.xlu0 %v5375_v52, %s16318_s25  ;;  %v441_v3 = vld [vmem:[%s10013_s21 + $0x458] sm:$0xf] }
 0x3b5   : > { %v1653_v30 = vpop.permute.xlu1 %1652  ;;  %v1651_v34 = vpop.permute.xlu0 %1650  ;;  %4649 = vmatprep.mubr.f32.mxu1 %v16610_v40  ;;  %v5231_v2 = vrot.slane %v441_v3, 4  ;;  %v4273_v3 = vadd.f32 %v12775_v32, %v13113_v39  ;;  %v327_v39 = vld [vmem:[%s10013_s21 + $0xb8] sm:$0xff] }
 0x3b6   : > { %v2080_v52 = vsel %vm2055_vm8, %v2047_v49, %v1651_v34  ;;  %v2081_v49 = vsel %vm2055_vm8, %v2048_v29, %v1653_v30  ;;  %v324_v34 = vld [vmem:[%s10013_s21 + $0xa0] sm:$0xf] }
 0x3b7   : > { %5923 = vrot.lane.b32.xlu1 %v5377_v38, %s16318_s25  ;;  %v2113_v23 = vsel %vm2088_vm9, %v2080_v52, %v16642_v19  ;;  %v5089_v38 = vsel %vm712_vm1, %v5086_v53, %v5088_v11  ;;  %v16643_v53 = vld [vmem:[#allocation98_spill] sm:$0xff]  ;;  %v5140_v1 = vrot.slane %v324_v34, 4  ;;  %v4326_v52 = vmax.f32 %v4268_v21, 0.0  ;;  %v9712_v21 = vld [vmem:[%s10013_s21 + $0x460] sm:$0xff] }
 0x3b8   : > { %8549 = vmatmul.mubr.msk.f32.gmra.mrb[78].mxu1 %vm4350_vm12, %v4324_v54  ;;  %5685 = vrot.lane.b32.xlu0 %v5230_v7, %s16534_s23  ;;  %v2114_v30 = vsel %vm2088_vm9, %v2081_v49, %v16643_v53  ;;  %v5232_v54 = vsel %vm853_vm2, %v5229_v58, %v5231_v2  ;;  %v4327_v2 = vmax.f32 %v4273_v3, 0.0 }
 0x3b9   : > { %v1175_v43 = vpop.permute.xlu1 %1174  ;;  %v1843_v15 = vpop.permute.xlu0 %1842  ;;  %4655 = vmatprep.mubr.f32.mxu1 %v16610_v40 }
 0x3ba   : > { %v2146_v57 = vsel %vm2121_vm10, %v2113_v23, %v1843_v15  ;;  %v5141_v23 = vsel %vm853_vm2, %v5138_v25, %v5140_v1  ;;  %v328_v15 = vld [vmem:[%s10013_s21 + $0xc0] sm:$0xff] }
 0x3bb   : > { %v13268_v51 = vpop.f32.mrb[8].mxu0  ;;  %8976 = vmatprep.mubr.msk.f32.mxu0 %vm2164_vm11, %v2146_v57  ;;  %5497 = vrot.lane.b32.xlu1 %v5139_v10, %s16319_s13  ;;  %v9711_v10 = vld [vmem:[%s10013_s21 + $0x818] sm:$0xff]  ;;  %v5091_v49 = vrot.slane %v328_v15, 2  ;;  %v565_v57 = vld [vmem:[%s10013_s21 + $0x848] sm:$0xf]  ;;  %v9715_v15 = vld [vmem:[%s10013_s21 + $0x480] sm:$0xff] }
 0x3bc   : > { %v13272_v7 = vpop.f32.mrb[9].mxu0  ;;  %8550 = vmatmul.mubr.msk.f32.gmra.mrb[80].mxu1 %vm4350_vm12, %v4325_v35  ;;  %5463 = vrot.lane.b32.xlu0 %v5089_v38, %s16541_s0  ;;  %v4278_v38 = vadd.f32 %v13107_v16, %v12775_v32  ;;  %v5090_v35 = vrot.slane %v327_v39, 2  ;;  %v9713_v32 = vld [vmem:[%s10013_s21 + $0x840] sm:$0xff]  ;;  %v5381_v3 = vrot.slane %v565_v57, 4  ;;  %v329_v57 = vld [vmem:[%s10013_s21 + $0xc8] sm:$0xff] }
 0x3bd   : > { %v1177_v56 = vpop.permute.xlu1 %1176  ;;  %v1845_v11 = vpop.permute.xlu0 %1844  ;;  %4661 = vmatprep.mubr.f32.mxu1 %v16610_v40  ;;  %v5379_v16 = vrot.slane %v9713_v32, 4  ;;  %v330_v32 = vld [vmem:[%s10013_s21 + $0xd0] sm:$0xff] }
 0x3be   : > { %v2147_v26 = vsel %vm2121_vm10, %v2114_v30, %v1845_v11  ;;  %v5378_v30 = vrot.slane %v12848_v62, 4  ;;  %v4328_v11 = vmax.f32 %v4278_v38, 0.0  ;;  %v5092_v62 = vsel %vm712_vm1, %v5090_v35, %v5091_v49 }
 0x3bf   : > { %8977 = vmatmul.mubr.msk.f32.gmra.mrb[24].mxu0 %vm2164_vm11, %v2147_v26  ;;  %5793 = vrot.lane.b32.xlu1 %v9711_v10, %s16528_s22  ;;  %v5233_v38 = vrot.slane %v9715_v15, 4  ;;  %v5382_v35 = vsel %vm853_vm2, %v5379_v16, %v5381_v3  ;;  %v16647_v3 = vld [vmem:[#allocation174_spill] sm:$0xff] }
 0x3c0   : > { %8551 = vmatmul.mubr.msk.f32.gmra.mrb[82].mxu1 %vm4350_vm12, %v4326_v52  ;;  %5687 = vrot.lane.b32.xlu0 %v5232_v54, %s16534_s23  ;;  %v16644_v54 = vld [vmem:[#allocation132_spill] sm:$0xff] }
 0x3c1   : > { %v1273_v29 = vpop.permute.xlu1 %1272  ;;  %v1271_v58 = vpop.permute.xlu0 %1270  ;;  %4667 = vmatprep.mubr.f32.mxu1 %v16610_v40  ;;  %v1917_v1 = vsel %vm1890_vm3, %v16644_v54, %v1175_v43  ;;  %v9714_v52 = vld [vmem:[%s10013_s21 + $0x468] sm:$0xff]  ;;  %v5380_v43 = vsel %vm853_vm2, %v5378_v30, %v5379_v16  ;;  %v5142_v54 = vrot.slane %v329_v57, 4 }
 0x3c2   : > { %v1950_v26 = vsel %vm1923_vm4, %v1917_v1, %v1271_v58  ;;  %v16645_v58 = vld [vmem:[#allocation134_spill] sm:$0xff]  ;;  %v5143_v1 = vrot.slane %v330_v32, 4  ;;  %v16648_v32 = vld [vmem:[#allocation104_spill] sm:$0xff] }
 0x3c3   : > { %5593 = vrot.lane.b32.xlu1 %v9712_v21, %s16323_s18 }
 0x3c4   : > { %8552 = vmatmul.mubr.msk.f32.gmra.mrb[84].mxu1 %vm4350_vm12, %v4327_v2  ;;  %5499 = vrot.lane.b32.xlu0 %v5141_v23, %s16319_s13  ;;  %v9716_v2 = vld [vmem:[%s10013_s21 + $0x488] sm:$0xff] }
 0x3c5   : > { %v1369_v34 = vpop.permute.xlu1 %1368  ;;  %v1367_v25 = vpop.permute.xlu0 %1366  ;;  %4673 = vmatprep.mubr.f32.mxu1 %v16610_v40  ;;  %v5234_v21 = vrot.slane %v9716_v2, 4 }
 0x3c6   : > { %v1983_v10 = vsel %vm1956_vm5, %v1950_v26, %v1367_v25 }
 0x3c7   : > { %5595 = vrot.lane.b32.xlu1 %v9714_v52, %s16323_s18 }
 0x3c8   : > { %8553 = vmatmul.mubr.msk.f32.gmra.mrb[86].mxu1 %vm4350_vm12, %v4328_v11  ;;  %5795 = vrot.lane.b32.xlu0 %v12788_v45, %s16528_s22  ;;  %v1918_v45 = vsel %vm1890_vm3, %v16645_v58, %v1177_v56  ;;  %v16646_v11 = vld [vmem:[#allocation28_spill] sm:$0xff]  ;;  %v5235_v56 = vsel %vm853_vm2, %v5233_v38, %v5234_v21 }
 0x3c9   : > { %v1561_v23 = vpop.permute.xlu1 %1560  ;;  %v1559_v39 = vpop.permute.xlu0 %1558  ;;  %4679 = vmatprep.mubr.f32.mxu1 %v16610_v40  ;;  %v1951_v25 = vsel %vm1923_vm4, %v1918_v45, %v1273_v29  ;;  %v2016_v30 = vsel %vm1989_vm6, %v1983_v10, %v16646_v11  ;;  %v448_v29 = vld [vmem:[%s10013_s21 + $0x490] sm:$0xf] }
 0x3ca   : > { %v1984_v52 = vsel %vm1956_vm5, %v1951_v25, %v1369_v34  ;;  %v2049_v26 = vsel %vm2022_vm7, %v2016_v30, %v1559_v39  ;;  %v5144_v34 = vsel %vm853_vm2, %v5142_v54, %v5143_v1  ;;  %v5236_v45 = vrot.slane %v448_v29, 4  ;;  %v331_v30 = vld [vmem:[%s10013_s21 + $0xd8] sm:$0xf]  ;;  %v16649_v54 = vld [vmem:[#allocation108_spill] sm:$0xff] }
 0x3cb   : > { %5465 = vrot.lane.b32.xlu1 %v5092_v62, %s16541_s0  ;;  %v5093_v62 = vrot.slane %v329_v57, 2  ;;  %v2017_v10 = vsel %vm1989_vm6, %v1984_v52, %v16647_v3 }
 0x3cc   : > { %5925 = vrot.lane.b32.xlu0 %v5380_v43, %s16318_s25  ;;  %v2050_v39 = vsel %vm2022_vm7, %v2017_v10, %v1561_v23  ;;  %v334_v10 = vld [vmem:[%s10013_s21 + $0xf0] sm:$0xff] }
 0x3cd   : > { %v1657_v15 = vpop.permute.xlu1 %1656  ;;  %v1655_v2 = vpop.permute.xlu0 %1654  ;;  %v5094_v57 = vsel %vm712_vm1, %v5091_v49, %v5093_v62 }
 0x3ce   : > { %v2082_v16 = vsel %vm2055_vm8, %v2049_v26, %v1655_v2  ;;  %v5237_v26 = vsel %vm853_vm2, %v5234_v21, %v5236_v45  ;;  %v9718_v21 = vld [vmem:[%s10013_s21 + $0x498] sm:$0xff] }
 0x3cf   : > { %5927 = vrot.lane.b32.xlu1 %v5382_v35, %s16318_s25  ;;  %v2115_v38 = vsel %vm2088_vm9, %v2082_v16, %v16648_v32  ;;  %v2083_v35 = vsel %vm2055_vm8, %v2050_v39, %v1657_v15  ;;  %v5145_v15 = vrot.slane %v331_v30, 4  ;;  %v5095_v39 = vrot.slane %v334_v10, 2  ;;  %v16650_v30 = vld [vmem:[#allocation145_spill] sm:$0xff] }
 0x3d0   : > { %5689 = vrot.lane.b32.xlu0 %v5235_v56, %s16534_s23  ;;  %v2116_v52 = vsel %vm2088_vm9, %v2083_v35, %v16649_v54  ;;  %v9717_v56 = vld [vmem:[%s10013_s21 + $0x850] sm:$0xff]  ;;  %v5383_v35 = vrot.slane %v12968_v0, 4 }
 0x3d1   : > { %v1179_v43 = vpop.permute.xlu1 %1178  ;;  %v1847_v58 = vpop.permute.xlu0 %1846  ;;  %v5146_v29 = vsel %vm853_vm2, %v5143_v1, %v5145_v15  ;;  %v9721_v15 = vld [vmem:[%s10013_s21 + $0x4b8] sm:$0xff] }
 0x3d2   : > { %v2148_v25 = vsel %vm2121_vm10, %v2115_v38, %v1847_v58  ;;  %v572_v58 = vld [vmem:[%s10013_s21 + $0x880] sm:$0xf] }
 0x3d3   : > { %8979 = vmatprep.mubr.msk.f32.mxu0 %vm2164_vm11, %v2148_v25  ;;  %5501 = vrot.lane.b32.xlu1 %v5144_v34, %s16319_s13  ;;  %v13357_v34 = vld [vmem:[%s10013_s21 + $0xf8] sm:$0xff] }
 0x3d4   : > { %5467 = vrot.lane.b32.xlu0 %v5094_v57, %s16541_s0  ;;  %v5096_v38 = vrot.slane %v13357_v34, 2  ;;  %v9719_v25 = vld [vmem:[%s10013_s21 + $0x878] sm:$0xff] }
 0x3d5   : > { %v1181_v23 = vpop.permute.xlu1 %1180  ;;  %v1849_v49 = vpop.permute.xlu0 %1848  ;;  %v5384_v1 = vrot.slane %v9719_v25, 4 }
 0x3d6   : > { %v2149_v2 = vsel %vm2121_vm10, %v2116_v52, %v1849_v49  ;;  %v1919_v52 = vsel %vm1890_vm3, %v16650_v30, %v1179_v43  ;;  %v9720_v49 = vld [vmem:[%s10013_s21 + $0x4a0] sm:$0xff]  ;;  %v5097_v0 = vsel %vm712_vm1, %v5095_v39, %v5096_v38 }
 0x3d7   : > { %8980 = vmatmul.mubr.msk.f32.gmra.mrb[26].mxu0 %vm2164_vm11, %v2149_v2  ;;  %5797 = vrot.lane.b32.xlu1 %v9717_v56, %s16528_s22  ;;  %v5238_v2 = vrot.slane %v9721_v15, 4  ;;  %v9722_v56 = vld [vmem:[%s10013_s21 + $0x4c0] sm:$0xff]  ;;  %v5385_v25 = vsel %vm853_vm2, %v5383_v35, %v5384_v1 }
 0x3d8   : > { %5691 = vrot.lane.b32.xlu0 %v5237_v26, %s16534_s23  ;;  %v5386_v26 = vrot.slane %v572_v58, 4  ;;  %v336_v30 = vld [vmem:[%s10013_s21 + $0x100] sm:$0xff] }
 0x3d9   : > { %v1277_v62 = vpop.permute.xlu1 %1276  ;;  %v1275_v16 = vpop.permute.xlu0 %1274  ;;  %v16651_v58 = vld [vmem:[#allocation147_spill] sm:$0xff] }
 0x3da   : > { %v1952_v10 = vsel %vm1923_vm4, %v1919_v52, %v1275_v16  ;;  %v1920_v15 = vsel %vm1890_vm3, %v16651_v58, %v1181_v23  ;;  %v5147_v23 = vrot.slane %v336_v30, 4 }
 0x3db   : > { %5597 = vrot.lane.b32.xlu1 %v9718_v21, %s16323_s18  ;;  %v1953_v39 = vsel %vm1923_vm4, %v1920_v15, %v1277_v62 }
 0x3dc   : > { %5503 = vrot.lane.b32.xlu0 %v5146_v29, %s16319_s13  ;;  %v5239_v29 = vrot.slane %v9722_v56, 4 }
 0x3dd   : > { %v1373_v57 = vpop.permute.xlu1 %1372  ;;  %v1371_v45 = vpop.permute.xlu0 %1370 }
 0x3de   : > { %v1985_v34 = vsel %vm1956_vm5, %v1952_v10, %v1371_v45  ;;  %v5240_v16 = vsel %vm853_vm2, %v5238_v2, %v5239_v29  ;;  %v1986_v58 = vsel %vm1956_vm5, %v1953_v39, %v1373_v57 }
 0x3df   : > { %5599 = vrot.lane.b32.xlu1 %v9720_v49, %s16323_s18  ;;  %v337_v49 = vld [vmem:[%s10013_s21 + $0x108] sm:$0xff]  ;;  %v2018_v45 = vsel %vm1989_vm6, %v1985_v34, %v12349_v59  ;;  %v5098_v34 = vrot.slane %v336_v30, 2  ;;  %v2019_v57 = vsel %vm1989_vm6, %v1986_v58, %v12385_v41 }
 0x3e0   : > { %5799 = vrot.lane.b32.xlu0 %v12890_v42, %s16528_s22  ;;  %v5387_v42 = vsel %vm853_vm2, %v5384_v1, %v5386_v26  ;;  %v5148_v10 = vrot.slane %v337_v49, 4  ;;  %v13398_v1 = vld [vmem:[%s16034_s2 + $0x1] ss:$0 sm:$0xff]  ;;  %v455_v59 = vld [vmem:[%s10013_s21 + $0x4c8] sm:$0xf] }
 0x3e1   : > { %v1565_v21 = vpop.permute.xlu1 %1564  ;;  %v1563_v43 = vpop.permute.xlu0 %1562 }
 0x3e2   : > { %v2052_v39 = vsel %vm2022_vm7, %v2019_v57, %v1565_v21 }
 0x3e3   : > { %v13382_v3 = vpop.f32.mrb[10].mxu0  ;;  %v9042_v56 = vpop.f32.mrb[28].mxu1  ;;  %5469 = vrot.lane.b32.xlu1 %v5097_v0, %s16541_s0  ;;  %v2051_v0 = vsel %vm2022_vm7, %v2018_v45, %v1563_v43  ;;  %v5149_v43 = vsel %vm853_vm2, %v5147_v23, %v5148_v10  ;;  %v16652_v45 = vld [vmem:[#allocation115_spill] sm:$0xff] }
 0x3e4   : > { %v13390_v35 = vpop.f32.mrb[11].mxu0  ;;  %v4282_v52 = vpop.f32.mrb[29].mxu1  ;;  %5929 = vrot.lane.b32.xlu0 %v5385_v25, %s16318_s25  ;;  %v4288_v25 = vadd.f32 %v13398_v1, %v9042_v56 }
 0x3e5   : > { %v4283_v62 = vadd.f32 %v13398_v1, %v4282_v52  ;;  %v1661_v26 = vpop.permute.xlu1 %1660  ;;  %v1659_v2 = vpop.permute.xlu0 %1658 }
 0x3e6   : > { %v2084_v15 = vsel %vm2055_vm8, %v2051_v0, %v1659_v2  ;;  %v5099_v0 = vsel %vm712_vm1, %v5096_v38, %v5098_v34  ;;  %v4330_v23 = vmax.f32 %v4288_v25, 0.0  ;;  %v16653_v38 = vld [vmem:[#allocation118_spill] sm:$0xff]  ;;  %v9724_v25 = vld [vmem:[%s10013_s21 + $0x888] sm:$0xff] }
 0x3e7   : > { %v4329_v49 = vmax.f32 %v4283_v62, 0.0  ;;  %5931 = vrot.lane.b32.xlu1 %v5387_v42, %s16318_s25  ;;  %v2117_v52 = vsel %vm2088_vm9, %v2084_v15, %v16652_v45  ;;  %v5241_v62 = vrot.slane %v455_v59, 4  ;;  %v2085_v42 = vsel %vm2055_vm8, %v2052_v39, %v1661_v26  ;;  %v342_v39 = vld [vmem:[%s10013_s21 + $0x130] sm:$0xff] }
 0x3e8   : > { %5693 = vrot.lane.b32.xlu0 %v5240_v16, %s16534_s23  ;;  %v338_v16 = vld [vmem:[%s10013_s21 + $0x110] sm:$0xf]  ;;  %v2118_v21 = vsel %vm2088_vm9, %v2085_v42, %v16653_v38 }
 0x3e9   : > { %8554 = vmatmul.mubr.msk.f32.gmra.mrb[88].mxu1 %vm4350_vm12, %v4329_v49  ;;  %v1183_v30 = vpop.permute.xlu1 %1182  ;;  %v1851_v56 = vpop.permute.xlu0 %1850  ;;  %v5242_v2 = vsel %vm853_vm2, %v5239_v29, %v5241_v62  ;;  %v5150_v34 = vrot.slane %v338_v16, 4  ;;  %v341_v29 = vld [vmem:[%s10013_s21 + $0x128] sm:$0xff]  ;;  %v5388_v62 = vrot.slane %v13093_v46, 4  ;;  %v9726_v42 = vld [vmem:[%s10013_s21 + $0x8b0] sm:$0xff]  ;;  %v579_v16 = vld [vmem:[%s10013_s21 + $0x8b8] sm:$0xf] }
 0x3ea   : > { %v2150_v58 = vsel %vm2121_vm10, %v2117_v52, %v1851_v56  ;;  %4685 = vmatprep.mubr.f32.mxu1 %v16610_v40  ;;  %v9725_v52 = vld [vmem:[%s10013_s21 + $0x4d0] sm:$0xff]  ;;  %v5100_v56 = vrot.slane %v341_v29, 2 }
 0x3eb   : > { %8982 = vmatprep.mubr.msk.f32.mxu0 %vm2164_vm11, %v2150_v58  ;;  %5505 = vrot.lane.b32.xlu1 %v5149_v43, %s16319_s13  ;;  %v5151_v43 = vsel %vm853_vm2, %v5148_v10, %v5150_v34  ;;  %v5389_v58 = vrot.slane %v9726_v42, 4 }
 0x3ec   : > { %5471 = vrot.lane.b32.xlu0 %v5099_v0, %s16541_s0  ;;  %v5101_v0 = vrot.slane %v342_v39, 2 }
 0x3ed   : > { %8555 = vmatmul.mubr.msk.f32.gmra.mrb[90].mxu1 %vm4350_vm12, %v4330_v23  ;;  %v1185_v59 = vpop.permute.xlu1 %1184  ;;  %v1853_v26 = vpop.permute.xlu0 %1852 }
 0x3ee   : > { %v2151_v15 = vsel %vm2121_vm10, %v2118_v21, %v1853_v26  ;;  %4691 = vmatprep.mubr.f32.mxu1 %v16610_v40  ;;  %v16654_v26 = vld [vmem:[#allocation156_spill] sm:$0xff]  ;;  %v5102_v29 = vsel %vm712_vm1, %v5100_v56, %v5101_v0 }
 0x3ef   : > { %8983 = vmatmul.mubr.msk.f32.gmra.mrb[28].mxu0 %vm2164_vm11, %v2151_v15  ;;  %5801 = vrot.lane.b32.xlu1 %v9724_v25, %s16528_s22  ;;  %v1921_v10 = vsel %vm1890_vm3, %v16654_v26, %v1183_v30  ;;  %v9727_v15 = vld [vmem:[%s10013_s21 + $0x4d8] sm:$0xff]  ;;  %v5391_v25 = vrot.slane %v579_v16, 4  ;;  %v5390_v30 = vsel %vm853_vm2, %v5388_v62, %v5389_v58  ;;  %v9728_v26 = vld [vmem:[%s10013_s21 + $0x4f0] sm:$0xff] }
 0x3f0   : > { %5695 = vrot.lane.b32.xlu0 %v5242_v2, %s16534_s23  ;;  %v16655_v2 = vld [vmem:[#allocation160_spill] sm:$0xff]  ;;  %v9729_v16 = vld [vmem:[%s10013_s21 + $0x4f8] sm:$0xff] }
 0x3f1   : > { %v1281_v49 = vpop.permute.xlu1 %1280  ;;  %v1279_v57 = vpop.permute.xlu0 %1278  ;;  %v1922_v34 = vsel %vm1890_vm3, %v16655_v2, %v1185_v59  ;;  %v5243_v2 = vrot.slane %v9728_v26, 4 }
 0x3f2   : > { %v1955_v46 = vsel %vm1923_vm4, %v1922_v34, %v1281_v49  ;;  %v343_v49 = vld [vmem:[%s10013_s21 + $0x138] sm:$0xff]  ;;  %v344_v34 = vld [vmem:[%s10013_s21 + $0x140] sm:$0xff] }
 0x3f3   : > { %5601 = vrot.lane.b32.xlu1 %v9725_v52, %s16323_s18  ;;  %v5152_v62 = vrot.slane %v343_v49, 4  ;;  %v5103_v26 = vrot.slane %v343_v49, 2 }
 0x3f4   : > { %5507 = vrot.lane.b32.xlu0 %v5151_v43, %s16319_s13  ;;  %v1954_v43 = vsel %vm1923_vm4, %v1921_v10, %v1279_v57 }
 0x3f5   : > { %v1377_v23 = vpop.permute.xlu1 %1376  ;;  %v1375_v21 = vpop.permute.xlu0 %1374 }
 0x3f6   : > { %v1988_v39 = vsel %vm1956_vm5, %v1955_v46, %v1377_v23  ;;  %v1987_v59 = vsel %vm1956_vm5, %v1954_v43, %v1375_v21  ;;  %v5153_v23 = vrot.slane %v344_v34, 4 }
 0x3f7   : > { %5603 = vrot.lane.b32.xlu1 %v9727_v15, %s16323_s18  ;;  %v5244_v15 = vrot.slane %v9729_v16, 4  ;;  %v2021_v57 = vsel %vm1989_vm6, %v1988_v39, %v12647_v9  ;;  %v2020_v56 = vsel %vm1989_vm6, %v1987_v59, %v12618_v55  ;;  %v462_v39 = vld [vmem:[%s10013_s21 + $0x500] sm:$0xf]  ;;  %v9748_v9 = vld [vmem:[%s10013_s21 + $0x1a8] sm:$0xff] }
 0x3f8   : > { %5803 = vrot.lane.b32.xlu0 %v13048_v18, %s16528_s22  ;;  %v5392_v18 = vsel %vm853_vm2, %v5389_v58, %v5391_v25  ;;  %v5154_v59 = vsel %vm853_vm2, %v5152_v62, %v5153_v23  ;;  %v16657_v16 = vld [vmem:[#allocation127_spill] sm:$0xff]  ;;  %v345_v62 = vld [vmem:[%s10013_s21 + $0x148] sm:$0xf] }
 0x3f9   : > { %v1569_v52 = vpop.permute.xlu1 %1568  ;;  %v1567_v42 = vpop.permute.xlu0 %1566 }
 0x3fa   : > { %v2054_v21 = vsel %vm2022_vm7, %v2021_v57, %v1569_v52  ;;  %v2053_v10 = vsel %vm2022_vm7, %v2020_v56, %v1567_v42  ;;  %v16656_v42 = vld [vmem:[#allocation130_spill] sm:$0xff]  ;;  %v5104_v57 = vsel %vm712_vm1, %v5101_v0, %v5103_v26  ;;  %v5246_v56 = vrot.slane %v462_v39, 4 }
 0x3fb   : > { %5473 = vrot.lane.b32.xlu1 %v5102_v29, %s16541_s0  ;;  %v5245_v29 = vsel %vm853_vm2, %v5243_v2, %v5244_v15 }
 0x3fc   : > { %5933 = vrot.lane.b32.xlu0 %v5390_v30, %s16318_s25  ;;  %v13474_v30 = vld [vmem:[%s16034_s2] ss:$0 sm:$0xff] }
 0x3fd   : > { %v1665_v46 = vpop.permute.xlu1 %1664  ;;  %v1663_v43 = vpop.permute.xlu0 %1662  ;;  %v2381_v28 = vadd.f32 %v13474_v30, %v13390_v35 }
 0x3fe   : > { %v2087_v58 = vsel %vm2055_vm8, %v2054_v21, %v1665_v46  ;;  %v2086_v25 = vsel %vm2055_vm8, %v2053_v10, %v1663_v43  ;;  %v2331_v21 = vadd.f32 %v13474_v30, %v12588_v47  ;;  %v5247_v47 = vsel %vm853_vm2, %v5244_v15, %v5246_v56  ;;  %v9733_v56 = vld [vmem:[%s10013_s21 + $0x530] sm:$0xff] }
 0x3ff   : > { %5935 = vrot.lane.b32.xlu1 %v5392_v18, %s16318_s25  ;;  %v2120_v2 = vsel %vm2088_vm9, %v2087_v58, %v16656_v42  ;;  %v2119_v49 = vsel %vm2088_vm9, %v2086_v25, %v16657_v16  ;;  %v5155_v43 = vrot.slane %v345_v62, 4  ;;  %v9730_v25 = vld [vmem:[%s10013_s21 + $0x8c0] sm:$0xff]  ;;  %v9735_v62 = vld [vmem:[%s10013_s21 + $0x8e8] sm:$0xff] }
 0x400   : > { %5697 = vrot.lane.b32.xlu0 %v5245_v29, %s16534_s23  ;;  %v2336_v29 = vadd.f32 %v12582_v17, %v13474_v30  ;;  %v2489_v26 = vmax.f32 %v2331_v21, 0.0  ;;  %v5249_v21 = vrot.slane %v9733_v56, 4  ;;  %v9739_v56 = vld [vmem:[%s10013_s21 + $0x178] sm:$0xff]  ;;  %v9771_v16 = vld [vmem:[%s10013_s21 + $0x5e8] sm:$0xff] }
 0x401   : > { %v1857_v52 = vpop.permute.xlu1 %1856  ;;  %v1855_v34 = vpop.permute.xlu0 %1854  ;;  %v5156_v17 = vsel %vm853_vm2, %v5153_v23, %v5155_v43  ;;  %v2346_v43 = vadd.f32 %v12696_v8, %v13474_v30 }
 0x402   : > { %v2153_v18 = vsel %vm2121_vm10, %v2120_v2, %v1857_v52  ;;  %v2152_v10 = vsel %vm2121_vm10, %v2119_v49, %v1855_v34  ;;  %v2490_v52 = vmax.f32 %v2336_v29, 0.0  ;;  %v2341_v2 = vadd.f32 %v13474_v30, %v12704_v48  ;;  %v9731_v49 = vld [vmem:[%s10013_s21 + $0x508] sm:$0xff]  ;;  %v9734_v48 = vld [vmem:[%s10013_s21 + $0x8e0] sm:$0xff] }
 0x403   : > { %8985 = vmatprep.mubr.msk.f32.mxu0 %vm2164_vm11, %v2152_v10  ;;  %5509 = vrot.lane.b32.xlu1 %v5154_v59, %s16319_s13  ;;  %v9732_v34 = vld [vmem:[%s10013_s21 + $0x528] sm:$0xff]  ;;  %v5393_v10 = vrot.slane %v9734_v48, 4  ;;  %v5158_v48 = vrot.slane %v9739_v56, 4  ;;  %v2492_v55 = vmax.f32 %v2346_v43, 0.0 }
 0x404   : > { %5475 = vrot.lane.b32.xlu0 %v5104_v57, %s16541_s0  ;;  %8986 = vmatmul.mubr.msk.f32.gmra.mrb[30].mxu0 %vm2164_vm11, %v2153_v18  ;;  %v5248_v57 = vrot.slane %v9732_v34, 4  ;;  %v2491_v29 = vmax.f32 %v2341_v2, 0.0 }
 0x405   : > { %v13493_v46 = vpop.permute.xlu1 %5455  ;;  %v13495_v0 = vpop.permute.xlu0 %5453  ;;  %4864 = vmatprep.mubr.f32.mxu0 %v16610_v40 }
 0x407   : > { %v13501_v58 = vpop.f32.mrb[12].mxu0  ;;  %5805 = vrot.lane.b32.xlu1 %v9730_v25, %s16528_s22  ;;  %v9736_v25 = vld [vmem:[%s10013_s21 + $0x510] sm:$0xff] }
 0x408   : > { %v13505_v39 = vpop.f32.mrb[13].mxu0  ;;  %5699 = vrot.lane.b32.xlu0 %v5247_v47, %s16534_s23  ;;  %8558 = vmatmul.mubr.msk.f32.vlgmr.msra.gmra.mrb[32].mxu0 %vm4350_vm12, %v2489_v26  ;;  %v5394_v47 = vrot.slane %v9735_v62, 4  ;;  %v586_v26 = vld [vmem:[%s10013_s21 + $0x8f0] sm:$0xf] }
 0x409   : > { %v13509_v15 = vpop.permute.xlu1 %5491  ;;  %v13511_v59 = vpop.permute.xlu0 %5489  ;;  %4870 = vmatprep.mubr.f32.mxu0 %v16610_v40 }
 0x40a   : > { %v5395_v2 = vsel %vm853_vm2, %v5393_v10, %v5394_v47 }
 0x40b   : > { %5605 = vrot.lane.b32.xlu1 %v9731_v49, %s16323_s18  ;;  %v9738_v49 = vld [vmem:[%s10013_s21 + $0x170] sm:$0xff] }
 0x40c   : > { %5511 = vrot.lane.b32.xlu0 %v5156_v17, %s16319_s13  ;;  %8559 = vmatmul.mubr.msk.f32.gmra.mrb[34].mxu0 %vm4350_vm12, %v2490_v52  ;;  %v9737_v17 = vld [vmem:[%s10013_s21 + $0x8c8] sm:$0xff]  ;;  %v5250_v52 = vsel %vm853_vm2, %v5248_v57, %v5249_v21  ;;  %v5157_v34 = vrot.slane %v9738_v49, 4 }
 0x40d   : > { %v13523_v23 = vpop.permute.xlu1 %5587  ;;  %v13525_v18 = vpop.permute.xlu0 %5585  ;;  %4876 = vmatprep.mubr.f32.mxu0 %v16610_v40 }
 0x40e   : > { %v5159_v57 = vsel %vm853_vm2, %v5157_v34, %v5158_v48 }
 0x40f   : > { %5607 = vrot.lane.b32.xlu1 %v9736_v25, %s16323_s18  ;;  %v5396_v25 = vrot.slane %v586_v26, 4 }
 0x410   : > { %5807 = vrot.lane.b32.xlu0 %v9737_v17, %s16528_s22  ;;  %8560 = vmatmul.mubr.msk.f32.gmra.mrb[36].mxu0 %vm4350_vm12, %v2491_v29  ;;  %v2351_v29 = vadd.f32 %v13474_v30, %v12883_v13  ;;  %v469_v17 = vld [vmem:[%s10013_s21 + $0x538] sm:$0xf]  ;;  %v2356_v13 = vadd.f32 %v12877_v24, %v13474_v30  ;;  %v2361_v24 = vadd.f32 %v13474_v30, %v13111_v33 }
 0x411   : > { %v13541_v62 = vpop.permute.xlu1 %5681  ;;  %v13543_v8 = vpop.permute.xlu0 %5457  ;;  %4882 = vmatprep.mubr.f32.mxu0 %v16610_v40  ;;  %v5397_v10 = vsel %vm853_vm2, %v5394_v47, %v5396_v25  ;;  %v5251_v43 = vrot.slane %v469_v17, 4  ;;  %v2366_v33 = vadd.f32 %v13105_v4, %v13474_v30  ;;  %v9744_v4 = vld [vmem:[%s10013_s21 + $0x918] sm:$0xff] }
 0x412   : > { %v2493_v26 = vmax.f32 %v2351_v29, 0.0  ;;  %v9740_v29 = vld [vmem:[%s10013_s21 + $0x8f8] sm:$0xff] }
 0x413   : > { %5701 = vrot.lane.b32.xlu1 %v5250_v52, %s16534_s23  ;;  %v352_v52 = vld [vmem:[%s10013_s21 + $0x180] sm:$0xf]  ;;  %v5252_v47 = vsel %vm853_vm2, %v5249_v21, %v5251_v43 }
 0x414   : > { %5937 = vrot.lane.b32.xlu0 %v5395_v2, %s16318_s25  ;;  %8561 = vmatmul.mubr.msk.f32.gmra.mrb[38].mxu0 %vm4350_vm12, %v2492_v55  ;;  %v5160_v34 = vrot.slane %v352_v52, 4  ;;  %v2494_v2 = vmax.f32 %v2356_v13, 0.0  ;;  %v9741_v43 = vld [vmem:[%s10013_s21 + $0x540] sm:$0xff] }
 0x415   : > { %v13554_v49 = vpop.permute.xlu1 %5493  ;;  %4888 = vmatprep.mubr.f32.mxu0 %v16610_v40  ;;  %v9742_v13 = vld [vmem:[%s10013_s21 + $0x560] sm:$0xff] }
 0x416   : > { %v13560_v56 = vpop.permute.xlu0 %5459  ;;  %v5161_v21 = vsel %vm853_vm2, %v5158_v48, %v5160_v34  ;;  %v9743_v48 = vld [vmem:[%s10013_s21 + $0x568] sm:$0xff]  ;;  %v5398_v34 = vrot.slane %v9744_v4, 4 }
 0x417   : > { %5513 = vrot.lane.b32.xlu1 %v5159_v57, %s16319_s13  ;;  %v2495_v57 = vmax.f32 %v2361_v24, 0.0  ;;  %v5254_v52 = vrot.slane %v9743_v48, 4  ;;  %v9747_v48 = vld [vmem:[%s10013_s21 + $0x900] sm:$0xff] }
 0x418   : > { %5939 = vrot.lane.b32.xlu0 %v5397_v10, %s16318_s25  ;;  %8562 = vmatmul.mubr.msk.f32.gmra.mrb[40].mxu0 %vm4350_vm12, %v2493_v26  ;;  %v5253_v26 = vrot.slane %v9742_v13, 4  ;;  %v9746_v13 = vld [vmem:[%s10013_s21 + $0x548] sm:$0xff] }
 0x419   : > { %v13566_v55 = vpop.permute.xlu1 %5789  ;;  %4894 = vmatprep.mubr.f32.mxu0 %v16610_v40 }
 0x41a   : > { %v13572_v25 = vpop.permute.xlu0 %5683  ;;  %v5255_v4 = vsel %vm853_vm2, %v5253_v26, %v5254_v52 }
 0x41b   : > { %5809 = vrot.lane.b32.xlu1 %v9740_v29, %s16528_s22  ;;  %v2496_v29 = vmax.f32 %v2366_v33, 0.0  ;;  %v9749_v33 = vld [vmem:[%s10013_s21 + $0x1b0] sm:$0xff] }
 0x41c   : > { %5703 = vrot.lane.b32.xlu0 %v5252_v47, %s16534_s23  ;;  %8563 = vmatmul.mubr.msk.f32.gmra.mrb[42].mxu0 %vm4350_vm12, %v2494_v2  ;;  %v9745_v2 = vld [vmem:[%s10013_s21 + $0x920] sm:$0xff]  ;;  %v5163_v41 = vrot.slane %v9749_v33, 4 }
 0x41d   : > { %v13578_v17 = vpop.permute.xlu1 %5589  ;;  %4900 = vmatprep.mubr.f32.mxu0 %v16610_v40  ;;  %v5399_v24 = vrot.slane %v9745_v2, 4  ;;  %v5162_v2 = vrot.slane %v9748_v9, 4 }
 0x41e   : > { %v13584_v10 = vpop.permute.xlu0 %5495 }
 0x41f   : > { %5609 = vrot.lane.b32.xlu1 %v9741_v43, %s16323_s18  ;;  %v593_v43 = vld [vmem:[%s10013_s21 + $0x928] sm:$0xf] }
 0x420   : > { %5515 = vrot.lane.b32.xlu0 %v5161_v21, %s16319_s13  ;;  %8564 = vmatmul.mubr.msk.f32.gmra.mrb[44].mxu0 %vm4350_vm12, %v2495_v57  ;;  %v2371_v21 = vadd.f32 %v13474_v30, %v13272_v7  ;;  %v5400_v7 = vsel %vm853_vm2, %v5398_v34, %v5399_v24  ;;  %v5401_v63 = vrot.slane %v593_v43, 4  ;;  %v5164_v34 = vsel %vm853_vm2, %v5162_v2, %v5163_v41 }
 0x421   : > { %v13592_v47 = vpop.permute.xlu1 %5591  ;;  %4906 = vmatprep.mubr.f32.mxu0 %v16610_v40 }
 0x422   : > { %v13599_v57 = vpop.permute.xlu0 %5791  ;;  %v2497_v36 = vmax.f32 %v2371_v21, 0.0 }
 0x423   : > { %5611 = vrot.lane.b32.xlu1 %v9746_v13, %s16323_s18  ;;  %v2376_v13 = vadd.f32 %v13268_v51, %v13474_v30  ;;  %v5402_v51 = vsel %vm853_vm2, %v5399_v24, %v5401_v63  ;;  %v5165_v24 = vrot.slane %v359_v44, 4 }
 0x424   : > { %5811 = vrot.lane.b32.xlu0 %v9747_v48, %s16528_s22  ;;  %8565 = vmatmul.mubr.msk.f32.gmra.mrb[46].mxu0 %vm4350_vm12, %v2496_v29  ;;  %v476_v29 = vld [vmem:[%s10013_s21 + $0x570] sm:$0xf] }
 0x425   : > { %v13610_v11 = vpop.permute.xlu1 %5461  ;;  %4912 = vmatprep.mubr.f32.mxu0 %v16610_v40  ;;  %v5256_v21 = vrot.slane %v476_v29, 4  ;;  %v2498_v33 = vmax.f32 %v2376_v13, 0.0  ;;  %v2499_v13 = vmax.f32 %v2381_v28, 0.0 }
 0x426   : > { %v13616_v48 = vpop.permute.xlu0 %5921 }
 0x427   : > { %v13619_v26 = vpop.f32.mrb[14].mxu0  ;;  %5705 = vrot.lane.b32.xlu1 %v5255_v4, %s16534_s23  ;;  %v5257_v35 = vsel %vm853_vm2, %v5254_v52, %v5256_v21 }
 0x428   : > { %v13622_v9 = vpop.f32.mrb[15].mxu0  ;;  %5941 = vrot.lane.b32.xlu0 %v5400_v7, %s16318_s25  ;;  %8566 = vmatmul.mubr.msk.f32.gmra.mrb[48].mxu0 %vm4350_vm12, %v2497_v36  ;;  %v2386_v7 = vadd.f32 %v13382_v3, %v13474_v30  ;;  %v2391_v3 = vadd.f32 %v13474_v30, %v13505_v39 }
 0x429   : > { %v13627_v43 = vpop.permute.xlu1 %5923  ;;  %4918 = vmatprep.mubr.f32.mxu0 %v16610_v40  ;;  %v2401_v6 = vadd.f32 %v13474_v30, %v13622_v9 }
 0x42a   : > { %v13633_v4 = vpop.permute.xlu0 %5685  ;;  %v2500_v28 = vmax.f32 %v2386_v7, 0.0 }
 0x42b   : > { %v9045_v61 = vpop.f32.mrb[30].mxu1  ;;  %5517 = vrot.lane.b32.xlu1 %v5164_v34, %s16319_s13 }
 0x42c   : > { %v4292_v36 = vpop.f32.mrb[31].mxu1  ;;  %5943 = vrot.lane.b32.xlu0 %v5402_v51, %s16318_s25  ;;  %8567 = vmatmul.mubr.msk.f32.gmra.mrb[50].mxu0 %vm4350_vm12, %v2498_v33  ;;  %v4298_v34 = vadd.f32 %v13398_v1, %v9045_v61  ;;  %v9750_v33 = vld [vmem:[%s10013_s21 + $0x930] sm:$0xff]  ;;  %v5166_v61 = vsel %vm853_vm2, %v5163_v41, %v5165_v24  ;;  %v9752_v41 = vld [vmem:[%s10013_s21 + $0x598] sm:$0xff]  ;;  %v9753_v24 = vld [vmem:[%s10013_s21 + $0x5a0] sm:$0xff] }
 0x42d   : > { %v4293_v2 = vadd.f32 %v13398_v1, %v4292_v36  ;;  %v13640_v63 = vpop.permute.xlu1 %5497  ;;  %4924 = vmatprep.mubr.f32.mxu0 %v16610_v40  ;;  %v5258_v39 = vrot.slane %v9752_v41, 4  ;;  %v5259_v7 = vrot.slane %v9753_v24, 4  ;;  %v600_v24 = vld [vmem:[%s10013_s21 + $0x960] sm:$0xf] }
 0x42e   : > { %v13646_v29 = vpop.permute.xlu0 %5463  ;;  %v4332_v52 = vmax.f32 %v4298_v34, 0.0  ;;  %v9754_v34 = vld [vmem:[%s10013_s21 + $0x950] sm:$0xff] }
 0x42f   : > { %v4331_v51 = vmax.f32 %v4293_v2, 0.0  ;;  %v13649_v5 = vpop.f32.mrb[32].mxu1  ;;  %5813 = vrot.lane.b32.xlu1 %v9750_v33, %s16528_s22  ;;  %v9751_v2 = vld [vmem:[%s10013_s21 + $0x578] sm:$0xff] }
 0x430   : > { %16658 = vst [vmem:[#allocation20_spill] sm:$0xff] %v13649_v5  ;;  %v13653_v36 = vpop.f32.mrb[33].mxu1  ;;  %5707 = vrot.lane.b32.xlu0 %v5257_v35, %s16534_s23  ;;  %8568 = vmatmul.mubr.msk.f32.gmra.mrb[52].mxu0 %vm4350_vm12, %v2499_v13  ;;  %v9755_v33 = vld [vmem:[%s10013_s21 + $0x958] sm:$0xff] }
 0x431   : > { %16659 = vst [vmem:[#allocation167_spill] sm:$0xff] %v13653_v36  ;;  %8556 = vmatmul.mubr.msk.f32.gmra.mrb[92].mxu1 %vm4350_vm12, %v4331_v51  ;;  %v13658_v44 = vpop.permute.xlu1 %5793  ;;  %4930 = vmatprep.mubr.f32.mxu0 %v16610_v40  ;;  %v5403_v51 = vrot.slane %v9754_v34, 4  ;;  %v9757_v34 = vld [vmem:[%s10013_s21 + $0x938] sm:$0xff] }
 0x432   : > { %v13664_v1 = vpop.permute.xlu0 %5687  ;;  %4697 = vmatprep.mubr.f32.mxu1 %v16610_v40 }
 0x433   : > { %v13667_v21 = vpop.f32.mrb[34].mxu1  ;;  %5613 = vrot.lane.b32.xlu1 %v9751_v2, %s16323_s18  ;;  %v2501_v2 = vmax.f32 %v2391_v3, 0.0  ;;  %v9758_v3 = vld [vmem:[%s10013_s21 + $0x1e0] sm:$0xff] }
 0x434   : > { %16660 = vst [vmem:[#allocation170_spill] sm:$0xff] %v13667_v21  ;;  %v13671_v35 = vpop.f32.mrb[35].mxu1  ;;  %5519 = vrot.lane.b32.xlu0 %v5166_v61, %s16319_s13  ;;  %8569 = vmatmul.mubr.msk.f32.gmra.mrb[54].mxu0 %vm4350_vm12, %v2500_v28  ;;  %v5404_v61 = vrot.slane %v9755_v33, 4  ;;  %v2396_v28 = vadd.f32 %v13501_v58, %v13474_v30  ;;  %v5260_v58 = vsel %vm853_vm2, %v5258_v39, %v5259_v7  ;;  %v5167_v33 = vrot.slane %v9758_v3, 4  ;;  %v9759_v21 = vld [vmem:[%s10013_s21 + $0x1e8] sm:$0xff] }
 0x435   : > { %16661 = vst [vmem:[#allocation171_spill] sm:$0xff] %v13671_v35  ;;  %8557 = vmatmul.mubr.msk.f32.gmra.mrb[94].mxu1 %vm4350_vm12, %v4332_v52  ;;  %v13678_v13 = vpop.permute.xlu1 %5593  ;;  %4936 = vmatprep.mubr.f32.mxu0 %v16610_v40  ;;  %v9756_v35 = vld [vmem:[%s10013_s21 + $0x580] sm:$0xff]  ;;  %v5168_v5 = vrot.slane %v9759_v21, 4  ;;  %v2406_v3 = vadd.f32 %v13619_v26, %v13474_v30 }
 0x436   : > { %v13685_v41 = vpop.permute.xlu0 %5499  ;;  %4978 = vmatprep.mubr.f32.mxu1 %v16610_v40 }
 0x437   : > { %v13689_v52 = vpop.f32.mrb[36].mxu1  ;;  %5615 = vrot.lane.b32.xlu1 %v9756_v35, %s16323_s18  ;;  %v5405_v35 = vsel %vm853_vm2, %v5403_v51, %v5404_v61  ;;  %v5169_v51 = vsel %vm853_vm2, %v5167_v33, %v5168_v5 }
 0x438   : > { %16662 = vst [vmem:[#allocation143_spill] sm:$0xff] %v13689_v52  ;;  %v13693_v36 = vpop.f32.mrb[37].mxu1  ;;  %5815 = vrot.lane.b32.xlu0 %v9757_v34, %s16528_s22  ;;  %8570 = vmatmul.mubr.msk.f32.gmra.mrb[56].mxu0 %vm4350_vm12, %v2501_v2  ;;  %v5406_v52 = vrot.slane %v600_v24, 4  ;;  %v483_v2 = vld [vmem:[%s10013_s21 + $0x5a8] sm:$0xf] }
 0x439   : > { %16663 = vst [vmem:[#allocation22_spill] sm:$0xff] %v13693_v36  ;;  %v13701_v60 = vpop.permute.xlu1 %5595  ;;  %4942 = vmatprep.mubr.f32.mxu0 %v16610_v40  ;;  %v2502_v36 = vmax.f32 %v2396_v28, 0.0  ;;  %v5261_v24 = vrot.slane %v483_v2, 4 }
 0x43a   : > { %v13707_v34 = vpop.permute.xlu0 %5795  ;;  %v5407_v9 = vsel %vm853_vm2, %v5404_v61, %v5406_v52  ;;  %v2504_v52 = vmax.f32 %v2406_v3, 0.0 }
 0x43b   : > { %v13710_v39 = vpop.f32.mrb[38].mxu1  ;;  %5709 = vrot.lane.b32.xlu1 %v5260_v58, %s16534_s23 }
 0x43c   : > { %16664 = vst [vmem:[#allocation24_spill] sm:$0xff] %v13710_v39  ;;  %v13713_v21 = vpop.f32.mrb[39].mxu1  ;;  %5945 = vrot.lane.b32.xlu0 %v5405_v35, %s16318_s25  ;;  %8571 = vmatmul.mubr.msk.f32.gmra.mrb[58].mxu0 %vm4350_vm12, %v2502_v36  ;;  %v2503_v39 = vmax.f32 %v2401_v6, 0.0  ;;  %v5262_v6 = vsel %vm853_vm2, %v5259_v7, %v5261_v24 }
 0x43d   : > { %16665 = vst [vmem:[#allocation154_spill] sm:$0xff] %v13713_v21  ;;  %v13718_v28 = vpop.permute.xlu1 %5465  ;;  %4948 = vmatprep.mubr.f32.mxu0 %v16610_v40  ;;  %v366_v21 = vld [vmem:[%s10013_s21 + $0x1f0] sm:$0xf] }
 0x43e   : > { %v13724_v58 = vpop.permute.xlu0 %5925  ;;  %v5170_v26 = vrot.slane %v366_v21, 4 }
 0x43f   : > { %16666 = vst [vmem:[#allocation111_spill] sm:$0xff] %v13724_v58  ;;  %v8966_v35 = vpop.f32.mrb[16].mxu0  ;;  %v13727_v14 = vpop.f32.mrb[40].mxu1  ;;  %5521 = vrot.lane.b32.xlu1 %v5169_v51, %s16319_s13 }
 0x440   : > { %16667 = vst [vmem:[#allocation113_spill] sm:$0xff] %v13727_v14  ;;  %v2410_v36 = vpop.f32.mrb[17].mxu0  ;;  %v13730_v33 = vpop.f32.mrb[41].mxu1  ;;  %5947 = vrot.lane.b32.xlu0 %v5407_v9, %s16318_s25  ;;  %8572 = vmatmul.mubr.msk.f32.gmra.mrb[60].mxu0 %vm4350_vm12, %v2503_v39  ;;  %v5171_v21 = vsel %vm853_vm2, %v5168_v5, %v5170_v26  ;;  %v2416_v9 = vadd.f32 %v8966_v35, %v13474_v30  ;;  %v9762_v5 = vld [vmem:[%s10013_s21 + $0x5d0] sm:$0xff]  ;;  %v9763_v35 = vld [vmem:[%s10013_s21 + $0x5d8] sm:$0xff] }
 0x441   : > { %16668 = vst [vmem:[#allocation48_spill] sm:$0xff] %v13730_v33  ;;  %v13734_v61 = vpop.permute.xlu1 %5927  ;;  %4954 = vmatprep.mubr.f32.mxu0 %v16610_v40  ;;  %v2411_v2 = vadd.f32 %v13474_v30, %v2410_v36  ;;  %v9760_v33 = vld [vmem:[%s10013_s21 + $0x968] sm:$0xff]  ;;  %v5263_v26 = vrot.slane %v9762_v5, 4  ;;  %v9766_v5 = vld [vmem:[%s10013_s21 + $0x5b8] sm:$0xff] }
 0x442   : > { %16669 = vst [vmem:[#allocation50_spill] sm:$0xff] %v13734_v61  ;;  %v13739_v14 = vpop.permute.xlu0 %5689 }
 0x443   : > { %v13741_v51 = vpop.f32.mrb[42].mxu1  ;;  %5817 = vrot.lane.b32.xlu1 %v9760_v33, %s16528_s22  ;;  %v2505_v24 = vmax.f32 %v2411_v2, 0.0  ;;  %v9761_v33 = vld [vmem:[%s10013_s21 + $0x5b0] sm:$0xff] }
 0x444   : > { %16670 = vst [vmem:[#allocation123_spill] sm:$0xff] %v13741_v51  ;;  %v13745_v39 = vpop.f32.mrb[43].mxu1  ;;  %5711 = vrot.lane.b32.xlu0 %v5262_v6, %s16534_s23  ;;  %8573 = vmatmul.mubr.msk.f32.gmra.mrb[62].mxu0 %vm4350_vm12, %v2504_v52  ;;  %v5264_v52 = vrot.slane %v9763_v35, 4  ;;  %v2506_v51 = vmax.f32 %v2416_v9, 0.0 }
 0x445   : > { %16671 = vst [vmem:[#allocation125_spill] sm:$0xff] %v13745_v39  ;;  %v13749_v7 = vpop.permute.xlu1 %5501  ;;  %4960 = vmatprep.mubr.f32.mxu0 %v16610_v40  ;;  %v9764_v39 = vld [vmem:[%s10013_s21 + $0x988] sm:$0xff] }
 0x446   : > { %v13754_v3 = vpop.permute.xlu0 %5467 }
 0x447   : > { %v13756_v36 = vpop.f32.mrb[44].mxu1  ;;  %5617 = vrot.lane.b32.xlu1 %v9761_v33, %s16323_s18  ;;  %v5408_v33 = vrot.slane %v9764_v39, 4  ;;  %v5265_v39 = vsel %vm853_vm2, %v5263_v26, %v5264_v52 }
 0x448   : > { %16672 = vst [vmem:[#allocation32_spill] sm:$0xff] %v13756_v36  ;;  %v13760_v6 = vpop.f32.mrb[45].mxu1  ;;  %5523 = vrot.lane.b32.xlu0 %v5171_v21, %s16319_s13  ;;  %8574 = vmatmul.mubr.msk.f32.gmra.mrb[64].mxu0 %vm4350_vm12, %v2505_v24  ;;  %v9765_v36 = vld [vmem:[%s10013_s21 + $0x990] sm:$0xff] }
 0x449   : > { %16673 = vst [vmem:[#allocation56_spill] sm:$0xff] %v13760_v6  ;;  %v13766_v2 = vpop.permute.xlu1 %5797  ;;  %4966 = vmatprep.mubr.f32.mxu0 %v16610_v40  ;;  %v5409_v6 = vrot.slane %v9765_v36, 4  ;;  %v9768_v36 = vld [vmem:[%s10013_s21 + $0x218] sm:$0xff] }
 0x44a   : > { %v13771_v21 = vpop.permute.xlu0 %5691  ;;  %v5172_v9 = vrot.slane %v9768_v36, 4 }
 0x44b   : > { %v13774_v24 = vpop.f32.mrb[46].mxu1  ;;  %5619 = vrot.lane.b32.xlu1 %v9766_v5, %s16323_s18  ;;  %v5412_v37 = vsel %vm853_vm2, %v5409_v6, %v5411_v12 }
 0x44c   : > { %16674 = vst [vmem:[#allocation34_spill] sm:$0xff] %v13774_v24  ;;  %v13778_v35 = vpop.f32.mrb[47].mxu1  ;;  %5819 = vrot.lane.b32.xlu0 %v9767_v50, %s16528_s22  ;;  %8575 = vmatmul.mubr.msk.f32.gmra.mrb[66].mxu0 %vm4350_vm12, %v2506_v51  ;;  %v5410_v24 = vsel %vm853_vm2, %v5408_v33, %v5409_v6  ;;  %v5174_v31 = vsel %vm853_vm2, %v5172_v9, %v5173_v20 }
 0x44d   : > { %16675 = vst [vmem:[#allocation58_spill] sm:$0xff] %v13778_v35  ;;  %v13786_v22 = vpop.permute.xlu1 %5597  ;;  %4972 = vmatprep.mubr.f32.mxu0 %v16610_v40  ;;  %v490_v35 = vld [vmem:[%s10013_s21 + $0x5e0] sm:$0xf] }
 0x44e   : > { %v13790_v5 = vpop.permute.xlu0 %5503  ;;  %v5266_v33 = vrot.slane %v490_v35, 4  ;;  %v9770_v35 = vld [vmem:[%s10013_s21 + $0x9a0] sm:$0xff] }
 0x44f   : > { %v13793_v50 = vpop.f32.mrb[48].mxu1  ;;  %5713 = vrot.lane.b32.xlu1 %v5265_v39, %s16534_s23 }
 0x450   : > { %16676 = vst [vmem:[#allocation106_spill] sm:$0xff] %v13793_v50  ;;  %v13796_v51 = vpop.f32.mrb[49].mxu1  ;;  %5949 = vrot.lane.b32.xlu0 %v5410_v24, %s16318_s25  ;;  %v5267_v9 = vsel %vm853_vm2, %v5264_v52, %v5266_v33  ;;  %v8590_v33 = vld [vmem:[%s16033_s1 + $0x50] sm:$0xff] }
 0x451   : > { %16677 = vst [vmem:[#allocation105_spill] sm:$0xff] %v13796_v51  ;;  %v13800_v26 = vpop.permute.xlu1 %5599  ;;  %v5175_v51 = vrot.slane %v373_v27, 4 }
 0x452   : > { %v13803_v36 = vpop.permute.xlu0 %5799 }
 0x453   : > { %16678 = vst [vmem:[#allocation135_spill] sm:$0xff] %v13803_v36  ;;  %v13806_v42 = vpop.f32.mrb[50].mxu1  ;;  %5525 = vrot.lane.b32.xlu1 %v5174_v31, %s16319_s13 }
 0x454   : > { %16679 = vst [vmem:[#allocation117_spill] sm:$0xff] %v13806_v42  ;;  %v13809_v39 = vpop.f32.mrb[51].mxu1  ;;  %5951 = vrot.lane.b32.xlu0 %v5412_v37, %s16318_s25  ;;  %v5176_v37 = vsel %vm853_vm2, %v5173_v20, %v5175_v51  ;;  %v9772_v51 = vld [vmem:[%s10013_s21 + $0x608] sm:$0xff] }
 0x455   : > { %16680 = vst [vmem:[#allocation137_spill] sm:$0xff] %v13809_v39  ;;  %v13812_v24 = vpop.permute.xlu1 %5469 }
 0x456   : > { %16681 = vst [vmem:[#allocation116_spill] sm:$0xff] %v13812_v24  ;;  %v13815_v50 = vpop.permute.xlu0 %5929  ;;  %v9779_v24 = vld [vmem:[%s10013_s21 + $0x258] sm:$0xff] }
 0x457   : > { %16682 = vst [vmem:[#allocation64_spill] sm:$0xff] %v13815_v50  ;;  %v8969_v12 = vpop.f32.mrb[18].mxu0  ;;  %v13817_v6 = vpop.f32.mrb[52].mxu1  ;;  %5821 = vrot.lane.b32.xlu1 %v9770_v35, %s16528_s22 }
 0x458   : > { %16683 = vst [vmem:[#allocation129_spill] sm:$0xff] %v13817_v6  ;;  %v2426_v31 = vadd.f32 %v8969_v12, %v13474_v30  ;;  %v2420_v42 = vpop.f32.mrb[19].mxu0  ;;  %v13822_v39 = vpop.f32.mrb[53].mxu1  ;;  %5715 = vrot.lane.b32.xlu0 %v5267_v9, %s16534_s23  ;;  %v8591_v12 = vld [vmem:[%s16033_s1 + $0x58] sm:$0xff] }
 0x459   : > { %16684 = vst [vmem:[#allocation66_spill] sm:$0xff] %v13822_v39  ;;  %v2421_v52 = vadd.f32 %v13474_v30, %v2420_v42  ;;  %v13826_v27 = vpop.permute.xlu1 %5931  ;;  %v9207_v9 = vpack.c.bf16 %v8591_v12, %v8590_v33  ;;  %v9774_v33 = vld [vmem:[%s10013_s21 + $0x9c0] sm:$0xff] }
 0x45a   : > { %16685 = vst [vmem:[#allocation128_spill] sm:$0xff] %v13826_v27  ;;  %v2508_v35 = vmax.f32 %v2426_v31, 0.0  ;;  %v13835_v39 = vpop.permute.xlu0 %5693  ;;  %v5268_v31 = vrot.slane %v9772_v51, 4  ;;  %v9773_v27 = vld [vmem:[%s10013_s21 + $0x610] sm:$0xff]  ;;  %v5413_v12 = vrot.slane %v9774_v33, 4 }
 0x45b   : > { %16686 = vst [vmem:[#allocation139_spill] sm:$0xff] %v13835_v39  ;;  %v2507_v42 = vmax.f32 %v2421_v52, 0.0  ;;  %v13837_v6 = vpop.f32.mrb[54].mxu1  ;;  %5621 = vrot.lane.b32.xlu1 %v9771_v16, %s16323_s18  ;;  %v5269_v50 = vrot.slane %v9773_v27, 4  ;;  %v9775_v16 = vld [vmem:[%s10013_s21 + $0x9c8] sm:$0xff]  ;;  %9208 = vmatprep.subr.bf16.mxu1 %v9207_v9 }
 0x45c   : > { %16687 = vst [vmem:[#allocation138_spill] sm:$0xff] %v13837_v6  ;;  %v13841_v20 = vpop.f32.mrb[55].mxu1  ;;  %8577 = vmatmul.mubr.msk.f32.vlgmr.msra.gmra.mrb[70].mxu1 %vm4350_vm12, %v2508_v35  ;;  %5527 = vrot.lane.b32.xlu0 %v5176_v37, %s16319_s13  ;;  %v5414_v6 = vrot.slane %v9775_v16, 4  ;;  %v8592_v37 = vld [vmem:[%s16033_s1 + $0x60] sm:$0xff]  ;;  %v8593_v27 = vld [vmem:[%s16033_s1 + $0x68] sm:$0xff]  ;;  %v9776_v16 = vld [vmem:[%s10013_s21 + $0x5f0] sm:$0xff] }
 0x45d   : > { %16688 = vst [vmem:[#allocation148_spill] sm:$0xff] %v13841_v20  ;;  %8576 = vmatmul.mubr.msk.f32.gmra.mrb[68].mxu0 %vm4350_vm12, %v2507_v42  ;;  %v13848_v52 = vpop.permute.xlu1 %5505  ;;  %4984 = vmatprep.mubr.f32.mxu1 %v16610_v40  ;;  %v614_v42 = vld [vmem:[%s10013_s21 + $0x9d0] sm:$0xf]  ;;  %v9211_v51 = vpack.c.bf16 %v8593_v27, %v8592_v37  ;;  %v5270_v39 = vsel %vm853_vm2, %v5268_v31, %v5269_v50  ;;  %v5178_v37 = vrot.slane %v9779_v24, 4 }
 0x45e   : > { %16689 = vst [vmem:[#allocation150_spill] sm:$0xff] %v13848_v52  ;;  %v13859_v35 = vpop.permute.xlu0 %5471  ;;  %6817 = vmatprep.mubr.f32.mxu0 %v16610_v40  ;;  %9210 = vmatpush3.bf16.msra.mxu1 %v9207_v9  ;;  %v9777_v52 = vld [vmem:[%s10013_s21 + $0x9a8] sm:$0xff]  ;;  %v5416_v45 = vrot.slane %v614_v42, 4  ;;  %v497_v9 = vld [vmem:[%s10013_s21 + $0x618] sm:$0xf] }
 0x45f   : > { %16690 = vst [vmem:[#allocation151_spill] sm:$0xff] %v13859_v35  ;;  %v13863_v33 = vpop.f32.mrb[56].mxu1  ;;  %5623 = vrot.lane.b32.xlu1 %v9776_v16, %s16323_s18  ;;  %v9778_v35 = vld [vmem:[%s10013_s21 + $0x250] sm:$0xff]  ;;  %9212 = vmatprep.subr.bf16.mxu1 %v9211_v51 }
 0x460   : > { %16691 = vst [vmem:[#allocation149_spill] sm:$0xff] %v13863_v33  ;;  %v13867_v20 = vpop.f32.mrb[57].mxu1  ;;  %5823 = vrot.lane.b32.xlu0 %v9777_v52, %s16528_s22  ;;  %v5177_v38 = vrot.slane %v9778_v35, 4  ;;  %v5415_v33 = vsel %vm853_vm2, %v5413_v12, %v5414_v6  ;;  %v8594_v24 = vld [vmem:[%s16033_s1 + $0x70] sm:$0xf] }
 0x461   : > { %16692 = vst [vmem:[#allocation72_spill] sm:$0xff] %v13867_v20  ;;  %v13874_v27 = vpop.permute.xlu1 %5801 }
 0x462   : > { %16693 = vst [vmem:[#allocation158_spill] sm:$0xff] %v13874_v27  ;;  %v13877_v61 = vpop.permute.xlu0 %5695  ;;  %9214 = vmatpush3.bf16.msra.mxu1 %v9211_v51  ;;  %v5179_v12 = vsel %vm853_vm2, %v5177_v38, %v5178_v37  ;;  %v5271_v51 = vrot.slane %v497_v9, 4 }
 0x463   : > { %16694 = vst [vmem:[#allocation161_spill] sm:$0xff] %v13877_v61  ;;  %v8972_v16 = vpop.f32.mrb[20].mxu0  ;;  %v13880_v20 = vpop.f32.mrb[58].mxu1  ;;  %5717 = vrot.lane.b32.xlu1 %v5270_v39, %s16534_s23  ;;  %9054 = vmatprep.subr.msk.mxu1 %vm853_vm2, %v8594_v24  ;;  %v5417_v39 = vsel %vm853_vm2, %v5414_v6, %v5416_v45  ;;  %v380_v61 = vld [vmem:[%s10013_s21 + $0x260] sm:$0xf] }
 0x464   : > { %16695 = vst [vmem:[#allocation74_spill] sm:$0xff] %v13880_v20  ;;  %v2430_v31 = vpop.f32.mrb[21].mxu0  ;;  %v13886_v52 = vpop.f32.mrb[59].mxu1  ;;  %5953 = vrot.lane.b32.xlu0 %v5415_v33, %s16318_s25  ;;  %v2436_v27 = vadd.f32 %v8972_v16, %v13474_v30  ;;  %v5272_v6 = vsel %vm853_vm2, %v5269_v50, %v5271_v51  ;;  %v5180_v33 = vrot.slane %v380_v61, 4  ;;  %v9782_v51 = vld [vmem:[%s10013_s21 + $0x640] sm:$0xff] }
 0x465   : > { %16696 = vst [vmem:[#allocation157_spill] sm:$0xff] %v13886_v52  ;;  %v2431_v35 = vadd.f32 %v13474_v30, %v2430_v31  ;;  %v13892_v42 = vpop.permute.xlu1 %5601  ;;  %v9780_v31 = vld [vmem:[%s10013_s21 + $0x9d8] sm:$0xff] }
 0x466   : > { %16697 = vst [vmem:[#allocation163_spill] sm:$0xff] %v13892_v42  ;;  %v13895_v20 = vpop.permute.xlu0 %5507  ;;  %9055 = vmatpush3.msk.msra.mxu1 %vm853_vm2, %v8594_v24  ;;  %v2510_v16 = vmax.f32 %v2436_v27, 0.0  ;;  %v5181_v50 = vsel %vm853_vm2, %v5178_v37, %v5180_v33 }
 0x467   : > { %16698 = vst [vmem:[#allocation168_spill] sm:$0xff] %v13895_v20  ;;  %v2509_v52 = vmax.f32 %v2431_v35, 0.0  ;;  %v13899_v58 = vpop.f32.mrb[60].mxu1  ;;  %5529 = vrot.lane.b32.xlu1 %v5179_v12, %s16319_s13  ;;  %9104 = vmatprep.subr.mxu1 %v16610_v40  ;;  %v9781_v35 = vld [vmem:[%s10013_s21 + $0x620] sm:$0xff] }
 0x468   : > { %16699 = vst [vmem:[#allocation80_spill] sm:$0xff] %v13899_v58  ;;  %v13903_v38 = vpop.f32.mrb[61].mxu1  ;;  %5955 = vrot.lane.b32.xlu0 %v5417_v39, %s16318_s25  ;;  %v9787_v58 = vld [vmem:[%s10013_s21 + $0x9e0] sm:$0xff] }
 0x469   : > { %16700 = vst [vmem:[#allocation166_spill] sm:$0xff] %v13903_v38  ;;  %8578 = vmatmul.mubr.msk.f32.gmra.mrb[72].mxu1 %vm4350_vm12, %v2509_v52  ;;  %v13908_v45 = vpop.permute.xlu1 %5603  ;;  %v9785_v38 = vld [vmem:[%s10013_s21 + $0xa00] sm:$0xff] }
 0x46a   : > { %16701 = vst [vmem:[#allocation82_spill] sm:$0xff] %v13908_v45  ;;  %v13911_v9 = vpop.permute.xlu0 %5803  ;;  %4990 = vmatprep.mubr.f32.mxu1 %v16610_v40 }
 0x46b   : > { %16702 = vst [vmem:[#allocation10_spill] sm:$0xff] %v13911_v9  ;;  %v13914_v24 = vpop.f32.mrb[62].mxu1  ;;  %5825 = vrot.lane.b32.xlu1 %v9780_v31, %s16528_s22  ;;  %v9784_v31 = vld [vmem:[%s10013_s21 + $0x9f8] sm:$0xff] }
 0x46c   : > { %16703 = vst [vmem:[#allocation26_spill] sm:$0xff] %v13914_v24  ;;  %v13918_v12 = vpop.f32.mrb[63].mxu1  ;;  %5719 = vrot.lane.b32.xlu0 %v5272_v6, %s16534_s23  ;;  %v5273_v6 = vrot.slane %v9782_v51, 4 }
 0x46d   : > { %16704 = vst [vmem:[#allocation30_spill] sm:$0xff] %v13918_v12  ;;  %8579 = vmatmul.mubr.msk.f32.gmra.mrb[74].mxu1 %vm4350_vm12, %v2510_v16  ;;  %v13922_v61 = vpop.permute.xlu1 %5473  ;;  %v9783_v16 = vld [vmem:[%s10013_s21 + $0x648] sm:$0xff]  ;;  %v5418_v12 = vrot.slane %v9784_v31, 4 }
 0x46e   : > { %16705 = vst [vmem:[#allocation172_spill] sm:$0xff] %v13922_v61  ;;  %v13925_v27 = vpop.permute.xlu0 %5933  ;;  %4996 = vmatprep.mubr.f32.mxu1 %v16610_v40  ;;  %v5274_v37 = vrot.slane %v9783_v16, 4 }
 0x46f   : > { %16706 = vst [vmem:[#allocation29_spill] sm:$0xff] %v13925_v27  ;;  %v13928_v52 = vpop.f32.mrb[64].mxu1  ;;  %5625 = vrot.lane.b32.xlu1 %v9781_v35, %s16323_s18  ;;  %v621_v35 = vld [vmem:[%s10013_s21 + $0xa08] sm:$0xf]  ;;  %v9789_v27 = vld [vmem:[%s10013_s21 + $0x290] sm:$0xff] }
 0x470   : > { %16707 = vst [vmem:[#allocation8_spill] sm:$0xff] %v13928_v52  ;;  %v13932_v39 = vpop.f32.mrb[65].mxu1  ;;  %5531 = vrot.lane.b32.xlu0 %v5181_v50, %s16319_s13  ;;  %v5419_v52 = vrot.slane %v9785_v38, 4  ;;  %v9786_v50 = vld [vmem:[%s10013_s21 + $0x628] sm:$0xff]  ;;  %v5275_v16 = vsel %vm853_vm2, %v5273_v6, %v5274_v37  ;;  %v5183_v38 = vrot.slane %v9789_v27, 4 }
 0x471   : > { %16708 = vst [vmem:[#allocation175_spill] sm:$0xff] %v13932_v39  ;;  %v13937_v33 = vpop.permute.xlu1 %5935 }
 0x472   : > { %16709 = vst [vmem:[#allocation88_spill] sm:$0xff] %v13937_v33  ;;  %v13941_v24 = vpop.permute.xlu0 %5697  ;;  %v9788_v33 = vld [vmem:[%s10013_s21 + $0x288] sm:$0xff]  ;;  %v5420_v61 = vsel %vm853_vm2, %v5418_v12, %v5419_v52 }
 0x473   : > { %16710 = vst [vmem:[#allocation36_spill] sm:$0xff] %v13941_v24  ;;  %v13944_v39 = vpop.f32.mrb[66].mxu1  ;;  %5627 = vrot.lane.b32.xlu1 %v9786_v50, %s16323_s18  ;;  %v5182_v31 = vrot.slane %v9788_v33, 4  ;;  %v504_v50 = vld [vmem:[%s10013_s21 + $0x650] sm:$0xf] }
 0x474   : > { %16711 = vst [vmem:[#allocation90_spill] sm:$0xff] %v13944_v39  ;;  %v13948_v51 = vpop.f32.mrb[67].mxu1  ;;  %5827 = vrot.lane.b32.xlu0 %v9787_v58, %s16528_s22  ;;  %v5421_v39 = vrot.slane %v621_v35, 4  ;;  %v5276_v33 = vrot.slane %v504_v50, 4 }
 0x475   : > { %16712 = vst [vmem:[#allocation35_spill] sm:$0xff] %v13948_v51  ;;  %v13955_v24 = vpop.permute.xlu1 %5509  ;;  %v5184_v27 = vsel %vm853_vm2, %v5182_v31, %v5183_v38 }
 0x476   : > { %16713 = vst [vmem:[#allocation38_spill] sm:$0xff] %v13955_v24  ;;  %v13958_v9 = vpop.permute.xlu0 %5475  ;;  %v5422_v12 = vsel %vm853_vm2, %v5419_v52, %v5421_v39  ;;  %v387_v24 = vld [vmem:[%s10013_s21 + $0x298] sm:$0xf]  ;;  %v5277_v31 = vsel %vm853_vm2, %v5274_v37, %v5276_v33  ;;  %v624_v52 = vld [vmem:[%s10013_s21 + $0xa20] sm:$0xff]  ;;  %v625_v39 = vld [vmem:[%s10013_s21 + $0xa28] sm:$0xff] }
 0x477   : > { %16714 = vst [vmem:[#allocation45_spill] sm:$0xff] %v13958_v9  ;;  %v13961_v51 = vpop.f32.mrb[68].mxu1  ;;  %5721 = vrot.lane.b32.xlu1 %v5275_v16, %s16534_s23 }
 0x478   : > { %16715 = vst [vmem:[#allocation119_spill] sm:$0xff] %v13961_v51  ;;  %v13964_v58 = vpop.f32.mrb[69].mxu1  ;;  %5957 = vrot.lane.b32.xlu0 %v5420_v61, %s16318_s25  ;;  %v622_v61 = vld [vmem:[%s10013_s21 + $0xa10] sm:$0xff] }
 0x479   : > { %16716 = vst [vmem:[#allocation43_spill] sm:$0xff] %v13964_v58  ;;  %v13968_v6 = vpop.permute.xlu1 %5805 }
 0x47a   : > { %16717 = vst [vmem:[#allocation122_spill] sm:$0xff] %v13968_v6  ;;  %v13971_v35 = vpop.permute.xlu0 %5699  ;;  %v8975_v9 = vpop.f32.mrb[22].mxu0  ;;  %v5185_v6 = vrot.slane %v387_v24, 4 }
 0x47b   : > { %16718 = vst [vmem:[#allocation96_spill] sm:$0xff] %v13971_v35  ;;  %v2440_v51 = vpop.f32.mrb[23].mxu0  ;;  %5533 = vrot.lane.b32.xlu1 %v5184_v27, %s16319_s13  ;;  %v2446_v50 = vadd.f32 %v8975_v9, %v13474_v30  ;;  %v5322_v27 = vrot.slane %v625_v39, 2  ;;  %v626_v9 = vld [vmem:[%s10013_s21 + $0xa30] sm:$0xff] }
 0x47c   : > { %v2441_v16 = vadd.f32 %v13474_v30, %v2440_v51  ;;  %5959 = vrot.lane.b32.xlu0 %v5422_v12, %s16318_s25  ;;  %v5321_v51 = vrot.slane %v624_v52, 2  ;;  %v5186_v24 = vsel %vm853_vm2, %v5183_v38, %v5185_v6  ;;  %v623_v38 = vld [vmem:[%s10013_s21 + $0xa18] sm:$0xff] }
 0x47d   : > { %v13978_v58 = vpop.permute.xlu1 %5605  ;;  %v2512_v37 = vmax.f32 %v2446_v50, 0.0  ;;  %v627_v52 = vld [vmem:[%s10013_s21 + $0xa38] sm:$0xff] }
 0x47e   : > { %16719 = vst [vmem:[#allocation98_spill] sm:$0xff] %v13978_v58  ;;  %v2511_v35 = vmax.f32 %v2441_v16, 0.0  ;;  %v13984_v45 = vpop.permute.xlu0 %5511  ;;  %v9790_v16 = vld [vmem:[%s10013_s21 + $0x658] sm:$0xff] }
 0x47f   : > { %16720 = vst [vmem:[#allocation132_spill] sm:$0xff] %v13984_v45  ;;  %5829 = vrot.lane.b32.xlu1 %v622_v61, %s16528_s22  ;;  %v5324_v61 = vrot.slane %v626_v9, 2  ;;  %v9791_v50 = vld [vmem:[%s10013_s21 + $0x678] sm:$0xff] }
 0x480   : > { %5723 = vrot.lane.b32.xlu0 %v5277_v31, %s16534_s23  ;;  %8580 = vmatmul.mubr.msk.f32.gmra.mrb[76].mxu1 %vm4350_vm12, %v2511_v35  ;;  %v5323_v35 = vsel %vm712_vm1, %v5321_v51, %v5322_v27  ;;  %v5278_v51 = vrot.slane %v9791_v50, 4  ;;  %v9795_v50 = vld [vmem:[%s10013_s21 + $0x2c8] sm:$0xff] }
 0x481   : > { %v13989_v12 = vpop.permute.xlu1 %5607  ;;  %5002 = vmatprep.mubr.f32.mxu1 %v16610_v40  ;;  %v5325_v39 = vsel %vm712_vm1, %v5322_v27, %v5324_v61  ;;  %v9794_v61 = vld [vmem:[%s10013_s21 + $0x2c0] sm:$0xff] }
 0x482   : > { %16721 = vst [vmem:[#allocation134_spill] sm:$0xff] %v13989_v12  ;;  %v13994_v33 = vpop.permute.xlu0 %5807  ;;  %v5424_v12 = vrot.slane %v627_v52, 4 }
 0x483   : > { %16722 = vst [vmem:[#allocation104_spill] sm:$0xff] %v13994_v33  ;;  %5629 = vrot.lane.b32.xlu1 %v9790_v16, %s16323_s18 }
 0x484   : > { %5535 = vrot.lane.b32.xlu0 %v5186_v24, %s16319_s13  ;;  %8581 = vmatmul.mubr.msk.f32.gmra.mrb[78].mxu1 %vm4350_vm12, %v2512_v37  ;;  %v9792_v24 = vld [vmem:[%s10013_s21 + $0x680] sm:$0xff] }
 0x485   : > { %v14001_v31 = vpop.permute.xlu1 %5701  ;;  %5008 = vmatprep.mubr.f32.mxu1 %v16610_v40  ;;  %v5279_v37 = vrot.slane %v9792_v24, 4  ;;  %v5188_v24 = vrot.slane %v9795_v50, 4 }
 0x486   : > { %16723 = vst [vmem:[#allocation145_spill] sm:$0xff] %v14001_v31  ;;  %v14005_v6 = vpop.permute.xlu0 %5937  ;;  %v5423_v31 = vrot.slane %v626_v9, 4 }
 0x487   : > { %16724 = vst [vmem:[#allocation147_spill] sm:$0xff] %v14005_v6  ;;  %5885 = vrot.lane.b32.xlu1 %v5323_v35, %s16530_s14  ;;  %v628_v6 = vld [vmem:[%s10013_s21 + $0xa40] sm:$0xf]  ;;  %v5280_v27 = vsel %vm853_vm2, %v5278_v51, %v5279_v37 }
 0x488   : > { %5831 = vrot.lane.b32.xlu0 %v623_v38, %s16528_s22  ;;  %v9793_v35 = vld [vmem:[%s10013_s21 + $0x660] sm:$0xff]  ;;  %v5187_v38 = vrot.slane %v9794_v61, 4  ;;  %v5425_v9 = vsel %vm853_vm2, %v5423_v31, %v5424_v12  ;;  %v5426_v52 = vrot.slane %v628_v6, 4  ;;  %v394_v6 = vld [vmem:[%s10013_s21 + $0x2d0] sm:$0xf] }
 0x489   : > { %v14013_v16 = vpop.permute.xlu1 %5513 }
 0x48a   : > { %16725 = vst [vmem:[#allocation156_spill] sm:$0xff] %v14013_v16  ;;  %v14015_v33 = vpop.permute.xlu0 %5939  ;;  %v511_v16 = vld [vmem:[%s10013_s21 + $0x688] sm:$0xf] }
 0x48b   : > { %16726 = vst [vmem:[#allocation160_spill] sm:$0xff] %v14015_v33  ;;  %5887 = vrot.lane.b32.xlu1 %v5325_v39, %s16530_s14  ;;  %v5189_v39 = vsel %vm853_vm2, %v5187_v38, %v5188_v24  ;;  %v5281_v61 = vrot.slane %v511_v16, 4  ;;  %v632_v16 = vld [vmem:[%s10013_s21 + $0xa60] sm:$0xff] }
 0x48c   : > { %5631 = vrot.lane.b32.xlu0 %v9793_v35, %s16323_s18  ;;  %v5427_v35 = vsel %vm853_vm2, %v5424_v12, %v5426_v52  ;;  %v631_v12 = vld [vmem:[%s10013_s21 + $0xa58] sm:$0xff] }
 0x48d   : > { %v14024_v45 = vpop.permute.xlu1 %5809  ;;  %v5282_v38 = vsel %vm853_vm2, %v5279_v37, %v5281_v61 }
 0x48e   : > { %16727 = vst [vmem:[#allocation177_spill] sm:$0xff] %v14024_v45  ;;  %v14027_v33 = vpop.permute.xlu0 %5703 }
 0x48f   : > { %16728 = vst [vmem:[#allocation178_spill] sm:$0xff] %v14027_v33  ;;  %5725 = vrot.lane.b32.xlu1 %v5280_v27, %s16534_s23 }
 0x490   : > { %5961 = vrot.lane.b32.xlu0 %v5425_v9, %s16318_s25  ;;  %v629_v9 = vld [vmem:[%s10013_s21 + $0xa48] sm:$0xff] }
 0x491   : > { %v14033_v51 = vpop.permute.xlu1 %5609 }
 0x492   : > { %16729 = vst [vmem:[#allocation179_spill] sm:$0xff] %v14033_v51  ;;  %v14036_v50 = vpop.permute.xlu0 %5515  ;;  %v8978_v31 = vpop.f32.mrb[24].mxu0  ;;  %v5190_v51 = vrot.slane %v394_v6, 4  ;;  %v9796_v6 = vld [vmem:[%s10013_s21 + $0x690] sm:$0xff] }
 0x493   : > { %16730 = vst [vmem:[#allocation180_spill] sm:$0xff] %v14036_v50  ;;  %v2450_v45 = vpop.f32.mrb[25].mxu0  ;;  %5537 = vrot.lane.b32.xlu1 %v5189_v39, %s16319_s13  ;;  %v2456_v52 = vadd.f32 %v8978_v31, %v13474_v30  ;;  %v5327_v39 = vrot.slane %v632_v16, 2  ;;  %v9797_v16 = vld [vmem:[%s10013_s21 + $0x6b0] sm:$0xff] }
 0x494   : > { %v2451_v27 = vadd.f32 %v13474_v30, %v2450_v45  ;;  %5963 = vrot.lane.b32.xlu0 %v5427_v35, %s16318_s25  ;;  %v5326_v45 = vrot.slane %v631_v12, 2  ;;  %v5191_v37 = vsel %vm853_vm2, %v5188_v24, %v5190_v51  ;;  %v633_v30 = vld [vmem:[%s10013_s21 + $0xa68] sm:$0xff]  ;;  %v630_v24 = vld [vmem:[%s10013_s21 + $0xa50] sm:$0xff] }
 0x495   : > { %v14043_v33 = vpop.permute.xlu1 %5611  ;;  %v2514_v61 = vmax.f32 %v2456_v52, 0.0  ;;  %v5283_v52 = vrot.slane %v9797_v16, 4  ;;  %v9801_v16 = vld [vmem:[%s10013_s21 + $0x300] sm:$0xff] }
 0x496   : > { %16731 = vst [vmem:[#allocation181_spill] sm:$0xff] %v14043_v33  ;;  %v2513_v50 = vmax.f32 %v2451_v27, 0.0  ;;  %v14049_v58 = vpop.permute.xlu0 %5811  ;;  %v5329_v27 = vrot.slane %v633_v30, 2  ;;  %v9805_v33 = vld [vmem:[%s10013_s21 + $0x6e8] sm:$0xff] }
 0x497   : > { %16732 = vst [vmem:[#allocation182_spill] sm:$0xff] %v14049_v58  ;;  %5833 = vrot.lane.b32.xlu1 %v629_v9, %s16528_s22 }
 0x498   : > { %5727 = vrot.lane.b32.xlu0 %v5282_v38, %s16534_s23  ;;  %8582 = vmatmul.mubr.msk.f32.gmra.mrb[80].mxu1 %vm4350_vm12, %v2513_v50  ;;  %v5328_v50 = vsel %vm712_vm1, %v5326_v45, %v5327_v39  ;;  %v634_v38 = vld [vmem:[%s10013_s21 + $0xa70] sm:$0xff]  ;;  %v5330_v12 = vsel %vm712_vm1, %v5327_v39, %v5329_v27  ;;  %v9798_v45 = vld [vmem:[%s10013_s21 + $0x6b8] sm:$0xff] }
 0x499   : > { %v14054_v35 = vpop.permute.xlu1 %5705  ;;  %5014 = vmatprep.mubr.f32.mxu1 %v16610_v40  ;;  %v9800_v27 = vld [vmem:[%s10013_s21 + $0x2f8] sm:$0xff] }
 0x49a   : > { %16733 = vst [vmem:[#allocation183_spill] sm:$0xff] %v14054_v35  ;;  %v14059_v31 = vpop.permute.xlu0 %5941 }
 0x49b   : > { %16734 = vst [vmem:[#allocation184_spill] sm:$0xff] %v14059_v31  ;;  %5633 = vrot.lane.b32.xlu1 %v9796_v6, %s16323_s18  ;;  %v5428_v6 = vrot.slane %v633_v30, 4  ;;  %v5429_v31 = vrot.slane %v634_v38, 4 }
 0x49c   : > { %5539 = vrot.lane.b32.xlu0 %v5191_v37, %s16319_s13  ;;  %8583 = vmatmul.mubr.msk.f32.gmra.mrb[82].mxu1 %vm4350_vm12, %v2514_v61  ;;  %v5284_v37 = vrot.slane %v9798_v45, 4  ;;  %v5193_v45 = vrot.slane %v9801_v16, 4 }
 0x49d   : > { %v14066_v9 = vpop.permute.xlu1 %5517  ;;  %5020 = vmatprep.mubr.f32.mxu1 %v16610_v40  ;;  %v5430_v30 = vsel %vm853_vm2, %v5428_v6, %v5429_v31  ;;  %v401_v6 = vld [vmem:[%s10013_s21 + $0x308] sm:$0xf] }
 0x49e   : > { %16735 = vst [vmem:[#allocation185_spill] sm:$0xff] %v14066_v9  ;;  %v14070_v51 = vpop.permute.xlu0 %5943  ;;  %v5285_v39 = vsel %vm853_vm2, %v5283_v52, %v5284_v37 }
 0x49f   : > { %16736 = vst [vmem:[#allocation186_spill] sm:$0xff] %v14070_v51  ;;  %5889 = vrot.lane.b32.xlu1 %v5328_v50, %s16530_s14  ;;  %v635_v51 = vld [vmem:[%s10013_s21 + $0xa78] sm:$0xf] }
 0x4a0   : > { %5835 = vrot.lane.b32.xlu0 %v630_v24, %s16528_s22  ;;  %v9799_v50 = vld [vmem:[%s10013_s21 + $0x698] sm:$0xff]  ;;  %v5192_v24 = vrot.slane %v9800_v27, 4  ;;  %v5431_v38 = vrot.slane %v635_v51, 4 }
 0x4a1   : > { %v14078_v61 = vpop.permute.xlu1 %5813 }
 0x4a2   : > { %16737 = vst [vmem:[#allocation187_spill] sm:$0xff] %v14078_v61  ;;  %v14080_v35 = vpop.permute.xlu0 %5707 }
 0x4a3   : > { %16738 = vst [vmem:[#allocation188_spill] sm:$0xff] %v14080_v35  ;;  %5891 = vrot.lane.b32.xlu1 %v5330_v12, %s16530_s14  ;;  %v518_v35 = vld [vmem:[%s10013_s21 + $0x6c0] sm:$0xf]  ;;  %v5194_v12 = vsel %vm853_vm2, %v5192_v24, %v5193_v45 }
 0x4a4   : > { %5635 = vrot.lane.b32.xlu0 %v9799_v50, %s16323_s18  ;;  %v5432_v50 = vsel %vm853_vm2, %v5429_v31, %v5431_v38  ;;  %v5286_v27 = vrot.slane %v518_v35, 4  ;;  %v5195_v31 = vrot.slane %v401_v6, 4  ;;  %v638_v38 = vld [vmem:[%s10013_s21 + $0xa90] sm:$0xff] }
 0x4a5   : > { %v14089_v58 = vpop.permute.xlu1 %5613 }
 0x4a6   : > { %16739 = vst [vmem:[#allocation189_spill] sm:$0xff] %v14089_v58  ;;  %v14092_v61 = vpop.permute.xlu0 %5519  ;;  %v5287_v35 = vsel %vm853_vm2, %v5284_v37, %v5286_v27  ;;  %v5196_v37 = vsel %vm853_vm2, %v5193_v45, %v5195_v31  ;;  %v640_v27 = vld [vmem:[%s10013_s21 + $0xaa0] sm:$0xff] }
 0x4a7   : > { %16740 = vst [vmem:[#allocation190_spill] sm:$0xff] %v14092_v61  ;;  %5729 = vrot.lane.b32.xlu1 %v5285_v39, %s16534_s23  ;;  %v14108_v39 = vld [vmem:[%s16034_s2] ss:$0 sm:$0xff] }
 0x4a8   : > { %5965 = vrot.lane.b32.xlu0 %v5430_v30, %s16318_s25  ;;  %v636_v30 = vld [vmem:[%s10013_s21 + $0xa80] sm:$0xff] }
 0x4a9   : > { %v14098_v52 = vpop.permute.xlu1 %5615 }
 0x4aa   : > { %16741 = vst [vmem:[#allocation191_spill] sm:$0xff] %v14098_v52  ;;  %v14101_v16 = vpop.permute.xlu0 %5815  ;;  %v8981_v51 = vpop.f32.mrb[26].mxu0 }
 0x4ab   : > { %16742 = vst [vmem:[#allocation192_spill] sm:$0xff] %v14101_v16  ;;  %v2460_v61 = vpop.f32.mrb[27].mxu0  ;;  %5541 = vrot.lane.b32.xlu1 %v5194_v12, %s16319_s13  ;;  %v639_v16 = vld [vmem:[%s10013_s21 + $0xa98] sm:$0xff]  ;;  %v2466_v12 = vadd.f32 %v14108_v39, %v8981_v51 }
 0x4ac   : > { %v2461_v24 = vadd.f32 %v14108_v39, %v2460_v61  ;;  %5967 = vrot.lane.b32.xlu0 %v5432_v50, %s16318_s25  ;;  %v5331_v61 = vrot.slane %v638_v38, 2  ;;  %v5332_v50 = vrot.slane %v639_v16, 2  ;;  %v5334_v16 = vrot.slane %v640_v27, 2  ;;  %v637_v38 = vld [vmem:[%s10013_s21 + $0xa88] sm:$0xff] }
 0x4ad   : > { %v14113_v52 = vpop.permute.xlu1 %5709  ;;  %v2516_v51 = vmax.f32 %v2466_v12, 0.0 }
 0x4ae   : > { %16743 = vst [vmem:[#allocation193_spill] sm:$0xff] %v14113_v52  ;;  %v2515_v58 = vmax.f32 %v2461_v24, 0.0  ;;  %v14119_v9 = vpop.permute.xlu0 %5945  ;;  %v16746_v24 = vld [vmem:[#allocation7_spill] sm:$0xff]  ;;  %v5333_v45 = vsel %vm712_vm1, %v5331_v61, %v5332_v50 }
 0x4af   : > { %16744 = vst [vmem:[#allocation194_spill] sm:$0xff] %v14119_v9  ;;  %5837 = vrot.lane.b32.xlu1 %v636_v30, %s16528_s22  ;;  %v7074_v30 = vsel %vm1890_vm3, %v16746_v24, 0.0  ;;  %v16747_v9 = vld [vmem:[#allocation9_spill] sm:$0xff] }
 0x4b0   : > { %5731 = vrot.lane.b32.xlu0 %v5287_v35, %s16534_s23  ;;  %8584 = vmatmul.mubr.msk.f32.gmra.mrb[84].mxu1 %vm4350_vm12, %v2515_v58  ;;  %v7075_v58 = vsel %vm1890_vm3, %v16747_v9, 0.0  ;;  %v9803_v35 = vld [vmem:[%s10013_s21 + $0x6c8] sm:$0xff] }
 0x4b1   : > { %v5522_v52 = vpop.permute.xlu1 %5521  ;;  %5026 = vmatprep.mubr.f32.mxu1 %v16610_v40  ;;  %v7076_v12 = vadd.f32 %v7075_v58, %v7074_v30  ;;  %v641_v9 = vld [vmem:[%s10013_s21 + $0xaa8] sm:$0xff]  ;;  %v5288_v30 = vrot.slane %v9805_v33, 4  ;;  %v9806_v58 = vld [vmem:[%s10013_s21 + $0x6f0] sm:$0xff] }
 0x4b2   : > { %v14127_v6 = vpop.permute.xlu0 %5947  ;;  %v5434_v20 = vrot.slane %v641_v9, 4 }
 0x4b3   : > { %16745 = vst [vmem:[#allocation195_spill] sm:$0xff] %v14127_v6  ;;  %5637 = vrot.lane.b32.xlu1 %v9803_v35, %s16323_s18  ;;  %v16750_v6 = vld [vmem:[#allocation13_spill] sm:$0xff] }
 0x4b4   : > { %5543 = vrot.lane.b32.xlu0 %v5196_v37, %s16319_s13  ;;  %8585 = vmatmul.mubr.msk.f32.gmra.mrb[86].mxu1 %vm4350_vm12, %v2516_v51  ;;  %v7077_v35 = vsel %vm1890_vm3, %v16750_v6, 0.0  ;;  %v9804_v37 = vld [vmem:[%s10013_s21 + $0x1c0] sm:$0xff] }
 0x4b5   : > { %v14138_v31 = vpop.permute.xlu1 %5817  ;;  %5032 = vmatprep.mubr.f32.mxu1 %v16610_v40  ;;  %v16751_v51 = vld [vmem:[#allocation59_spill] sm:$0xff]  ;;  %v7078_v36 = vadd.f32 %v7077_v35, %v7076_v12  ;;  %v9809_v12 = vld [vmem:[%s10013_s21 + $0x338] sm:$0xff] }
 0x4b6   : > { %16748 = vst [vmem:[#allocation196_spill] sm:$0xff] %v14138_v31  ;;  %v14142_v24 = vpop.permute.xlu0 %5711  ;;  %v6033_v61 = vsel %vm1890_vm3, %v9804_v37, %v16751_v51  ;;  %v5335_v31 = vsel %vm712_vm1, %v5332_v50, %v5334_v16  ;;  %v16753_v50 = vld [vmem:[#allocation15_spill] sm:$0xff]  ;;  %v9807_v16 = vld [vmem:[%s10013_s21 + $0x6d0] sm:$0xff]  ;;  %v5198_v35 = vrot.slane %v9809_v12, 4 }
 0x4b7   : > { %16749 = vst [vmem:[#allocation197_spill] sm:$0xff] %v14142_v24  ;;  %5893 = vrot.lane.b32.xlu1 %v5333_v45, %s16530_s14  ;;  %v5289_v24 = vrot.slane %v9806_v58, 4  ;;  %v6065_v6 = vsel %vm1923_vm4, %v6033_v61, %v5522_v52  ;;  %v5433_v45 = vrot.slane %v640_v27, 4  ;;  %v7079_v33 = vsel %vm1890_vm3, %v16753_v50, 0.0  ;;  %v9808_v27 = vld [vmem:[%s10013_s21 + $0x330] sm:$0xff] }
 0x4b8   : > { %5839 = vrot.lane.b32.xlu0 %v637_v38, %s16528_s22  ;;  %v642_v38 = vld [vmem:[%s10013_s21 + $0xab0] sm:$0xf]  ;;  %v5197_v9 = vrot.slane %v9808_v27, 4  ;;  %v7080_v61 = vadd.f32 %v7079_v33, %v7078_v36  ;;  %v525_v50 = vld [vmem:[%s10013_s21 + $0x6f8] sm:$0xf] }
 0x4b9   : > { %v5618_v42 = vpop.permute.xlu1 %5617  ;;  %v5290_v52 = vsel %vm853_vm2, %v5288_v30, %v5289_v24  ;;  %v5436_v51 = vrot.slane %v642_v38, 4  ;;  %v5291_v36 = vrot.slane %v525_v50, 4  ;;  %v408_v12 = vld [vmem:[%s10013_s21 + $0x340] sm:$0xf]  ;;  %v645_v50 = vld [vmem:[%s10013_s21 + $0xac8] sm:$0xff] }
 0x4ba   : > { %v14157_v54 = vsel %vm1956_vm5, %v6065_v6, %v5618_v42  ;;  %v14159_v37 = vpop.permute.xlu0 %5523  ;;  %v5435_v6 = vsel %vm853_vm2, %v5433_v45, %v5434_v20  ;;  %v5199_v30 = vsel %vm853_vm2, %v5197_v9, %v5198_v35 }
 0x4bb   : > { %16752 = vst [vmem:[#allocation59_spill] sm:$0xff] %v14157_v54  ;;  %5895 = vrot.lane.b32.xlu1 %v5335_v31, %s16530_s14  ;;  %v16756_v31 = vld [vmem:[#allocation19_spill] sm:$0xff]  ;;  %v5437_v45 = vsel %vm853_vm2, %v5434_v20, %v5436_v51  ;;  %v5292_v20 = vsel %vm853_vm2, %v5289_v24, %v5291_v36  ;;  %v646_v51 = vld [vmem:[%s10013_s21 + $0xad0] sm:$0xff]  ;;  %v5336_v24 = vrot.slane %v645_v50, 2 }
 0x4bc   : > { %5639 = vrot.lane.b32.xlu0 %v9807_v16, %s16323_s18  ;;  %v7081_v54 = vsel %vm1890_vm3, %v16756_v31, 0.0  ;;  %v16759_v31 = vld [vmem:[#allocation21_spill] sm:$0xff] }
 0x4bd   : > { %v14170_v42 = vpop.permute.xlu1 %5619  ;;  %v7082_v38 = vadd.f32 %v7081_v54, %v7080_v61  ;;  %v5200_v54 = vrot.slane %v408_v12, 4 }
 0x4be   : > { %16754 = vst [vmem:[#allocation198_spill] sm:$0xff] %v14170_v42  ;;  %v14173_v58 = vpop.permute.xlu0 %5819 }
 0x4bf   : > { %16755 = vst [vmem:[#allocation199_spill] sm:$0xff] %v14173_v58  ;;  %5733 = vrot.lane.b32.xlu1 %v5290_v52, %s16534_s23  ;;  %v7083_v58 = vsel %vm1890_vm3, %v16759_v31, 0.0 }
 0x4c0   : > { %5969 = vrot.lane.b32.xlu0 %v5435_v6, %s16318_s25  ;;  %v643_v6 = vld [vmem:[%s10013_s21 + $0xab8] sm:$0xff]  ;;  %v7084_v61 = vadd.f32 %v7083_v58, %v7082_v38  ;;  %v5201_v58 = vsel %vm853_vm2, %v5198_v35, %v5200_v54 }
 0x4c1   : > { %v14181_v16 = vpop.permute.xlu1 %5713  ;;  %v14211_v38 = vld [vmem:[%s10013_s21 + $0xad8] sm:$0xff] }
 0x4c2   : > { %16757 = vst [vmem:[#allocation200_spill] sm:$0xff] %v14181_v16  ;;  %v14184_v33 = vpop.permute.xlu0 %5949  ;;  %v8984_v27 = vpop.f32.mrb[28].mxu0  ;;  %v5339_v54 = vrot.slane %v14211_v38, 2 }
 0x4c3   : > { %16758 = vst [vmem:[#allocation201_spill] sm:$0xff] %v14184_v33  ;;  %v2470_v52 = vpop.f32.mrb[29].mxu0  ;;  %5545 = vrot.lane.b32.xlu1 %v5199_v30, %s16319_s13  ;;  %v2476_v33 = vadd.f32 %v14108_v39, %v8984_v27  ;;  %v16761_v30 = vld [vmem:[#allocation31_spill] sm:$0xff] }
 0x4c4   : > { %v2471_v9 = vadd.f32 %v14108_v39, %v2470_v52  ;;  %5971 = vrot.lane.b32.xlu0 %v5437_v45, %s16318_s25  ;;  %v7085_v52 = vsel %vm1890_vm3, %v16761_v30, 0.0  ;;  %v5337_v45 = vrot.slane %v646_v51, 2  ;;  %v644_v51 = vld [vmem:[%s10013_s21 + $0xac0] sm:$0xff] }
 0x4c5   : > { %v14193_v16 = vpop.permute.xlu1 %5525  ;;  %v7086_v27 = vadd.f32 %v7085_v52, %v7084_v61  ;;  %v2518_v12 = vmax.f32 %v2476_v33, 0.0  ;;  %v304_v33 = vld [vmem:[%s10013_s21] sm:$0xff]  ;;  %v305_v52 = vld [vmem:[%s10013_s21 + $0x8] sm:$0xff] }
 0x4c6   : > { %v2517_v31 = vmax.f32 %v2471_v9, 0.0  ;;  %v14199_v42 = vpop.permute.xlu0 %5951  ;;  %v5338_v35 = vsel %vm712_vm1, %v5336_v24, %v5337_v45  ;;  %v6017_v24 = vsel %vm1890_vm3, %v304_v33, %v13495_v0  ;;  %v5340_v30 = vsel %vm712_vm1, %v5337_v45, %v5339_v54 }
 0x4c7   : > { %16760 = vst [vmem:[#allocation202_spill] sm:$0xff] %v14199_v42  ;;  %5841 = vrot.lane.b32.xlu1 %v643_v6, %s16528_s22  ;;  %v16764_v6 = vld [vmem:[#allocation33_spill] sm:$0xff]  ;;  %v14243_v42 = vld [vmem:[%s10013_s21 + $0x728] sm:$0xff]  ;;  %v6049_v0 = vsel %vm1923_vm4, %v6017_v24, %v13511_v59  ;;  %v5438_v45 = vrot.slane %v14211_v38, 4 }
 0x4c8   : > { %5735 = vrot.lane.b32.xlu0 %v5292_v20, %s16534_s23  ;;  %8586 = vmatmul.mubr.msk.f32.gmra.mrb[88].mxu1 %vm4350_vm12, %v2517_v31  ;;  %v7087_v31 = vsel %vm1890_vm3, %v16764_v6, 0.0  ;;  %v9810_v20 = vld [vmem:[%s10013_s21 + $0x700] sm:$0xff]  ;;  %v649_v59 = vld [vmem:[%s10013_s21 + $0xae8] sm:$0xf]  ;;  %v9813_v24 = vld [vmem:[%s10013_s21 + $0x150] sm:$0xff] }
 0x4c9   : > { %v14206_v36 = vpop.permute.xlu1 %5821  ;;  %5038 = vmatprep.mubr.f32.mxu1 %v16610_v40  ;;  %v7088_v61 = vadd.f32 %v7087_v31, %v7086_v27  ;;  %v9811_v27 = vld [vmem:[%s10013_s21 + $0x720] sm:$0xff] }
 0x4ca   : > { %16762 = vst [vmem:[#allocation203_spill] sm:$0xff] %v14206_v36  ;;  %v14213_v9 = vpop.permute.xlu0 %5715  ;;  %v5293_v31 = vrot.slane %v9811_v27, 4 }
 0x4cb   : > { %16763 = vst [vmem:[#allocation204_spill] sm:$0xff] %v14213_v9  ;;  %5641 = vrot.lane.b32.xlu1 %v9810_v20, %s16323_s18  ;;  %v14232_v20 = vld [vmem:[%s10013_s21 + $0xae0] sm:$0xff] }
 0x4cc   : > { %5547 = vrot.lane.b32.xlu0 %v5201_v58, %s16319_s13  ;;  %8587 = vmatmul.mubr.msk.f32.gmra.mrb[90].mxu1 %vm4350_vm12, %v2518_v12  ;;  %v16767_v58 = vld [vmem:[#allocation47_spill] sm:$0xff]  ;;  %v5439_v54 = vrot.slane %v14232_v20, 4  ;;  %v16772_v20 = vld [vmem:[#allocation42_spill] sm:$0xff] }
 0x4cd   : > { %v14224_v50 = vpop.permute.xlu1 %5621  ;;  %5044 = vmatprep.mubr.f32.mxu1 %v16610_v40  ;;  %v7089_v12 = vsel %vm1890_vm3, %v16767_v58, 0.0  ;;  %v16771_v58 = vld [vmem:[#allocation39_spill] sm:$0xff] }
 0x4ce   : > { %16765 = vst [vmem:[#allocation205_spill] sm:$0xff] %v14224_v50  ;;  %v14229_v6 = vpop.permute.xlu0 %5527  ;;  %v14267_v38 = vsel %vm1890_vm3, %v9813_v24, %v16771_v58  ;;  %v16774_v58 = vld [vmem:[#allocation52_spill] sm:$0xff]  ;;  %v5440_v36 = vsel %vm853_vm2, %v5438_v45, %v5439_v54  ;;  %v5441_v50 = vrot.slane %v649_v59, 4 }
 0x4cf   : > { %16766 = vst [vmem:[#allocation206_spill] sm:$0xff] %v14229_v6  ;;  %5897 = vrot.lane.b32.xlu1 %v5338_v35, %s16530_s14  ;;  %v6018_v35 = vsel %vm1890_vm3, %v305_v52, %v13493_v46  ;;  %v6081_v46 = vsel %vm1956_vm5, %v6049_v0, %v13525_v18  ;;  %v311_v52 = vld [vmem:[%s10013_s21 + $0x38] sm:$0xff] }
 0x4d0   : > { %5843 = vrot.lane.b32.xlu0 %v644_v51, %s16528_s22  ;;  %v14254_v51 = vadd.f32 %v7089_v12, %v7088_v61  ;;  %v6050_v27 = vsel %vm1923_vm4, %v6018_v35, %v13509_v15  ;;  %v9814_v61 = vld [vmem:[%s10013_s21 + $0x158] sm:$0xff]  ;;  %v9815_v15 = vld [vmem:[%s10013_s21 + $0x188] sm:$0xff]  ;;  %v16773_v35 = vld [vmem:[#allocation51_spill] sm:$0xff] }
 0x4d1   : > { %v14250_v33 = vpop.permute.xlu1 %5623  ;;  %v14272_v12 = vsel %vm1890_vm3, %v9814_v61, %v16772_v20  ;;  %v14277_v18 = vsel %vm1890_vm3, %v9815_v15, %v16773_v35  ;;  %v6082_v0 = vsel %vm1956_vm5, %v6050_v27, %v13523_v23  ;;  %v16775_v61 = vrot.slane %v14243_v42, 4  ;;  %v9818_v15 = vld [vmem:[%s10013_s21 + $0x368] sm:$0xff]  ;;  %v14295_v23 = vld [vmem:[%s10013_s21 + $0x370] sm:$0xff] }
 0x4d2   : > { %16768 = vst [vmem:[#allocation207_spill] sm:$0xff] %v14250_v33  ;;  %16769 = vst [vmem:[#allocation208_spill] sm:$0xff] %v14254_v51  ;;  %v14261_v9 = vpop.permute.xlu0 %5823  ;;  %v312_v51 = vld [vmem:[%s10013_s21 + $0x40] sm:$0xff]  ;;  %v9817_v33 = vld [vmem:[%s10013_s21 + $0x708] sm:$0xff]  ;;  %v5202_v35 = vrot.slane %v9818_v15, 4 }
 0x4d3   : > { %16770 = vst [vmem:[#allocation209_spill] sm:$0xff] %v14261_v9  ;;  %5899 = vrot.lane.b32.xlu1 %v5340_v30, %s16530_s14  ;;  %v9816_v9 = vld [vmem:[%s10013_s21 + $0x190] sm:$0xff]  ;;  %v5295_v20 = vsel %vm853_vm2, %v5293_v31, %v16775_v61  ;;  %v16776_v27 = vld [vmem:[#allocation44_spill] sm:$0xff]  ;;  %v6020_v15 = vsel %vm1890_vm3, %v312_v51, %v13560_v56  ;;  %v16777_v30 = vld [vmem:[#allocation46_spill] sm:$0xff] }
 0x4d4   : > { %v14286_v24 = vsel %vm1890_vm3, %v9816_v9, %v16774_v58  ;;  %5643 = vrot.lane.b32.xlu0 %v9817_v33, %s16323_s18  ;;  %v6113_v6 = vsel %vm1989_vm6, %v6081_v46, %v16776_v27  ;;  %v6019_v9 = vsel %vm1890_vm3, %v311_v52, %v13543_v8  ;;  %v318_v58 = vld [vmem:[%s10013_s21 + $0x70] sm:$0xff]  ;;  %v6114_v46 = vsel %vm1989_vm6, %v6082_v0, %v16777_v30  ;;  %v319_v27 = vld [vmem:[%s10013_s21 + $0x78] sm:$0xff] }
 0x4d5   : > { %v14303_v33 = vpop.permute.xlu1 %5717  ;;  %v6145_v31 = vsel %vm2022_vm7, %v6113_v6, %v13541_v62  ;;  %v6051_v61 = vsel %vm1923_vm4, %v6019_v9, %v13554_v49  ;;  %v532_v52 = vld [vmem:[%s10013_s21 + $0x730] sm:$0xf]  ;;  %v6146_v59 = vsel %vm2022_vm7, %v6114_v46, %v13572_v25  ;;  %v6052_v49 = vsel %vm1923_vm4, %v6020_v15, %v13584_v10  ;;  %v16780_v46 = vld [vmem:[#allocation54_spill] sm:$0xff] }
 0x4d6   : > { %v14315_v8 = vpop.permute.xlu0 %5953  ;;  %v6177_v45 = vsel %vm2055_vm8, %v6145_v31, %v13566_v55  ;;  %v6083_v62 = vsel %vm1956_vm5, %v6051_v61, %v13578_v17  ;;  %v6084_v6 = vsel %vm1956_vm5, %v6052_v49, %v13592_v47  ;;  %v6178_v51 = vsel %vm2055_vm8, %v6146_v59, %v13599_v57  ;;  %v415_v31 = vld [vmem:[%s10013_s21 + $0x378] sm:$0xf]  ;;  %v14384_v49 = vld [vmem:[%s10013_s21 + $0xb08] sm:$0xff] }
 0x4d7   : > { %v8987_v56 = vpop.f32.mrb[30].mxu0  ;;  %5737 = vrot.lane.b32.xlu1 %v5295_v20, %s16534_s23  ;;  %v6021_v55 = vsel %vm1890_vm3, %v318_v58, %v13610_v11  ;;  %v16778_v17 = vrot.slane %v14295_v23, 4  ;;  %v6022_v0 = vsel %vm1890_vm3, %v319_v27, %v13646_v29  ;;  %v5442_v57 = vsel %vm853_vm2, %v5439_v54, %v5441_v50  ;;  %v325_v54 = vld [vmem:[%s10013_s21 + $0xa8] sm:$0xff]  ;;  %v326_v27 = vld [vmem:[%s10013_s21 + $0xb0] sm:$0xff] }
 0x4d8   : > { %5973 = vrot.lane.b32.xlu0 %v5440_v36, %s16318_s25  ;;  %v2480_v25 = vpop.f32.mrb[31].mxu0  ;;  %v5296_v30 = vrot.slane %v532_v52, 4  ;;  %v6209_v11 = vsel %vm2088_vm9, %v6177_v45, %v16642_v19  ;;  %v16779_v36 = vld [vmem:[#allocation53_spill] sm:$0xff]  ;;  %v6054_v29 = vsel %vm1923_vm4, %v6022_v0, %v13685_v41  ;;  %v2486_v61 = vadd.f32 %v14108_v39, %v8987_v56 }
 0x4d9   : > { %v5204_v10 = vsel %vm853_vm2, %v5202_v35, %v16778_v17  ;;  %v2481_v47 = vadd.f32 %v14108_v39, %v2480_v25  ;;  %v14340_v20 = vpop.permute.xlu1 %5529  ;;  %v6115_v9 = vsel %vm1989_vm6, %v6083_v62, %v16779_v36  ;;  %v6053_v35 = vsel %vm1923_vm4, %v6021_v55, %v13640_v63  ;;  %v650_v39 = vld [vmem:[%s10013_s21 + $0xaf0] sm:$0xff]  ;;  %v652_v62 = vld [vmem:[%s10013_s21 + $0xb00] sm:$0xff] }
 0x4da   : > { %v14351_v58 = vpop.permute.xlu0 %5955  ;;  %v6085_v50 = vsel %vm1956_vm5, %v6053_v35, %v13678_v13  ;;  %v6086_v19 = vsel %vm1956_vm5, %v6054_v29, %v13701_v60  ;;  %v6241_v63 = vsel %vm2121_vm10, %v6209_v11, %v13616_v48  ;;  %v6210_v41 = vsel %vm2088_vm9, %v6178_v51, %v16643_v53  ;;  %v16783_v51 = vld [vmem:[#allocation62_spill] sm:$0xff]  ;;  %v16786_v29 = vld [vmem:[#allocation135_spill] sm:$0xff] }
 0x4db   : > { %v2519_v15 = vmax.f32 %v2481_v47, 0.0  ;;  %5549 = vrot.lane.b32.xlu1 %v5204_v10, %s16319_s13  ;;  %v6147_v13 = vsel %vm2022_vm7, %v6115_v9, %v13633_v4  ;;  %v6116_v60 = vsel %vm1989_vm6, %v6084_v6, %v16780_v46  ;;  %v16781_v53 = vrot.slane %v14243_v42, 4 }
 0x4dc   : > { %5975 = vrot.lane.b32.xlu0 %v5442_v57, %s16318_s25  ;;  %v6179_v52 = vsel %vm2055_vm8, %v6147_v13, %v13658_v44  ;;  %v6148_v45 = vsel %vm2022_vm7, %v6116_v60, %v13664_v1  ;;  %v5205_v59 = vrot.slane %v415_v31, 4  ;;  %v6023_v44 = vsel %vm1890_vm3, %v325_v54, %v13718_v28  ;;  %v16782_v1 = vld [vmem:[#allocation61_spill] sm:$0xff]  ;;  %v333_v31 = vld [vmem:[%s10013_s21 + $0xe8] sm:$0xff]  ;;  %v16788_v54 = vld [vmem:[#allocation50_spill] sm:$0xff] }
 0x4dd   : > { %8588 = vmatmul.mubr.msk.f32.gmra.mrb[92].mxu1 %vm4350_vm12, %v2519_v15  ;;  %v14377_v48 = vpop.permute.xlu1 %5825  ;;  %v5297_v4 = vsel %vm853_vm2, %v16781_v53, %v5296_v30  ;;  %v6180_v56 = vsel %vm2055_vm8, %v6148_v45, %v13707_v34  ;;  %v6117_v6 = vsel %vm1989_vm6, %v6085_v50, %v16782_v1  ;;  %v6118_v55 = vsel %vm1989_vm6, %v6086_v19, %v16783_v51  ;;  %v14411_v57 = vld [vmem:[%s10013_s21 + $0xb10] sm:$0xff]  ;;  %v332_v30 = vld [vmem:[%s10013_s21 + $0xe0] sm:$0xff]  ;;  %v9820_v15 = vld [vmem:[%s10013_s21 + $0x738] sm:$0xff] }
 0x4de   : > { %v14394_v42 = vpop.permute.xlu0 %5719  ;;  %5050 = vmatprep.mubr.f32.mxu1 %v16610_v40  ;;  %v6149_v25 = vsel %vm2022_vm7, %v6117_v6, %v13739_v14  ;;  %v6055_v34 = vsel %vm1923_vm4, %v6023_v44, %v13749_v7  ;;  %v6024_v28 = vsel %vm1890_vm3, %v326_v27, %v13754_v3  ;;  %v2520_v17 = vmax.f32 %v2486_v61, 0.0  ;;  %v16789_v61 = vld [vmem:[#allocation115_spill] sm:$0xff]  ;;  %v16790_v13 = vld [vmem:[#allocation116_spill] sm:$0xff]  ;;  %v16791_v60 = vld [vmem:[#allocation69_spill] sm:$0xff] }
 0x4df   : > { %5845 = vrot.lane.b32.xlu1 %v650_v39, %s16528_s22  ;;  %v6181_v10 = vsel %vm2055_vm8, %v6149_v25, %v13766_v2  ;;  %v6056_v0 = vsel %vm1923_vm4, %v6024_v28, %v13790_v5  ;;  %v5341_v47 = vrot.slane %v652_v62, 2  ;;  %v5342_v14 = vrot.slane %v14384_v49, 2  ;;  %v16792_v39 = vld [vmem:[#allocation70_spill] sm:$0xff]  ;;  %v16796_v44 = vld [vmem:[#allocation151_spill] sm:$0xff]  ;;  %v16798_v28 = vld [vmem:[#allocation161_spill] sm:$0xff] }
 0x4e0   : > { %5739 = vrot.lane.b32.xlu0 %v5297_v4, %s16534_s23  ;;  %v6150_v7 = vsel %vm2022_vm7, %v6118_v55, %v13771_v21  ;;  %v6087_v3 = vsel %vm1956_vm5, %v6055_v34, %v13786_v22  ;;  %v6088_v2 = vsel %vm1956_vm5, %v6056_v0, %v13800_v26  ;;  %v16784_v11 = vrot.slane %v14295_v23, 4  ;;  %v16785_v22 = vld [vmem:[#allocation108_spill] sm:$0xff]  ;;  %v16787_v23 = vld [vmem:[#allocation111_spill] sm:$0xff]  ;;  %v16793_v53 = vld [vmem:[#allocation118_spill] sm:$0xff] }
 0x4e1   : > { %8589 = vmatmul.mubr.msk.f32.gmra.mrb[94].mxu1 %vm4350_vm12, %v2520_v17  ;;  %v14421_v5 = vpop.permute.xlu1 %5625  ;;  %v6242_v9 = vsel %vm2121_vm10, %v6210_v41, %v13627_v43  ;;  %v6211_v21 = vsel %vm2088_vm9, %v6179_v52, %v16648_v32  ;;  %v6212_v35 = vsel %vm2088_vm9, %v6180_v56, %v16785_v22  ;;  %v6182_v26 = vsel %vm2055_vm8, %v6150_v7, %v16786_v29  ;;  %v16795_v49 = vld [vmem:[#allocation150_spill] sm:$0xff]  ;;  %v539_v22 = vld [vmem:[%s10013_s21 + $0x768] sm:$0xf] }
 0x4e2   : > { %v5206_v36 = vsel %vm853_vm2, %v16784_v11, %v5205_v59  ;;  %v14435_v50 = vpop.permute.xlu0 %5531  ;;  %9056 = vmatprep.mubr.msk.f32.mxu1 %vm2164_vm11, %v6241_v63  ;;  %v6243_v19 = vsel %vm2121_vm10, %v6211_v21, %v16787_v23  ;;  %v6244_v43 = vsel %vm2121_vm10, %v6212_v35, %v16788_v54  ;;  %v6213_v32 = vsel %vm2088_vm9, %v6181_v10, %v16789_v61  ;;  %v7144_v63 = vld [vmem:[%s16035_s3] sm:$0xf]  ;;  %v651_v51 = vld [vmem:[%s10013_s21 + $0xaf8] sm:$0xff]  ;;  %v16799_v10 = vld [vmem:[#allocation168_spill] sm:$0xff] }
 0x4e3   : > { %5645 = vrot.lane.b32.xlu1 %v9820_v15, %s16323_s18  ;;  %v5344_v41 = vrot.slane %v14411_v57, 2  ;;  %v6025_v46 = vsel %vm1890_vm3, %v332_v30, %v16790_v13  ;;  %v6119_v27 = vsel %vm1989_vm6, %v6087_v3, %v16791_v60  ;;  %v6120_v52 = vsel %vm1989_vm6, %v6088_v2, %v16792_v39  ;;  %v16794_v59 = vld [vmem:[#allocation139_spill] sm:$0xff]  ;;  %v14471_v55 = vld [vmem:[%s10013_s21 + $0xb18] sm:$0xff]  ;;  %v9823_v61 = vld [vmem:[%s10013_s21 + $0x1c8] sm:$0xff] }
 0x4e4   : > { %5551 = vrot.lane.b32.xlu0 %v5206_v36, %s16319_s13  ;;  %v5343_v45 = vsel %vm712_vm1, %v5341_v47, %v5342_v14  ;;  %v6214_v4 = vsel %vm2088_vm9, %v6182_v26, %v16793_v53  ;;  %v6151_v62 = vsel %vm2022_vm7, %v6119_v27, %v16794_v59  ;;  %v6057_v56 = vsel %vm1923_vm4, %v6025_v46, %v16795_v49  ;;  %v16797_v25 = vld [vmem:[#allocation158_spill] sm:$0xff]  ;;  %v16800_v3 = vld [vmem:[#allocation163_spill] sm:$0xff]  ;;  %v16803_v15 = vld [vmem:[#allocation60_spill] sm:$0xff] }
 0x4e5   : > { %v6026_v1 = vsel %vm1890_vm3, %v333_v31, %v16796_v44  ;;  %v14466_v6 = vpop.permute.xlu1 %5627  ;;  %9057 = vmatmul.mubr.msk.f32.vlgmr.msra.gmra.mrb[96].mxu1 %vm2164_vm11, %v6242_v9  ;;  %v6183_v34 = vsel %vm2055_vm8, %v6151_v62, %v16797_v25  ;;  %v6152_v17 = vsel %vm2022_vm7, %v6120_v52, %v16798_v28  ;;  %v339_v47 = vld [vmem:[%s10013_s21 + $0x118] sm:$0xff]  ;;  %v6089_v2 = vsel %vm1956_vm5, %v6057_v56, %v16800_v3  ;;  %v9822_v26 = vld [vmem:[%s10013_s21 + $0x760] sm:$0xff]  ;;  %v16804_v13 = vld [vmem:[#allocation64_spill] sm:$0xff] }
 0x4e6   : > { %v6058_v0 = vsel %vm1923_vm4, %v6026_v1, %v16799_v10  ;;  %v14480_v7 = vpop.permute.xlu0 %5827  ;;  %9059 = vmatprep.mubr.msk.f32.mxu1 %vm2164_vm11, %v6243_v19  ;;  %9105 = vmatpush3.msk.msra.mxu1 %vm853_vm2, %v7144_v63  ;;  %v16801_v30 = vld [vmem:[#allocation82_spill] sm:$0xff]  ;;  %v5345_v21 = vsel %vm712_vm1, %v5342_v14, %v5344_v41  ;;  %v5299_v31 = vrot.slane %v9822_v26, 4  ;;  %v5443_v23 = vrot.slane %v14411_v57, 4  ;;  %v656_v54 = vld [vmem:[%s10013_s21 + $0xb20] sm:$0xf]  ;;  %v16805_v41 = vld [vmem:[#allocation128_spill] sm:$0xff] }
 0x4e7   : > { %v6090_v11 = vsel %vm1956_vm5, %v6058_v0, %v16801_v30  ;;  %v16802_v36 = vld [vmem:[#allocation10_spill] sm:$0xff]  ;;  %5901 = vrot.lane.b32.xlu1 %v5343_v45, %s16530_s14  ;;  %v5444_v19 = vrot.slane %v14471_v55, 4  ;;  %v14502_v63 = vsel %vm1890_vm3, %v9823_v61, %v16803_v15  ;;  %v6245_v14 = vsel %vm2121_vm10, %v6213_v32, %v16804_v13  ;;  %v16806_v60 = vld [vmem:[#allocation172_spill] sm:$0xff]  ;;  %v16807_v57 = vld [vmem:[#allocation127_spill] sm:$0xff] }
 0x4e8   : > { %v6184_v9 = vsel %vm2055_vm8, %v6152_v17, %v16802_v36  ;;  %5847 = vrot.lane.b32.xlu0 %v651_v51, %s16528_s22  ;;  %v9821_v35 = vld [vmem:[%s10013_s21 + $0x758] sm:$0xff]  ;;  %v6246_v46 = vsel %vm2121_vm10, %v6214_v4, %v16805_v41  ;;  %v6027_v27 = vsel %vm1890_vm3, %v339_v47, %v16806_v60  ;;  %v6215_v52 = vsel %vm2088_vm9, %v6183_v34, %v16807_v57  ;;  %v16808_v45 = vld [vmem:[#allocation77_spill] sm:$0xff]  ;;  %v340_v62 = vld [vmem:[%s10013_s21 + $0x120] sm:$0xff] }
 0x4e9   : > { %v5298_v29 = vrot.slane %v9821_v35, 4  ;;  %v14510_v39 = vpop.permute.xlu1 %5721  ;;  %9060 = vmatmul.mubr.msk.f32.gmra.mrb[98].mxu1 %vm2164_vm11, %v6244_v43  ;;  %v6121_v53 = vsel %vm1989_vm6, %v6089_v2, %v16808_v45  ;;  %v16809_v59 = vld [vmem:[#allocation38_spill] sm:$0xff]  ;;  %v5301_v4 = vrot.slane %v539_v22, 4  ;;  %v5446_v25 = vrot.slane %v656_v54, 4  ;;  %v16813_v34 = vld [vmem:[#allocation29_spill] sm:$0xff]  ;;  %v16814_v17 = vld [vmem:[#allocation36_spill] sm:$0xff] }
 0x4ea   : > { %v6059_v32 = vsel %vm1923_vm4, %v6027_v27, %v16809_v59  ;;  %v14520_v49 = vpop.permute.xlu0 %5957  ;;  %9062 = vmatprep.mubr.msk.f32.mxu1 %vm2164_vm11, %v6245_v14  ;;  %v16810_v56 = vld [vmem:[#allocation130_spill] sm:$0xff]  ;;  %v6247_v28 = vsel %vm2121_vm10, %v6215_v52, %v16813_v34  ;;  %v6153_v10 = vsel %vm2022_vm7, %v6121_v53, %v16814_v17  ;;  %v9824_v0 = vld [vmem:[%s10013_s21 + $0x740] sm:$0xff]  ;;  %v5445_v3 = vsel %vm853_vm2, %v5443_v23, %v5444_v19  ;;  %v16815_v2 = vld [vmem:[#allocation88_spill] sm:$0xff] }
 0x4eb   : > { %v6216_v44 = vsel %vm2088_vm9, %v6184_v9, %v16810_v56  ;;  %v16811_v1 = vld [vmem:[#allocation78_spill] sm:$0xff]  ;;  %5903 = vrot.lane.b32.xlu1 %v5345_v21, %s16530_s14  ;;  %v5300_v47 = vsel %vm853_vm2, %v5298_v29, %v5299_v31  ;;  %v16818_v22 = vld [vmem:[#allocation96_spill] sm:$0xff]  ;;  %v16821_v15 = vld [vmem:[#allocation85_spill] sm:$0xff]  ;;  %v5302_v41 = vsel %vm853_vm2, %v5299_v31, %v5301_v4  ;;  %v5447_v59 = vsel %vm853_vm2, %v5444_v19, %v5446_v25 }
 0x4ec   : > { %v6122_v43 = vsel %vm1989_vm6, %v6090_v11, %v16811_v1  ;;  %v16812_v51 = vld [vmem:[#allocation98_spill] sm:$0xff]  ;;  %5647 = vrot.lane.b32.xlu0 %v9824_v0, %s16323_s18  ;;  %v6248_v30 = vsel %vm2121_vm10, %v6216_v44, %v16815_v2  ;;  %v16816_v11 = vld [vmem:[#allocation45_spill] sm:$0xff]  ;;  %v16819_v29 = vld [vmem:[#allocation132_spill] sm:$0xff] }
 0x4ed   : > { %v6091_v55 = vsel %vm1956_vm5, %v6059_v32, %v16812_v51  ;;  %v6028_v36 = vsel %vm1890_vm3, %v340_v62, %v16816_v11  ;;  %v16817_v9 = vld [vmem:[#allocation122_spill] sm:$0xff]  ;;  %v6154_v35 = vsel %vm2022_vm7, %v6122_v43, %v16818_v22  ;;  %v14546_v26 = vpop.permute.xlu1 %5533  ;;  %9063 = vmatmul.mubr.msk.f32.gmra.mrb[100].mxu1 %vm2164_vm11, %v6246_v46  ;;  %v16820_v54 = vld [vmem:[#allocation104_spill] sm:$0xff]  ;;  %v14560_v60 = vld [vmem:[%s10013_s21 + $0xb40] sm:$0xff] }
 0x4ee   : > { %v6185_v21 = vsel %vm2055_vm8, %v6153_v10, %v16817_v9  ;;  %v6060_v23 = vsel %vm1923_vm4, %v6028_v36, %v16819_v29  ;;  %v6186_v61 = vsel %vm2055_vm8, %v6154_v35, %v16820_v54  ;;  %v6123_v13 = vsel %vm1989_vm6, %v6091_v55, %v16821_v15  ;;  %v14555_v14 = vpop.permute.xlu0 %5959  ;;  %9065 = vmatprep.mubr.msk.f32.mxu1 %vm2164_vm11, %v6247_v28  ;;  %v16822_v27 = vld [vmem:[#allocation134_spill] sm:$0xff]  ;;  %v16823_v57 = vld [vmem:[#allocation145_spill] sm:$0xff]  ;;  %v16824_v45 = vld [vmem:[#allocation156_spill] sm:$0xff] }
 0x4ef   : > { %v6092_v46 = vsel %vm1956_vm5, %v6060_v23, %v16822_v27  ;;  %v6155_v52 = vsel %vm2022_vm7, %v6123_v13, %v16823_v57  ;;  %v6061_v53 = vsel %vm1923_vm4, %v14267_v38, %v16824_v45  ;;  %5741 = vrot.lane.b32.xlu1 %v5300_v47, %s16534_s23  ;;  %v14572_v32 = vld [vmem:[%s10013_s21 + $0xb48] sm:$0xff]  ;;  %v659_v62 = vld [vmem:[%s10013_s21 + $0xb38] sm:$0xff]  ;;  %v16825_v31 = vld [vmem:[#allocation141_spill] sm:$0xff]  ;;  %v5347_v0 = vrot.slane %v14560_v60, 2 }
 0x4f0   : > { %v6217_v4 = vsel %vm2088_vm9, %v6185_v21, %v16825_v31  ;;  %v16826_v56 = vld [vmem:[#allocation177_spill] sm:$0xff]  ;;  %v16827_v1 = vld [vmem:[#allocation179_spill] sm:$0xff]  ;;  %v16828_v51 = vld [vmem:[#allocation180_spill] sm:$0xff]  ;;  %5977 = vrot.lane.b32.xlu0 %v5445_v3, %s16318_s25  ;;  %v5349_v36 = vrot.slane %v14572_v32, 2  ;;  %v5346_v9 = vrot.slane %v659_v62, 2 }
 0x4f1   : > { %v6187_v44 = vsel %vm2055_vm8, %v6155_v52, %v16826_v56  ;;  %v6093_v43 = vsel %vm1956_vm5, %v6061_v53, %v16827_v1  ;;  %v6062_v38 = vsel %vm1923_vm4, %v14272_v12, %v16828_v51  ;;  %v16829_v55 = vld [vmem:[#allocation147_spill] sm:$0xff]  ;;  %v16830_v25 = vld [vmem:[#allocation140_spill] sm:$0xff]  ;;  %v16831_v28 = vld [vmem:[#allocation181_spill] sm:$0xff]  ;;  %v14591_v10 = vpop.permute.xlu1 %5829  ;;  %9066 = vmatmul.mubr.msk.f32.gmra.mrb[102].mxu1 %vm2164_vm11, %v6248_v30 }
 0x4f2   : > { %v6249_v19 = vsel %vm2121_vm10, %v6217_v4, %v16829_v55  ;;  %v6218_v34 = vsel %vm2088_vm9, %v6186_v61, %v16830_v25  ;;  %v6094_v17 = vsel %vm1956_vm5, %v6062_v38, %v16831_v28  ;;  %v16832_v12 = vld [vmem:[#allocation160_spill] sm:$0xff]  ;;  %v16833_v3 = vld [vmem:[#allocation86_spill] sm:$0xff]  ;;  %v14599_v11 = vpop.permute.xlu0 %5723  ;;  %v16835_v22 = vld [vmem:[#allocation93_spill] sm:$0xff] }
 0x4f3   : > { %v6250_v47 = vsel %vm2121_vm10, %v6218_v34, %v16832_v12  ;;  %v6124_v2 = vsel %vm1989_vm6, %v6092_v46, %v16833_v3  ;;  %9068 = vmatprep.mubr.msk.f32.mxu1 %vm2164_vm11, %v6249_v19  ;;  %v16834_v21 = vld [vmem:[#allocation178_spill] sm:$0xff]  ;;  %v6125_v35 = vsel %vm1989_vm6, %v6093_v43, %v16835_v22  ;;  %v16836_v29 = vld [vmem:[#allocation152_spill] sm:$0xff]  ;;  %v16837_v54 = vld [vmem:[#allocation185_spill] sm:$0xff]  ;;  %5743 = vrot.lane.b32.xlu1 %v5302_v41, %s16534_s23 }
 0x4f4   : > { %v6156_v30 = vsel %vm2022_vm7, %v6124_v2, %v16834_v21  ;;  %v6219_v23 = vsel %vm2088_vm9, %v6187_v44, %v16836_v29  ;;  %v6063_v61 = vsel %vm1923_vm4, %v14277_v18, %v16837_v54  ;;  %v662_v15 = vld [vmem:[%s10013_s21 + $0xb50] sm:$0xff]  ;;  %v663_v13 = vld [vmem:[%s10013_s21 + $0xb58] sm:$0xf]  ;;  %v16839_v46 = vld [vmem:[#allocation183_spill] sm:$0xff]  ;;  %5979 = vrot.lane.b32.xlu0 %v5447_v59, %s16318_s25 }
 0x4f5   : > { %v16838_v60 = vld [vmem:[#allocation182_spill] sm:$0xff]  ;;  %v6157_v57 = vsel %vm2022_vm7, %v6125_v35, %v16839_v46  ;;  %v16841_v53 = vld [vmem:[#allocation189_spill] sm:$0xff]  ;;  %v16842_v41 = vld [vmem:[#allocation67_spill] sm:$0xff]  ;;  %v14634_v55 = vpop.permute.xlu1 %5629  ;;  %9069 = vmatmul.mubr.msk.f32.gmra.mrb[104].mxu1 %vm2164_vm11, %v6250_v47  ;;  %v5449_v12 = vrot.slane %v662_v15, 4  ;;  %v5451_v3 = vrot.slane %v663_v13, 4 }
 0x4f6   : > { %v6188_v27 = vsel %vm2055_vm8, %v6156_v30, %v16838_v60  ;;  %v16840_v52 = vld [vmem:[#allocation94_spill] sm:$0xff]  ;;  %v6095_v62 = vsel %vm1956_vm5, %v6063_v61, %v16841_v53  ;;  %v658_v18 = vld [vmem:[%s10013_s21 + $0xb30] sm:$0xff]  ;;  %v16843_v56 = vld [vmem:[#allocation184_spill] sm:$0xff]  ;;  %v5348_v60 = vsel %vm712_vm1, %v5346_v9, %v5347_v0  ;;  %v6066_v9 = vsel %vm1923_vm4, %v14502_v63, %v14159_v37 }
 0x4f7   : > { %v6126_v45 = vsel %vm1989_vm6, %v6094_v17, %v16840_v52  ;;  %v9825_v31 = vld [vmem:[%s10013_s21 + $0x1f8] sm:$0xff]  ;;  %v6251_v44 = vsel %vm2121_vm10, %v6219_v23, %v16843_v56  ;;  %v16844_v1 = vld [vmem:[#allocation187_spill] sm:$0xff]  ;;  %v16845_v51 = vld [vmem:[#allocation188_spill] sm:$0xff]  ;;  %v14643_v17 = vpop.permute.xlu0 %5535  ;;  %5851 = vrot.lane.b32.xlu1 %v658_v18, %s16528_s22 }
 0x4f8   : > { %v6035_v4 = vsel %vm1890_vm3, %v9825_v31, %v16842_v41  ;;  %v6189_v43 = vsel %vm2055_vm8, %v6157_v57, %v16844_v1  ;;  %v6158_v38 = vsel %vm2022_vm7, %v6126_v45, %v16845_v51  ;;  %v657_v19 = vld [vmem:[%s10013_s21 + $0xb28] sm:$0xff]  ;;  %v16846_v59 = vld [vmem:[#allocation190_spill] sm:$0xff]  ;;  %9071 = vmatprep.mubr.msk.f32.mxu1 %vm2164_vm11, %v6251_v44  ;;  %v16848_v2 = vld [vmem:[#allocation153_spill] sm:$0xff]  ;;  %v5452_v44 = vsel %vm853_vm2, %v5449_v12, %v5451_v3 }
 0x4f9   : > { %v6064_v25 = vsel %vm1923_vm4, %v14286_v24, %v16846_v59  ;;  %v16847_v34 = vld [vmem:[#allocation192_spill] sm:$0xff]  ;;  %v6220_v21 = vsel %vm2088_vm9, %v6188_v27, %v16848_v2  ;;  %v16849_v30 = vld [vmem:[#allocation191_spill] sm:$0xff]  ;;  %v16850_v22 = vld [vmem:[#allocation101_spill] sm:$0xff]  ;;  %v5350_v24 = vsel %vm712_vm1, %v5347_v0, %v5349_v36  ;;  %5849 = vrot.lane.b32.xlu0 %v657_v19, %s16528_s22  ;;  %v14668_v53 = vpop.permute.xlu1 %5885  ;;  %v6067_v37 = vsel %vm1923_vm4, %v6035_v4, %v14193_v16 }
 0x4fa   : > { %v6190_v28 = vsel %vm2055_vm8, %v6158_v38, %v16847_v34  ;;  %v6096_v47 = vsel %vm1956_vm5, %v6064_v25, %v16849_v30  ;;  %v6127_v35 = vsel %vm1989_vm6, %v6095_v62, %v16850_v22  ;;  %v16851_v29 = vld [vmem:[#allocation186_spill] sm:$0xff]  ;;  %v16852_v54 = vld [vmem:[#allocation193_spill] sm:$0xff]  ;;  %v16855_v57 = vld [vmem:[#allocation23_spill] sm:$0xff]  ;;  %v5448_v62 = vrot.slane %v14572_v32, 4 }
 0x4fb   : > { %v6252_v23 = vsel %vm2121_vm10, %v6220_v21, %v16851_v29  ;;  %v6159_v61 = vsel %vm2022_vm7, %v6127_v35, %v16852_v54  ;;  %v16853_v15 = vld [vmem:[#allocation173_spill] sm:$0xff]  ;;  %v16854_v27 = vld [vmem:[#allocation194_spill] sm:$0xff]  ;;  %v6222_v52 = vsel %vm2088_vm9, %v6190_v28, %v16855_v57  ;;  %v16856_v36 = vld [vmem:[#allocation196_spill] sm:$0xff]  ;;  %v14679_v56 = vpop.permute.xlu0 %5831  ;;  %5907 = vrot.lane.b32.xlu1 %v5350_v24, %s16530_s14 }
 0x4fc   : > { %v6221_v13 = vsel %vm2088_vm9, %v6189_v43, %v16853_v15  ;;  %v6191_v45 = vsel %vm2055_vm8, %v6159_v61, %v16856_v36  ;;  %9072 = vmatmul.mubr.msk.f32.gmra.mrb[106].mxu1 %vm2164_vm11, %v6252_v23  ;;  %v16857_v18 = vld [vmem:[#allocation195_spill] sm:$0xff]  ;;  %v16858_v41 = vld [vmem:[#allocation102_spill] sm:$0xff]  ;;  %v16859_v1 = vld [vmem:[#allocation197_spill] sm:$0xff]  ;;  %v5450_v54 = vsel %vm853_vm2, %v5448_v62, %v5449_v12 }
 0x4fd   : > { %v6253_v46 = vsel %vm2121_vm10, %v6221_v13, %v16854_v27  ;;  %v6254_v31 = vsel %vm2121_vm10, %v6222_v52, %v16857_v18  ;;  %v6128_v0 = vsel %vm1989_vm6, %v6096_v47, %v16858_v41  ;;  %v16860_v43 = vld [vmem:[#allocation198_spill] sm:$0xff]  ;;  %v16861_v38 = vld [vmem:[#allocation112_spill] sm:$0xff]  ;;  %v16862_v19 = vld [vmem:[#allocation59_spill] sm:$0xff]  ;;  %5905 = vrot.lane.b32.xlu0 %v5348_v60, %s16530_s14  ;;  %v14709_v23 = vpop.permute.xlu1 %5887 }
 0x4fe   : > { %9074 = vmatprep.mubr.msk.f32.mxu1 %vm2164_vm11, %v6253_v46  ;;  %v6160_v32 = vsel %vm2022_vm7, %v6128_v0, %v16859_v1  ;;  %v6098_v51 = vsel %vm1956_vm5, %v6066_v9, %v16860_v43  ;;  %v6129_v59 = vsel %vm1989_vm6, %v16862_v19, %v16861_v38  ;;  %v16863_v63 = vld [vmem:[#allocation199_spill] sm:$0xff]  ;;  %v16864_v34 = vld [vmem:[#allocation200_spill] sm:$0xff]  ;;  %v16866_v21 = vld [vmem:[#allocation205_spill] sm:$0xff] }
 0x4ff   : > { %v6192_v25 = vsel %vm2055_vm8, %v6160_v32, %v16863_v63  ;;  %v6161_v28 = vsel %vm2022_vm7, %v6129_v59, %v16864_v34  ;;  %v16865_v3 = vld [vmem:[#allocation176_spill] sm:$0xff]  ;;  %v6099_v30 = vsel %vm1956_vm5, %v6067_v37, %v16866_v21  ;;  %v9826_v47 = vld [vmem:[%s10013_s21 + $0x200] sm:$0xff]  ;;  %v16868_v4 = vld [vmem:[#allocation201_spill] sm:$0xff]  ;;  %5983 = vrot.lane.b32.xlu1 %v5452_v44, %s16318_s25 }
 0x500   : > { %v6223_v2 = vsel %vm2088_vm9, %v6191_v45, %v16865_v3  ;;  %v16867_v22 = vld [vmem:[#allocation68_spill] sm:$0xff]  ;;  %v16869_v24 = vld [vmem:[#allocation203_spill] sm:$0xff]  ;;  %9075 = vmatmul.mubr.msk.f32.gmra.mrb[108].mxu1 %vm2164_vm11, %v6254_v31  ;;  %v16870_v61 = vld [vmem:[#allocation49_spill] sm:$0xff]  ;;  %v14722_v45 = vpop.permute.xlu0 %5631 }
 0x501   : > { %v6036_v16 = vsel %vm1890_vm3, %v9826_v47, %v16867_v22  ;;  %v6255_v35 = vsel %vm2121_vm10, %v6223_v2, %v16868_v4  ;;  %v6193_v29 = vsel %vm2055_vm8, %v6161_v28, %v16869_v24  ;;  %v7091_v15 = vsel %vm1890_vm3, %v16870_v61, 0.0  ;;  %v9827_v13 = vld [vmem:[%s10013_s21 + $0x230] sm:$0xff]  ;;  %v16871_v60 = vld [vmem:[#allocation75_spill] sm:$0xff]  ;;  %v16872_v46 = vld [vmem:[#allocation114_spill] sm:$0xff]  ;;  %5981 = vrot.lane.b32.xlu0 %v5450_v54, %s16318_s25  ;;  %v14750_v3 = vpop.permute.xlu1 %5725  ;;  %s296_s25 = sand.u32 1, %s9893_s28  }
 0x502   : > { %v6037_v27 = vsel %vm1890_vm3, %v9827_v13, %v16871_v60  ;;  %v6130_v57 = vsel %vm1989_vm6, %v6098_v51, %v16872_v46  ;;  %v16873_v52 = vld [vmem:[#allocation206_spill] sm:$0xff]  ;;  %9077 = vmatprep.mubr.msk.f32.mxu1 %vm2164_vm11, %v6255_v35  ;;  %v16875_v62 = vld [vmem:[#allocation204_spill] sm:$0xff]  ;;  %v16876_v41 = vld [vmem:[#allocation207_spill] sm:$0xff]  ;;  %s8435_s13 = sshll.u32 %s296_s25, 9 }
 0x503   : > { %v6068_v36 = vsel %vm1923_vm4, %v6036_v16, %v16873_v52  ;;  %v16874_v18 = vld [vmem:[#allocation14_spill] sm:$0xff]  ;;  %v6162_v31 = vsel %vm2022_vm7, %v6130_v57, %v16875_v62  ;;  %v16877_v9 = vld [vmem:[#allocation124_spill] sm:$0xff]  ;;  %v16879_v51 = vld [vmem:[#allocation209_spill] sm:$0xff]  ;;  %v6069_v34 = vsel %vm1923_vm4, %v6037_v27, %v14340_v20  ;;  %s15791_s18 = scalar_lea.vmem [#allocation2], %s8435_s13 }
 0x504   : > { %v6224_v12 = vsel %vm2088_vm9, %v6192_v25, %v16874_v18  ;;  %v6100_v0 = vsel %vm1956_vm5, %v6068_v36, %v16876_v41  ;;  %v6131_v1 = vsel %vm1989_vm6, %v6099_v30, %v16877_v9  ;;  %v16878_v32 = vld [vmem:[#allocation202_spill] sm:$0xff]  ;;  %v6194_v38 = vsel %vm2055_vm8, %v6162_v31, %v16879_v51  ;;  %v16880_v59 = vld [vmem:[#allocation131_spill] sm:$0xff]  ;;  %v16881_v63 = vld [vmem:[#allocation208_spill] sm:$0xff]  ;;  %s8369_s22 = sshll.u32 %s15791_s18, 4  ;;  %s15984_s22 = int_to_ptr.vmem [resolvable:$true] %s8369_s22 }
 0x505   : > { %v6256_v43 = vsel %vm2121_vm10, %v6224_v12, %v16878_v32  ;;  %v6163_v19 = vsel %vm2022_vm7, %v6131_v1, %v14303_v33  ;;  %v6225_v37 = vsel %vm2088_vm9, %v6193_v29, %v16880_v59  ;;  %v7092_v25 = vadd.f32 %v7091_v15, %v16881_v63  ;;  %v16882_v33 = vld [vmem:[#allocation55_spill] sm:$0xff]  ;;  %v16883_v21 = vld [vmem:[#allocation126_spill] sm:$0xff]  ;;  %v16884_v22 = vld [vmem:[#allocation76_spill] sm:$0xff]  ;;  %s9839_s0 = scalar_lea.vmem %s15984_s22, 8192  ;;  %p9846_p0 = scmp.lt.s32.totalorder %s15984_s22, %s9844_s29 }
 0x506   : > { %v6257_v44 = vsel %vm2121_vm10, %v6225_v37, %v14315_v8  ;;  %v6195_v28 = vsel %vm2055_vm8, %v6163_v19, %v14377_v48  ;;  %9078 = vmatmul.mubr.msk.f32.gmra.mrb[110].mxu1 %vm2164_vm11, %v6256_v43  ;;  %v7093_v2 = vsel %vm1890_vm3, %v16882_v33, 0.0  ;;  %v6132_v30 = vsel %vm1989_vm6, %v6100_v0, %v16883_v21  ;;  %v5962_v8 = vpop.permute.xlu0 %5961  ;;  %v9828_v20 = vld [vmem:[%s10013_s21 + $0x238] sm:$0xff]  ;;  %v16885_v16 = vld [vmem:[#allocation155_spill] sm:$0xff]  ;;  %v16887_v27 = vld [vmem:[#allocation133_spill] sm:$0xff]  ;;  %p9840_p11 = scmp.ne.s32.totalorder %s15984_s22, %s9839_s0  ;;  %p9847_p1 = scmp.lt.s32.totalorder %s9845_s20, %s9839_s0 }
 0x507   : > { %v6101_v47 = vsel %vm1956_vm5, %v6069_v34, %v14421_v5  ;;  %9080 = vmatprep.mubr.msk.f32.mxu1 %vm2164_vm11, %v6257_v44  ;;  %v6038_v48 = vsel %vm1890_vm3, %v9828_v20, %v16884_v22  ;;  %v6226_v4 = vsel %vm2088_vm9, %v6194_v38, %v16885_v16  ;;  %v6164_v35 = vsel %vm2022_vm7, %v6132_v30, %v14394_v42  ;;  %v16886_v54 = vld [vmem:[#allocation162_spill] sm:$0xff]  ;;  %v16890_v12 = vld [vmem:[#allocation136_spill] sm:$0xff]  ;;  %v16892_v38 = vld [vmem:[#allocation65_spill] sm:$0xff] }
 0x508   : > { %v6258_v24 = vsel %vm2121_vm10, %v6226_v4, %v14351_v58  ;;  %v6070_v29 = vsel %vm1923_vm4, %v6038_v48, %v14435_v50  ;;  %v6196_v5 = vsel %vm2055_vm8, %v6164_v35, %v14480_v7  ;;  %v6227_v15 = vsel %vm2088_vm9, %v6195_v28, %v16886_v54  ;;  %v14781_v58 = vpop.permute.xlu1 %5537  ;;  %v16888_v50 = vld [vmem:[#allocation57_spill] sm:$0xff]  ;;  %v16893_v63 = vld [vmem:[#allocation71_spill] sm:$0xff]  ;;  %v9829_v44 = vld [vmem:[%s10013_s21 + $0x268] sm:$0xff]  ;;  %p9841_p12 = pnand %p9840_p11, %p9998_p5  ;;  %p9848_p2 = por %p9847_p1, %p9846_p0 }
 0x509   : > { %v7094_v13 = vadd.f32 %v7093_v2, %v7092_v25  ;;  %v6102_v60 = vsel %vm1956_vm5, %v6070_v29, %v14466_v6  ;;  %v6133_v46 = vsel %vm1989_vm6, %v6101_v47, %v16887_v27  ;;  %v6259_v42 = vsel %vm2121_vm10, %v6227_v15, %v14520_v49  ;;  %v16889_v6 = vld [vmem:[#allocation169_spill] sm:$0xff]  ;;  %v16896_v48 = vld [vmem:[#allocation84_spill] sm:$0xff] }
 0x50a   : > { %9081 = vmatmul.mubr.msk.f32.gmra.mrb[112].mxu1 %vm2164_vm11, %v6258_v24  ;;  %v7095_v7 = vsel %vm1890_vm3, %v16888_v50, 0.0  ;;  %v6165_v57 = vsel %vm2022_vm7, %v6133_v46, %v14510_v39  ;;  %v5964_v52 = vpop.permute.xlu0 %5963  ;;  %v6228_v36 = vsel %vm2088_vm9, %v6196_v5, %v16889_v6  ;;  %v6134_v62 = vsel %vm1989_vm6, %v6102_v60, %v16890_v12  ;;  %v9830_v22 = vld [vmem:[%s10013_s21 + $0x270] sm:$0xff]  ;;  %v16897_v24 = vld [vmem:[#allocation144_spill] sm:$0xff]  ;;  %p9842_p13 = pneg %p9841_p12 }
 0x50b   : > { %9083 = vmatprep.mubr.msk.f32.mxu1 %vm2164_vm11, %v6259_v42  ;;  %v6197_v18 = vsel %vm2055_vm8, %v6165_v57, %v14591_v10  ;;  %v6260_v49 = vsel %vm2121_vm10, %v6228_v36, %v14555_v14  ;;  %v7096_v41 = vadd.f32 %v7095_v7, %v7094_v13  ;;  %v6166_v39 = vsel %vm2022_vm7, %v6134_v62, %v14599_v11  ;;  %v16891_v10 = vld [vmem:[#allocation63_spill] sm:$0xff]  ;;  %v16900_v6 = vld [vmem:[#allocation81_spill] sm:$0xff]  ;;  %v8630_v62 = vld [vmem:[%s16038_s6 + $0x108] sm:$0xff] }
 0x50c   : > { %v6229_v31 = vsel %vm2088_vm9, %v6197_v18, %v14668_v53  ;;  %v5834_v9 = vpop.permute.xlu1 %5833  ;;  %v7097_v1 = vsel %vm1890_vm3, %v16891_v10, 0.0  ;;  %v6198_v14 = vsel %vm2055_vm8, %v6166_v39, %v14679_v56  ;;  %v7099_v19 = vsel %vm1890_vm3, %v16892_v38, 0.0  ;;  %v16898_v13 = vld [vmem:[#allocation79_spill] sm:$0xff]  ;;  %p9849_p3 = pnand %p9848_p2, %p9842_p13 }
 0x50d   : > { %v6261_v0 = vsel %vm2121_vm10, %v6229_v31, %v5962_v8  ;;  %v6230_v53 = vsel %vm2088_vm9, %v6198_v14, %v14709_v23  ;;  %v7098_v43 = vadd.f32 %v7097_v1, %v7096_v41  ;;  %v7101_v25 = vsel %vm1890_vm3, %v16893_v63, 0.0  ;;  %v16894_v23 = vld [vmem:[#allocation83_spill] sm:$0xff]  ;;  %v16895_v8 = vld [vmem:[#allocation73_spill] sm:$0xff]  ;;  %v8632_v31 = vld [vmem:[%s16038_s6 + $0x118] sm:$0xff] }
 0x50e   : > { %9084 = vmatmul.mubr.msk.f32.gmra.mrb[114].mxu1 %vm2164_vm11, %v6260_v49  ;;  %v5728_v32 = vpop.permute.xlu0 %5727  ;;  %v6262_v11 = vsel %vm2121_vm10, %v6230_v53, %v5964_v52  ;;  %v6039_v34 = vsel %vm1890_vm3, %v9829_v44, %v16894_v23  ;;  %v7103_v20 = vsel %vm1890_vm3, %v16895_v8, 0.0  ;;  %v6040_v16 = vsel %vm1890_vm3, %v9830_v22, %v16896_v48  ;;  %v8629_v41 = vld [vmem:[%s16038_s6 + $0x100] sm:$0xff]  ;;  %v8631_v1 = vld [vmem:[%s16038_s6 + $0x110] sm:$0xff] }
 0x50f   : > { %9086 = vmatprep.mubr.msk.f32.mxu1 %vm2164_vm11, %v6261_v0  ;;  %v7100_v56 = vadd.f32 %v7099_v19, %v7098_v43  ;;  %v6071_v2 = vsel %vm1923_vm4, %v6039_v34, %v14546_v26  ;;  %v6072_v35 = vsel %vm1923_vm4, %v6040_v16, %v14643_v17  ;;  %v7105_v60 = vsel %vm1890_vm3, %v16898_v13, 0.0  ;;  %v16899_v17 = vld [vmem:[#allocation146_spill] sm:$0xff]  ;;  %v16901_v14 = vld [vmem:[#allocation87_spill] sm:$0xff] }
 0x510   : > { %v14811_v51 = vpop.permute.xlu1 %5633  ;;  %v6103_v21 = vsel %vm1956_vm5, %v6071_v2, %v14634_v55  ;;  %v6104_v26 = vsel %vm1956_vm5, %v6072_v35, %v14722_v45  ;;  %v7107_v36 = vsel %vm1890_vm3, %v16900_v6, 0.0  ;;  %v16903_v34 = vld [vmem:[#allocation95_spill] sm:$0xff]  ;;  %v16905_v35 = vld [vmem:[#allocation97_spill] sm:$0xff] }
 0x511   : > { %v7102_v30 = vadd.f32 %v7101_v25, %v7100_v56  ;;  %v6135_v29 = vsel %vm1989_vm6, %v6103_v21, %v16897_v24  ;;  %v6136_v42 = vsel %vm1989_vm6, %v6104_v26, %v16899_v17  ;;  %v16902_v56 = vld [vmem:[#allocation89_spill] sm:$0xff]  ;;  %v9831_v2 = vld [vmem:[%s10013_s21 + $0x2a0] sm:$0xff]  ;;  %v7115_v24 = vsel %vm1890_vm3, %v16905_v35, 0.0  ;;  %v16906_v26 = vld [vmem:[#allocation92_spill] sm:$0xff] }
 0x512   : > { %9087 = vmatmul.mubr.msk.f32.gmra.mrb[116].mxu1 %vm2164_vm11, %v6262_v11  ;;  %v14816_v59 = vpop.permute.xlu0 %5539  ;;  %v6167_v55 = vsel %vm2022_vm7, %v6135_v29, %v14750_v3  ;;  %v6168_v45 = vsel %vm2022_vm7, %v6136_v42, %v5728_v32  ;;  %v7109_v32 = vsel %vm1890_vm3, %v16901_v14, 0.0  ;;  %v9217_v11 = vpack.c.bf16 %v8631_v1, %v8629_v41  ;;  %v16904_v21 = vld [vmem:[#allocation91_spill] sm:$0xff]  ;;  %v9832_v29 = vld [vmem:[%s10013_s21 + $0x2a8] sm:$0xff]  ;;  %v8640_v1 = vld [vmem:[%s16038_s6 + $0x158] sm:$0xff] }
 0x513   : > { %v7104_v5 = vadd.f32 %v7103_v20, %v7102_v30  ;;  %v6199_v54 = vsel %vm2055_vm8, %v6167_v55, %v5834_v9  ;;  %v9215_v9 = vpack.c.bf16 %v8632_v31, %v8630_v62  ;;  %v6041_v30 = vsel %vm1890_vm3, %v9831_v2, %v16904_v21  ;;  %v8634_v42 = vld [vmem:[%s16038_s6 + $0x128] sm:$0xff]  ;;  %v16909_v31 = vld [vmem:[#allocation165_spill] sm:$0xff] }
 0x514   : > { %v5890_v37 = vpop.permute.xlu1 %5889  ;;  %v6073_v20 = vsel %vm1923_vm4, %v6041_v30, %v14781_v58  ;;  %v6042_v55 = vsel %vm1890_vm3, %v9832_v29, %v16906_v26  ;;  %v8643_v26 = vld [vmem:[%s16038_s6 + $0x170] sm:$0xff] }
 0x515   : > { %v6231_v27 = vsel %vm2088_vm9, %v6199_v54, %v5890_v37  ;;  %v7106_v3 = vadd.f32 %v7105_v60, %v7104_v5  ;;  %9216 = vmatprep.subr.bf16.mxu0 %v9215_v9  ;;  %v7111_v37 = vsel %vm1890_vm3, %v16902_v56, 0.0  ;;  %v6105_v22 = vsel %vm1956_vm5, %v6073_v20, %v14811_v51  ;;  %v16907_v60 = vld [vmem:[#allocation164_spill] sm:$0xff] }
 0x516   : > { %v5836_v28 = vpop.permute.xlu0 %5835  ;;  %9218 = vmatpush1.bf16.msra.mxu0 %v9217_v11  ;;  %v6074_v54 = vsel %vm1923_vm4, %v6042_v55, %v14816_v59  ;;  %v6137_v58 = vsel %vm1989_vm6, %v6105_v22, %v16907_v60  ;;  %v8638_v9 = vld [vmem:[%s16038_s6 + $0x148] sm:$0xff]  ;;  %v8644_v22 = vld [vmem:[%s16038_s6 + $0x178] sm:$0xff]  ;;  %v16911_v55 = vld [vmem:[#allocation11_spill] sm:$0xff] }
 0x517   : > { %v6200_v57 = vsel %vm2055_vm8, %v6168_v45, %v5836_v28  ;;  %v7108_v39 = vadd.f32 %v7107_v36, %v7106_v3  ;;  %v7113_v28 = vsel %vm1890_vm3, %v16903_v34, 0.0  ;;  %v16908_v36 = vld [vmem:[#allocation103_spill] sm:$0xff]  ;;  %v8642_v20 = vld [vmem:[%s16038_s6 + $0x168] sm:$0xff] }
 0x518   : > { %v5892_v47 = vpop.permute.xlu1 %5891  ;;  %v9227_v29 = vpack.c.bf16 %v8644_v22, %v8642_v20 }
 0x519   : > { %v6232_v18 = vsel %vm2088_vm9, %v6200_v57, %v5892_v47  ;;  %v7110_v43 = vadd.f32 %v7109_v32, %v7108_v39 }
 0x51a   : > { %v5636_v4 = vpop.permute.xlu0 %5635 }
 0x51b   : > { %v7112_v44 = vadd.f32 %v7111_v37, %v7110_v43  ;;  %v6106_v51 = vsel %vm1956_vm5, %v6074_v54, %v5636_v4  ;;  %v8633_v4 = vld [vmem:[%s16038_s6 + $0x120] sm:$0xff]  ;;  %v9223_v37 = vpack.c.bf16 %v8640_v1, %v8638_v9  ;;  %v7121_v54 = vsel %vm1890_vm3, %v16911_v55, 0.0 }
 0x51c   : > { %v5730_v15 = vpop.permute.xlu1 %5729  ;;  %v6138_v41 = vsel %vm1989_vm6, %v6106_v51, %v16909_v31  ;;  %v9833_v31 = vld [vmem:[%s10013_s21 + $0x2d8] sm:$0xff] }
 0x51d   : > { %v7114_v48 = vadd.f32 %v7113_v28, %v7112_v44  ;;  %v8639_v44 = vld [vmem:[%s16038_s6 + $0x150] sm:$0xff] }
 0x51e   : > { %v5966_v46 = vpop.permute.xlu0 %5965 }
 0x51f   : > { %v6263_v7 = vsel %vm2121_vm10, %v6231_v27, %v5966_v46  ;;  %v6169_v46 = vsel %vm2022_vm7, %v6137_v58, %v5730_v15  ;;  %v7116_v59 = vadd.f32 %v7115_v24, %v7114_v48  ;;  %v8635_v15 = vld [vmem:[%s16038_s6 + $0x130] sm:$0xff] }
 0x520   : > { %9089 = vmatprep.mubr.msk.f32.mxu1 %vm2164_vm11, %v6263_v7  ;;  %v14850_v52 = vpop.permute.xlu1 %5541  ;;  %v8636_v7 = vld [vmem:[%s16038_s6 + $0x138] sm:$0xff]  ;;  %v9221_v62 = vpack.c.bf16 %v8635_v15, %v8633_v4 }
 0x521   : > { %v9219_v57 = vpack.c.bf16 %v8636_v7, %v8634_v42 }
 0x522   : > { %v5968_v49 = vpop.permute.xlu0 %5967 }
 0x523   : > { %v6264_v12 = vsel %vm2121_vm10, %v6232_v18, %v5968_v49  ;;  %v7117_v18 = vsel %vm1890_vm3, %v16908_v36, 0.0  ;;  %9220 = vmatprep.subr.bf16.mxu0 %v9219_v57 }
 0x524   : > { %9090 = vmatmul.mubr.msk.f32.gmra.mrb[118].mxu1 %vm2164_vm11, %v6264_v12  ;;  %v5838_v0 = vpop.permute.xlu1 %5837  ;;  %9222 = vmatpush1.bf16.msra.mxu0 %v9221_v62  ;;  %v7118_v32 = vadd.f32 %v7117_v18, %v7116_v59  ;;  %v16912_v59 = vld [vmem:[#allocation12_spill] sm:$0xff] }
 0x525   : > { %v6201_v45 = vsel %vm2055_vm8, %v6169_v46, %v5838_v0  ;;  %9224 = vmatprep.subr.bf16.mxu0 %v9223_v37  ;;  %v16915_v37 = vld [vmem:[#allocation18_spill] sm:$0xff] }
 0x526   : > { %v5732_v53 = vpop.permute.xlu0 %5731 }
 0x527   : > { %v6170_v0 = vsel %vm2022_vm7, %v6138_v41, %v5732_v53  ;;  %v8637_v53 = vld [vmem:[%s16038_s6 + $0x140] sm:$0xff] }
 0x528   : > { %v14871_v19 = vpop.permute.xlu1 %5637  ;;  %v9225_v30 = vpack.c.bf16 %v8639_v44, %v8637_v53  ;;  %v16914_v41 = vld [vmem:[#allocation99_spill] sm:$0xff]  ;;  %v7127_v53 = vsel %vm1890_vm3, %v16915_v37, 0.0 }
 0x529   : > { %v9834_v44 = vld [vmem:[%s10013_s21 + $0x2e0] sm:$0xff] }
 0x52a   : > { %v14875_v25 = vpop.permute.xlu0 %5543  ;;  %9226 = vmatpush1.bf16.msra.mxu0 %v9225_v30 }
 0x52b   : > { %9228 = vmatprep.subr.bf16.mxu0 %v9227_v29 }
 0x52c   : > { %v5894_v23 = vpop.permute.xlu1 %5893 }
 0x52d   : > { %v6233_v49 = vsel %vm2088_vm9, %v6201_v45, %v5894_v23  ;;  %v16910_v23 = vld [vmem:[#allocation107_spill] sm:$0xff]  ;;  %v7123_v45 = vsel %vm1890_vm3, %v16912_v59, 0.0 }
 0x52e   : > { %v5840_v47 = vpop.permute.xlu0 %5839  ;;  %v7119_v28 = vsel %vm1890_vm3, %v16910_v23, 0.0 }
 0x52f   : > { %v14897_v27 = vpop.f32.mrb[70].mxu1  ;;  %v6202_v11 = vsel %vm2055_vm8, %v6170_v0, %v5840_v47  ;;  %v7120_v48 = vadd.f32 %v7119_v28, %v7118_v32  ;;  %v16916_v28 = vld [vmem:[#allocation100_spill] sm:$0xff] }
 0x530   : > { %v5896_v16 = vpop.permute.xlu1 %5895  ;;  %v14901_v17 = vpop.f32.mrb[71].mxu1 }
 0x531   : > { %v6234_v2 = vsel %vm2088_vm9, %v6202_v11, %v5896_v16  ;;  %v8641_v16 = vld [vmem:[%s16038_s6 + $0x160] sm:$0xff]  ;;  %v7122_v46 = vadd.f32 %v7121_v54, %v7120_v48 }
 0x532   : > { %v14891_v5 = vpop.permute.xlu0 %5639  ;;  %v9229_v58 = vpack.c.bf16 %v8643_v26, %v8641_v16  ;;  %v16918_v16 = vld [vmem:[#allocation25_spill] sm:$0xff] }
 0x533   : > { %v7124_v15 = vadd.f32 %v7123_v45, %v7122_v46  ;;  %v7129_v26 = vsel %vm1890_vm3, %v16918_v16, 0.0 }
 0x534   : > { %v14910_v3 = vpop.permute.xlu1 %5733  ;;  %9230 = vmatpush1.bf16.msra.mxu0 %v9229_v58 }
 0x536   : > { %v5970_v12 = vpop.permute.xlu0 %5969 }
 0x537   : > { %v6265_v39 = vsel %vm2121_vm10, %v6233_v49, %v5970_v12  ;;  %v16913_v12 = vld [vmem:[#allocation17_spill] sm:$0xff] }
 0x538   : > { %9092 = vmatprep.mubr.msk.f32.mxu1 %vm2164_vm11, %v6265_v39  ;;  %v14933_v43 = vpop.permute.xlu1 %5545  ;;  %v7125_v62 = vsel %vm1890_vm3, %v16913_v12, 0.0  ;;  %v6043_v39 = vsel %vm1890_vm3, %v9833_v31, %v16914_v41 }
 0x539   : > { %v6075_v9 = vsel %vm1923_vm4, %v6043_v39, %v14850_v52  ;;  %v7126_v32 = vadd.f32 %v7125_v62, %v7124_v15  ;;  %v16920_v62 = vld [vmem:[#allocation27_spill] sm:$0xff] }
 0x53a   : > { %v5972_v21 = vpop.permute.xlu0 %5971  ;;  %v6107_v1 = vsel %vm1956_vm5, %v6075_v9, %v14871_v19  ;;  %v7131_v31 = vsel %vm1890_vm3, %v16920_v62, 0.0 }
 0x53b   : > { %v6266_v47 = vsel %vm2121_vm10, %v6234_v2, %v5972_v21  ;;  %v6044_v2 = vsel %vm1890_vm3, %v9834_v44, %v16916_v28  ;;  %v7128_v22 = vadd.f32 %v7127_v53, %v7126_v32 }
 0x53c   : > { %9093 = vmatmul.mubr.msk.f32.gmra.mrb[120].mxu1 %vm2164_vm11, %v6266_v47  ;;  %v5842_v24 = vpop.permute.xlu1 %5841  ;;  %v14960_v51 = vpop.f32.mrb[72].mxu1  ;;  %v6076_v30 = vsel %vm1923_vm4, %v6044_v2, %v14875_v25  ;;  %v16917_v47 = vld [vmem:[#allocation28_spill] sm:$0xff]  ;;  %v16919_v25 = vld [vmem:[#allocation174_spill] sm:$0xff] }
 0x53d   : > { %v14962_v42 = vpop.f32.mrb[73].mxu1  ;;  %v6139_v20 = vsel %vm1989_vm6, %v6107_v1, %v16917_v47  ;;  %v6108_v52 = vsel %vm1956_vm5, %v6076_v30, %v14891_v5 }
 0x53e   : > { %v5736_v60 = vpop.permute.xlu0 %5735  ;;  %v6171_v19 = vsel %vm2022_vm7, %v6139_v20, %v14910_v3  ;;  %v6140_v46 = vsel %vm1989_vm6, %v6108_v52, %v16919_v25  ;;  %v7130_v3 = vadd.f32 %v7129_v26, %v7128_v22  ;;  %v16923_v26 = vld [vmem:[#allocation109_spill] sm:$0xff] }
 0x53f   : > { %v6203_v48 = vsel %vm2055_vm8, %v6171_v19, %v5842_v24  ;;  %v6172_v5 = vsel %vm2022_vm7, %v6140_v46, %v5736_v60  ;;  %v16921_v60 = vld [vmem:[#allocation37_spill] sm:$0xff] }
 0x540   : > { %v5642_v7 = vpop.permute.xlu1 %5641  ;;  %v14968_v4 = vpop.f32.mrb[74].mxu1  ;;  %v7132_v9 = vadd.f32 %v7131_v31, %v7130_v3  ;;  %v7133_v32 = vsel %vm1890_vm3, %v16921_v60, 0.0  ;;  %v9836_v3 = vld [vmem:[%s10013_s21 + $0x318] sm:$0xff] }
 0x541   : > { %v14970_v18 = vpop.f32.mrb[75].mxu1 }
 0x542   : > { %v14966_v57 = vpop.permute.xlu0 %5547  ;;  %v7134_v28 = vadd.f32 %v7133_v32, %v7132_v9 }
 0x544   : > { %v5898_v49 = vpop.permute.xlu1 %5897 }
 0x545   : > { %v6235_v54 = vsel %vm2088_vm9, %v6203_v48, %v5898_v49  ;;  %v9835_v48 = vld [vmem:[%s10013_s21 + $0x310] sm:$0xff] }
 0x546   : > { %v5844_v0 = vpop.permute.xlu0 %5843 }
 0x547   : > { %v6204_v15 = vsel %vm2055_vm8, %v6172_v5, %v5844_v0 }
 0x548   : > { %v5900_v11 = vpop.permute.xlu1 %5899 }
 0x549   : > { %v6236_v41 = vsel %vm2088_vm9, %v6204_v15, %v5900_v11  ;;  %v16922_v11 = vld [vmem:[#allocation40_spill] sm:$0xff]  ;;  %v16924_v15 = vld [vmem:[#allocation110_spill] sm:$0xff] }
 0x54a   : > { %v5644_v21 = vpop.permute.xlu0 %5643  ;;  %v7135_v30 = vsel %vm1890_vm3, %v16922_v11, 0.0  ;;  %v6046_v31 = vsel %vm1890_vm3, %v9836_v3, %v16924_v15  ;;  %v16927_v15 = vld [vmem:[#allocation121_spill] sm:$0xff] }
 0x54b   : > { %v7136_v22 = vadd.f32 %v7135_v30, %v7134_v28 }
 0x54c   : > { %v5738_v29 = vpop.permute.xlu1 %5737 }
 0x54d   : > { %v7137_v5 = vrot.slane %v7136_v22, 4 }
 0x54e   : > { %v5974_v58 = vpop.permute.xlu0 %5973 }
 0x54f   : > { %v6267_v45 = vsel %vm2121_vm10, %v6235_v54, %v5974_v58  ;;  %v6045_v54 = vsel %vm1890_vm3, %v9835_v48, %v16923_v26  ;;  %v7138_v30 = vadd.f32 %v7137_v5, %v7136_v22  ;;  %v9837_v5 = vld [vmem:[%s10013_s21 + $0x350] sm:$0xff] }
 0x550   : > { %9095 = vmatprep.mubr.msk.f32.mxu1 %vm2164_vm11, %v6267_v45  ;;  %v5550_v24 = vpop.permute.xlu1 %5549  ;;  %v6077_v25 = vsel %vm1923_vm4, %v6045_v54, %v14933_v43  ;;  %v16926_v54 = vld [vmem:[#allocation41_spill] sm:$0xff] }
 0x551   : > { %v6109_v46 = vsel %vm1956_vm5, %v6077_v25, %v5642_v7 }
 0x552   : > { %v5976_v49 = vpop.permute.xlu0 %5975 }
 0x553   : > { %v6268_v39 = vsel %vm2121_vm10, %v6236_v41, %v5976_v49  ;;  %v15011_v44 = vpop.f32.mrb[76].mxu1  ;;  %v6078_v49 = vsel %vm1923_vm4, %v6046_v31, %v14966_v57  ;;  %v6048_v31 = vsel %vm1890_vm3, %v9837_v5, %v16927_v15 }
 0x554   : > { %9096 = vmatmul.mubr.msk.f32.gmra.mrb[122].mxu1 %vm2164_vm11, %v6268_v39  ;;  %v5846_v1 = vpop.permute.xlu1 %5845  ;;  %v15013_v0 = vpop.f32.mrb[77].mxu1  ;;  %v16925_v39 = vld [vmem:[#allocation16_spill] sm:$0xff]  ;;  %v6110_v32 = vsel %vm1956_vm5, %v6078_v49, %v5644_v21 }
 0x555   : > { %v6141_v9 = vsel %vm1989_vm6, %v6109_v46, %v16925_v39  ;;  %v6142_v25 = vsel %vm1989_vm6, %v6110_v32, %v16926_v54 }
 0x556   : > { %v5740_v53 = vpop.permute.xlu0 %5739  ;;  %v6173_v28 = vsel %vm2022_vm7, %v6141_v9, %v5738_v29  ;;  %v16928_v9 = vld [vmem:[#allocation120_spill] sm:$0xff] }
 0x557   : > { %v15017_v20 = vpop.f32.mrb[78].mxu1  ;;  %v6205_v43 = vsel %vm2055_vm8, %v6173_v28, %v5846_v1  ;;  %v6174_v46 = vsel %vm2022_vm7, %v6142_v25, %v5740_v53  ;;  %v7139_v1 = vrot.slane %v7138_v30, 2  ;;  %v9838_v53 = vld [vmem:[%s10013_s21 + $0x348] sm:$0xff]  ;;  %s8783_s21 = sshll.u32 %s9981_s9, 13  ;;  %s15990_s9 = scalar_lea.sflag [#allocation3], %s296_s25 }
 0x558   : > { %v5646_v2 = vpop.permute.xlu1 %5645  ;;  %v15019_v52 = vpop.f32.mrb[79].mxu1  ;;  %v6047_v32 = vsel %vm1890_vm3, %v9838_v53, %v16928_v9  ;;  %s15982_s24 = scalar_lea.hbm %s16040_s8, %s8783_s21 }
 0x559   : > { %v7140_v39 = vadd.f32 %v7139_v1, %v7138_v30  ;;  %v16930_v30 = vld [vmem:[#allocation142_spill] sm:$0xff]  ;;  %v16931_v1 = vld [vmem:[#allocation159_spill] sm:$0xff] }
 0x55a   : > { %v5552_v47 = vpop.permute.xlu0 %5551 }
 0x55c   : > { %v5902_v19 = vpop.permute.xlu1 %5901 }
 0x55d   : > { %v6237_v48 = vsel %vm2088_vm9, %v6205_v43, %v5902_v19 }
 0x55e   : > { %v5848_v58 = vpop.permute.xlu0 %5847 }
 0x55f   : > { %v6206_v21 = vsel %vm2055_vm8, %v6174_v46, %v5848_v58  ;;  %v6080_v58 = vsel %vm1923_vm4, %v6048_v31, %v5552_v47 }
 0x560   : > { %v5904_v45 = vpop.permute.xlu1 %5903 }
 0x561   : > { %v6238_v3 = vsel %vm2088_vm9, %v6206_v21, %v5904_v45  ;;  %v6079_v45 = vsel %vm1923_vm4, %v6047_v32, %v5550_v24 }
 0x562   : > { %v5648_v41 = vpop.permute.xlu0 %5647 }
 0x563   : > { %v6112_v43 = vsel %vm1956_vm5, %v6080_v58, %v5648_v41 }
 0x564   : > { %v5742_v7 = vpop.permute.xlu1 %5741  ;;  %v6144_v46 = vsel %vm1989_vm6, %v6112_v43, %v16930_v30 }
 0x566   : > { %v5978_v26 = vpop.permute.xlu0 %5977 }
 0x567   : > { %v6269_v57 = vsel %vm2121_vm10, %v6237_v48, %v5978_v26  ;;  %v6111_v26 = vsel %vm1956_vm5, %v6079_v45, %v5646_v2 }
 0x568   : > { %9098 = vmatprep.mubr.msk.f32.mxu1 %vm2164_vm11, %v6269_v57  ;;  %v5744_v29 = vpop.permute.xlu1 %5743  ;;  %v7141_v57 = vrot.slane %v7140_v39, 1  ;;  %v6143_v47 = vsel %vm1989_vm6, %v6111_v26, %v16931_v1  ;;  %v15109_v1 = vld [vmem:[%s16034_s2 + $0x2] ss:$0 sm:$0xff] }
 0x569   : > { %v6175_v41 = vsel %vm2022_vm7, %v6143_v47, %v5742_v7 }
 0x56a   : > { %v5980_v22 = vpop.permute.xlu0 %5979  ;;  %v7142_v31 = vadd.f32 %v7141_v57, %v7140_v39 }
 0x56b   : > { %v6270_v19 = vsel %vm2121_vm10, %v6238_v3, %v5980_v22  ;;  %v15056_v48 = vpop.f32.mrb[80].mxu1  ;;  %v6176_v3 = vsel %vm2022_vm7, %v6144_v46, %v5744_v29 }
 0x56c   : > { %9099 = vmatmul.mubr.msk.f32.gmra.mrb[124].mxu1 %vm2164_vm11, %v6270_v19  ;;  %v5852_v49 = vpop.permute.xlu1 %5851  ;;  %v15059_v54 = vpop.f32.mrb[81].mxu1  ;;  %v7143_v7 = vmul.f32 0.00390625, %v7142_v31  ;;  %v8682_v31 = vld [vmem:[%s16038_s6 + $0x198] sm:$0xff] }
 0x56d   : > { %16929 = vst [vmem:[#allocation39_spill] sm:$0xff] %v15059_v54  ;;  %v6208_v22 = vsel %vm2055_vm8, %v6176_v3, %v5852_v49 }
 0x56e   : > { %v5850_v28 = vpop.permute.xlu0 %5849 }
 0x56f   : > { %v15066_v24 = vpop.f32.mrb[82].mxu1  ;;  %v6207_v19 = vsel %vm2055_vm8, %v6175_v41, %v5850_v28 }
 0x570   : > { %v5908_v25 = vpop.permute.xlu1 %5907  ;;  %v15070_v2 = vpop.f32.mrb[83].mxu1 }
 0x571   : > { %16932 = vst [vmem:[#allocation42_spill] sm:$0xff] %v15070_v2  ;;  %v6240_v5 = vsel %vm2088_vm9, %v6208_v22, %v5908_v25 }
 0x572   : > { %v5906_v21 = vpop.permute.xlu0 %5905 }
 0x573   : > { %v6239_v53 = vsel %vm2088_vm9, %v6207_v19, %v5906_v21 }
 0x574   : > { %v5984_v15 = vpop.permute.xlu1 %5983 }
 0x575   : > { %v6272_v9 = vsel %vm2121_vm10, %v6240_v5, %v5984_v15  ;;  %v8680_v15 = vld [vmem:[%s16038_s6 + $0x188] sm:$0xff] }
 0x576   : > { %v5982_v32 = vpop.permute.xlu0 %5981 }
 0x577   : > { %v6271_v29 = vsel %vm2121_vm10, %v6239_v53, %v5982_v32  ;;  %v8679_v32 = vld [vmem:[%s16038_s6 + $0x180] sm:$0xff] }
 0x578   : > { %9101 = vmatprep.mubr.msk.f32.mxu1 %vm2164_vm11, %v6271_v29  ;;  %v8681_v29 = vld [vmem:[%s16038_s6 + $0x190] sm:$0xff] }
 0x579   : > { %9102 = vmatmul.mubr.msk.f32.gmra.mrb[126].mxu1 %vm2164_vm11, %v6272_v9  ;;  %v9231_v9 = vpack.c.bf16 %v8682_v31, %v8680_v15  ;;  %v8684_v15 = vld [vmem:[%s16038_s6 + $0x1a8] sm:$0xff]  ;;  %v8686_v31 = vld [vmem:[%s16038_s6 + $0x1b8] sm:$0xff] }
 0x57a   : > { %9106 = vmatprep.mubr.msk.f32.mxu1 %vm9912_vm13, %v16610_v40 }
 0x57b   : > { %9232 = vmatprep.subr.bf16.mxu1 %v9231_v9 }
 0x57d   : > { %9107 = vmatmul.mubr.msk.f32.vlgmr.msra.gmra.mrb[128].mxu1 %vm1890_vm3, %v7143_v7  ;;  %v9233_v7 = vpack.c.bf16 %v8681_v29, %v8679_v32 }
 0x57e   : > { %7306 = vmatprep.mubr.f32.mxu1 %v16610_v40 }
 0x57f   : > { %9234 = vmatpush1.bf16.msra.mxu1 %v9233_v7  ;;  %v8688_v7 = vld [vmem:[%s16038_s6 + $0x1c8] sm:$0xff] }
 0x583   : > { %v15082_v49 = vpop.f32.mrb[84].mxu1 }
 0x584   : > { %v15084_v39 = vpop.f32.mrb[85].mxu1 }
 0x585   : > { %16933 = vst [vmem:[#allocation51_spill] sm:$0xff] %v15084_v39 }
 0x587   : > { %v15086_v58 = vpop.f32.mrb[86].mxu1 }
 0x588   : > { %v15088_v28 = vpop.f32.mrb[87].mxu1 }
 0x589   : > { %16934 = vst [vmem:[#allocation52_spill] sm:$0xff] %v15088_v28 }
 0x59b   : > { %v15090_v45 = vpop.f32.mrb[88].mxu1 }
 0x59c   : > { %v15092_v43 = vpop.f32.mrb[89].mxu1 }
 0x59d   : > { %16935 = vst [vmem:[#allocation44_spill] sm:$0xff] %v15092_v43 }
 0x59f   : > { %v15094_v26 = vpop.f32.mrb[90].mxu1 }
 0x5a0   : > { %v15096_v25 = vpop.f32.mrb[91].mxu1 }
 0x5a1   : > { %16936 = vst [vmem:[#allocation46_spill] sm:$0xff] %v15096_v25 }
 0x5b0   : > { %v15098_v57 = vpop.f32.mrb[92].mxu1 }
 0x5b1   : > { %v15100_v30 = vpop.f32.mrb[93].mxu1 }
 0x5b2   : > { %16937 = vst [vmem:[#allocation53_spill] sm:$0xff] %v15100_v30  ;;  %v9235_v30 = vpack.c.bf16 %v8686_v31, %v8684_v15  ;;  %v8690_v15 = vld [vmem:[%s16038_s6 + $0x1d8] sm:$0xff] }
 0x5b3   : > { %v9239_v25 = vpack.c.bf16 %v8690_v15, %v8688_v7  ;;  %v8694_v7 = vld [vmem:[%s16038_s6 + $0x1f8] sm:$0xff] }
 0x5b4   : > { %v15102_v46 = vpop.f32.mrb[94].mxu1  ;;  %9236 = vmatprep.subr.bf16.mxu1 %v9235_v30  ;;  %v8689_v30 = vld [vmem:[%s16038_s6 + $0x1d0] sm:$0xff] }
 0x5b5   : > { %v15104_v21 = vpop.f32.mrb[95].mxu1 }
 0x5b6   : > { %16938 = vst [vmem:[#allocation54_spill] sm:$0xff] %v15104_v21 }
 0x5b8   : > { %v9058_v47 = vpop.f32.mrb[96].mxu1 }
 0x5b9   : > { %v6449_v3 = vpop.f32.mrb[97].mxu1  ;;  %v6455_v22 = vadd.f32 %v9058_v47, %v15109_v1 }
 0x5ba   : > { %v6450_v41 = vadd.f32 %v15109_v1, %v6449_v3 }
 0x5bb   : > { %v6609_v47 = vmax.f32 %v6455_v22, 0.0  ;;  %v8685_v22 = vld [vmem:[%s16038_s6 + $0x1b0] sm:$0xff] }
 0x5bc   : > { %v6608_v19 = vmax.f32 %v6450_v41, 0.0  ;;  %v9061_v5 = vpop.f32.mrb[98].mxu1 }
 0x5bd   : > { %v6459_v53 = vpop.f32.mrb[99].mxu1  ;;  %v6465_v9 = vadd.f32 %v9061_v5, %v15109_v1 }
 0x5be   : > { %8645 = vmatmul.mubr.msk.f32.vlgmr.msra.gmra.mrb[32].mxu0 %vm4350_vm12, %v6608_v19  ;;  %v6460_v3 = vadd.f32 %v15109_v1, %v6459_v53  ;;  %v8683_v19 = vld [vmem:[%s16038_s6 + $0x1a0] sm:$0xff] }
 0x5bf   : > { %6823 = vmatprep.mubr.f32.mxu0 %v16610_v40  ;;  %v9237_v53 = vpack.c.bf16 %v8685_v22, %v8683_v19 }
 0x5c0   : > { %v9064_v41 = vpop.f32.mrb[100].mxu1  ;;  %v6610_v32 = vmax.f32 %v6460_v3, 0.0  ;;  %v6611_v3 = vmax.f32 %v6465_v9, 0.0 }
 0x5c1   : > { %v6469_v21 = vpop.f32.mrb[101].mxu1  ;;  %9238 = vmatpush1.bf16.msra.mxu1 %v9237_v53  ;;  %v8692_v53 = vld [vmem:[%s16038_s6 + $0x1e8] sm:$0xff]  ;;  %v6475_v9 = vadd.f32 %v9064_v41, %v15109_v1 }
 0x5c2   : > { %8646 = vmatmul.mubr.msk.f32.gmra.mrb[34].mxu0 %vm4350_vm12, %v6609_v47  ;;  %v8687_v47 = vld [vmem:[%s16038_s6 + $0x1c0] sm:$0xff]  ;;  %9240 = vmatprep.subr.bf16.mxu1 %v9239_v25  ;;  %v6470_v19 = vadd.f32 %v15109_v1, %v6469_v21  ;;  %v9243_v43 = vpack.c.bf16 %v8694_v7, %v8692_v53  ;;  %v8693_v25 = vld [vmem:[%s16038_s6 + $0x1f0] sm:$0xff] }
 0x5c3   : > { %6829 = vmatprep.mubr.f32.mxu0 %v16610_v40  ;;  %v9241_v5 = vpack.c.bf16 %v8689_v30, %v8687_v47  ;;  %v15177_v53 = vld [vmem:[%s16036_s4] sm:$0xf] }
 0x5c4   : > { %v9067_v29 = vpop.f32.mrb[102].mxu1  ;;  %v6612_v47 = vmax.f32 %v6470_v19, 0.0 }
 0x5c5   : > { %v6479_v31 = vpop.f32.mrb[103].mxu1  ;;  %9242 = vmatpush1.bf16.msra.mxu1 %v9241_v5  ;;  %v6485_v7 = vadd.f32 %v9067_v29, %v15109_v1 }
 0x5c6   : > { %8647 = vmatmul.mubr.msk.f32.gmra.mrb[36].mxu0 %vm4350_vm12, %v6610_v32  ;;  %v8691_v32 = vld [vmem:[%s16038_s6 + $0x1e0] sm:$0xff]  ;;  %9244 = vmatprep.subr.bf16.mxu1 %v9243_v43  ;;  %v6480_v43 = vadd.f32 %v15109_v1, %v6479_v31 }
 0x5c7   : > { %6835 = vmatprep.mubr.f32.mxu0 %v16610_v40  ;;  %v9245_v21 = vpack.c.bf16 %v8693_v25, %v8691_v32 }
 0x5c8   : > { %v9070_v22 = vpop.f32.mrb[104].mxu1  ;;  %v6614_v32 = vmax.f32 %v6480_v43, 0.0 }
 0x5c9   : > { %v6489_v15 = vpop.f32.mrb[105].mxu1  ;;  %9246 = vmatpush1.bf16.msra.mxu1 %v9245_v21 }
 0x5ca   : > { %8648 = vmatmul.mubr.msk.f32.gmra.mrb[38].mxu0 %vm4350_vm12, %v6611_v3  ;;  %9109 = vmatprep.subr.msk.mxu1 %vm853_vm2, %v15177_v53  ;;  %v6613_v3 = vmax.f32 %v6475_v9, 0.0  ;;  %v6490_v9 = vadd.f32 %v15109_v1, %v6489_v15 }
 0x5cb   : > { %6841 = vmatprep.mubr.f32.mxu0 %v16610_v40 }
 0x5cc   : > { %v6616_v39 = vmax.f32 %v6490_v9, 0.0 }
 0x5ce   : > { %8649 = vmatmul.mubr.msk.f32.gmra.mrb[40].mxu0 %vm4350_vm12, %v6612_v47  ;;  %v6615_v47 = vmax.f32 %v6485_v7, 0.0 }
 0x5cf   : > { %v9073_v30 = vpop.f32.mrb[106].mxu1  ;;  %6847 = vmatprep.mubr.f32.mxu0 %v16610_v40 }
 0x5d0   : > { %v6499_v5 = vpop.f32.mrb[107].mxu1 }
 0x5d1   : > { %v6500_v7 = vadd.f32 %v15109_v1, %v6499_v5 }
 0x5d2   : > { %8650 = vmatmul.mubr.msk.f32.gmra.mrb[42].mxu0 %vm4350_vm12, %v6613_v3  ;;  %v6495_v3 = vadd.f32 %v9070_v22, %v15109_v1 }
 0x5d3   : > { %v9076_v41 = vpop.f32.mrb[108].mxu1  ;;  %6853 = vmatprep.mubr.f32.mxu0 %v16610_v40  ;;  %v6618_v54 = vmax.f32 %v6500_v7, 0.0 }
 0x5d4   : > { %v6509_v19 = vpop.f32.mrb[109].mxu1  ;;  %v6515_v5 = vadd.f32 %v9076_v41, %v15109_v1 }
 0x5d6   : > { %8651 = vmatmul.mubr.msk.f32.gmra.mrb[44].mxu0 %vm4350_vm12, %v6614_v32  ;;  %v6617_v32 = vmax.f32 %v6495_v3, 0.0 }
 0x5d7   : > { %6859 = vmatprep.mubr.f32.mxu0 %v16610_v40 }
 0x5d9   : > { %v9079_v25 = vpop.f32.mrb[110].mxu1 }
 0x5da   : > { %v6519_v21 = vpop.f32.mrb[111].mxu1  ;;  %8652 = vmatmul.mubr.msk.f32.gmra.mrb[46].mxu0 %vm4350_vm12, %v6615_v47  ;;  %v6505_v47 = vadd.f32 %v9073_v30, %v15109_v1  ;;  %v6621_v30 = vmax.f32 %v6515_v5, 0.0 }
 0x5db   : > { %6865 = vmatprep.mubr.f32.mxu0 %v16610_v40  ;;  %v6520_v3 = vadd.f32 %v15109_v1, %v6519_v21 }
 0x5dc   : > { %v6619_v22 = vmax.f32 %v6505_v47, 0.0 }
 0x5dd   : > { %v9082_v28 = vpop.f32.mrb[112].mxu1 }
 0x5de   : > { %v6529_v31 = vpop.f32.mrb[113].mxu1  ;;  %8653 = vmatmul.mubr.msk.f32.gmra.mrb[48].mxu0 %vm4350_vm12, %v6616_v39  ;;  %v6510_v39 = vadd.f32 %v15109_v1, %v6509_v19  ;;  %v6525_v19 = vadd.f32 %v9079_v25, %v15109_v1  ;;  %v6535_v21 = vadd.f32 %v9082_v28, %v15109_v1  ;;  %v8731_v25 = vld [vmem:[%s16038_s6 + $0x208] sm:$0xff] }
 0x5df   : > { %6871 = vmatprep.mubr.f32.mxu0 %v16610_v40  ;;  %v6530_v47 = vadd.f32 %v15109_v1, %v6529_v31  ;;  %v8730_v31 = vld [vmem:[%s16038_s6 + $0x200] sm:$0xff] }
 0x5e0   : > { %v6620_v9 = vmax.f32 %v6510_v39, 0.0  ;;  %v6623_v41 = vmax.f32 %v6525_v19, 0.0  ;;  %v8733_v39 = vld [vmem:[%s16038_s6 + $0x218] sm:$0xff]  ;;  %v6625_v5 = vmax.f32 %v6535_v21, 0.0 }
 0x5e1   : > { %v9085_v29 = vpop.f32.mrb[114].mxu1 }
 0x5e2   : > { %v6539_v43 = vpop.f32.mrb[115].mxu1  ;;  %8654 = vmatmul.mubr.msk.f32.gmra.mrb[50].mxu0 %vm4350_vm12, %v6617_v32  ;;  %v6622_v32 = vmax.f32 %v6520_v3, 0.0  ;;  %v6545_v19 = vadd.f32 %v9085_v29, %v15109_v1  ;;  %v8735_v29 = vld [vmem:[%s16038_s6 + $0x228] sm:$0xff] }
 0x5e3   : > { %6877 = vmatprep.mubr.f32.mxu0 %v16610_v40  ;;  %v6540_v28 = vadd.f32 %v15109_v1, %v6539_v43 }
 0x5e4   : > { %v6627_v43 = vmax.f32 %v6545_v19, 0.0 }
 0x5e5   : > { %v9088_v2 = vpop.f32.mrb[116].mxu1 }
 0x5e6   : > { %v6549_v15 = vpop.f32.mrb[117].mxu1  ;;  %8655 = vmatmul.mubr.msk.f32.gmra.mrb[52].mxu0 %vm4350_vm12, %v6618_v54  ;;  %v6555_v21 = vadd.f32 %v9088_v2, %v15109_v1 }
 0x5e7   : > { %6883 = vmatprep.mubr.f32.mxu0 %v16610_v40 }
 0x5ea   : > { %8656 = vmatmul.mubr.msk.f32.gmra.mrb[54].mxu0 %vm4350_vm12, %v6619_v22  ;;  %v6624_v22 = vmax.f32 %v6530_v47, 0.0 }
 0x5eb   : > { %6889 = vmatprep.mubr.f32.mxu0 %v16610_v40 }
 0x5ee   : > { %8657 = vmatmul.mubr.msk.f32.gmra.mrb[56].mxu0 %vm4350_vm12, %v6620_v9  ;;  %v9247_v9 = vpack.c.bf16 %v8733_v39, %v8731_v25  ;;  %v8734_v39 = vld [vmem:[%s16038_s6 + $0x220] sm:$0xff] }
 0x5ef   : > { %6895 = vmatprep.mubr.f32.mxu0 %v16610_v40 }
 0x5f0   : > { %9248 = vmatprep.subr.bf16.mxu0 %v9247_v9  ;;  %v8739_v9 = vld [vmem:[%s16038_s6 + $0x248] sm:$0xff] }
 0x5f2   : > { %8658 = vmatmul.mubr.msk.f32.gmra.mrb[58].mxu0 %vm4350_vm12, %v6621_v30  ;;  %v8732_v30 = vld [vmem:[%s16038_s6 + $0x210] sm:$0xff] }
 0x5f3   : > { %6901 = vmatprep.mubr.f32.mxu0 %v16610_v40  ;;  %v9249_v3 = vpack.c.bf16 %v8732_v30, %v8730_v31  ;;  %v6629_v31 = vmax.f32 %v6555_v21, 0.0  ;;  %v8741_v30 = vld [vmem:[%s16038_s6 + $0x258] sm:$0xff] }
 0x5f4   : > { %v9255_v19 = vpack.c.bf16 %v8741_v30, %v8739_v9 }
 0x5f5   : > { %9250 = vmatpush1.bf16.msra.mxu0 %v9249_v3 }
 0x5f6   : > { %8659 = vmatmul.mubr.msk.f32.gmra.mrb[60].mxu0 %vm4350_vm12, %v6622_v32  ;;  %v6626_v32 = vmax.f32 %v6540_v28, 0.0  ;;  %v8736_v28 = vld [vmem:[%s16038_s6 + $0x230] sm:$0xff] }
 0x5f7   : > { %v9091_v54 = vpop.f32.mrb[118].mxu1  ;;  %6907 = vmatprep.mubr.f32.mxu0 %v16610_v40  ;;  %v9253_v3 = vpack.c.bf16 %v8736_v28, %v8734_v39  ;;  %v8742_v39 = vld [vmem:[%s16038_s6 + $0x260] sm:$0xff] }
 0x5f8   : > { %v6559_v7 = vpop.f32.mrb[119].mxu1 }
 0x5f9   : > { %v6560_v2 = vadd.f32 %v15109_v1, %v6559_v7  ;;  %v8740_v7 = vld [vmem:[%s16038_s6 + $0x250] sm:$0xff] }
 0x5fa   : > { %8660 = vmatmul.mubr.msk.f32.gmra.mrb[62].mxu0 %vm4350_vm12, %v6623_v41  ;;  %v6550_v41 = vadd.f32 %v15109_v1, %v6549_v15  ;;  %v8737_v15 = vld [vmem:[%s16038_s6 + $0x238] sm:$0xff] }
 0x5fb   : > { %6913 = vmatprep.mubr.f32.mxu0 %v16610_v40 }
 0x5fe   : > { %8661 = vmatmul.mubr.msk.f32.gmra.mrb[64].mxu0 %vm4350_vm12, %v6624_v22  ;;  %v6628_v22 = vmax.f32 %v6550_v41, 0.0  ;;  %v8745_v41 = vld [vmem:[%s16038_s6 + $0x278] sm:$0xff] }
 0x5ff   : > { %6919 = vmatprep.mubr.f32.mxu0 %v16610_v40 }
 0x602   : > { %8662 = vmatmul.mubr.msk.f32.gmra.mrb[66].mxu0 %vm4350_vm12, %v6625_v5  ;;  %v9251_v5 = vpack.c.bf16 %v8737_v15, %v8735_v29  ;;  %v6630_v29 = vmax.f32 %v6560_v2, 0.0 }
 0x603   : > { %6925 = vmatprep.mubr.f32.mxu0 %v16610_v40 }
 0x604   : > { %9252 = vmatprep.subr.bf16.mxu0 %v9251_v5 }
 0x605   : > { %9254 = vmatpush1.bf16.msra.mxu0 %v9253_v3 }
 0x606   : > { %8663 = vmatmul.mubr.msk.f32.gmra.mrb[68].mxu0 %vm4350_vm12, %v6626_v32  ;;  %v8738_v32 = vld [vmem:[%s16038_s6 + $0x240] sm:$0xff]  ;;  %9256 = vmatprep.subr.bf16.mxu0 %v9255_v19 }
 0x607   : > { %6931 = vmatprep.mubr.f32.mxu0 %v16610_v40  ;;  %v9257_v21 = vpack.c.bf16 %v8740_v7, %v8738_v32 }
 0x609   : > { %9258 = vmatpush1.bf16.msra.mxu0 %v9257_v21 }
 0x60a   : > { %8664 = vmatmul.mubr.msk.f32.gmra.mrb[70].mxu0 %vm4350_vm12, %v6627_v43  ;;  %v8743_v43 = vld [vmem:[%s16038_s6 + $0x268] sm:$0xff] }
 0x60b   : > { %6937 = vmatprep.mubr.f32.mxu0 %v16610_v40  ;;  %v9259_v15 = vpack.c.bf16 %v8745_v41, %v8743_v43 }
 0x60d   : > { %9260 = vmatprep.subr.bf16.mxu0 %v9259_v15 }
 0x60e   : > { %8665 = vmatmul.mubr.msk.f32.gmra.mrb[72].mxu0 %vm4350_vm12, %v6628_v22  ;;  %v6565_v22 = vadd.f32 %v9091_v54, %v15109_v1 }
 0x60f   : > { %v9094_v47 = vpop.f32.mrb[120].mxu1  ;;  %6943 = vmatprep.mubr.f32.mxu0 %v16610_v40 }
 0x610   : > { %v6569_v25 = vpop.f32.mrb[121].mxu1  ;;  %v6631_v28 = vmax.f32 %v6565_v22, 0.0  ;;  %v6575_v2 = vadd.f32 %v9094_v47, %v15109_v1 }
 0x611   : > { %v6570_v54 = vadd.f32 %v15109_v1, %v6569_v25 }
 0x612   : > { %8666 = vmatmul.mubr.msk.f32.gmra.mrb[74].mxu0 %vm4350_vm12, %v6629_v31  ;;  %v8744_v31 = vld [vmem:[%s16038_s6 + $0x270] sm:$0xff]  ;;  %v6633_v30 = vmax.f32 %v6575_v2, 0.0 }
 0x613   : > { %6949 = vmatprep.mubr.f32.mxu0 %v16610_v40  ;;  %v9261_v5 = vpack.c.bf16 %v8744_v31, %v8742_v39  ;;  %v6632_v9 = vmax.f32 %v6570_v54, 0.0 }
 0x615   : > { %9262 = vmatpush1.bf16.msra.mxu0 %v9261_v5 }
 0x616   : > { %8667 = vmatmul.mubr.msk.f32.gmra.mrb[76].mxu0 %vm4350_vm12, %v6630_v29 }
 0x617   : > { %6955 = vmatprep.mubr.f32.mxu0 %v16610_v40 }
 0x61a   : > { %8668 = vmatmul.mubr.msk.f32.gmra.mrb[78].mxu0 %vm4350_vm12, %v6631_v28 }
 0x61b   : > { %6961 = vmatprep.mubr.f32.mxu0 %v16610_v40 }
 0x61e   : > { %8669 = vmatmul.mubr.msk.f32.gmra.mrb[80].mxu0 %vm4350_vm12, %v6632_v9 }
 0x61f   : > { %6967 = vmatprep.mubr.f32.mxu0 %v16610_v40 }
 0x622   : > { %8670 = vmatmul.mubr.msk.f32.gmra.mrb[82].mxu0 %vm4350_vm12, %v6633_v30 }
 0x623   : > { %6973 = vmatprep.mubr.f32.mxu0 %v16610_v40 }
 0x627   : > { %v9097_v3 = vpop.f32.mrb[122].mxu1 }
 0x628   : > { %v6579_v25 = vpop.f32.mrb[123].mxu1  ;;  %v6585_v32 = vadd.f32 %v9097_v3, %v15109_v1 }
 0x629   : > { %v6580_v19 = vadd.f32 %v15109_v1, %v6579_v25  ;;  %v16939_v25 = vld [vmem:[#allocation7_spill] sm:$0xff] }
 0x62a   : > { %v6635_v47 = vmax.f32 %v6585_v32, 0.0  ;;  %v16942_v32 = vld [vmem:[#allocation15_spill] sm:$0xff] }
 0x62b   : > { %v6634_v7 = vmax.f32 %v6580_v19, 0.0  ;;  %v16941_v19 = vld [vmem:[#allocation13_spill] sm:$0xff] }
 0x62d   : > { %8671 = vmatmul.mubr.msk.f32.gmra.mrb[84].mxu0 %vm4350_vm12, %v6634_v7  ;;  %v16943_v7 = vld [vmem:[#allocation19_spill] sm:$0xff] }
 0x62e   : > { %6979 = vmatprep.mubr.f32.mxu0 %v16610_v40 }
 0x631   : > { %8672 = vmatmul.mubr.msk.f32.gmra.mrb[86].mxu0 %vm4350_vm12, %v6635_v47  ;;  %v16945_v47 = vld [vmem:[#allocation31_spill] sm:$0xff] }
 0x632   : > { %6985 = vmatprep.mubr.f32.mxu0 %v16610_v40 }
 0x63f   : > { %v9100_v43 = vpop.f32.mrb[124].mxu1 }
 0x640   : > { %v6589_v41 = vpop.f32.mrb[125].mxu1  ;;  %v6595_v22 = vadd.f32 %v9100_v43, %v15109_v1  ;;  %v16946_v43 = vld [vmem:[#allocation33_spill] sm:$0xff] }
 0x641   : > { %v6590_v21 = vadd.f32 %v15109_v1, %v6589_v41  ;;  %v16947_v41 = vld [vmem:[#allocation47_spill] sm:$0xff] }
 0x642   : > { %v6637_v15 = vmax.f32 %v6595_v22, 0.0  ;;  %v16956_v22 = vld [vmem:[#allocation106_spill] sm:$0xff] }
 0x643   : > { %v6636_v29 = vmax.f32 %v6590_v21, 0.0 }
 0x645   : > { %8673 = vmatmul.mubr.msk.f32.gmra.mrb[88].mxu0 %vm4350_vm12, %v6636_v29 }
 0x646   : > { %6991 = vmatprep.mubr.f32.mxu0 %v16610_v40 }
 0x649   : > { %8674 = vmatmul.mubr.msk.f32.gmra.mrb[90].mxu0 %vm4350_vm12, %v6637_v15  ;;  %v16957_v15 = vld [vmem:[#allocation117_spill] sm:$0xff] }
 0x64a   : > { %6997 = vmatprep.mubr.f32.mxu0 %v16610_v40 }
 0x64c   : > { %v9103_v39 = vpop.f32.mrb[126].mxu1 }
 0x64d   : > { %v6599_v31 = vpop.f32.mrb[127].mxu1  ;;  %v6605_v28 = vadd.f32 %v9103_v39, %v15109_v1 }
 0x64e   : > { %v6600_v5 = vadd.f32 %v15109_v1, %v6599_v31  ;;  %v16940_v1 = vld [vmem:[#allocation9_spill] sm:$0xff] }
 0x64f   : > { %v6639_v3 = vmax.f32 %v6605_v28, 0.0  ;;  %v16958_v31 = vld [vmem:[#allocation129_spill] sm:$0xff]  ;;  %v16959_v28 = vld [vmem:[#allocation138_spill] sm:$0xff] }
 0x650   : > { %v6638_v54 = vmax.f32 %v6600_v5, 0.0  ;;  %v7217_v2 = vpop.f32.mrb[128].mxu1 }
 0x651   : > { %v7221_v9 = vmax.f32 %v7217_v2, 0.0  ;;  %v9108_v30 = vpop.f32.mrb[129].mxu1 }
 0x652   : > { %8675 = vmatmul.mubr.msk.f32.gmra.mrb[92].mxu0 %vm4350_vm12, %v6638_v54 }
 0x653   : > { %8695 = vmatmul.mubr.msk.f32.vlgmr.msra.gmra.mrb[130].mxu1 %vm4350_vm12, %v7221_v9  ;;  %7003 = vmatprep.mubr.f32.mxu0 %v16610_v40  ;;  %v16960_v9 = vld [vmem:[#allocation149_spill] sm:$0xff] }
 0x654   : > { %9110 = vmatpush3.msk.msra.mxu1 %vm853_vm2, %v15177_v53  ;;  %9111 = vmatprep.mubr.msk.f32.mxu1 %vm1890_vm3, %v16939_v25  ;;  %v16944_v53 = vld [vmem:[#allocation21_spill] sm:$0xff] }
 0x656   : > { %8676 = vmatmul.mubr.msk.f32.gmra.mrb[94].mxu0 %vm4350_vm12, %v6639_v3  ;;  %v16961_v3 = vld [vmem:[#allocation74_spill] sm:$0xff] }
 0x657   : > { %9112 = vmatmul.mubr.msk.f32.vlgmr.msra.gmra.mrb[132].mxu1 %vm1890_vm3, %v16940_v1  ;;  %7894 = vmatprep.mubr.f32.mxu0 %v16610_v40  ;;  %v16962_v1 = vld [vmem:[#allocation80_spill] sm:$0xff] }
 0x658   : > { %9114 = vmatprep.mubr.msk.f32.mxu1 %vm1890_vm3, %v16941_v19 }
 0x65b   : > { %9115 = vmatmul.mubr.msk.f32.gmra.mrb[134].mxu1 %vm1890_vm3, %v16942_v32  ;;  %v16963_v32 = vld [vmem:[#allocation26_spill] sm:$0xff] }
 0x65c   : > { %9117 = vmatprep.mubr.msk.f32.mxu1 %vm1890_vm3, %v16943_v7 }
 0x65f   : > { %9118 = vmatmul.mubr.msk.f32.gmra.mrb[136].mxu1 %vm1890_vm3, %v16944_v53  ;;  %v16964_v53 = vld [vmem:[#allocation8_spill] sm:$0xff] }
 0x660   : > { %9120 = vmatprep.mubr.msk.f32.mxu1 %vm1890_vm3, %v16945_v47 }
 0x663   : > { %9121 = vmatmul.mubr.msk.f32.gmra.mrb[138].mxu1 %vm1890_vm3, %v16946_v43  ;;  %v16966_v43 = vld [vmem:[#allocation90_spill] sm:$0xff] }
 0x664   : > { %9123 = vmatprep.mubr.msk.f32.mxu1 %vm1890_vm3, %v16947_v41 }
 0x667   : > { %9124 = vmatmul.mubr.msk.f32.gmra.mrb[140].mxu1 %vm1890_vm3, %v16870_v61  ;;  %v7313_v61 = vlaneseq }
 0x668   : > { %9126 = vmatprep.mubr.msk.f32.mxu1 %vm1890_vm3, %v16882_v33 }
 0x669   : > { %v15377_v33 = vshrl.u32 %v7313_v61, 7  ;;  %v16968_v61 = vld [vmem:[#allocation119_spill] sm:$0xff] }
 0x66b   : > { %9127 = vmatmul.mubr.msk.f32.gmra.mrb[142].mxu1 %vm1890_vm3, %v16888_v50  ;;  %v15380_v50 = vsub.s32 0, %v15377_v33 }
 0x66c   : > { %9129 = vmatprep.mubr.msk.f32.mxu1 %vm1890_vm3, %v16891_v10 }
 0x66f   : > { %9130 = vmatmul.mubr.msk.f32.gmra.mrb[144].mxu1 %vm1890_vm3, %v16892_v38 }
 0x670   : > { %9132 = vmatprep.mubr.msk.f32.mxu1 %vm1890_vm3, %v16893_v63 }
 0x673   : > { %9133 = vmatmul.mubr.msk.f32.gmra.mrb[146].mxu1 %vm1890_vm3, %v16895_v8 }
 0x674   : > { %9135 = vmatprep.mubr.msk.f32.mxu1 %vm1890_vm3, %v16898_v13  ;;  %v16948_v13 = vld [vmem:[#allocation20_spill] sm:$0xff] }
 0x677   : > { %9136 = vmatmul.mubr.msk.f32.gmra.mrb[148].mxu1 %vm1890_vm3, %v16900_v6 }
 0x678   : > { %9138 = vmatprep.mubr.msk.f32.mxu1 %vm1890_vm3, %v16901_v14  ;;  %v16949_v14 = vld [vmem:[#allocation170_spill] sm:$0xff] }
 0x67b   : > { %9139 = vmatmul.mubr.msk.f32.gmra.mrb[150].mxu1 %vm1890_vm3, %v16902_v56 }
 0x67c   : > { %9141 = vmatprep.mubr.msk.f32.mxu1 %vm1890_vm3, %v16903_v34  ;;  %v16950_v34 = vld [vmem:[#allocation143_spill] sm:$0xff] }
 0x67f   : > { %9142 = vmatmul.mubr.msk.f32.gmra.mrb[152].mxu1 %vm1890_vm3, %v16905_v35 }
 0x680   : > { %9144 = vmatprep.mubr.msk.f32.mxu1 %vm1890_vm3, %v16908_v36  ;;  %v16951_v36 = vld [vmem:[#allocation24_spill] sm:$0xff] }
 0x683   : > { %9145 = vmatmul.mubr.msk.f32.gmra.mrb[154].mxu1 %vm1890_vm3, %v16910_v23 }
 0x684   : > { %9147 = vmatprep.mubr.msk.f32.mxu1 %vm1890_vm3, %v16911_v55  ;;  %v16952_v55 = vld [vmem:[#allocation113_spill] sm:$0xff] }
 0x687   : > { %9148 = vmatmul.mubr.msk.f32.gmra.mrb[156].mxu1 %vm1890_vm3, %v16912_v59 }
 0x688   : > { %9150 = vmatprep.mubr.msk.f32.mxu1 %vm1890_vm3, %v16913_v12  ;;  %v16953_v12 = vld [vmem:[#allocation123_spill] sm:$0xff] }
 0x68b   : > { %9151 = vmatmul.mubr.msk.f32.gmra.mrb[158].mxu1 %vm1890_vm3, %v16915_v37 }
 0x68c   : > { %9153 = vmatprep.mubr.msk.f32.mxu1 %vm1890_vm3, %v16918_v16  ;;  %v16954_v16 = vld [vmem:[#allocation32_spill] sm:$0xff] }
 0x68f   : > { %9154 = vmatmul.mubr.msk.f32.gmra.mrb[160].mxu1 %vm1890_vm3, %v16920_v62 }
 0x690   : > { %9156 = vmatprep.mubr.msk.f32.mxu1 %vm1890_vm3, %v16921_v60  ;;  %v16955_v60 = vld [vmem:[#allocation34_spill] sm:$0xff] }
 0x693   : > { %9157 = vmatmul.mubr.msk.f32.gmra.mrb[162].mxu1 %vm1890_vm3, %v16922_v11 }
 0x726   : > { %v7308_v10 = vpop.f32.mrb[130].mxu1 }
 0x727   : > { %v7316_v38 = vrot.slane %v7308_v10, %v15380_v50  ;;  %v7310_v63 = vpop.f32.mrb[131].mxu1 }
 0x728   : > { %v15384_v8 = vrot.slane %v7310_v63, %v15380_v50 }
 0x729   : > { %v15387_v6 = vadd.f32 %v7316_v38, %v16948_v13  ;;  %v15390_v56 = vadd.f32 %v7316_v38, %v16949_v14  ;;  %v15393_v35 = vadd.f32 %v7316_v38, %v16950_v34  ;;  %v15396_v23 = vadd.f32 %v7316_v38, %v16951_v36 }
 0x72a   : > { %v15399_v59 = vadd.f32 %v7316_v38, %v16952_v55  ;;  %v15402_v37 = vadd.f32 %v7316_v38, %v16953_v12  ;;  %v15405_v62 = vadd.f32 %v7316_v38, %v16954_v16  ;;  %v15408_v11 = vadd.f32 %v7316_v38, %v16955_v60  ;;  %v15410_v21 = vpop.f32.mrb[132].mxu1 }
 0x72b   : > { %v15413_v29 = vadd.f32 %v7316_v38, %v16956_v22  ;;  %v15416_v39 = vadd.f32 %v7316_v38, %v16957_v15  ;;  %v15419_v5 = vadd.f32 %v7316_v38, %v16958_v31  ;;  %v15422_v54 = vadd.f32 %v7316_v38, %v16959_v28  ;;  %v7526_v2 = vpop.f32.mrb[133].mxu1  ;;  %v16984_v22 = vld [vmem:[#allocation171_spill] sm:$0xff]  ;;  %v16985_v15 = vld [vmem:[#allocation22_spill] sm:$0xff] }
 0x72c   : > { %v15425_v30 = vadd.f32 %v7316_v38, %v16960_v9  ;;  %v15428_v25 = vadd.f32 %v7316_v38, %v16961_v3  ;;  %v15431_v19 = vadd.f32 %v7316_v38, %v16962_v1  ;;  %v15434_v7 = vadd.f32 %v7316_v38, %v16963_v32  ;;  %v16989_v9 = vld [vmem:[#allocation56_spill] sm:$0xff]  ;;  %v16990_v1 = vld [vmem:[#allocation58_spill] sm:$0xff] }
 0x72d   : > { %v15437_v47 = vadd.f32 %v7316_v38, %v16964_v53  ;;  %v15440_v41 = vadd.f32 %v7316_v38, %v16966_v43  ;;  %v15443_v10 = vadd.f32 %v7316_v38, %v16968_v61  ;;  %v15446_v63 = vadd.f32 %v7316_v38, %v14897_v27  ;;  %v16991_v43 = vld [vmem:[#allocation105_spill] sm:$0xff] }
 0x72e   : > { %v15449_v13 = vadd.f32 %v7316_v38, %v14960_v51  ;;  %v15452_v14 = vadd.f32 %v7316_v38, %v14968_v4  ;;  %v15455_v34 = vadd.f32 %v7316_v38, %v15011_v44  ;;  %v15458_v36 = vadd.f32 %v7316_v38, %v15017_v20  ;;  %v9116_v55 = vpop.f32.mrb[134].mxu1 }
 0x72f   : > { %16965 = vst [vmem:[#allocation61_spill] sm:$0xff] %v15437_v47  ;;  %16967 = vst [vmem:[#allocation62_spill] sm:$0xff] %v15440_v41  ;;  %v15461_v12 = vadd.f32 %v7316_v38, %v15056_v48  ;;  %v15464_v16 = vadd.f32 %v7316_v38, %v15066_v24  ;;  %v15467_v27 = vadd.f32 %v7316_v38, %v15082_v49  ;;  %v7536_v4 = vpop.f32.mrb[135].mxu1  ;;  %v16983_v24 = vld [vmem:[#allocation167_spill] sm:$0xff] }
 0x730   : > { %16969 = vst [vmem:[#allocation108_spill] sm:$0xff] %v15443_v10  ;;  %16970 = vst [vmem:[#allocation135_spill] sm:$0xff] %v15446_v63  ;;  %v15470_v51 = vadd.f32 %v7316_v38, %v15086_v58  ;;  %v15473_v44 = vadd.f32 %v7316_v38, %v15090_v45  ;;  %v15476_v20 = vadd.f32 %v7316_v38, %v15094_v26  ;;  %v16986_v26 = vld [vmem:[#allocation154_spill] sm:$0xff] }
 0x731   : > { %16971 = vst [vmem:[#allocation111_spill] sm:$0xff] %v15449_v13  ;;  %16972 = vst [vmem:[#allocation50_spill] sm:$0xff] %v15452_v14  ;;  %v15479_v60 = vadd.f32 %v7316_v38, %v15098_v57  ;;  %v15482_v48 = vadd.f32 %v7316_v38, %v15102_v46  ;;  %v15486_v49 = vadd.f32 %v15384_v8, %v16983_v24  ;;  %v16987_v57 = vld [vmem:[#allocation48_spill] sm:$0xff]  ;;  %v16988_v38 = vld [vmem:[#allocation125_spill] sm:$0xff] }
 0x732   : > { %16973 = vst [vmem:[#allocation115_spill] sm:$0xff] %v15455_v34  ;;  %16974 = vst [vmem:[#allocation116_spill] sm:$0xff] %v15458_v36  ;;  %v15490_v58 = vadd.f32 %v15384_v8, %v16984_v22  ;;  %v15494_v45 = vadd.f32 %v15384_v8, %v16985_v15  ;;  %v15498_v31 = vadd.f32 %v15384_v8, %v16986_v26  ;;  %v9119_v53 = vpop.f32.mrb[136].mxu1  ;;  %v16992_v24 = vld [vmem:[#allocation137_spill] sm:$0xff]  ;;  %v16993_v15 = vld [vmem:[#allocation66_spill] sm:$0xff] }
 0x733   : > { %16975 = vst [vmem:[#allocation69_spill] sm:$0xff] %v15461_v12  ;;  %16976 = vst [vmem:[#allocation70_spill] sm:$0xff] %v15464_v16  ;;  %v15502_v46 = vadd.f32 %v15384_v8, %v16987_v57  ;;  %v15506_v28 = vadd.f32 %v15384_v8, %v16988_v38  ;;  %v15510_v3 = vadd.f32 %v15384_v8, %v16989_v9  ;;  %v16994_v57 = vld [vmem:[#allocation148_spill] sm:$0xff]  ;;  %v7546_v9 = vpop.f32.mrb[137].mxu1  ;;  %v17003_v16 = vld [vmem:[#allocation43_spill] sm:$0xff] }
 0x734   : > { %16977 = vst [vmem:[#allocation118_spill] sm:$0xff] %v15467_v27  ;;  %16978 = vst [vmem:[#allocation139_spill] sm:$0xff] %v15470_v51  ;;  %v15514_v32 = vadd.f32 %v15384_v8, %v16990_v1  ;;  %v15518_v61 = vadd.f32 %v15384_v8, %v16991_v43  ;;  %v15522_v22 = vadd.f32 %v15384_v8, %v16992_v24  ;;  %v16995_v1 = vld [vmem:[#allocation72_spill] sm:$0xff]  ;;  %v16999_v51 = vld [vmem:[#allocation175_spill] sm:$0xff] }
 0x735   : > { %16979 = vst [vmem:[#allocation150_spill] sm:$0xff] %v15473_v44  ;;  %16980 = vst [vmem:[#allocation151_spill] sm:$0xff] %v15476_v20  ;;  %v15526_v26 = vadd.f32 %v15384_v8, %v16993_v15  ;;  %v15530_v38 = vadd.f32 %v15384_v8, %v16994_v57  ;;  %v16997_v20 = vld [vmem:[#allocation166_spill] sm:$0xff]  ;;  %v15550_v57 = vadd.f32 %v15384_v8, %v16999_v51  ;;  %v17001_v27 = vld [vmem:[#allocation35_spill] sm:$0xff] }
 0x736   : > { %16981 = vst [vmem:[#allocation158_spill] sm:$0xff] %v15479_v60  ;;  %16982 = vst [vmem:[#allocation161_spill] sm:$0xff] %v15482_v48  ;;  %v15534_v48 = vadd.f32 %v15384_v8, %v16995_v1  ;;  %v16996_v60 = vld [vmem:[#allocation157_spill] sm:$0xff]  ;;  %v15542_v24 = vadd.f32 %v15384_v8, %v16997_v20  ;;  %v16998_v44 = vld [vmem:[#allocation30_spill] sm:$0xff]  ;;  %v15554_v1 = vadd.f32 %v15384_v8, %v17001_v27  ;;  %v9122_v12 = vpop.f32.mrb[138].mxu1 }
 0x737   : > { %v15538_v43 = vadd.f32 %v15384_v8, %v16996_v60  ;;  %v15546_v15 = vadd.f32 %v15384_v8, %v16998_v44  ;;  %17000 = vst [vmem:[#allocation168_spill] sm:$0xff] %v15550_v57  ;;  %v15558_v60 = vadd.f32 %v15384_v8, %v17003_v16  ;;  %v15562_v20 = vadd.f32 %v15384_v8, %v14901_v17  ;;  %v15583_v17 = vld [vmem:[%s16037_s5] ss:$0 sm:$0xff]  ;;  %v17018_v14 = vld [vmem:[#allocation44_spill] sm:$0xff]  ;;  %v17020_v13 = vld [vmem:[#allocation46_spill] sm:$0xff] }
 0x738   : > { %17002 = vst [vmem:[#allocation163_spill] sm:$0xff] %v15554_v1  ;;  %v15566_v44 = vadd.f32 %v15384_v8, %v14962_v42  ;;  %v15570_v51 = vadd.f32 %v15384_v8, %v14970_v18  ;;  %v15574_v27 = vadd.f32 %v15384_v8, %v15013_v0  ;;  %v15578_v16 = vadd.f32 %v15384_v8, %v15019_v52  ;;  %v17010_v42 = vld [vmem:[#allocation39_spill] sm:$0xff]  ;;  %v17012_v18 = vld [vmem:[#allocation42_spill] sm:$0xff]  ;;  %v17016_v52 = vld [vmem:[#allocation52_spill] sm:$0xff] }
 0x739   : > { %17004 = vst [vmem:[#allocation82_spill] sm:$0xff] %v15558_v60  ;;  %17005 = vst [vmem:[#allocation10_spill] sm:$0xff] %v15562_v20  ;;  %v15587_v36 = vadd.f32 %v15384_v8, %v17010_v42  ;;  %v15591_v34 = vadd.f32 %v15384_v8, %v17012_v18  ;;  %v17014_v0 = vld [vmem:[#allocation51_spill] sm:$0xff]  ;;  %v15607_v42 = vadd.f32 %v15384_v8, %v17020_v13 }
 0x73a   : > { %17006 = vst [vmem:[#allocation60_spill] sm:$0xff] %v15566_v44  ;;  %17007 = vst [vmem:[#allocation64_spill] sm:$0xff] %v15570_v51  ;;  %v7556_v51 = vpop.f32.mrb[139].mxu1  ;;  %v15603_v44 = vadd.f32 %v15384_v8, %v17018_v14  ;;  %v7537_v13 = vadd.f32 %v15583_v17, %v7536_v4  ;;  %v7547_v4 = vadd.f32 %v15583_v17, %v7546_v9 }
 0x73b   : > { %17008 = vst [vmem:[#allocation128_spill] sm:$0xff] %v15574_v27  ;;  %17009 = vst [vmem:[#allocation172_spill] sm:$0xff] %v15578_v16  ;;  %v15595_v27 = vadd.f32 %v15384_v8, %v17014_v0  ;;  %v15599_v16 = vadd.f32 %v15384_v8, %v17016_v52  ;;  %v7527_v52 = vadd.f32 %v15583_v17, %v7526_v2 }
 0x73c   : > { %17011 = vst [vmem:[#allocation127_spill] sm:$0xff] %v15587_v36  ;;  %17013 = vst [vmem:[#allocation77_spill] sm:$0xff] %v15591_v34  ;;  %v17022_v36 = vld [vmem:[#allocation53_spill] sm:$0xff]  ;;  %v17024_v34 = vld [vmem:[#allocation54_spill] sm:$0xff] }
 0x73d   : > { %17015 = vst [vmem:[#allocation38_spill] sm:$0xff] %v15595_v27  ;;  %17017 = vst [vmem:[#allocation130_spill] sm:$0xff] %v15599_v16  ;;  %v15611_v18 = vadd.f32 %v15384_v8, %v17022_v36  ;;  %v15615_v0 = vadd.f32 %v15384_v8, %v17024_v34  ;;  %v9125_v16 = vpop.f32.mrb[140].mxu1  ;;  %v7532_v27 = vadd.f32 %v15410_v21, %v15583_v17  ;;  %v7685_v14 = vmax.f32 %v7527_v52, 0.0 }
 0x73e   : > { %17019 = vst [vmem:[#allocation78_spill] sm:$0xff] %v15603_v44  ;;  %17021 = vst [vmem:[#allocation98_spill] sm:$0xff] %v15607_v42  ;;  %v7566_v44 = vpop.f32.mrb[141].mxu1  ;;  %v7687_v8 = vmax.f32 %v7537_v13, 0.0  ;;  %v7542_v21 = vadd.f32 %v9116_v55, %v15583_v17  ;;  %v7552_v55 = vadd.f32 %v9119_v53, %v15583_v17 }
 0x73f   : > { %17023 = vst [vmem:[#allocation29_spill] sm:$0xff] %v15611_v18  ;;  %17025 = vst [vmem:[#allocation36_spill] sm:$0xff] %v15615_v0  ;;  %8746 = vmatmul.mubr.msk.f32.vlgmr.msra.gmra.mrb[32].mxu0 %vm4350_vm12, %v7685_v14  ;;  %v15623_v36 = vpop.f32.mrb[142].mxu1  ;;  %v7686_v18 = vmax.f32 %v7532_v27, 0.0 }
 0x740   : > { %7900 = vmatprep.mubr.f32.mxu0 %v16610_v40  ;;  %v7576_v42 = vpop.f32.mrb[143].mxu1  ;;  %v7688_v27 = vmax.f32 %v7542_v21, 0.0  ;;  %v7557_v21 = vadd.f32 %v15583_v17, %v7556_v51 }
 0x742   : > { %v15627_v2 = vpop.f32.mrb[144].mxu1 }
 0x743   : > { %8747 = vmatmul.mubr.msk.f32.gmra.mrb[34].mxu0 %vm4350_vm12, %v7686_v18  ;;  %v15630_v34 = vpop.f32.mrb[145].mxu1  ;;  %v7689_v18 = vmax.f32 %v7547_v4, 0.0 }
 0x744   : > { %7906 = vmatprep.mubr.f32.mxu0 %v16610_v40 }
 0x746   : > { %v15635_v52 = vpop.f32.mrb[146].mxu1 }
 0x747   : > { %8748 = vmatmul.mubr.msk.f32.gmra.mrb[36].mxu0 %vm4350_vm12, %v7687_v8  ;;  %v15637_v14 = vpop.f32.mrb[147].mxu1 }
 0x748   : > { %7912 = vmatprep.mubr.f32.mxu0 %v16610_v40 }
 0x74a   : > { %v9137_v13 = vpop.f32.mrb[148].mxu1 }
 0x74b   : > { %8749 = vmatmul.mubr.msk.f32.gmra.mrb[38].mxu0 %vm4350_vm12, %v7688_v27  ;;  %v15643_v0 = vadd.f32 %v9137_v13, %v15583_v17  ;;  %v7606_v8 = vpop.f32.mrb[149].mxu1  ;;  %v7690_v27 = vmax.f32 %v7552_v55, 0.0  ;;  %v7691_v13 = vmax.f32 %v7557_v21, 0.0 }
 0x74c   : > { %7918 = vmatprep.mubr.f32.mxu0 %v16610_v40  ;;  %v15646_v9 = vadd.f32 %v15583_v17, %v7606_v8 }
 0x74e   : > { %v9140_v4 = vpop.f32.mrb[150].mxu1 }
 0x74f   : > { %8750 = vmatmul.mubr.msk.f32.gmra.mrb[40].mxu0 %vm4350_vm12, %v7689_v18  ;;  %v15652_v20 = vadd.f32 %v9140_v4, %v15583_v17  ;;  %v7616_v63 = vpop.f32.mrb[151].mxu1  ;;  %v7562_v18 = vadd.f32 %v9122_v12, %v15583_v17 }
 0x750   : > { %7924 = vmatprep.mubr.f32.mxu0 %v16610_v40  ;;  %v15655_v53 = vadd.f32 %v15583_v17, %v7616_v63  ;;  %v7567_v63 = vadd.f32 %v15583_v17, %v7566_v44 }
 0x751   : > { %v7692_v4 = vmax.f32 %v7562_v18, 0.0 }
 0x752   : > { %v9143_v8 = vpop.f32.mrb[152].mxu1 }
 0x753   : > { %8751 = vmatmul.mubr.msk.f32.gmra.mrb[42].mxu0 %vm4350_vm12, %v7690_v27  ;;  %v15661_v51 = vadd.f32 %v9143_v8, %v15583_v17  ;;  %v7626_v60 = vpop.f32.mrb[153].mxu1  ;;  %v7693_v8 = vmax.f32 %v7567_v63, 0.0 }
 0x754   : > { %7930 = vmatprep.mubr.f32.mxu0 %v16610_v40  ;;  %v15664_v55 = vadd.f32 %v15583_v17, %v7626_v60 }
 0x756   : > { %v9146_v21 = vpop.f32.mrb[154].mxu1 }
 0x757   : > { %8752 = vmatmul.mubr.msk.f32.gmra.mrb[44].mxu0 %vm4350_vm12, %v7691_v13  ;;  %v15670_v27 = vadd.f32 %v9146_v21, %v15583_v17  ;;  %v7636_v10 = vpop.f32.mrb[155].mxu1  ;;  %v7572_v13 = vadd.f32 %v9125_v16, %v15583_v17 }
 0x758   : > { %7936 = vmatprep.mubr.f32.mxu0 %v16610_v40  ;;  %v15673_v12 = vadd.f32 %v15583_v17, %v7636_v10  ;;  %v7577_v10 = vadd.f32 %v15583_v17, %v7576_v42  ;;  %v7582_v42 = vadd.f32 %v15623_v36, %v15583_v17 }
 0x759   : > { %v7694_v21 = vmax.f32 %v7572_v13, 0.0 }
 0x75a   : > { %v9149_v60 = vpop.f32.mrb[156].mxu1 }
 0x75b   : > { %8753 = vmatmul.mubr.msk.f32.gmra.mrb[46].mxu0 %vm4350_vm12, %v7692_v4  ;;  %v15679_v44 = vadd.f32 %v9149_v60, %v15583_v17  ;;  %v7646_v1 = vpop.f32.mrb[157].mxu1  ;;  %v7695_v60 = vmax.f32 %v7577_v10, 0.0 }
 0x75c   : > { %7942 = vmatprep.mubr.f32.mxu0 %v16610_v40  ;;  %v15682_v18 = vadd.f32 %v15583_v17, %v7646_v1 }
 0x75e   : > { %v9152_v63 = vpop.f32.mrb[158].mxu1 }
 0x75f   : > { %8754 = vmatmul.mubr.msk.f32.gmra.mrb[48].mxu0 %vm4350_vm12, %v7693_v8  ;;  %v15688_v4 = vadd.f32 %v9152_v63, %v15583_v17  ;;  %v7656_v41 = vpop.f32.mrb[159].mxu1 }
 0x760   : > { %7948 = vmatprep.mubr.f32.mxu0 %v16610_v40  ;;  %v15691_v16 = vadd.f32 %v15583_v17, %v7656_v41  ;;  %v7587_v41 = vadd.f32 %v15583_v17, %v15630_v34  ;;  %v7597_v34 = vadd.f32 %v15583_v17, %v15637_v14  ;;  %v7702_v14 = vmax.f32 %v15643_v0, 0.0 }
 0x761   : > { %v7706_v0 = vmax.f32 %v15661_v51, 0.0  ;;  %v7710_v51 = vmax.f32 %v15679_v44, 0.0 }
 0x762   : > { %v9155_v1 = vpop.f32.mrb[160].mxu1  ;;  %v7697_v47 = vmax.f32 %v7587_v41, 0.0  ;;  %v7602_v41 = vadd.f32 %v15635_v52, %v15583_v17  ;;  %v7705_v52 = vmax.f32 %v15664_v55, 0.0  ;;  %v7711_v55 = vmax.f32 %v15691_v16, 0.0  ;;  %v8151_v16 = vld [vmem:[%s16039_s7] sm:$0x3] }
 0x763   : > { %8755 = vmatmul.mubr.msk.f32.gmra.mrb[50].mxu0 %vm4350_vm12, %v7694_v21  ;;  %v15698_v8 = vadd.f32 %v9155_v1, %v15583_v17  ;;  %v7666_v13 = vpop.f32.mrb[161].mxu1  ;;  %v7696_v21 = vmax.f32 %v7582_v42, 0.0 }
 0x764   : > { %7954 = vmatprep.mubr.f32.mxu0 %v16610_v40  ;;  %v15701_v63 = vadd.f32 %v15583_v17, %v7666_v13  ;;  %v7699_v13 = vmax.f32 %v7597_v34, 0.0 }
 0x765   : > { %v7714_v44 = vmax.f32 %v15698_v8, 0.0  ;;  %v15779_v8 = vrot.slane %v8151_v16, %v15380_v50 }
 0x766   : > { %v9158_v10 = vpop.f32.mrb[162].mxu1 }
 0x767   : > { %8756 = vmatmul.mubr.msk.f32.gmra.mrb[52].mxu0 %vm4350_vm12, %v7695_v60  ;;  %v15708_v57 = vadd.f32 %v9158_v10, %v15583_v17  ;;  %v7676_v36 = vpop.f32.mrb[163].mxu1  ;;  %v7592_v60 = vadd.f32 %v15627_v2, %v15583_v17  ;;  %v7700_v2 = vmax.f32 %v7602_v41, 0.0  ;;  %v7703_v10 = vmax.f32 %v15655_v53, 0.0 }
 0x768   : > { %7960 = vmatprep.mubr.f32.mxu0 %v16610_v40  ;;  %v7677_v1 = vadd.f32 %v15583_v17, %v7676_v36  ;;  %v7704_v17 = vmax.f32 %v15652_v20, 0.0  ;;  %v7708_v20 = vmax.f32 %v15670_v27, 0.0  ;;  %v7709_v53 = vmax.f32 %v15682_v18, 0.0 }
 0x769   : > { %v7698_v42 = vmax.f32 %v7592_v60, 0.0  ;;  %v7712_v27 = vmax.f32 %v15688_v4, 0.0  ;;  %v7716_v4 = vmax.f32 %v15708_v57, 0.0 }
 0x76a   : > { %v7715_v18 = vmax.f32 %v7677_v1, 0.0 }
 0x76b   : > { %8757 = vmatmul.mubr.msk.f32.gmra.mrb[54].mxu0 %vm4350_vm12, %v7696_v21 }
 0x76c   : > { %7966 = vmatprep.mubr.f32.mxu0 %v16610_v40 }
 0x76f   : > { %8758 = vmatmul.mubr.msk.f32.gmra.mrb[56].mxu0 %vm4350_vm12, %v7697_v47  ;;  %v7701_v47 = vmax.f32 %v15646_v9, 0.0  ;;  %v7707_v9 = vmax.f32 %v15673_v12, 0.0  ;;  %v7713_v12 = vmax.f32 %v15701_v63, 0.0  ;;  %v8159_v63 = vsub.s32 1, %v15377_v33 }
 0x770   : > { %7972 = vmatprep.mubr.f32.mxu0 %v16610_v40 }
 0x771   : > { %v15781_v36 = vrot.slane %v8151_v16, %v8159_v63 }
 0x773   : > { %8759 = vmatmul.mubr.msk.f32.gmra.mrb[58].mxu0 %vm4350_vm12, %v7698_v42 }
 0x774   : > { %7978 = vmatprep.mubr.f32.mxu0 %v16610_v40 }
 0x777   : > { %8760 = vmatmul.mubr.msk.f32.gmra.mrb[60].mxu0 %vm4350_vm12, %v7699_v13 }
 0x778   : > { %7984 = vmatprep.mubr.f32.mxu0 %v16610_v40 }
 0x77b   : > { %8761 = vmatmul.mubr.msk.f32.gmra.mrb[62].mxu0 %vm4350_vm12, %v7700_v2 }
 0x77c   : > { %7990 = vmatprep.mubr.f32.mxu0 %v16610_v40 }
 0x77f   : > { %8762 = vmatmul.mubr.msk.f32.gmra.mrb[64].mxu0 %vm4350_vm12, %v7701_v47 }
 0x780   : > { %7996 = vmatprep.mubr.f32.mxu0 %v16610_v40 }
 0x783   : > { %8763 = vmatmul.mubr.msk.f32.gmra.mrb[66].mxu0 %vm4350_vm12, %v7702_v14 }
 0x784   : > { %8002 = vmatprep.mubr.f32.mxu0 %v16610_v40 }
 0x787   : > { %8764 = vmatmul.mubr.msk.f32.gmra.mrb[68].mxu0 %vm4350_vm12, %v7703_v10 }
 0x788   : > { %8008 = vmatprep.mubr.f32.mxu0 %v16610_v40 }
 0x78b   : > { %8765 = vmatmul.mubr.msk.f32.gmra.mrb[70].mxu0 %vm4350_vm12, %v7704_v17 }
 0x78c   : > { %8014 = vmatprep.mubr.f32.mxu0 %v16610_v40 }
 0x78f   : > { %8766 = vmatmul.mubr.msk.f32.gmra.mrb[72].mxu0 %vm4350_vm12, %v7705_v52 }
 0x790   : > { %8020 = vmatprep.mubr.f32.mxu0 %v16610_v40 }
 0x793   : > { %8767 = vmatmul.mubr.msk.f32.gmra.mrb[74].mxu0 %vm4350_vm12, %v7706_v0 }
 0x794   : > { %8026 = vmatprep.mubr.f32.mxu0 %v16610_v40 }
 0x797   : > { %8768 = vmatmul.mubr.msk.f32.gmra.mrb[76].mxu0 %vm4350_vm12, %v7707_v9 }
 0x798   : > { %8032 = vmatprep.mubr.f32.mxu0 %v16610_v40 }
 0x79b   : > { %8769 = vmatmul.mubr.msk.f32.gmra.mrb[78].mxu0 %vm4350_vm12, %v7708_v20 }
 0x79c   : > { %8038 = vmatprep.mubr.f32.mxu0 %v16610_v40 }
 0x79f   : > { %8770 = vmatmul.mubr.msk.f32.gmra.mrb[80].mxu0 %vm4350_vm12, %v7709_v53 }
 0x7a0   : > { %8044 = vmatprep.mubr.f32.mxu0 %v16610_v40 }
 0x7a3   : > { %8771 = vmatmul.mubr.msk.f32.gmra.mrb[82].mxu0 %vm4350_vm12, %v7710_v51 }
 0x7a4   : > { %8050 = vmatprep.mubr.f32.mxu0 %v16610_v40 }
 0x7a7   : > { %8772 = vmatmul.mubr.msk.f32.gmra.mrb[84].mxu0 %vm4350_vm12, %v7711_v55 }
 0x7a8   : > { %8056 = vmatprep.mubr.f32.mxu0 %v16610_v40 }
 0x7ab   : > { %8773 = vmatmul.mubr.msk.f32.gmra.mrb[86].mxu0 %vm4350_vm12, %v7712_v27 }
 0x7ac   : > { %8062 = vmatprep.mubr.f32.mxu0 %v16610_v40 }
 0x7af   : > { %8774 = vmatmul.mubr.msk.f32.gmra.mrb[88].mxu0 %vm4350_vm12, %v7713_v12 }
 0x7b0   : > { %8068 = vmatprep.mubr.f32.mxu0 %v16610_v40 }
 0x7b3   : > { %8775 = vmatmul.mubr.msk.f32.gmra.mrb[90].mxu0 %vm4350_vm12, %v7714_v44 }
 0x7b4   : > { %8074 = vmatprep.mubr.f32.mxu0 %v16610_v40 }
 0x7b7   : > { %8776 = vmatmul.mubr.msk.f32.gmra.mrb[92].mxu0 %vm4350_vm12, %v7715_v18 }
 0x7b8   : > { %8080 = vmatprep.mubr.f32.mxu0 %v16610_v40 }
 0x7bb   : > { %8777 = vmatmul.mubr.msk.f32.gmra.mrb[94].mxu0 %vm4350_vm12, %v7716_v4 }
 0x812   : > { %v7896_v21 = vpop.f32.mrb[32].mxu0 }
 0x813   : > { %v9272_v40 = vadd.f32 %v15387_v6, %v7896_v21  ;;  %v7898_v57 = vpop.f32.mrb[33].mxu0 }
 0x814   : > { %v9274_v1 = vadd.f32 %v15486_v49, %v7898_v57 }
 0x815   : > { %v8163_v60 = vadd.f32 %v9272_v40, %v15779_v8 }
 0x816   : > { %v8164_v34 = vadd.f32 %v9274_v1, %v15781_v36  ;;  %v7902_v42 = vpop.f32.mrb[34].mxu0 }
 0x817   : > { %v8227_v33 = vmax.f32 %v8163_v60, 0.0  ;;  %v9276_v13 = vadd.f32 %v15390_v56, %v7902_v42  ;;  %v7904_v50 = vpop.f32.mrb[35].mxu0 }
 0x818   : > { %v8228_v41 = vmax.f32 %v8164_v34, 0.0  ;;  %v9278_v2 = vadd.f32 %v15490_v58, %v7904_v50 }
 0x819   : > { %8291 = vst [vmem:[%s15791_s18] sm:$0xff] %v8227_v33  ;;  %v8165_v6 = vadd.f32 %v9276_v13, %v15779_v8 }
 0x81a   : > { %8292 = vst [vmem:[%s15791_s18 + $0x8] sm:$0xff] %v8228_v41  ;;  %v8166_v49 = vadd.f32 %v9278_v2, %v15781_v36  ;;  %v7908_v47 = vpop.f32.mrb[36].mxu0 }
 0x81b   : > { %v8229_v14 = vmax.f32 %v8165_v6, 0.0  ;;  %v9280_v56 = vadd.f32 %v15393_v35, %v7908_v47  ;;  %v7910_v10 = vpop.f32.mrb[37].mxu0 }
 0x81c   : > { %v8230_v58 = vmax.f32 %v8166_v49, 0.0  ;;  %v9282_v17 = vadd.f32 %v15494_v45, %v7910_v10 }
 0x81d   : > { %8293 = vst [vmem:[%s15791_s18 + $0x10] sm:$0xff] %v8229_v14  ;;  %v8167_v52 = vadd.f32 %v9280_v56, %v15779_v8 }
 0x81e   : > { %8294 = vst [vmem:[%s15791_s18 + $0x18] sm:$0xff] %v8230_v58  ;;  %v8168_v0 = vadd.f32 %v9282_v17, %v15781_v36  ;;  %v7914_v9 = vpop.f32.mrb[38].mxu0 }
 0x81f   : > { %v8231_v20 = vmax.f32 %v8167_v52, 0.0  ;;  %v9284_v53 = vadd.f32 %v15396_v23, %v7914_v9  ;;  %v7916_v51 = vpop.f32.mrb[39].mxu0 }
 0x820   : > { %v8232_v55 = vmax.f32 %v8168_v0, 0.0  ;;  %v9286_v35 = vadd.f32 %v15498_v31, %v7916_v51 }
 0x821   : > { %8295 = vst [vmem:[%s15791_s18 + $0x20] sm:$0xff] %v8231_v20  ;;  %v8169_v27 = vadd.f32 %v9284_v53, %v15779_v8 }
 0x822   : > { %8296 = vst [vmem:[%s15791_s18 + $0x28] sm:$0xff] %v8232_v55  ;;  %v8170_v45 = vadd.f32 %v9286_v35, %v15781_v36  ;;  %v7920_v12 = vpop.f32.mrb[40].mxu0 }
 0x823   : > { %v8233_v44 = vmax.f32 %v8169_v27, 0.0  ;;  %v9288_v18 = vadd.f32 %v15399_v59, %v7920_v12  ;;  %v7922_v4 = vpop.f32.mrb[41].mxu0 }
 0x824   : > { %v8234_v16 = vmax.f32 %v8170_v45, 0.0  ;;  %v9290_v23 = vadd.f32 %v15502_v46, %v7922_v4 }
 0x825   : > { %8297 = vst [vmem:[%s15791_s18 + $0x30] sm:$0xff] %v8233_v44  ;;  %v8171_v63 = vadd.f32 %v9288_v18, %v15779_v8 }
 0x826   : > { %8298 = vst [vmem:[%s15791_s18 + $0x38] sm:$0xff] %v8234_v16  ;;  %v8172_v31 = vadd.f32 %v9290_v23, %v15781_v36  ;;  %v7926_v21 = vpop.f32.mrb[42].mxu0 }
 0x827   : > { %v8235_v40 = vmax.f32 %v8171_v63, 0.0  ;;  %v9292_v57 = vadd.f32 %v15402_v37, %v7926_v21  ;;  %v7928_v1 = vpop.f32.mrb[43].mxu0 }
 0x828   : > { %v8236_v60 = vmax.f32 %v8172_v31, 0.0  ;;  %v9294_v59 = vadd.f32 %v15506_v28, %v7928_v1 }
 0x829   : > { %8299 = vst [vmem:[%s15791_s18 + $0x40] sm:$0xff] %v8235_v40  ;;  %v8173_v34 = vadd.f32 %v9292_v57, %v15779_v8 }
 0x82a   : > { %8300 = vst [vmem:[%s15791_s18 + $0x48] sm:$0xff] %v8236_v60  ;;  %v8174_v46 = vadd.f32 %v9294_v59, %v15781_v36  ;;  %v7932_v42 = vpop.f32.mrb[44].mxu0 }
 0x82b   : > { %v8237_v33 = vmax.f32 %v8173_v34, 0.0  ;;  %v9296_v13 = vadd.f32 %v15405_v62, %v7932_v42  ;;  %v7934_v50 = vpop.f32.mrb[45].mxu0 }
 0x82c   : > { %v8238_v41 = vmax.f32 %v8174_v46, 0.0  ;;  %v9298_v37 = vadd.f32 %v15510_v3, %v7934_v50 }
 0x82d   : > { %8301 = vst [vmem:[%s15791_s18 + $0x50] sm:$0xff] %v8237_v33  ;;  %v8175_v2 = vadd.f32 %v9296_v13, %v15779_v8 }
 0x82e   : > { %8302 = vst [vmem:[%s15791_s18 + $0x58] sm:$0xff] %v8238_v41  ;;  %v8176_v28 = vadd.f32 %v9298_v37, %v15781_v36  ;;  %v7938_v6 = vpop.f32.mrb[46].mxu0 }
 0x82f   : > { %v8239_v49 = vmax.f32 %v8175_v2, 0.0  ;;  %v9300_v47 = vadd.f32 %v15408_v11, %v7938_v6  ;;  %v7940_v14 = vpop.f32.mrb[47].mxu0 }
 0x830   : > { %v8240_v56 = vmax.f32 %v8176_v28, 0.0  ;;  %v9302_v62 = vadd.f32 %v15514_v32, %v7940_v14 }
 0x831   : > { %8303 = vst [vmem:[%s15791_s18 + $0x60] sm:$0xff] %v8239_v49  ;;  %v8177_v10 = vadd.f32 %v9300_v47, %v15779_v8 }
 0x832   : > { %8304 = vst [vmem:[%s15791_s18 + $0x68] sm:$0xff] %v8240_v56  ;;  %v8178_v3 = vadd.f32 %v9302_v62, %v15781_v36  ;;  %v7944_v58 = vpop.f32.mrb[48].mxu0 }
 0x833   : > { %v8241_v17 = vmax.f32 %v8177_v10, 0.0  ;;  %v9304_v52 = vadd.f32 %v15413_v29, %v7944_v58  ;;  %v7946_v0 = vpop.f32.mrb[49].mxu0 }
 0x834   : > { %v8242_v9 = vmax.f32 %v8178_v3, 0.0  ;;  %v9306_v11 = vadd.f32 %v15518_v61, %v7946_v0 }
 0x835   : > { %8305 = vst [vmem:[%s15791_s18 + $0x70] sm:$0xff] %v8241_v17  ;;  %v8179_v20 = vadd.f32 %v9304_v52, %v15779_v8 }
 0x836   : > { %8306 = vst [vmem:[%s15791_s18 + $0x78] sm:$0xff] %v8242_v9  ;;  %v8180_v32 = vadd.f32 %v9306_v11, %v15781_v36  ;;  %v7950_v53 = vpop.f32.mrb[50].mxu0 }
 0x837   : > { %v8243_v51 = vmax.f32 %v8179_v20, 0.0  ;;  %v9308_v55 = vadd.f32 %v15416_v39, %v7950_v53  ;;  %v7952_v35 = vpop.f32.mrb[51].mxu0  ;;  %v17026_v20 = vld [vmem:[#allocation61_spill] sm:$0xff] }
 0x838   : > { %v8244_v27 = vmax.f32 %v8180_v32, 0.0  ;;  %v9310_v29 = vadd.f32 %v15522_v22, %v7952_v35 }
 0x839   : > { %8307 = vst [vmem:[%s15791_s18 + $0x80] sm:$0xff] %v8243_v51  ;;  %v8181_v45 = vadd.f32 %v9308_v55, %v15779_v8 }
 0x83a   : > { %8308 = vst [vmem:[%s15791_s18 + $0x88] sm:$0xff] %v8244_v27  ;;  %v8182_v61 = vadd.f32 %v9310_v29, %v15781_v36  ;;  %v7956_v12 = vpop.f32.mrb[52].mxu0 }
 0x83b   : > { %v8245_v44 = vmax.f32 %v8181_v45, 0.0  ;;  %v9312_v18 = vadd.f32 %v15419_v5, %v7956_v12  ;;  %v7958_v4 = vpop.f32.mrb[53].mxu0  ;;  %v17028_v45 = vld [vmem:[#allocation62_spill] sm:$0xff] }
 0x83c   : > { %v8246_v16 = vmax.f32 %v8182_v61, 0.0  ;;  %v9314_v39 = vadd.f32 %v15526_v26, %v7958_v4 }
 0x83d   : > { %8309 = vst [vmem:[%s15791_s18 + $0x90] sm:$0xff] %v8245_v44  ;;  %v8183_v23 = vadd.f32 %v9312_v18, %v15779_v8  ;;  %v17029_v18 = vld [vmem:[#allocation163_spill] sm:$0xff] }
 0x83e   : > { %8310 = vst [vmem:[%s15791_s18 + $0x98] sm:$0xff] %v8246_v16  ;;  %v8184_v22 = vadd.f32 %v9314_v39, %v15781_v36  ;;  %v7962_v63 = vpop.f32.mrb[54].mxu0 }
 0x83f   : > { %v8247_v31 = vmax.f32 %v8183_v23, 0.0  ;;  %v9316_v21 = vadd.f32 %v15422_v54, %v7962_v63  ;;  %v7964_v40 = vpop.f32.mrb[55].mxu0  ;;  %v17030_v63 = vld [vmem:[#allocation108_spill] sm:$0xff] }
 0x840   : > { %v8248_v57 = vmax.f32 %v8184_v22, 0.0  ;;  %v9318_v5 = vadd.f32 %v15530_v38, %v7964_v40 }
 0x841   : > { %8311 = vst [vmem:[%s15791_s18 + $0xa0] sm:$0xff] %v8247_v31  ;;  %v8185_v1 = vadd.f32 %v9316_v21, %v15779_v8 }
 0x842   : > { %8312 = vst [vmem:[%s15791_s18 + $0xa8] sm:$0xff] %v8248_v57  ;;  %v8186_v26 = vadd.f32 %v9318_v5, %v15781_v36  ;;  %v7968_v60 = vpop.f32.mrb[56].mxu0  ;;  %v17031_v57 = vld [vmem:[#allocation82_spill] sm:$0xff] }
 0x843   : > { %v8249_v59 = vmax.f32 %v8185_v1, 0.0  ;;  %v9320_v34 = vadd.f32 %v15425_v30, %v7968_v60  ;;  %v7970_v46 = vpop.f32.mrb[57].mxu0 }
 0x844   : > { %v8250_v42 = vmax.f32 %v8186_v26, 0.0  ;;  %v9322_v54 = vadd.f32 %v15534_v48, %v7970_v46 }
 0x845   : > { %8313 = vst [vmem:[%s15791_s18 + $0xb0] sm:$0xff] %v8249_v59  ;;  %v8187_v33 = vadd.f32 %v9320_v34, %v15779_v8  ;;  %v17032_v34 = vld [vmem:[#allocation135_spill] sm:$0xff] }
 0x846   : > { %8314 = vst [vmem:[%s15791_s18 + $0xb8] sm:$0xff] %v8250_v42  ;;  %v8188_v38 = vadd.f32 %v9322_v54, %v15781_v36  ;;  %v7974_v13 = vpop.f32.mrb[58].mxu0 }
 0x847   : > { %v8251_v50 = vmax.f32 %v8187_v33, 0.0  ;;  %v9324_v41 = vadd.f32 %v15428_v25, %v7974_v13  ;;  %v7976_v37 = vpop.f32.mrb[59].mxu0  ;;  %v17033_v33 = vld [vmem:[#allocation10_spill] sm:$0xff] }
 0x848   : > { %v8252_v2 = vmax.f32 %v8188_v38, 0.0  ;;  %v9326_v30 = vadd.f32 %v15538_v43, %v7976_v37 }
 0x849   : > { %8315 = vst [vmem:[%s15791_s18 + $0xc0] sm:$0xff] %v8251_v50  ;;  %v8189_v28 = vadd.f32 %v9324_v41, %v15779_v8 }
 0x84a   : > { %8316 = vst [vmem:[%s15791_s18 + $0xc8] sm:$0xff] %v8252_v2  ;;  %v8190_v48 = vadd.f32 %v9326_v30, %v15781_v36  ;;  %v7980_v6 = vpop.f32.mrb[60].mxu0  ;;  %v17034_v2 = vld [vmem:[#allocation111_spill] sm:$0xff] }
 0x84b   : > { %v8253_v49 = vmax.f32 %v8189_v28, 0.0  ;;  %v9328_v47 = vadd.f32 %v15431_v19, %v7980_v6  ;;  %v7982_v14 = vpop.f32.mrb[61].mxu0  ;;  %v17035_v6 = vld [vmem:[#allocation60_spill] sm:$0xff] }
 0x84c   : > { %v8254_v56 = vmax.f32 %v8190_v48, 0.0  ;;  %v9330_v25 = vadd.f32 %v15542_v24, %v7982_v14 }
 0x84d   : > { %8317 = vst [vmem:[%s15791_s18 + $0xd0] sm:$0xff] %v8253_v49  ;;  %v8191_v62 = vadd.f32 %v9328_v47, %v15779_v8 }
 0x84e   : > { %8318 = vst [vmem:[%s15791_s18 + $0xd8] sm:$0xff] %v8254_v56  ;;  %v8192_v43 = vadd.f32 %v9330_v25, %v15781_v36  ;;  %v7986_v10 = vpop.f32.mrb[62].mxu0 }
 0x84f   : > { %v8255_v3 = vmax.f32 %v8191_v62, 0.0  ;;  %v9332_v58 = vadd.f32 %v15434_v7, %v7986_v10  ;;  %v7988_v17 = vpop.f32.mrb[63].mxu0  ;;  %v17027_v7 = vld [vmem:[#allocation168_spill] sm:$0xff]  ;;  %v17036_v62 = vld [vmem:[#allocation50_spill] sm:$0xff] }
 0x850   : > { %v8256_v52 = vmax.f32 %v8192_v43, 0.0  ;;  %v9334_v19 = vadd.f32 %v15546_v15, %v7988_v17 }
 0x851   : > { %8319 = vst [vmem:[%s15791_s18 + $0xe0] sm:$0xff] %v8255_v3  ;;  %v8193_v0 = vadd.f32 %v9332_v58, %v15779_v8  ;;  %v17037_v58 = vld [vmem:[#allocation64_spill] sm:$0xff] }
 0x852   : > { %8320 = vst [vmem:[%s15791_s18 + $0xe8] sm:$0xff] %v8256_v52  ;;  %v8194_v24 = vadd.f32 %v9334_v19, %v15781_v36  ;;  %v7992_v9 = vpop.f32.mrb[64].mxu0 }
 0x853   : > { %v8257_v11 = vmax.f32 %v8193_v0, 0.0  ;;  %v9336_v32 = vadd.f32 %v17026_v20, %v7992_v9  ;;  %v7994_v53 = vpop.f32.mrb[65].mxu0  ;;  %v17038_v9 = vld [vmem:[#allocation115_spill] sm:$0xff] }
 0x854   : > { %v8258_v51 = vmax.f32 %v8194_v24, 0.0  ;;  %v9338_v55 = vadd.f32 %v17027_v7, %v7994_v53  ;;  %v17039_v53 = vld [vmem:[#allocation128_spill] sm:$0xff] }
 0x855   : > { %8321 = vst [vmem:[%s15791_s18 + $0xf0] sm:$0xff] %v8257_v11  ;;  %v8195_v35 = vadd.f32 %v9336_v32, %v15779_v8 }
 0x856   : > { %8322 = vst [vmem:[%s15791_s18 + $0xf8] sm:$0xff] %v8258_v51  ;;  %v8196_v15 = vadd.f32 %v9338_v55, %v15781_v36  ;;  %v7998_v27 = vpop.f32.mrb[66].mxu0 }
 0x857   : > { %v8259_v29 = vmax.f32 %v8195_v35, 0.0  ;;  %v9340_v61 = vadd.f32 %v17028_v45, %v7998_v27  ;;  %v8000_v12 = vpop.f32.mrb[67].mxu0  ;;  %v17040_v27 = vld [vmem:[#allocation116_spill] sm:$0xff] }
 0x858   : > { %v8260_v44 = vmax.f32 %v8196_v15, 0.0  ;;  %v9342_v4 = vadd.f32 %v17029_v18, %v8000_v12  ;;  %v17041_v12 = vld [vmem:[#allocation172_spill] sm:$0xff] }
 0x859   : > { %8323 = vst [vmem:[%s15791_s18 + $0x100] sm:$0xff] %v8259_v29  ;;  %v8197_v16 = vadd.f32 %v9340_v61, %v15779_v8 }
 0x85a   : > { %8324 = vst [vmem:[%s15791_s18 + $0x108] sm:$0xff] %v8260_v44  ;;  %v8198_v39 = vadd.f32 %v9342_v4, %v15781_v36  ;;  %v8004_v23 = vpop.f32.mrb[68].mxu0 }
 0x85b   : > { %v8261_v22 = vmax.f32 %v8197_v16, 0.0  ;;  %v9344_v31 = vadd.f32 %v17030_v63, %v8004_v23  ;;  %v8006_v21 = vpop.f32.mrb[69].mxu0  ;;  %v17042_v23 = vld [vmem:[#allocation69_spill] sm:$0xff] }
 0x85c   : > { %v8262_v40 = vmax.f32 %v8198_v39, 0.0  ;;  %v9346_v5 = vadd.f32 %v17031_v57, %v8006_v21  ;;  %v17043_v21 = vld [vmem:[#allocation127_spill] sm:$0xff] }
 0x85d   : > { %8325 = vst [vmem:[%s15791_s18 + $0x110] sm:$0xff] %v8261_v22  ;;  %v8199_v1 = vadd.f32 %v9344_v31, %v15779_v8 }
 0x85e   : > { %8326 = vst [vmem:[%s15791_s18 + $0x118] sm:$0xff] %v8262_v40  ;;  %v8200_v26 = vadd.f32 %v9346_v5, %v15781_v36  ;;  %v8010_v60 = vpop.f32.mrb[70].mxu0 }
 0x85f   : > { %v8263_v59 = vmax.f32 %v8199_v1, 0.0  ;;  %v9348_v46 = vadd.f32 %v17032_v34, %v8010_v60  ;;  %v8012_v42 = vpop.f32.mrb[71].mxu0  ;;  %v17044_v60 = vld [vmem:[#allocation70_spill] sm:$0xff] }
 0x860   : > { %v8264_v54 = vmax.f32 %v8200_v26, 0.0  ;;  %v9350_v38 = vadd.f32 %v17033_v33, %v8012_v42  ;;  %v17045_v42 = vld [vmem:[#allocation77_spill] sm:$0xff] }
 0x861   : > { %8327 = vst [vmem:[%s15791_s18 + $0x120] sm:$0xff] %v8263_v59  ;;  %v8201_v13 = vadd.f32 %v9348_v46, %v15779_v8 }
 0x862   : > { %8328 = vst [vmem:[%s15791_s18 + $0x128] sm:$0xff] %v8264_v54  ;;  %v8202_v50 = vadd.f32 %v9350_v38, %v15781_v36  ;;  %v8016_v41 = vpop.f32.mrb[72].mxu0 }
 0x863   : > { %v8265_v37 = vmax.f32 %v8201_v13, 0.0  ;;  %v9352_v30 = vadd.f32 %v17034_v2, %v8016_v41  ;;  %v8018_v28 = vpop.f32.mrb[73].mxu0  ;;  %v17046_v41 = vld [vmem:[#allocation118_spill] sm:$0xff] }
 0x864   : > { %v8266_v48 = vmax.f32 %v8202_v50, 0.0  ;;  %v9354_v49 = vadd.f32 %v17035_v6, %v8018_v28  ;;  %v17047_v28 = vld [vmem:[#allocation38_spill] sm:$0xff] }
 0x865   : > { %8329 = vst [vmem:[%s15791_s18 + $0x130] sm:$0xff] %v8265_v37  ;;  %v8203_v47 = vadd.f32 %v9352_v30, %v15779_v8 }
 0x866   : > { %8330 = vst [vmem:[%s15791_s18 + $0x138] sm:$0xff] %v8266_v48  ;;  %v8204_v14 = vadd.f32 %v9354_v49, %v15781_v36  ;;  %v8022_v56 = vpop.f32.mrb[74].mxu0 }
 0x867   : > { %v8267_v25 = vmax.f32 %v8203_v47, 0.0  ;;  %v9356_v43 = vadd.f32 %v17036_v62, %v8022_v56  ;;  %v8024_v10 = vpop.f32.mrb[75].mxu0  ;;  %v17048_v56 = vld [vmem:[#allocation139_spill] sm:$0xff] }
 0x868   : > { %v8268_v3 = vmax.f32 %v8204_v14, 0.0  ;;  %v9358_v17 = vadd.f32 %v17037_v58, %v8024_v10  ;;  %v17049_v10 = vld [vmem:[#allocation130_spill] sm:$0xff] }
 0x869   : > { %8331 = vst [vmem:[%s15791_s18 + $0x140] sm:$0xff] %v8267_v25  ;;  %v8205_v52 = vadd.f32 %v9356_v43, %v15779_v8 }
 0x86a   : > { %8332 = vst [vmem:[%s15791_s18 + $0x148] sm:$0xff] %v8268_v3  ;;  %v8206_v19 = vadd.f32 %v9358_v17, %v15781_v36  ;;  %v8028_v0 = vpop.f32.mrb[76].mxu0 }
 0x86b   : > { %v8269_v24 = vmax.f32 %v8205_v52, 0.0  ;;  %v9360_v11 = vadd.f32 %v17038_v9, %v8028_v0  ;;  %v8030_v20 = vpop.f32.mrb[77].mxu0  ;;  %v17050_v0 = vld [vmem:[#allocation150_spill] sm:$0xff] }
 0x86c   : > { %v8270_v32 = vmax.f32 %v8206_v19, 0.0  ;;  %v9362_v51 = vadd.f32 %v17039_v53, %v8030_v20  ;;  %v17051_v20 = vld [vmem:[#allocation78_spill] sm:$0xff] }
 0x86d   : > { %8333 = vst [vmem:[%s15791_s18 + $0x150] sm:$0xff] %v8269_v24  ;;  %v8207_v7 = vadd.f32 %v9360_v11, %v15779_v8 }
 0x86e   : > { %8334 = vst [vmem:[%s15791_s18 + $0x158] sm:$0xff] %v8270_v32  ;;  %v8208_v55 = vadd.f32 %v9362_v51, %v15781_v36  ;;  %v8034_v35 = vpop.f32.mrb[78].mxu0 }
 0x86f   : > { %v8271_v15 = vmax.f32 %v8207_v7, 0.0  ;;  %v9364_v29 = vadd.f32 %v17040_v27, %v8034_v35  ;;  %v8036_v45 = vpop.f32.mrb[79].mxu0  ;;  %v17052_v35 = vld [vmem:[#allocation151_spill] sm:$0xff] }
 0x870   : > { %v8272_v61 = vmax.f32 %v8208_v55, 0.0  ;;  %v9366_v44 = vadd.f32 %v17041_v12, %v8036_v45  ;;  %v17053_v45 = vld [vmem:[#allocation98_spill] sm:$0xff] }
 0x871   : > { %8335 = vst [vmem:[%s15791_s18 + $0x160] sm:$0xff] %v8271_v15  ;;  %v8209_v18 = vadd.f32 %v9364_v29, %v15779_v8 }
 0x872   : > { %8336 = vst [vmem:[%s15791_s18 + $0x168] sm:$0xff] %v8272_v61  ;;  %v8210_v4 = vadd.f32 %v9366_v44, %v15781_v36  ;;  %v8040_v16 = vpop.f32.mrb[80].mxu0 }
 0x873   : > { %v8273_v39 = vmax.f32 %v8209_v18, 0.0  ;;  %v9368_v22 = vadd.f32 %v17042_v23, %v8040_v16  ;;  %v8042_v63 = vpop.f32.mrb[81].mxu0  ;;  %v17054_v16 = vld [vmem:[#allocation158_spill] sm:$0xff] }
 0x874   : > { %v8274_v31 = vmax.f32 %v8210_v4, 0.0  ;;  %v9370_v40 = vadd.f32 %v17043_v21, %v8042_v63  ;;  %v17055_v63 = vld [vmem:[#allocation29_spill] sm:$0xff] }
 0x875   : > { %8337 = vst [vmem:[%s15791_s18 + $0x170] sm:$0xff] %v8273_v39  ;;  %v8211_v57 = vadd.f32 %v9368_v22, %v15779_v8 }
 0x876   : > { %8338 = vst [vmem:[%s15791_s18 + $0x178] sm:$0xff] %v8274_v31  ;;  %v8212_v5 = vadd.f32 %v9370_v40, %v15781_v36  ;;  %v8046_v1 = vpop.f32.mrb[82].mxu0 }
 0x877   : > { %v8275_v26 = vmax.f32 %v8211_v57, 0.0  ;;  %v9372_v59 = vadd.f32 %v17044_v60, %v8046_v1  ;;  %v8048_v34 = vpop.f32.mrb[83].mxu0  ;;  %v17056_v1 = vld [vmem:[#allocation161_spill] sm:$0xff] }
 0x878   : > { %v8276_v46 = vmax.f32 %v8212_v5, 0.0  ;;  %v9374_v54 = vadd.f32 %v17045_v42, %v8048_v34  ;;  %v17057_v34 = vld [vmem:[#allocation36_spill] sm:$0xff] }
 0x879   : > { %8339 = vst [vmem:[%s15791_s18 + $0x180] sm:$0xff] %v8275_v26  ;;  %v8213_v33 = vadd.f32 %v9372_v59, %v15779_v8 }
 0x87a   : > { %8340 = vst [vmem:[%s15791_s18 + $0x188] sm:$0xff] %v8276_v46  ;;  %v8214_v38 = vadd.f32 %v9374_v54, %v15781_v36  ;;  %v8052_v13 = vpop.f32.mrb[84].mxu0 }
 0x87b   : > { %v8277_v50 = vmax.f32 %v8213_v33, 0.0  ;;  %v9376_v37 = vadd.f32 %v17046_v41, %v8052_v13  ;;  %v8054_v2 = vpop.f32.mrb[85].mxu0 }
 0x87c   : > { %v8278_v30 = vmax.f32 %v8214_v38, 0.0  ;;  %v9378_v48 = vadd.f32 %v17047_v28, %v8054_v2 }
 0x87d   : > { %8341 = vst [vmem:[%s15791_s18 + $0x190] sm:$0xff] %v8277_v50  ;;  %v8215_v6 = vadd.f32 %v9376_v37, %v15779_v8 }
 0x87e   : > { %8342 = vst [vmem:[%s15791_s18 + $0x198] sm:$0xff] %v8278_v30  ;;  %v8216_v49 = vadd.f32 %v9378_v48, %v15781_v36  ;;  %v8058_v47 = vpop.f32.mrb[86].mxu0 }
 0x87f   : > { %v8279_v14 = vmax.f32 %v8215_v6, 0.0  ;;  %v9380_v25 = vadd.f32 %v17048_v56, %v8058_v47  ;;  %v8060_v62 = vpop.f32.mrb[87].mxu0 }
 0x880   : > { %v8280_v43 = vmax.f32 %v8216_v49, 0.0  ;;  %v9382_v3 = vadd.f32 %v17049_v10, %v8060_v62 }
 0x881   : > { %8343 = vst [vmem:[%s15791_s18 + $0x1a0] sm:$0xff] %v8279_v14  ;;  %v8217_v58 = vadd.f32 %v9380_v25, %v15779_v8 }
 0x882   : > { %8344 = vst [vmem:[%s15791_s18 + $0x1a8] sm:$0xff] %v8280_v43  ;;  %v8218_v17 = vadd.f32 %v9382_v3, %v15781_v36  ;;  %v8064_v52 = vpop.f32.mrb[88].mxu0 }
 0x883   : > { %v8281_v19 = vmax.f32 %v8217_v58, 0.0  ;;  %v9384_v24 = vadd.f32 %v17050_v0, %v8064_v52  ;;  %v8066_v9 = vpop.f32.mrb[89].mxu0 }
 0x884   : > { %v8282_v11 = vmax.f32 %v8218_v17, 0.0  ;;  %v9386_v32 = vadd.f32 %v17051_v20, %v8066_v9 }
 0x885   : > { %8345 = vst [vmem:[%s15791_s18 + $0x1b0] sm:$0xff] %v8281_v19  ;;  %v8219_v53 = vadd.f32 %v9384_v24, %v15779_v8 }
 0x886   : > { %8346 = vst [vmem:[%s15791_s18 + $0x1b8] sm:$0xff] %v8282_v11  ;;  %v8220_v51 = vadd.f32 %v9386_v32, %v15781_v36  ;;  %v8070_v7 = vpop.f32.mrb[90].mxu0 }
 0x887   : > { %v8283_v55 = vmax.f32 %v8219_v53, 0.0  ;;  %v9388_v15 = vadd.f32 %v17052_v35, %v8070_v7  ;;  %v8072_v27 = vpop.f32.mrb[91].mxu0 }
 0x888   : > { %v8284_v29 = vmax.f32 %v8220_v51, 0.0  ;;  %v9390_v61 = vadd.f32 %v17053_v45, %v8072_v27 }
 0x889   : > { %8347 = vst [vmem:[%s15791_s18 + $0x1c0] sm:$0xff] %v8283_v55  ;;  %v8221_v12 = vadd.f32 %v9388_v15, %v15779_v8 }
 0x88a   : > { %8348 = vst [vmem:[%s15791_s18 + $0x1c8] sm:$0xff] %v8284_v29  ;;  %v8222_v44 = vadd.f32 %v9390_v61, %v15781_v36  ;;  %v8076_v18 = vpop.f32.mrb[92].mxu0 }
 0x88b   : > { %v8285_v4 = vmax.f32 %v8221_v12, 0.0  ;;  %v9392_v39 = vadd.f32 %v17054_v16, %v8076_v18  ;;  %v8078_v23 = vpop.f32.mrb[93].mxu0 }
 0x88c   : > { %v8286_v22 = vmax.f32 %v8222_v44, 0.0  ;;  %v9394_v31 = vadd.f32 %v17055_v63, %v8078_v23 }
 0x88d   : > { %8349 = vst [vmem:[%s15791_s18 + $0x1d0] sm:$0xff] %v8285_v4  ;;  %v8223_v21 = vadd.f32 %v9392_v39, %v15779_v8 }
 0x88e   : > { %8350 = vst [vmem:[%s15791_s18 + $0x1d8] sm:$0xff] %v8286_v22  ;;  %v8224_v40 = vadd.f32 %v9394_v31, %v15781_v36  ;;  %v8082_v57 = vpop.f32.mrb[94].mxu0 }
 0x88f   : > { %v8287_v5 = vmax.f32 %v8223_v21, 0.0  ;;  %v9396_v26 = vadd.f32 %v17056_v1, %v8082_v57  ;;  %v8084_v60 = vpop.f32.mrb[95].mxu0 }
 0x890   : > { %v8288_v59 = vmax.f32 %v8224_v40, 0.0  ;;  %v9398_v46 = vadd.f32 %v17057_v34, %v8084_v60 }
 0x891   : > { %8351 = vst [vmem:[%s15791_s18 + $0x1e0] sm:$0xff] %v8287_v5  ;;  %v8225_v42 = vadd.f32 %v9396_v26, %v15779_v8 }
 0x892   : > { %8352 = vst [vmem:[%s15791_s18 + $0x1e8] sm:$0xff] %v8288_v59  ;;  %v8226_v54 = vadd.f32 %v9398_v46, %v15781_v36 }
 0x893   : > { %v8289_v33 = vmax.f32 %v8225_v42, 0.0 }
 0x894   : > { %v8290_v38 = vmax.f32 %v8226_v54, 0.0 }
 0x895   : > { %8353 = vst [vmem:[%s15791_s18 + $0x1f0] sm:$0xff] %v8289_v33 }
 0x896   : > { %8354 = vst [vmem:[%s15791_s18 + $0x1f8] sm:$0xff] %v8290_v38 }
 0x897   : > { %9852 = shalt.err (!%p9849_p3)
}
 0x898   : > { %s9853_s26 = scalar_lea.hbm %s15982_s24, 8192  ;;  %s9857_s25 = scalar_lea.hbm %s16040_s8, 16384 }
 0x899   : > { %p9854_p4 = scmp.ne.s32.totalorder %s15982_s24, %s9853_s26  ;;  %p9858_p9 = scmp.lt.u32.totalorder %s15982_s24, %s16040_s8 }
 0x89a   : > { %p9859_p10 = scmp.lt.u32.totalorder %s9857_s25, %s9853_s26  ;;  %p9861_p12 = scmp.lt.u32.totalorder %s9853_s26, %s15982_s24 }
 0x89b   : > { %p9855_p7 = pnand %p9854_p4, %p9998_p5 }
 0x89c   : > { %p9860_p11 = por %p9859_p10, %p9858_p9 }
 0x89d   : > { %p9856_p8 = pneg %p9855_p7 }
 0x89e   : > { %p9862_p13 = por %p9861_p12, %p9860_p11 }
 0x8a0   : > { %p9863_p0 = pnand %p9862_p13, %p9856_p8 }
 0x8a2   : > { %9866 = shalt.err (!%p9863_p0)
}
 0x8a3   : > { %s9914_s21 = smov 256  }
 0x8a4   : > { %9528 = dma.vmem_to_hbm [thread:$0]  (%p9998_p5), %s15984_s22, 8192, %s15982_s24, %s15990_s9, %s9914_s21, %s9914_s21, %s16322_s17  }
 0x8a5 PF: > { %p9534_p1 = scmp.ge.s32.totalorder %s9901_s30, 2  ;;  %s8384_s23 = sand.u32 1, %s9889_s27  }
 0x8a6   : > { %s8385_s12 = scalar_lea.sflag [#allocation3], %s8384_s23 }
 0x8a7   : > { %p9531_p2 = pnand %p9534_p1, %p10002_p6 }
 0x8a9   : > { %9884 = dma.done.wait (!%p9531_p2), %s8385_s12, 8192  }
 0x8aa   : > { %9886 = vsyncadd (!%p9531_p2), %s8385_s12, 4294959104  ;;  %s17058_s0 = sld [smem:[#allocation5_spill]]  ;;  %s17059_s29 = sld [smem:[#allocation6_spill]] }
 0x8ab   : > { %p18_p3 = scmp.ge.s32.totalorder %s9985_s11, 4   ;;  %s17060_s27 = smov %s9893_s28 }
 0x8ac   : > { %s17062_s30 = smov %s9985_s11 }
 0x8ad   :  { %20 = sbr.rel (!%p18_p3) target bundleno = 5 (0x5), region = 93 }
 0x8b0   : > { %s17061_s28 = smov %s17058_s0 }
 0x8b4   :  { %8390 = vsyncpa [#allocation3], 1 }
 0x8b5   :  { %8392 = vsyncpa [#allocation3 + $0x1], 1 }

</bundles_post_ra>
